<compile_context>
chip_gen: v7x
topology: tpu7x:2x2x1
jax: 0.10.0
libtpu: 0.0.40
codegen_flags: <defaults>
</compile_context>

<pallas_src>
import numpy as np
import jax
import jax.numpy as jnp
from jax import lax
from jax.experimental import pallas as pl
from jax.experimental.pallas import tpu as pltpu

SIZE = 200            # native optical resolution (module hardwires 200)
ROWS_PAD = 256        # fin row padding: bf16 sublane pack + tile-friendly M
NUM_REGIONS = 10
NREG_PAD = 16         # detector-region axis padded (10 -> 16)
NUM_LAYERS = 5
DISTANCE = 0.03
LL = 0.08
WL = 3.0e8 / 4.0e11          # 7.5e-4
FI = 1.0 / LL                # 12.5
WN = 2.0 * 3.1415926 / WL
NA = 1.0
NS = 1.5
T_COEF = (NS - NA) / (NS + NA)   # 0.2
R_COEF = 2.0 * NA / (NS + NA)    # 0.8
EPS = 1e-20                       # guards |d|^2 ~ 0 in fin = a - (b@c)/d

_DETECTOR_REGIONS = (
    (46, 66, 46, 66), (46, 66, 93, 113), (46, 66, 140, 160),
    (85, 105, 46, 66), (85, 105, 78, 98), (85, 105, 109, 129), (85, 105, 140, 160),
    (125, 145, 46, 66), (125, 145, 93, 113), (125, 145, 140, 160),
)


# --------------------------------------------------------------------------
# Deterministic parameter construction (mirrors DiffractiveLayer / Net.__init__)
# --------------------------------------------------------------------------
def make_propagation_kernels():
    xx, yy = np.meshgrid(np.arange(SIZE), np.arange(SIZE), indexing="ij")
    phi = ((xx - SIZE // 2) * FI) ** 2 + ((yy - SIZE // 2) * FI) ** 2
    hf = np.fft.fftshift(np.exp(1j * WN * DISTANCE)
                         * np.exp(-1j * WL * np.pi * DISTANCE * phi))
    hr = np.fft.fftshift(np.exp(1j * WN * DISTANCE)
                         * np.exp(+1j * WL * np.pi * DISTANCE * phi))
    return jnp.asarray(hf, jnp.complex64), jnp.asarray(hr, jnp.complex64)


def make_phases(key):
    # 2*pi * xavier_uniform(200, 200): bound = sqrt(6 / (fan_in + fan_out))
    bound = float(np.sqrt(6.0 / (SIZE + SIZE)))
    keys = jax.random.split(key, NUM_LAYERS)
    return tuple(2.0 * np.pi
                 * jax.random.uniform(k, (SIZE, SIZE), jnp.float32, -bound, bound)
                 for k in keys)


def make_detector_masks():
    """Row / column selection masks so the 10 region-means become one small
    in-kernel matmul + masked sublane reduce (mean scale baked into wsel)."""
    rsel = np.zeros((ROWS_PAD, NREG_PAD), np.float32)
    wsel = np.zeros((SIZE, NREG_PAD), np.float32)
    for k, (r0, r1, c0, c1) in enumerate(_DETECTOR_REGIONS):
        rsel[r0:r1, k] = 1.0
        wsel[c0:c1, k] = 1.0 / float((r1 - r0) * (c1 - c0))
    return jnp.asarray(rsel), jnp.asarray(wsel)


# --------------------------------------------------------------------------
# One-time (x-independent) precompute path — plain jnp glue around the FFTs,
# finishing with the exact-math Pallas fin kernel.
# --------------------------------------------------------------------------
def make_transfer_coeffs(phase):
    """Closed form of R @ diag(e^{-j phi}, e^{+j phi}) @ Tm — built ONCE
    (the same phase[0] is used by both model() calls)."""
    m1 = jnp.exp(-1j * phase)     # e^{-j phi}
    m2 = jnp.exp(+1j * phase)     # e^{+j phi}
    inv_t2 = 1.0 / (T_COEF * T_COEF)
    r = R_COEF
    a = inv_t2 * (m1 - r * r * m2)
    b = inv_t2 * r * (m2 - m1)
    c = inv_t2 * r * (m1 - m2)
    d = inv_t2 * (m2 - r * r * m1)
    return a, b, c, d


def diffractive_layer(uf, ur, Hf, Hr):
    # k-space elementwise complex multiply fused with the FFTs by XLA.
    af = jnp.fft.ifft2(Hf * jnp.fft.fft2(uf))
    ar = jnp.fft.ifft2(Hr * jnp.fft.fft2(ur))
    return af, ar


def model_field(xf, xr, coeffs, Hf, Hr):
    # Original control flow only ever executes layer index 0 before returning.
    a, b, c, d = coeffs
    tf, tr = diffractive_layer(xf, xr, Hf, Hr)
    xp = a * tf + b * tr
    xn = c * tf + d * tr
    return diffractive_layer(xp, xn, Hf, Hr)


# --------------------------------------------------------------------------
# Pallas kernel 1 (one-time): fin = A - (B @ C) / D, complex, EXACT math.
# f32 MXU matmuls with precision=HIGHEST, exact complex divide (EPS guard).
# --------------------------------------------------------------------------
def _fin_kernel(a_re_ref, a_im_ref, b_re_ref, b_im_ref,
                c_re_ref, c_im_ref, d_re_ref, d_im_ref,
                f_re_ref, f_im_ref):
    hp = lax.Precision.HIGHEST
    b_r, b_i = b_re_ref[...], b_im_ref[...]
    c_r, c_i = c_re_ref[...], c_im_ref[...]
    bc_r = (jnp.dot(b_r, c_r, preferred_element_type=jnp.float32, precision=hp)
            - jnp.dot(b_i, c_i, preferred_element_type=jnp.float32, precision=hp))
    bc_i = (jnp.dot(b_r, c_i, preferred_element_type=jnp.float32, precision=hp)
            + jnp.dot(b_i, c_r, preferred_element_type=jnp.float32, precision=hp))
    d_r, d_i = d_re_ref[...], d_im_ref[...]
    den = d_r * d_r + d_i * d_i + EPS
    f_re_ref[...] = a_re_ref[...] - (bc_r * d_r + bc_i * d_i) / den
    f_im_ref[...] = a_im_ref[...] - (bc_i * d_r - bc_r * d_i) / den


def compute_fin(A, Bm, Cm, Dm):
    def split(z):
        return (jnp.real(z).astype(jnp.float32), jnp.imag(z).astype(jnp.float32))

    a_re, a_im = split(A)
    b_re, b_im = split(Bm)
    c_re, c_im = split(Cm)
    d_re, d_im = split(Dm)
    s = jax.ShapeDtypeStruct((SIZE, SIZE), jnp.float32)
    return pl.pallas_call(_fin_kernel, out_shape=(s, s))(
        a_re, a_im, b_re, b_im, c_re, c_im, d_re, d_im)


def precompute_fin(phase0, Hf, Hr):
    """x-independent: depends only on (phases, H).  Compute once, reuse per call.
    Returns fin as bf16 planes, rows zero-padded 200 -> 256 (clean bf16 sublane
    packing; padded rows contribute nothing — the detector row masks are zero
    there)."""
    coeffs = make_transfer_coeffs(phase0)
    one = (1.0 + 1.0j) * jnp.ones((SIZE, SIZE), jnp.complex64)   # torch.ones((200,200,2))
    zero = jnp.zeros((SIZE, SIZE), jnp.complex64)
    A, Bm = model_field(one, zero, coeffs, Hf, Hr)
    Cm, Dm = model_field(zero, one, coeffs, Hf, Hr)
    fin_r, fin_i = compute_fin(A, Bm, Cm, Dm)                    # (200, 200) f32, exact
    pad = ((0, ROWS_PAD - SIZE), (0, 0))
    return (jnp.pad(fin_r, pad).astype(jnp.bfloat16),
            jnp.pad(fin_i, pad).astype(jnp.bfloat16))


# --------------------------------------------------------------------------
# Pallas kernel 2 (per-inference hot path), grid=(B,):
#   per batch element:  y = fin @ x  (4-dot complex, bf16 MXU / f32 acc),
#   |y|, then the fused 10-region detector readout (column-mask matmul +
#   row-mask sublane reduce).  fin / masks are VMEM-resident across the grid.
# --------------------------------------------------------------------------
def _apply_kernel(fin_r_ref, fin_i_ref, rsel_ref, wsel_ref,
                  x_re_ref, x_im_ref, o_ref):
    f_r = fin_r_ref[...]                       # (ROWS_PAD, SIZE) bf16, resident
    f_i = fin_i_ref[...]
    x_r = x_re_ref[0].astype(jnp.bfloat16)     # (SIZE, SIZE)
    x_i = x_im_ref[0].astype(jnp.bfloat16)

    # Plain 4-dot complex matmul (no Karatsuba cancellation), f32 accumulation.
    t_rr = jnp.dot(f_r, x_r, preferred_element_type=jnp.float32)
    t_ii = jnp.dot(f_i, x_i, preferred_element_type=jnp.float32)
    t_ri = jnp.dot(f_r, x_i, preferred_element_type=jnp.float32)
    t_ir = jnp.dot(f_i, x_r, preferred_element_type=jnp.float32)
    y_r = t_rr - t_ii
    y_i = t_ri + t_ir
    y_abs = jnp.sqrt(y_r * y_r + y_i * y_i)    # (ROWS_PAD, SIZE) f32

    # Fused detector readout: region means as (|y| @ col_mask) ⊙ row_mask,
    # reduced over rows.  Mean scale is baked into wsel.
    colsum = jnp.dot(y_abs, wsel_ref[...], preferred_element_type=jnp.float32,
                     precision=lax.Precision.HIGHEST)            # (ROWS_PAD, NREG_PAD)
    det = jnp.sum(colsum * rsel_ref[...], axis=0, keepdims=True)  # (1, NREG_PAD)
    o_ref[...] = det.reshape(1, 1, NREG_PAD)


def net_forward(x, fin_r_bf, fin_i_bf, rsel, wsel):
    """Per-inference path: one gridded pallas_call + a 10-wide log_softmax."""
    batch = x.shape[0]
    x_re = x[..., 0]          # (B, 200, 200) — only remaining XLA-side plumbing
    x_im = x[..., 1]

    det16 = pl.pallas_call(
        _apply_kernel,
        out_shape=jax.ShapeDtypeStruct((batch, 1, NREG_PAD), jnp.float32),
        grid=(batch,),
        in_specs=[
            pl.BlockSpec((ROWS_PAD, SIZE), lambda b: (0, 0)),       # fin_r (resident)
            pl.BlockSpec((ROWS_PAD, SIZE), lambda b: (0, 0)),       # fin_i (resident)
            pl.BlockSpec((ROWS_PAD, NREG_PAD), lambda b: (0, 0)),   # rsel  (resident)
            pl.BlockSpec((SIZE, NREG_PAD), lambda b: (0, 0)),       # wsel  (resident)
            pl.BlockSpec((1, SIZE, SIZE), lambda b: (b, 0, 0)),     # x_re[b]
            pl.BlockSpec((1, SIZE, SIZE), lambda b: (b, 0, 0)),     # x_im[b]
        ],
        out_specs=pl.BlockSpec((1, 1, NREG_PAD), lambda b: (b, 0, 0)),
        compiler_params=pltpu.CompilerParams(
            dimension_semantics=("parallel",),        # shard batch over TCs on v7x
            vmem_limit_bytes=32 * 1024 * 1024),       # per-step use ~2 MB, batch-flat
    )(fin_r_bf, fin_i_bf, rsel, wsel, x_re, x_im)

    det = det16[:, 0, :NUM_REGIONS]                   # (B, 10)
    return jax.nn.log_softmax(det, axis=-1)


# --------------------------------------------------------------------------
if __name__ == "__main__":
    key = jax.random.PRNGKey(0)
    key_x, key_p = jax.random.split(key)

    phases = make_phases(key_p)          # 5 phase planes (only index 0 is ever used)
    Hf, Hr = make_propagation_kernels()

    # x-independent precompute: run ONCE (exact math), reuse for every forward call.
    fin_r_bf, fin_i_bf = jax.jit(precompute_fin)(phases[0], Hf, Hr)
    fin_r_bf = jax.block_until_ready(fin_r_bf)

    rsel, wsel = make_detector_masks()   # constant detector selection masks

    batch = 2
    x = jax.random.normal(key_x, (batch, SIZE, SIZE, 2), dtype=jnp.float32)

    fwd = jax.jit(net_forward)
    out = fwd(x, fin_r_bf, fin_i_bf, rsel, wsel)
    out = jax.block_until_ready(out)

    assert out.shape == (batch, NUM_REGIONS)
    assert bool(jnp.all(jnp.isfinite(out)))
    print("KERNEL_OK")
</pallas_src>

<mosaic_0001>
module attributes {stable_mosaic.version = 11 : i64} {
  func.func @_fin_kernel(%arg0: memref<200x200xf32, #tpu.memory_space<vmem>>, %arg1: memref<200x200xf32, #tpu.memory_space<vmem>>, %arg2: memref<200x200xf32, #tpu.memory_space<vmem>>, %arg3: memref<200x200xf32, #tpu.memory_space<vmem>>, %arg4: memref<200x200xf32, #tpu.memory_space<vmem>>, %arg5: memref<200x200xf32, #tpu.memory_space<vmem>>, %arg6: memref<200x200xf32, #tpu.memory_space<vmem>>, %arg7: memref<200x200xf32, #tpu.memory_space<vmem>>, %arg8: memref<200x200xf32, #tpu.memory_space<vmem>>, %arg9: memref<200x200xf32, #tpu.memory_space<vmem>>) attributes {dimension_semantics = [], scalar_prefetch = 0 : i64, scratch_operands = 0 : i64, tpu.core_type = #tpu.core_type<tc>} {
    %c0 = arith.constant 0 : index
    %c0_0 = arith.constant 0 : index
    %0 = vector.load %arg2[%c0, %c0_0] : memref<200x200xf32, #tpu.memory_space<vmem>>, vector<200x200xf32>
    %c0_1 = arith.constant 0 : index
    %c0_2 = arith.constant 0 : index
    %1 = vector.load %arg3[%c0_1, %c0_2] : memref<200x200xf32, #tpu.memory_space<vmem>>, vector<200x200xf32>
    %c0_3 = arith.constant 0 : index
    %c0_4 = arith.constant 0 : index
    %2 = vector.load %arg4[%c0_3, %c0_4] : memref<200x200xf32, #tpu.memory_space<vmem>>, vector<200x200xf32>
    %c0_5 = arith.constant 0 : index
    %c0_6 = arith.constant 0 : index
    %3 = vector.load %arg5[%c0_5, %c0_6] : memref<200x200xf32, #tpu.memory_space<vmem>>, vector<200x200xf32>
    %cst = arith.constant dense<0.000000e+00> : vector<200x200xf32>
    %4 = tpu.matmul %0, %2, %cst {dimension_numbers = #tpu.dot_dimension_numbers<[1], [0], [0], [1], [0, 0, 1, 1], [], []>, precision = #tpu.contract_precision<fp32>} : vector<200x200xf32>, vector<200x200xf32>, vector<200x200xf32> -> vector<200x200xf32>
    %cst_7 = arith.constant dense<0.000000e+00> : vector<200x200xf32>
    %5 = tpu.matmul %1, %3, %cst_7 {dimension_numbers = #tpu.dot_dimension_numbers<[1], [0], [0], [1], [0, 0, 1, 1], [], []>, precision = #tpu.contract_precision<fp32>} : vector<200x200xf32>, vector<200x200xf32>, vector<200x200xf32> -> vector<200x200xf32>
    %6 = arith.subf %4, %5 : vector<200x200xf32>
    %cst_8 = arith.constant dense<0.000000e+00> : vector<200x200xf32>
    %7 = tpu.matmul %0, %3, %cst_8 {dimension_numbers = #tpu.dot_dimension_numbers<[1], [0], [0], [1], [0, 0, 1, 1], [], []>, precision = #tpu.contract_precision<fp32>} : vector<200x200xf32>, vector<200x200xf32>, vector<200x200xf32> -> vector<200x200xf32>
    %cst_9 = arith.constant dense<0.000000e+00> : vector<200x200xf32>
    %8 = tpu.matmul %1, %2, %cst_9 {dimension_numbers = #tpu.dot_dimension_numbers<[1], [0], [0], [1], [0, 0, 1, 1], [], []>, precision = #tpu.contract_precision<fp32>} : vector<200x200xf32>, vector<200x200xf32>, vector<200x200xf32> -> vector<200x200xf32>
    %9 = arith.addf %7, %8 : vector<200x200xf32>
    %c0_10 = arith.constant 0 : index
    %c0_11 = arith.constant 0 : index
    %10 = vector.load %arg6[%c0_10, %c0_11] : memref<200x200xf32, #tpu.memory_space<vmem>>, vector<200x200xf32>
    %c0_12 = arith.constant 0 : index
    %c0_13 = arith.constant 0 : index
    %11 = vector.load %arg7[%c0_12, %c0_13] : memref<200x200xf32, #tpu.memory_space<vmem>>, vector<200x200xf32>
    %12 = arith.mulf %10, %10 : vector<200x200xf32>
    %13 = arith.mulf %11, %11 : vector<200x200xf32>
    %14 = arith.addf %12, %13 : vector<200x200xf32>
    %cst_14 = arith.constant 9.99999968E-21 : f32
    %15 = vector.broadcast %cst_14 : f32 to vector<200x200xf32>
    %16 = arith.addf %14, %15 : vector<200x200xf32>
    %c0_15 = arith.constant 0 : index
    %c0_16 = arith.constant 0 : index
    %17 = vector.load %arg0[%c0_15, %c0_16] : memref<200x200xf32, #tpu.memory_space<vmem>>, vector<200x200xf32>
    %18 = arith.mulf %6, %10 : vector<200x200xf32>
    %19 = arith.mulf %9, %11 : vector<200x200xf32>
    %20 = arith.addf %18, %19 : vector<200x200xf32>
    %21 = arith.divf %20, %16 : vector<200x200xf32>
    %22 = arith.subf %17, %21 : vector<200x200xf32>
    %c0_17 = arith.constant 0 : index
    %c0_18 = arith.constant 0 : index
    %23 = vector.load %arg8[%c0_17, %c0_18] : memref<200x200xf32, #tpu.memory_space<vmem>>, vector<200x200xf32>
    tpu.vector_store %arg8[%c0_17, %c0_18], %22 {strides = array<i32>} : memref<200x200xf32, #tpu.memory_space<vmem>>, vector<200x200xf32>,
    %c0_19 = arith.constant 0 : index
    %c0_20 = arith.constant 0 : index
    %24 = vector.load %arg1[%c0_19, %c0_20] : memref<200x200xf32, #tpu.memory_space<vmem>>, vector<200x200xf32>
    %25 = arith.mulf %9, %10 : vector<200x200xf32>
    %26 = arith.mulf %6, %11 : vector<200x200xf32>
    %27 = arith.subf %25, %26 : vector<200x200xf32>
    %28 = arith.divf %27, %16 : vector<200x200xf32>
    %29 = arith.subf %24, %28 : vector<200x200xf32>
    %c0_21 = arith.constant 0 : index
    %c0_22 = arith.constant 0 : index
    %30 = vector.load %arg9[%c0_21, %c0_22] : memref<200x200xf32, #tpu.memory_space<vmem>>, vector<200x200xf32>
    tpu.vector_store %arg9[%c0_21, %c0_22], %29 {strides = array<i32>} : memref<200x200xf32, #tpu.memory_space<vmem>>, vector<200x200xf32>,
    return
  }
}

</mosaic_0001>

<bundles_post_ra>
// kernel: custom-call
= control target key start
LH: loop header
LB: loop body
LE: loop exit
PB: predicated region body
PF: predicated region fallthrough
CT: control target
= control target key end

     0   :  { %2 = vsyncpa [#allocation0], 0  ;;  %s61_s0 = inlined_call_operand.hbm [shape: c64[200,200], index: 0, kind: input, shape index: {}]   ;;  %s62_s1 = inlined_call_operand.vmem [shape: f32[200,200], index: 1, kind: output, shape index: {}]  }
   0x1   :  { %s3_s8 = sshll.u32 %s62_s1, 4  ;;  %s9_s11 = scalar_lea.hbm %s61_s0, 6400  ;;  %s4_s8 = int_to_ptr.vmem [resolvable:$true] %s3_s8 }
   0x2   :  { %p10_p0 = scmp.ne.s32.totalorder %s61_s0, %s9_s11  ;;  %s11_s16 = scalar_lea.hbm %s61_s0, 12800 }
   0x3   :  { %p12_p1 = scmp.lt.u32.totalorder %s11_s16, %s9_s11  ;;  %p13_p2 = scmp.lt.u32.totalorder %s9_s11, %s61_s0 }
   0x5   :  { %p14_p3 = por %p13_p2, %p12_p1 }
   0x7   :  { %p15_p4 = pnand %p14_p3, %p10_p0 }
   0x9   :  { %18 = shalt.err (!%p15_p4)  }
   0xa   :  { %s19_s1 = scalar_lea.vmem %s4_s8, 6400  ;;  %p24_p6 = scmp.lt.s32.totalorder %s4_s8, %s4_s8 }
   0xb   :  { %p20_p5 = scmp.ne.s32.totalorder %s4_s8, %s19_s1  ;;  %p25_p7 = scmp.lt.s32.totalorder %s19_s1, %s19_s1 }
   0xd   :  { %p26_p8 = por %p25_p7, %p24_p6 }
   0xf   :  { %p27_p9 = pnand %p26_p8, %p20_p5 }
  0x11   :  { %30 = shalt.err (!%p27_p9)  }
  0x12   :  { %6 = dma.hbm_to_vmem [thread:$0]  %s61_s0, 6400, %s4_s8, [#allocation0] }
  0x13   :  { %31 = dma.done.wait [#allocation0], 6400  }
  0x14   :  { %32 = vsyncadd [#allocation0], 4294960896 }
  0x15   :  { %8 = vsyncpa [#allocation0], 1 }

// kernel: custom-call.1
= control target key start
LH: loop header
LB: loop body
LE: loop exit
PB: predicated region body
PF: predicated region fallthrough
CT: control target
= control target key end

     0   :  { %s59_s0 = inlined_call_operand.hbm [shape: c64[200,200], index: 0, kind: input, shape index: {}]   ;;  %s60_s1 = inlined_call_operand.vmem [shape: f32[200,200], index: 1, kind: output, shape index: {}]  }
   0x1   :  { %s2_s8 = scalar_lea.hbm %s59_s0, 6400 }
   0x2   :  { %3 = vsyncpa [#allocation0], 0  ;;  %s4_s11 = sshll.u32 %s60_s1, 4  ;;  %s34_s14 = scalar_lea.hbm %s59_s0, 12800  ;;  %s5_s11 = int_to_ptr.vmem [resolvable:$true] %s4_s11 }
   0x3   :  { %p11_p0 = scmp.ne.s32.totalorder %s2_s8, %s34_s14  ;;  %p13_p1 = scmp.lt.u32.totalorder %s2_s8, %s59_s0 }
   0x4   :  { %p14_p2 = scmp.lt.u32.totalorder %s34_s14, %s34_s14  ;;  %p16_p4 = scmp.lt.u32.totalorder %s34_s14, %s2_s8 }
   0x6   :  { %p15_p3 = por %p14_p2, %p13_p1 }
   0x8   :  { %p17_p5 = por %p16_p4, %p15_p3 }
   0xa   :  { %p18_p6 = pnand %p17_p5, %p11_p0 }
   0xc   :  { %21 = shalt.err (!%p18_p6)  }
   0xd   :  { %s22_s17 = scalar_lea.vmem %s5_s11, 6400  ;;  %p27_p8 = scmp.lt.s32.totalorder %s5_s11, %s5_s11 }
   0xe   :  { %p23_p7 = scmp.ne.s32.totalorder %s5_s11, %s22_s17  ;;  %p28_p9 = scmp.lt.s32.totalorder %s22_s17, %s22_s17 }
  0x10   :  { %p29_p10 = por %p28_p9, %p27_p8 }
  0x12   :  { %p30_p11 = pnand %p29_p10, %p23_p7 }
  0x14   :  { %33 = shalt.err (!%p30_p11)  }
  0x15   :  { %7 = dma.hbm_to_vmem [thread:$0]  %s2_s8, 6400, %s5_s11, [#allocation0] }
  0x16   :  { %35 = dma.done.wait [#allocation0], 6400  }
  0x17   :  { %36 = vsyncadd [#allocation0], 4294960896 }
  0x18   :  { %9 = vsyncpa [#allocation0], 1 }

// kernel: precompute_fin.1
= control target key start
LH: loop header
LB: loop body
LE: loop exit
PB: predicated region body
PF: predicated region fallthrough
CT: control target
= control target key end

     0   :  { %vm231_vm0 = vcmask 588800   ;;  %s21503_s4 = inlined_call_operand.vmem [shape: f32[200,200], index: 4, kind: input, shape index: {}]   ;;  %s21504_s2 = inlined_call_operand.vmem [shape: f32[200,200], index: 2, kind: input, shape index: {}]   ;;  %s21505_s3 = inlined_call_operand.vmem [shape: f32[200,200], index: 3, kind: input, shape index: {}]   ;;  %s21506_s5 = inlined_call_operand.vmem [shape: f32[200,200], index: 5, kind: input, shape index: {}]   ;;  %s21507_s6 = inlined_call_operand.vmem [shape: f32[200,200], index: 6, kind: input, shape index: {}]   ;;  %s21508_s7 = inlined_call_operand.vmem [shape: f32[200,200], index: 7, kind: input, shape index: {}]   ;;  %s21509_s0 = inlined_call_operand.vmem [shape: f32[200,200], index: 0, kind: input, shape index: {}]   ;;  %s21510_s1 = inlined_call_operand.vmem [shape: f32[200,200], index: 1, kind: input, shape index: {}]   ;;  %s21511_s8 = inlined_call_operand.vmem [shape: f32[200,200], index: 8, kind: output, shape index: {0}]   ;;  %s21512_s9 = inlined_call_operand.vmem [shape: f32[200,200], index: 9, kind: output, shape index: {1}]  }
   0x1   :  { %v14319_v0 = vld [vmem:[%s21503_s4 + $0x8] sm:$0xff]  ;;  %v14324_v1 = vld [vmem:[%s21503_s4 + $0x18] sm:$0xff]  ;;  %v14329_v2 = vld [vmem:[%s21503_s4] sm:$0xff] }
   0x2   :  { %v21538_v3 = vand.u32 4294901760, %v14319_v0  ;;  %v21537_v4 = vand.u32 4294901760, %v14324_v1  ;;  %v14336_v5 = vld [vmem:[%s21503_s4 + $0x10] sm:$0xff]  ;;  %v21536_v6 = vand.u32 4294901760, %v14329_v2  ;;  %v14342_v7 = vld [vmem:[%s21503_s4 + $0x28] sm:$0xff]  ;;  %v14347_v8 = vld [vmem:[%s21503_s4 + $0x38] sm:$0xff] }
   0x3   :  { %v21535_v9 = vand.u32 4294901760, %v14336_v5  ;;  %v21532_v10 = vand.u32 4294901760, %v14342_v7  ;;  %v21531_v11 = vand.u32 4294901760, %v14347_v8  ;;  %v14355_v12 = vld [vmem:[%s21503_s4 + $0x20] sm:$0xff]  ;;  %v14360_v13 = vld [vmem:[%s21503_s4 + $0x30] sm:$0xff]  ;;  %v14365_v14 = vld [vmem:[%s21503_s4 + $0x48] sm:$0xff] }
   0x4   :  { %v14371_v15 = vpack.c.bf16 %v21537_v4, %v21538_v3  ;;  %v21530_v16 = vand.u32 4294901760, %v14355_v12  ;;  %v21529_v17 = vand.u32 4294901760, %v14360_v13  ;;  %v14378_v18 = vld [vmem:[%s21503_s4 + $0x58] sm:$0xff]  ;;  %v21528_v19 = vand.u32 4294901760, %v14365_v14  ;;  %v14384_v20 = vld [vmem:[%s21503_s4 + $0x40] sm:$0xff]  ;;  %v14389_v21 = vld [vmem:[%s21503_s4 + $0x50] sm:$0xff] }
   0x5   :  { %v14395_v22 = vpack.c.bf16 %v21535_v9, %v21536_v6  ;;  %v14401_v23 = vpack.c.bf16 %v21531_v11, %v21532_v10  ;;  %v21525_v24 = vand.u32 4294901760, %v14378_v18  ;;  %v21524_v25 = vand.u32 4294901760, %v14384_v20  ;;  %v14408_v26 = vld [vmem:[%s21503_s4 + $0x68] sm:$0xff]  ;;  %v14413_v27 = vld [vmem:[%s21503_s4 + $0x78] sm:$0xff]  ;;  %v14418_v28 = vld [vmem:[%s21503_s4 + $0x60] sm:$0xff] }
   0x6   :  { %22592 = vst [vmem:[#allocation2_spill] sm:$0xff] %v14371_v15  ;;  %11851 = vmatprep.subr.bf16.mxu1 %v14371_v15  ;;  %12427 = vmatprep.subr.bf16.mxu0 %v14371_v15  ;;  %v14426_v29 = vpack.c.bf16 %v21529_v17, %v21530_v16  ;;  %v21523_v30 = vand.u32 4294901760, %v14389_v21  ;;  %v21522_v31 = vand.u32 4294901760, %v14408_v26  ;;  %v21517_v32 = vand.u32 4294901760, %v14413_v27  ;;  %v14434_v33 = vld [vmem:[%s21503_s4 + $0x70] sm:$0xff]  ;;  %v14439_v34 = vld [vmem:[%s21503_s4 + $0x88] sm:$0xff] }
   0x7   :  { %22593 = vst [vmem:[#allocation3_spill] sm:$0xff] %v14395_v22  ;;  %22594 = vst [vmem:[#allocation4_spill] sm:$0xff] %v14401_v23  ;;  %v14444_v35 = vld [vmem:[%s21503_s4 + $0x98] sm:$0xff]  ;;  %11853 = vmatpush1.bf16.msra.mxu1 %v14395_v22  ;;  %12429 = vmatpush1.bf16.msra.mxu0 %v14395_v22  ;;  %v14452_v36 = vpack.c.bf16 %v21525_v24, %v21528_v19  ;;  %v21516_v37 = vand.u32 4294901760, %v14418_v28  ;;  %v21515_v38 = vand.u32 4294901760, %v14434_v33  ;;  %v21514_v39 = vand.u32 4294901760, %v14439_v34 }
   0x8   :  { %22595 = vst [vmem:[#allocation5_spill] sm:$0xff] %v14426_v29  ;;  %v14460_v40 = vld [vmem:[%s21503_s4 + $0x80] sm:$0xff]  ;;  %v14465_v41 = vld [vmem:[%s21503_s4 + $0x90] sm:$0xff]  ;;  %v14470_v42 = vld [vmem:[%s21503_s4 + $0xa8] sm:$0xff]  ;;  %11855 = vmatprep.subr.bf16.mxu1 %v14401_v23  ;;  %12431 = vmatprep.subr.bf16.mxu0 %v14401_v23  ;;  %v14478_v43 = vpack.c.bf16 %v21523_v30, %v21524_v25  ;;  %v14484_v44 = vpack.c.bf16 %v21517_v32, %v21522_v31  ;;  %v21513_v45 = vand.u32 4294901760, %v14444_v35 }
   0x9   :  { %22596 = vst [vmem:[#allocation6_spill] sm:$0xff] %v14452_v36  ;;  %v21519_v46 = vand.u32 4294901760, %v14460_v40  ;;  %v14491_v47 = vld [vmem:[%s21503_s4 + $0xb8] sm:$0xff]  ;;  %v14496_v48 = vld [vmem:[%s21503_s4 + $0xa0] sm:$0xff]  ;;  %v14501_v49 = vld [vmem:[%s21503_s4 + $0xb0] sm:$0xff]  ;;  %v14507_v50 = vpack.c.bf16 %v21515_v38, %v21516_v37  ;;  %v21518_v51 = vand.u32 4294901760, %v14465_v41 }
   0xa   :  { %22597 = vst [vmem:[#allocation7_spill] sm:$0xff] %v14478_v43  ;;  %22598 = vst [vmem:[#allocation8_spill] sm:$0xff] %v14484_v44  ;;  %v21521_v52 = vand.u32 4294901760, %v14470_v42  ;;  %v21520_v53 = vand.u32 4294901760, %v14491_v47  ;;  %v14515_v54 = vld [vmem:[%s21503_s4 + $0xc8] sm:$0xff]  ;;  %v14520_v55 = vld [vmem:[%s21503_s4 + $0xd8] sm:$0xff]  ;;  %v14531_v57 = vpack.c.bf16 %v21513_v45, %v21514_v39 }
   0xb   :  { %22599 = vst [vmem:[#allocation9_spill] sm:$0xff] %v14507_v50  ;;  %v14525_v56 = vld [vmem:[%s21503_s4 + $0xc0] sm:$0xff]  ;;  %v21527_v58 = vand.u32 4294901760, %v14496_v48  ;;  %v21526_v59 = vand.u32 4294901760, %v14501_v49  ;;  %v21534_v60 = vand.u32 4294901760, %v14515_v54  ;;  %v14539_v61 = vld [vmem:[%s21503_s4 + $0xd0] sm:$0xff]  ;;  %11857 = vmatpush1.bf16.msra.mxu1 %v14426_v29  ;;  %12433 = vmatpush1.bf16.msra.mxu0 %v14426_v29  ;;  %v14557_v45 = vpack.c.bf16 %v21518_v51, %v21519_v46 }
   0xc   :  { %22600 = vst [vmem:[#allocation10_spill] sm:$0xff] %v14531_v57  ;;  %v14544_v62 = vld [vmem:[%s21503_s4 + $0xe8] sm:$0xff]  ;;  %v14549_v63 = vld [vmem:[%s21503_s4 + $0xf8] sm:$0xff]  ;;  %v14563_v39 = vpack.c.bf16 %v21520_v53, %v21521_v52  ;;  %v21533_v38 = vand.u32 4294901760, %v14520_v55  ;;  %v21540_v37 = vand.u32 4294901760, %v14525_v56  ;;  %v14570_v32 = vld [vmem:[%s21503_s4 + $0xe0] sm:$0xff]  ;;  %11859 = vmatprep.subr.bf16.mxu1 %v14452_v36  ;;  %12435 = vmatprep.subr.bf16.mxu0 %v14452_v36 }
   0xd   :  { %22601 = vst [vmem:[#allocation11_spill] sm:$0xff] %v14557_v45  ;;  %v14575_v51 = vld [vmem:[%s21503_s4 + $0xf0] sm:$0xff]  ;;  %v14580_v46 = vld [vmem:[%s21503_s4 + $0x108] sm:$0xff]  ;;  %v14588_v53 = vpack.c.bf16 %v21526_v59, %v21527_v58  ;;  %v21539_v52 = vand.u32 4294901760, %v14539_v61  ;;  %v21542_v31 = vand.u32 4294901760, %v14544_v62  ;;  %v21541_v30 = vand.u32 4294901760, %v14549_v63 }
   0xe   :  { %22602 = vst [vmem:[#allocation12_spill] sm:$0xff] %v14563_v39  ;;  %22603 = vst [vmem:[#allocation13_spill] sm:$0xff] %v14575_v51  ;;  %v14596_v25 = vld [vmem:[%s21503_s4 + $0x118] sm:$0xff]  ;;  %v14601_v24 = vld [vmem:[%s21503_s4 + $0x100] sm:$0xff]  ;;  %v14612_v58 = vpack.c.bf16 %v21533_v38, %v21534_v60  ;;  %v21546_v19 = vand.u32 4294901760, %v14570_v32  ;;  %v21545_v17 = vand.u32 4294901760, %v14575_v51 }
   0xf   :  { %22604 = vst [vmem:[#allocation14_spill] sm:$0xff] %v14580_v46  ;;  %22605 = vst [vmem:[#allocation15_spill] sm:$0xff] %v14588_v53  ;;  %v14606_v59 = vld [vmem:[%s21503_s4 + $0x110] sm:$0xff]  ;;  %v14620_v11 = vld [vmem:[%s21503_s4 + $0x128] sm:$0xff]  ;;  %v14636_v60 = vpack.c.bf16 %v21539_v52, %v21540_v37  ;;  %v14642_v9 = vpack.c.bf16 %v21541_v30, %v21542_v31  ;;  %11861 = vmatpush1.bf16.msra.mxu1 %v14478_v43  ;;  %12437 = vmatpush1.bf16.msra.mxu0 %v14478_v43  ;;  %v22623_v6 = vand.u32 4294901760, %v14596_v25 }
  0x10   :  { %22606 = vst [vmem:[#allocation16_spill] sm:$0xff] %v14596_v25  ;;  %22607 = vst [vmem:[#allocation17_spill] sm:$0xff] %v14601_v24  ;;  %v14625_v10 = vld [vmem:[%s21503_s4 + $0x138] sm:$0xff]  ;;  %v14630_v38 = vld [vmem:[%s21503_s4 + $0x120] sm:$0xff]  ;;  %v14667_v30 = vpack.c.bf16 %v21545_v17, %v21546_v19  ;;  %11863 = vmatprep.subr.bf16.mxu1 %v14484_v44  ;;  %12439 = vmatprep.subr.bf16.mxu0 %v14484_v44  ;;  %v22622_v19 = vand.u32 4294901760, %v14580_v46  ;;  %v22628_v36 = vand.u32 4294901760, %v14606_v59 }
  0x11   :  { %22608 = vst [vmem:[#allocation18_spill] sm:$0xff] %v14606_v59  ;;  %22609 = vst [vmem:[#allocation19_spill] sm:$0xff] %v14612_v58  ;;  %v14649_v3 = vld [vmem:[%s21503_s4 + $0x130] sm:$0xff]  ;;  %v14654_v52 = vld [vmem:[%s21503_s4 + $0x148] sm:$0xff]  ;;  %v22630_v31 = vand.u32 4294901760, %v14620_v11  ;;  %v22631_v22 = vand.u32 4294901760, %v14625_v10 }
  0x12   :  { %22610 = vst [vmem:[#allocation20_spill] sm:$0xff] %v14620_v11  ;;  %22611 = vst [vmem:[#allocation21_spill] sm:$0xff] %v14625_v10  ;;  %v14659_v37 = vld [vmem:[%s21503_s4 + $0x158] sm:$0xff]  ;;  %v14675_v16 = vld [vmem:[%s21503_s4 + $0x140] sm:$0xff]  ;;  %v14693_v4 = vpack.c.bf16 %v22623_v6, %v22622_v19  ;;  %v22627_v19 = vand.u32 4294901760, %v14601_v24 }
  0x13   :  { %22612 = vst [vmem:[#allocation22_spill] sm:$0xff] %v14630_v38  ;;  %22613 = vst [vmem:[#allocation23_spill] sm:$0xff] %v14636_v60  ;;  %v14680_v43 = vld [vmem:[%s21503_s4 + $0x150] sm:$0xff]  ;;  %v14685_v17 = vld [vmem:[%s21503_s4 + $0x168] sm:$0xff]  ;;  %v14723_v15 = vpack.c.bf16 %v22631_v22, %v22630_v31  ;;  %v22634_v22 = vand.u32 4294901760, %v14649_v3  ;;  %11865 = vmatpush1.bf16.msra.mxu1 %v14507_v50  ;;  %12441 = vmatpush1.bf16.msra.mxu0 %v14507_v50  ;;  %v22640_v50 = vand.u32 4294901760, %v14675_v16 }
  0x14   :  { %22614 = vst [vmem:[#allocation24_spill] sm:$0xff] %v14642_v9  ;;  %22615 = vst [vmem:[#allocation25_spill] sm:$0xff] %v14649_v3  ;;  %v14701_v23 = vld [vmem:[%s21503_s4 + $0x178] sm:$0xff]  ;;  %v14706_v44 = vld [vmem:[%s21503_s4 + $0x160] sm:$0xff]  ;;  %v14717_v29 = vpack.c.bf16 %v22628_v36, %v22627_v19  ;;  %v22633_v19 = vand.u32 4294901760, %v14630_v38  ;;  %11867 = vmatprep.subr.bf16.mxu1 %v14531_v57  ;;  %12443 = vmatprep.subr.bf16.mxu0 %v14531_v57 }
  0x15   :  { %22616 = vst [vmem:[#allocation26_spill] sm:$0xff] %v14654_v52  ;;  %22617 = vst [vmem:[#allocation27_spill] sm:$0xff] %v14659_v37  ;;  %v14711_v6 = vld [vmem:[%s21503_s4 + $0x170] sm:$0xff]  ;;  %v180_v51 = vld [vmem:[%s21503_s4 + $0x188] sm:$0xff]  ;;  %v22644_v25 = vand.u32 4294901760, %v14701_v23 }
  0x16   :  { %22618 = vst [vmem:[#allocation28_spill] sm:$0xff] %v14667_v30  ;;  %22619 = vst [vmem:[#allocation29_spill] sm:$0xff] %v14675_v16  ;;  %v179_v59 = vld [vmem:[%s21503_s4 + $0x180] sm:$0xff]  ;;  %v32_v36 = vld [vmem:[%s21504_s2 + $0x8] sm:$0xff]  ;;  %v14740_v31 = vpack.c.bf16 %v22634_v22, %v22633_v19  ;;  %v22636_v19 = vand.u32 4294901760, %v14654_v52  ;;  %v22637_v22 = vand.u32 4294901760, %v14659_v37 }
  0x17   :  { %22620 = vst [vmem:[#allocation30_spill] sm:$0xff] %v14680_v43  ;;  %22621 = vst [vmem:[#allocation31_spill] sm:$0xff] %v14685_v17  ;;  %v82_v11 = vld [vmem:[%s21505_s3 + $0x8] sm:$0xff]  ;;  %v31_v24 = vld [vmem:[%s21504_s2] sm:$0xff]  ;;  %v14761_v3 = vand.u32 4294901760, %v180_v51  ;;  %v22641_v37 = vand.u32 4294901760, %v14680_v43  ;;  %11869 = vmatpush1.bf16.msra.mxu1 %v14557_v45  ;;  %12445 = vmatpush1.bf16.msra.mxu0 %v14557_v45 }
  0x18   :  { %22624 = vst [vmem:[#allocation32_spill] sm:$0xff] %v14693_v4  ;;  %22625 = vst [vmem:[#allocation33_spill] sm:$0xff] %v14701_v23  ;;  %v14757_v46 = vpack.c.bf16 %v22637_v22, %v22636_v19  ;;  %v81_v38 = vld [vmem:[%s21505_s3] sm:$0xff]  ;;  %v22643_v22 = vand.u32 4294901760, %v14685_v17  ;;  %v14780_v10 = vand.u32 4294901760, %v179_v59  ;;  %v233_v52 = vsel %vm231_vm0, %v32_v36, 0  ;;  %11871 = vmatprep.subr.bf16.mxu1 %v14563_v39  ;;  %12447 = vmatprep.subr.bf16.mxu0 %v14563_v39 }
  0x19   :  { %22626 = vst [vmem:[#allocation34_spill] sm:$0xff] %v14706_v44  ;;  %22629 = vst [vmem:[#allocation35_spill] sm:$0xff] %v14717_v29  ;;  %v14772_v19 = vpack.c.bf16 %v22641_v37, %v22640_v50  ;;  %v34_v57 = vld [vmem:[%s21504_s2 + $0x18] sm:$0xff]  ;;  %v22647_v16 = vand.u32 4294901760, %v14706_v44  ;;  %v22648_v43 = vand.u32 4294901760, %v14711_v6  ;;  %v14792_v50 = vand.u32 4294901760, %v233_v52 }
  0x1a   :  { %22632 = vst [vmem:[#allocation36_spill] sm:$0xff] %v14723_v15  ;;  %22635 = vst [vmem:[#allocation37_spill] sm:$0xff] %v14740_v31  ;;  %v14778_v51 = vpack.c.bf16 %v22644_v25, %v22643_v22  ;;  %v2898_v23 = vsel %vm231_vm0, %v82_v11, 0  ;;  %v14795_v25 = vand.u32 4294901760, %v31_v24  ;;  %v22653_v36 = vand.u32 4294901760, %v14319_v0 }
  0x1b   :  { %22638 = vst [vmem:[#allocation38_spill] sm:$0xff] %v14757_v46  ;;  %22639 = vst [vmem:[#allocation39_spill] sm:$0xff] %v14761_v3  ;;  %v14790_v37 = vpack.c.bf16 %v22648_v43, %v22647_v16  ;;  %v14797_v59 = vand.u32 4294901760, %v2898_v23  ;;  %v22654_v17 = vand.u32 4294901760, %v14324_v1  ;;  %v14809_v16 = vand.u32 4294901760, %v81_v38  ;;  %11873 = vmatpush1.bf16.msra.mxu1 %v14588_v53  ;;  %12449 = vmatpush1.bf16.msra.mxu0 %v14588_v53 }
  0x1c   :  { %22642 = vst [vmem:[#allocation40_spill] sm:$0xff] %v14772_v19  ;;  %22645 = vst [vmem:[#allocation41_spill] sm:$0xff] %v14778_v51  ;;  %v14802_v22 = vsub.f32 %v14319_v0, %v22653_v36  ;;  %v14814_v11 = vsub.f32 %v233_v52, %v14792_v50  ;;  %v14817_v43 = vsub.f32 %v31_v24, %v14795_v25  ;;  %v22659_v0 = vand.u32 4294901760, %v14329_v2 }
  0x1d   :  { %22646 = vst [vmem:[#allocation42_spill] sm:$0xff] %v14780_v10  ;;  %22649 = vst [vmem:[#allocation43_spill] sm:$0xff] %v14790_v37  ;;  %v14807_v44 = vsub.f32 %v14324_v1, %v22654_v17  ;;  %v236_v1 = vsel %vm231_vm0, %v34_v57, 0  ;;  %v14828_v17 = vsub.f32 %v2898_v23, %v14797_v59  ;;  %v14833_v24 = vsub.f32 %v81_v38, %v14809_v16 }
  0x1e   :  { %22650 = vst [vmem:[#allocation44_spill] sm:$0xff] %v14792_v50  ;;  %22651 = vst [vmem:[#allocation45_spill] sm:$0xff] %v14795_v25  ;;  %v14822_v36 = vsub.f32 %v14329_v2, %v22659_v0  ;;  %v14836_v25 = vand.u32 4294901760, %v14814_v11  ;;  %v14839_v2 = vand.u32 4294901760, %v14817_v43  ;;  %v22665_v0 = vand.u32 4294901760, %v14336_v5  ;;  %11875 = vmatprep.subr.bf16.mxu1 %v14612_v58  ;;  %12451 = vmatprep.subr.bf16.mxu0 %v14612_v58  ;;  %v83_v50 = vld [vmem:[%s21505_s3 + $0x10] sm:$0xff] }
  0x1f   :  { %22652 = vst [vmem:[#allocation46_spill] sm:$0xff] %v14797_v59  ;;  %22655 = vst [vmem:[#allocation47_spill] sm:$0xff] %v14807_v44  ;;  %v14848_v52 = vand.u32 4294901760, %v14828_v17  ;;  %v22668_v45 = vand.u32 4294901760, %v14802_v22  ;;  %v22669_v39 = vand.u32 4294901760, %v14807_v44  ;;  %v14857_v59 = vand.u32 4294901760, %v14833_v24  ;;  %11877 = vmatpush1.bf16.msra.mxu1 %v14636_v60  ;;  %12453 = vmatpush1.bf16.msra.mxu0 %v14636_v60 }
  0x20   :  { %22656 = vst [vmem:[#allocation48_spill] sm:$0xff] %v14809_v16  ;;  %22657 = vst [vmem:[#allocation49_spill] sm:$0xff] %v14814_v11  ;;  %v21599_v57 = vand.u32 4294901760, %v14822_v36  ;;  %v14845_v23 = vsub.f32 %v14336_v5, %v22665_v0  ;;  %v424_v5 = vsub.f32 %v14814_v11, %v14836_v25  ;;  %v430_v0 = vsub.f32 %v14817_v43, %v14839_v2 }
  0x21   :  { %22658 = vst [vmem:[#allocation50_spill] sm:$0xff] %v14817_v43  ;;  %22660 = vst [vmem:[#allocation51_spill] sm:$0xff] %v14822_v36  ;;  %v825_v38 = vsub.f32 %v14802_v22, %v22668_v45  ;;  %v837_v16 = vsub.f32 %v14807_v44, %v22669_v39  ;;  %v3089_v39 = vsub.f32 %v14828_v17, %v14848_v52  ;;  %v86_v43 = vld [vmem:[%s21505_s3 + $0x28] sm:$0xff]  ;;  %11879 = vmatprep.subr.bf16.mxu1 %v14642_v9 }
  0x22   :  { %22661 = vst [vmem:[#allocation52_spill] sm:$0xff] %v14828_v17  ;;  %22662 = vst [vmem:[#allocation53_spill] sm:$0xff] %v14833_v24  ;;  %v831_v45 = vsub.f32 %v14822_v36, %v21599_v57  ;;  %v33_v57 = vld [vmem:[%s21504_s2 + $0x10] sm:$0xff]  ;;  %v14884_v58 = vand.u32 4294901760, %v424_v5  ;;  %v14910_v36 = vand.u32 4294901760, %v83_v50  ;;  %12455 = vmatprep.subr.bf16.mxu0 %v14642_v9 }
  0x23   :  { %22663 = vst [vmem:[#allocation54_spill] sm:$0xff] %v14836_v25  ;;  %22664 = vst [vmem:[#allocation55_spill] sm:$0xff] %v14839_v2  ;;  %v826_v53 = vand.u32 4294901760, %v825_v38  ;;  %v838_v44 = vand.u32 4294901760, %v837_v16  ;;  %v3095_v25 = vsub.f32 %v14833_v24, %v14857_v59  ;;  %v84_v2 = vld [vmem:[%s21505_s3 + $0x18] sm:$0xff]  ;;  %v22673_v38 = vand.u32 4294901760, %v14845_v23  ;;  %11881 = vmatpush1.bf16.msra.mxu1 %v14667_v30  ;;  %12457 = vmatpush1.bf16.msra.mxu0 %v14667_v30 }
  0x24   :  { %22666 = vst [vmem:[#allocation56_spill] sm:$0xff] %v14845_v23  ;;  %22667 = vst [vmem:[#allocation57_spill] sm:$0xff] %v14848_v52  ;;  %v14886_v52 = vand.u32 4294901760, %v430_v0  ;;  %v832_v16 = vand.u32 4294901760, %v831_v45  ;;  %v36_v24 = vld [vmem:[%s21504_s2 + $0x28] sm:$0xff]  ;;  %v14897_v17 = vand.u32 4294901760, %v3089_v39  ;;  %426 = vmatprep.mubr.f32.mxu1 %v14884_v58  ;;  %v14932_v9 = vsub.f32 %v83_v50, %v14910_v36  ;;  %11883 = vmatprep.subr.bf16.mxu1 %v14693_v4 }
  0x25   :  { %22670 = vst [vmem:[#allocation58_spill] sm:$0xff] %v14857_v59  ;;  %22671 = vst [vmem:[#allocation59_spill] sm:$0xff] %v14884_v58  ;;  %v843_v59 = vsub.f32 %v14845_v23, %v22673_v38  ;;  %v14899_v11 = vpack.c.bf16 %v838_v44, %v826_v53  ;;  %v14901_v5 = vand.u32 4294901760, %v3095_v25  ;;  %v14903_v0 = vand.u32 4294901760, %v236_v1  ;;  %v35_v44 = vld [vmem:[%s21504_s2 + $0x20] sm:$0xff]  ;;  %12459 = vmatprep.subr.bf16.mxu0 %v14693_v4 }
  0x26   :  { %22672 = vst [vmem:[#allocation60_spill] sm:$0xff] %v14886_v52  ;;  %22674 = vst [vmem:[#allocation61_spill] sm:$0xff] %v14897_v17  ;;  %v2901_v38 = vsel %vm231_vm0, %v84_v2, 0  ;;  %v14908_v23 = vand.u32 4294901760, %v33_v57  ;;  %v2904_v2 = vsel %vm231_vm0, %v86_v43, 0  ;;  %5731 = vmatprep.mubr.f32.mxu0 %v14897_v17  ;;  %v14944_v58 = vand.u32 4294901760, %v35_v44 }
  0x27   :  { %22675 = vst [vmem:[#allocation62_spill] sm:$0xff] %v14901_v5  ;;  %22676 = vst [vmem:[#allocation63_spill] sm:$0xff] %v14903_v0  ;;  %v844_v45 = vand.u32 4294901760, %v843_v59  ;;  %v14918_v53 = vsub.f32 %v236_v1, %v14903_v0  ;;  %v14920_v25 = vand.u32 4294901760, %v2901_v38  ;;  %v239_v59 = vsel %vm231_vm0, %v36_v24, 0  ;;  %11885 = vmatpush1.bf16.msra.mxu1 %v14717_v29  ;;  %12461 = vmatpush1.bf16.msra.mxu0 %v14717_v29 }
  0x28   :  { %22677 = vst [vmem:[#allocation64_spill] sm:$0xff] %v14908_v23  ;;  %22678 = vst [vmem:[#allocation65_spill] sm:$0xff] %v14910_v36  ;;  %v14929_v60 = vsub.f32 %v33_v57, %v14908_v23  ;;  %v14934_v1 = vand.u32 4294901760, %v239_v59  ;;  %v14942_v43 = vand.u32 4294901760, %v2904_v2  ;;  %v14952_v50 = vand.u32 4294901760, %v14932_v9  ;;  %11887 = vmatprep.subr.bf16.mxu1 %v14723_v15  ;;  %12463 = vmatprep.subr.bf16.mxu0 %v14723_v15 }
  0x29   :  { %22679 = vst [vmem:[#allocation66_spill] sm:$0xff] %v14918_v53  ;;  %22680 = vst [vmem:[#allocation67_spill] sm:$0xff] %v14920_v25  ;;  %v14926_v39 = vpack.c.bf16 %v844_v45, %v832_v16  ;;  %v14937_v0 = vand.u32 4294901760, %v14918_v53  ;;  %v14940_v24 = vsub.f32 %v2901_v38, %v14920_v25  ;;  %v22691_v45 = vand.u32 4294901760, %v14342_v7 }
  0x2a   :  { %22681 = vst [vmem:[#allocation68_spill] sm:$0xff] %v14929_v60  ;;  %22682 = vst [vmem:[#allocation69_spill] sm:$0xff] %v14932_v9  ;;  %v14949_v57 = vand.u32 4294901760, %v14929_v60  ;;  %v14955_v16 = vsub.f32 %v239_v59, %v14934_v1  ;;  %v14970_v36 = vsub.f32 %v2904_v2, %v14942_v43  ;;  %v14973_v59 = vsub.f32 %v35_v44, %v14944_v58 }
  0x2b   :  { %22683 = vst [vmem:[#allocation70_spill] sm:$0xff] %v14934_v1  ;;  %22684 = vst [vmem:[#allocation71_spill] sm:$0xff] %v14937_v0  ;;  %v14960_v38 = vsub.f32 %v14342_v7, %v22691_v45  ;;  %v440_v17 = vsub.f32 %v14918_v53, %v14937_v0  ;;  %v14967_v30 = vand.u32 4294901760, %v14940_v24  ;;  %v3111_v45 = vsub.f32 %v14932_v9, %v14952_v50 }
  0x2c   :  { %22685 = vst [vmem:[#allocation72_spill] sm:$0xff] %v14940_v24  ;;  %22686 = vst [vmem:[#allocation73_spill] sm:$0xff] %v14942_v43  ;;  %v446_v7 = vsub.f32 %v14929_v60, %v14949_v57  ;;  %v14980_v4 = vand.u32 4294901760, %v14955_v16  ;;  %v14988_v43 = vand.u32 4294901760, %v14970_v36  ;;  %v14991_v44 = vand.u32 4294901760, %v14973_v59  ;;  %11889 = vmatpush1.bf16.msra.mxu1 %v14740_v31  ;;  %12465 = vmatpush1.bf16.msra.mxu0 %v14740_v31 }
  0x2d   :  { %22687 = vst [vmem:[#allocation74_spill] sm:$0xff] %v14944_v58  ;;  %22688 = vst [vmem:[#allocation75_spill] sm:$0xff] %v14949_v57  ;;  %v14983_v53 = vand.u32 4294901760, %v440_v17  ;;  %v3105_v2 = vsub.f32 %v14940_v24, %v14967_v30  ;;  %v15000_v17 = vand.u32 4294901760, %v3111_v45  ;;  %v22703_v45 = vand.u32 4294901760, %v14347_v8  ;;  %11891 = vmatprep.subr.bf16.mxu1 %v14757_v46  ;;  %12467 = vmatprep.subr.bf16.mxu0 %v14757_v46 }
  0x2e   :  { %22689 = vst [vmem:[#allocation76_spill] sm:$0xff] %v14952_v50  ;;  %22690 = vst [vmem:[#allocation77_spill] sm:$0xff] %v14955_v16  ;;  %v85_v50 = vld [vmem:[%s21505_s3 + $0x20] sm:$0xff]  ;;  %v14998_v0 = vand.u32 4294901760, %v446_v7  ;;  %v456_v57 = vsub.f32 %v14955_v16, %v14980_v4  ;;  %v3121_v29 = vsub.f32 %v14970_v36, %v14988_v43  ;;  %v462_v7 = vsub.f32 %v14973_v59, %v14991_v44 }
  0x2f   :  { %22692 = vst [vmem:[#allocation78_spill] sm:$0xff] %v14967_v30  ;;  %22693 = vst [vmem:[#allocation79_spill] sm:$0xff] %v14970_v36  ;;  %v22701_v30 = vand.u32 4294901760, %v14960_v38  ;;  %v15009_v60 = vand.u32 4294901760, %v3105_v2  ;;  %v88_v2 = vld [vmem:[%s21505_s3 + $0x38] sm:$0xff]  ;;  %v22710_v24 = vand.u32 4294901760, %v14360_v13 }
  0x30   :  { %22694 = vst [vmem:[#allocation80_spill] sm:$0xff] %v14973_v59  ;;  %22695 = vst [vmem:[#allocation81_spill] sm:$0xff] %v14980_v4  ;;  %v15018_v4 = vsub.f32 %v14347_v8, %v22703_v45  ;;  %v15026_v15 = vand.u32 4294901760, %v456_v57  ;;  %v15035_v8 = vand.u32 4294901760, %v3121_v29  ;;  %v15037_v45 = vand.u32 4294901760, %v462_v7  ;;  %11893 = vmatpush1.bf16.msra.mxu1 %v14772_v19  ;;  %12469 = vmatpush1.bf16.msra.mxu0 %v14772_v19 }
  0x31   :  { %22696 = vst [vmem:[#allocation82_spill] sm:$0xff] %v14983_v53  ;;  %22697 = vst [vmem:[#allocation83_spill] sm:$0xff] %v14988_v43  ;;  %v849_v9 = vsub.f32 %v14960_v38, %v22701_v30  ;;  %v38_v30 = vld [vmem:[%s21504_s2 + $0x38] sm:$0xff]  ;;  %v15028_v43 = vand.u32 4294901760, %v85_v50  ;;  %v15043_v58 = vsub.f32 %v14360_v13, %v22710_v24  ;;  %v2907_v24 = vsel %vm231_vm0, %v88_v2, 0  ;;  %11895 = vmatprep.subr.bf16.mxu1 %v14778_v51 }
  0x32   :  { %22698 = vst [vmem:[#allocation84_spill] sm:$0xff] %v14991_v44  ;;  %22699 = vst [vmem:[#allocation85_spill] sm:$0xff] %v14998_v0  ;;  %v22707_v44 = vand.u32 4294901760, %v14355_v12  ;;  %v21676_v36 = vand.u32 4294901760, %v15018_v4  ;;  %v242_v13 = vsel %vm231_vm0, %v38_v30, 0  ;;  %12471 = vmatprep.subr.bf16.mxu0 %v14778_v51 }
  0x33   :  { %22700 = vst [vmem:[#allocation86_spill] sm:$0xff] %v15000_v17  ;;  %22702 = vst [vmem:[#allocation87_spill] sm:$0xff] %v15009_v60  ;;  %v850_v16 = vand.u32 4294901760, %v849_v9  ;;  %v37_v9 = vld [vmem:[%s21504_s2 + $0x30] sm:$0xff]  ;;  %v15054_v29 = vsub.f32 %v85_v50, %v15028_v43  ;;  %v21683_v7 = vand.u32 4294901760, %v15043_v58  ;;  %v15065_v31 = vand.u32 4294901760, %v242_v13 }
  0x34   :  { %22704 = vst [vmem:[#allocation88_spill] sm:$0xff] %v15018_v4  ;;  %22705 = vst [vmem:[#allocation89_spill] sm:$0xff] %v15026_v15  ;;  %v15033_v59 = vsub.f32 %v14355_v12, %v22707_v44  ;;  %v87_v12 = vld [vmem:[%s21505_s3 + $0x30] sm:$0xff]  ;;  %v861_v44 = vsub.f32 %v15018_v4, %v21676_v36  ;;  %v15067_v50 = vand.u32 4294901760, %v2907_v24  ;;  %v40_v4 = vld [vmem:[%s21504_s2 + $0x48] sm:$0xff]  ;;  %11897 = vmatpush1.bf16.msra.mxu1 %v14790_v37  ;;  %12473 = vmatpush1.bf16.msra.mxu0 %v14790_v37 }
  0x35   :  { %22706 = vst [vmem:[#allocation90_spill] sm:$0xff] %v15028_v43  ;;  %22708 = vst [vmem:[#allocation91_spill] sm:$0xff] %v15035_v8  ;;  %v15070_v57 = vand.u32 4294901760, %v15054_v29  ;;  %v15075_v43 = vand.u32 4294901760, %v37_v9  ;;  %v15077_v46 = vand.u32 4294901760, %v87_v12  ;;  %v867_v36 = vsub.f32 %v15043_v58, %v21683_v7  ;;  %404 = vmatprep.subr.mxu1 %v14761_v3  ;;  %5709 = vmatprep.subr.mxu0 %v14761_v3 }
  0x36   :  { %22709 = vst [vmem:[#allocation92_spill] sm:$0xff] %v15037_v45  ;;  %22711 = vst [vmem:[#allocation93_spill] sm:$0xff] %v15054_v29  ;;  %v22715_v30 = vand.u32 4294901760, %v15033_v59  ;;  %v862_v1 = vand.u32 4294901760, %v861_v44  ;;  %v15083_v23 = vsub.f32 %v242_v13, %v15065_v31  ;;  %v15086_v25 = vsub.f32 %v2907_v24, %v15067_v50 }
  0x37   :  { %22712 = vst [vmem:[#allocation94_spill] sm:$0xff] %v15065_v31  ;;  %22713 = vst [vmem:[#allocation95_spill] sm:$0xff] %v15067_v50  ;;  %v3127_v44 = vsub.f32 %v15054_v29, %v15070_v57  ;;  %v15096_v7 = vsub.f32 %v37_v9, %v15075_v43  ;;  %v15099_v13 = vsub.f32 %v87_v12, %v15077_v46  ;;  %v868_v50 = vand.u32 4294901760, %v867_v36  ;;  %v90_v9 = vld [vmem:[%s21505_s3 + $0x48] sm:$0xff]  ;;  %v39_v12 = vld [vmem:[%s21504_s2 + $0x40] sm:$0xff] }
  0x38   :  { %22714 = vst [vmem:[#allocation96_spill] sm:$0xff] %v15070_v57  ;;  %v855_v2 = vsub.f32 %v15033_v59, %v22715_v30  ;;  %22716 = vst [vmem:[#allocation97_spill] sm:$0xff] %v15075_v43  ;;  %v15103_v24 = vpack.c.bf16 %v862_v1, %v850_v16  ;;  %v15106_v31 = vand.u32 4294901760, %v15083_v23  ;;  %v15109_v19 = vand.u32 4294901760, %v15086_v25  ;;  %406 = vmatpush1.msra.mxu1 %v14780_v10 }
  0x39   :  { %22717 = vst [vmem:[#allocation98_spill] sm:$0xff] %v15077_v46  ;;  %22718 = vst [vmem:[#allocation99_spill] sm:$0xff] %v15083_v23  ;;  %v15120_v1 = vand.u32 4294901760, %v15096_v7  ;;  %v15123_v36 = vand.u32 4294901760, %v15099_v13  ;;  %v245_v16 = vsel %vm231_vm0, %v40_v4, 0  ;;  %5711 = vmatpush1.msra.mxu0 %v14780_v10  ;;  %432 = vmatmul.mubr.f32.vlgmr.msra.gmra.mrb[0].mxu1 %v14886_v52 }
  0x3a   :  { %22719 = vst [vmem:[#allocation100_spill] sm:$0xff] %v15086_v25  ;;  %v856_v30 = vand.u32 4294901760, %v855_v2  ;;  %22720 = vst [vmem:[#allocation101_spill] sm:$0xff] %v15096_v7  ;;  %v15117_v2 = vand.u32 4294901760, %v3127_v44  ;;  %v472_v51 = vsub.f32 %v15083_v23, %v15106_v31  ;;  %v3137_v29 = vsub.f32 %v15086_v25, %v15109_v19  ;;  %11899 = vmatprep.subr.bf16.mxu1 %v14899_v11 }
  0x3b   :  { %22721 = vst [vmem:[#allocation102_spill] sm:$0xff] %v15099_v13  ;;  %22722 = vst [vmem:[#allocation103_spill] sm:$0xff] %v15106_v31  ;;  %v15132_v46 = vand.u32 4294901760, %v245_v16  ;;  %v478_v44 = vsub.f32 %v15096_v7, %v15120_v1  ;;  %v3143_v4 = vsub.f32 %v15099_v13, %v15123_v36  ;;  %v22736_v25 = vand.u32 4294901760, %v14365_v14  ;;  %5737 = vmatmul.mubr.f32.vlgmr.msra.gmra.mrb[0].mxu0 %v14901_v5 }
  0x3c   :  { %22723 = vst [vmem:[#allocation104_spill] sm:$0xff] %v15109_v19  ;;  %22724 = vst [vmem:[#allocation105_spill] sm:$0xff] %v15117_v2  ;;  %v15126_v57 = vpack.c.bf16 %v868_v50, %v856_v30  ;;  %v2910_v50 = vsel %vm231_vm0, %v90_v9, 0  ;;  %v15141_v30 = vand.u32 4294901760, %v39_v12  ;;  %v89_v19 = vld [vmem:[%s21505_s3 + $0x40] sm:$0xff]  ;;  %v15148_v31 = vand.u32 4294901760, %v472_v51  ;;  %11901 = vmatpush1.bf16.msra.mxu1 %v14926_v39  ;;  %12475 = vmatprep.subr.bf16.mxu0 %v14899_v11 }
  0x3d   :  { %22725 = vst [vmem:[#allocation106_spill] sm:$0xff] %v15120_v1  ;;  %22726 = vst [vmem:[#allocation107_spill] sm:$0xff] %v15123_v36  ;;  %v15150_v37 = vand.u32 4294901760, %v3137_v29  ;;  %v15153_v1 = vsub.f32 %v245_v16, %v15132_v46  ;;  %v15155_v36 = vand.u32 4294901760, %v2910_v50  ;;  %v15157_v9 = vand.u32 4294901760, %v478_v44  ;;  %442 = vmatprep.mubr.f32.mxu1 %v14983_v53  ;;  %5747 = vmatprep.mubr.f32.mxu0 %v15009_v60  ;;  %v44_v60 = vld [vmem:[%s21504_s2 + $0x68] sm:$0xff] }
  0x3e   :  { %22727 = vst [vmem:[#allocation108_spill] sm:$0xff] %v15132_v46  ;;  %22728 = vst [vmem:[#allocation109_spill] sm:$0xff] %v15141_v30  ;;  %v15159_v13 = vand.u32 4294901760, %v3143_v4  ;;  %v15162_v7 = vsub.f32 %v39_v12, %v15141_v30  ;;  %v15167_v23 = vsub.f32 %v14365_v14, %v22736_v25  ;;  %v22739_v16 = vand.u32 4294901760, %v14378_v18  ;;  %12477 = vmatpush1.bf16.msra.mxu0 %v14926_v39 }
  0x3f   :  { %22729 = vst [vmem:[#allocation110_spill] sm:$0xff] %v15148_v31  ;;  %22730 = vst [vmem:[#allocation111_spill] sm:$0xff] %v15150_v37  ;;  %v15170_v51 = vand.u32 4294901760, %v15153_v1  ;;  %v15173_v29 = vsub.f32 %v2910_v50, %v15155_v36  ;;  %v15180_v4 = vand.u32 4294901760, %v89_v19  ;;  %v22742_v12 = vand.u32 4294901760, %v14384_v20  ;;  %448 = vmatmul.mubr.f32.gmra.mrb[2].mxu1 %v14998_v0  ;;  %11903 = vmatprep.subr.bf16.mxu1 %v15103_v24 }
  0x40   :  { %22731 = vst [vmem:[#allocation112_spill] sm:$0xff] %v15153_v1  ;;  %22732 = vst [vmem:[#allocation113_spill] sm:$0xff] %v15155_v36  ;;  %v15178_v44 = vsub.f32 %v14378_v18, %v22739_v16  ;;  %v15185_v14 = vand.u32 4294901760, %v15162_v7  ;;  %v22743_v30 = vand.u32 4294901760, %v14389_v21  ;;  %5753 = vmatmul.mubr.f32.gmra.mrb[2].mxu0 %v15000_v17  ;;  %458 = vmatprep.mubr.f32.mxu1 %v15026_v15 }
  0x41   :  { %22733 = vst [vmem:[#allocation114_spill] sm:$0xff] %v15157_v9  ;;  %22734 = vst [vmem:[#allocation115_spill] sm:$0xff] %v15159_v13  ;;  %v15191_v50 = vsub.f32 %v14384_v20, %v22742_v12  ;;  %v488_v16 = vsub.f32 %v15153_v1, %v15170_v51  ;;  %v15203_v36 = vand.u32 4294901760, %v15173_v29  ;;  %v15207_v20 = vsub.f32 %v89_v19, %v15180_v4  ;;  %v42_v19 = vld [vmem:[%s21504_s2 + $0x58] sm:$0xff] }
  0x42   :  { %22735 = vst [vmem:[#allocation116_spill] sm:$0xff] %v15162_v7  ;;  %22737 = vst [vmem:[#allocation117_spill] sm:$0xff] %v15170_v51  ;;  %v15196_v18 = vsub.f32 %v14389_v21, %v22743_v30  ;;  %v494_v21 = vsub.f32 %v15162_v7, %v15185_v14  ;;  %v22746_v30 = vand.u32 4294901760, %v15167_v23  ;;  %v92_v51 = vld [vmem:[%s21505_s3 + $0x58] sm:$0xff]  ;;  %5763 = vmatprep.mubr.f32.mxu0 %v15035_v8  ;;  %11905 = vmatpush1.bf16.msra.mxu1 %v15126_v57 }
  0x43   :  { %22738 = vst [vmem:[#allocation118_spill] sm:$0xff] %v15173_v29  ;;  %22740 = vst [vmem:[#allocation119_spill] sm:$0xff] %v15180_v4  ;;  %v15223_v25 = vand.u32 4294901760, %v488_v16  ;;  %v3153_v5 = vsub.f32 %v15173_v29, %v15203_v36  ;;  %v15231_v52 = vand.u32 4294901760, %v15207_v20  ;;  %v22751_v53 = vand.u32 4294901760, %v15191_v50  ;;  %v41_v29 = vld [vmem:[%s21504_s2 + $0x50] sm:$0xff]  ;;  %12479 = vmatprep.subr.bf16.mxu0 %v15103_v24  ;;  %464 = vmatmul.mubr.f32.gmra.mrb[4].mxu1 %v15037_v45 }
  0x44   :  { %22741 = vst [vmem:[#allocation120_spill] sm:$0xff] %v15185_v14  ;;  %22744 = vst [vmem:[#allocation121_spill] sm:$0xff] %v15203_v36  ;;  %v873_v12 = vsub.f32 %v15167_v23, %v22746_v30  ;;  %v22748_v14 = vand.u32 4294901760, %v15178_v44  ;;  %v15238_v11 = vand.u32 4294901760, %v494_v21  ;;  %v15276_v15 = vand.u32 4294901760, %v41_v29  ;;  %12481 = vmatpush1.bf16.msra.mxu0 %v15126_v57  ;;  %474 = vmatprep.mubr.f32.mxu1 %v15148_v31 }
  0x45   :  { %22745 = vst [vmem:[#allocation122_spill] sm:$0xff] %v15207_v20  ;;  %22747 = vst [vmem:[#allocation123_spill] sm:$0xff] %v15223_v25  ;;  %v879_v36 = vsub.f32 %v15191_v50, %v22751_v53  ;;  %v15251_v39 = vand.u32 4294901760, %v3153_v5  ;;  %v248_v53 = vsel %vm231_vm0, %v42_v19, 0  ;;  %v94_v19 = vld [vmem:[%s21505_s3 + $0x68] sm:$0xff]  ;;  %5769 = vmatmul.mubr.f32.gmra.mrb[4].mxu0 %v15117_v2 }
  0x46   :  { %v885_v30 = vsub.f32 %v15178_v44, %v22748_v14  ;;  %22749 = vst [vmem:[#allocation124_spill] sm:$0xff] %v15231_v52  ;;  %22750 = vst [vmem:[#allocation125_spill] sm:$0xff] %v15238_v11  ;;  %v874_v16 = vand.u32 4294901760, %v873_v12  ;;  %v22752_v14 = vand.u32 4294901760, %v15196_v18  ;;  %v3159_v12 = vsub.f32 %v15207_v20, %v15231_v52  ;;  %5779 = vmatprep.mubr.f32.mxu0 %v15150_v37 }
  0x47   :  { %22753 = vst [vmem:[#allocation126_spill] sm:$0xff] %v15251_v39  ;;  %v880_v5 = vand.u32 4294901760, %v879_v36  ;;  %v2913_v52 = vsel %vm231_vm0, %v92_v51, 0  ;;  %22757 = vst [vmem:[#allocation130_spill] sm:$0xff] %v15276_v15  ;;  %480 = vmatmul.mubr.f32.gmra.mrb[6].mxu1 %v15157_v9 }
  0x48   :  { %v891_v7 = vsub.f32 %v15196_v18, %v22752_v14  ;;  %v886_v21 = vand.u32 4294901760, %v885_v30  ;;  %v91_v14 = vld [vmem:[%s21505_s3 + $0x50] sm:$0xff]  ;;  %v15264_v30 = vand.u32 4294901760, %v248_v53  ;;  %v15272_v1 = vand.u32 4294901760, %v3159_v12  ;;  %490 = vmatprep.mubr.f32.mxu1 %v15223_v25 }
  0x49   :  { %v15274_v17 = vand.u32 4294901760, %v2913_v52  ;;  %v15285_v8 = vand.u32 4294901760, %v91_v14  ;;  %v15294_v12 = vsub.f32 %v41_v29, %v15276_v15  ;;  %5785 = vmatmul.mubr.f32.gmra.mrb[6].mxu0 %v15159_v13 }
  0x4a   :  { %v892_v0 = vand.u32 4294901760, %v891_v7  ;;  %22754 = vst [vmem:[#allocation127_spill] sm:$0xff] %v15264_v30  ;;  %v11906_v20 = vpack.c.bf16 %v886_v21, %v874_v16  ;;  %22755 = vst [vmem:[#allocation128_spill] sm:$0xff] %v15272_v1  ;;  %v43_v7 = vld [vmem:[%s21504_s2 + $0x60] sm:$0xff]  ;;  %v15283_v51 = vsub.f32 %v248_v53, %v15264_v30  ;;  %v251_v16 = vsel %vm231_vm0, %v44_v60, 0  ;;  %5795 = vmatprep.mubr.f32.mxu0 %v15251_v39  ;;  %v46_v39 = vld [vmem:[%s21504_s2 + $0x78] sm:$0xff] }
  0x4b   :  { %22756 = vst [vmem:[#allocation129_spill] sm:$0xff] %v15274_v17  ;;  %22759 = vst [vmem:[#allocation132_spill] sm:$0xff] %v15285_v8  ;;  %v15291_v21 = vsub.f32 %v2913_v52, %v15274_v17  ;;  %v15296_v4 = vand.u32 4294901760, %v251_v16  ;;  %v15305_v24 = vsub.f32 %v91_v14, %v15285_v8  ;;  %v15309_v52 = vand.u32 4294901760, %v43_v7  ;;  %496 = vmatmul.mubr.f32.gmra.mrb[8].mxu1 %v15238_v11 }
  0x4c   :  { %v11908_v36 = vpack.c.bf16 %v892_v0, %v880_v5  ;;  %22758 = vst [vmem:[#allocation131_spill] sm:$0xff] %v15283_v51  ;;  %22761 = vst [vmem:[#allocation134_spill] sm:$0xff] %v15294_v12  ;;  %v2916_v0 = vsel %vm231_vm0, %v94_v19, 0  ;;  %v15302_v60 = vand.u32 4294901760, %v15283_v51  ;;  %11907 = vmatprep.subr.bf16.mxu1 %v11906_v20  ;;  %v15316_v53 = vand.u32 4294901760, %v15294_v12  ;;  %12483 = vmatprep.subr.bf16.mxu0 %v11906_v20 }
  0x4d   :  { %22760 = vst [vmem:[#allocation133_spill] sm:$0xff] %v15291_v21  ;;  %22762 = vst [vmem:[#allocation135_spill] sm:$0xff] %v15296_v4  ;;  %v15307_v57 = vand.u32 4294901760, %v2916_v0  ;;  %v15313_v29 = vand.u32 4294901760, %v15291_v21  ;;  %v15319_v5 = vsub.f32 %v251_v16, %v15296_v4  ;;  %v22770_v19 = vand.u32 4294901760, %v14408_v26  ;;  %5801 = vmatmul.mubr.f32.gmra.mrb[8].mxu0 %v15272_v1 }
  0x4e   :  { %22763 = vst [vmem:[#allocation136_spill] sm:$0xff] %v15302_v60  ;;  %22764 = vst [vmem:[#allocation137_spill] sm:$0xff] %v15305_v24  ;;  %11909 = vmatpush1.bf16.msra.mxu1 %v11908_v36  ;;  %v504_v31 = vsub.f32 %v15283_v51, %v15302_v60  ;;  %v15329_v37 = vand.u32 4294901760, %v15305_v24  ;;  %v15335_v2 = vsub.f32 %v43_v7, %v15309_v52  ;;  %12485 = vmatpush1.bf16.msra.mxu0 %v11908_v36 }
  0x4f   :  { %22765 = vst [vmem:[#allocation138_spill] sm:$0xff] %v15307_v57  ;;  %22766 = vst [vmem:[#allocation139_spill] sm:$0xff] %v15309_v52  ;;  %v15324_v14 = vsub.f32 %v14408_v26, %v22770_v19  ;;  %v15332_v45 = vsub.f32 %v2916_v0, %v15307_v57  ;;  %v3169_v26 = vsub.f32 %v15291_v21, %v15313_v29  ;;  %v15343_v16 = vand.u32 4294901760, %v15319_v5 }
  0x50   :  { %22767 = vst [vmem:[#allocation140_spill] sm:$0xff] %v15313_v29  ;;  %22768 = vst [vmem:[#allocation141_spill] sm:$0xff] %v15316_v53  ;;  %v510_v20 = vsub.f32 %v15294_v12, %v15316_v53  ;;  %v15348_v7 = vand.u32 4294901760, %v504_v31  ;;  %v3175_v0 = vsub.f32 %v15305_v24, %v15329_v37  ;;  %v15356_v36 = vand.u32 4294901760, %v15335_v2  ;;  %v93_v53 = vld [vmem:[%s21505_s3 + $0x60] sm:$0xff] }
  0x51   :  { %22769 = vst [vmem:[#allocation142_spill] sm:$0xff] %v15319_v5  ;;  %22771 = vst [vmem:[#allocation143_spill] sm:$0xff] %v15329_v37  ;;  %v15353_v9 = vand.u32 4294901760, %v15332_v45  ;;  %v15362_v19 = vand.u32 4294901760, %v3169_v26  ;;  %v520_v31 = vsub.f32 %v15319_v5, %v15343_v16  ;;  %v22780_v13 = vand.u32 4294901760, %v15324_v14 }
  0x52   :  { %22772 = vst [vmem:[#allocation144_spill] sm:$0xff] %v15332_v45  ;;  %22773 = vst [vmem:[#allocation145_spill] sm:$0xff] %v15335_v2  ;;  %v15364_v25 = vand.u32 4294901760, %v510_v20  ;;  %v15371_v29 = vand.u32 4294901760, %v3175_v0  ;;  %v526_v24 = vsub.f32 %v15335_v2, %v15356_v36  ;;  %v22782_v26 = vand.u32 4294901760, %v14413_v27  ;;  %506 = vmatprep.mubr.f32.mxu1 %v15348_v7 }
  0x53   :  { %22774 = vst [vmem:[#allocation146_spill] sm:$0xff] %v15343_v16  ;;  %22775 = vst [vmem:[#allocation147_spill] sm:$0xff] %v15348_v7  ;;  %v897_v37 = vsub.f32 %v15324_v14, %v22780_v13  ;;  %v3185_v60 = vsub.f32 %v15332_v45, %v15353_v9  ;;  %v96_v13 = vld [vmem:[%s21505_s3 + $0x78] sm:$0xff]  ;;  %v15389_v0 = vand.u32 4294901760, %v520_v31  ;;  %v15391_v16 = vand.u32 4294901760, %v93_v53  ;;  %5811 = vmatprep.mubr.f32.mxu0 %v15362_v19 }
  0x54   :  { %22776 = vst [vmem:[#allocation148_spill] sm:$0xff] %v15353_v9  ;;  %22777 = vst [vmem:[#allocation149_spill] sm:$0xff] %v15356_v36  ;;  %v15380_v20 = vsub.f32 %v14413_v27, %v22782_v26  ;;  %v22785_v36 = vand.u32 4294901760, %v14418_v28  ;;  %v15402_v2 = vand.u32 4294901760, %v526_v24  ;;  %v22788_v31 = vand.u32 4294901760, %v14434_v33  ;;  %512 = vmatmul.mubr.f32.gmra.mrb[10].mxu1 %v15364_v25  ;;  %5817 = vmatmul.mubr.f32.gmra.mrb[10].mxu0 %v15371_v29 }
  0x55   :  { %22778 = vst [vmem:[#allocation150_spill] sm:$0xff] %v15362_v19  ;;  %22779 = vst [vmem:[#allocation151_spill] sm:$0xff] %v15364_v25  ;;  %v898_v9 = vand.u32 4294901760, %v897_v37  ;;  %v15400_v26 = vand.u32 4294901760, %v3185_v60  ;;  %v15418_v60 = vsub.f32 %v93_v53, %v15391_v16  ;;  %v254_v11 = vsel %vm231_vm0, %v46_v39, 0  ;;  %522 = vmatprep.mubr.f32.mxu1 %v15389_v0 }
  0x56   :  { %22781 = vst [vmem:[#allocation152_spill] sm:$0xff] %v15371_v29  ;;  %22783 = vst [vmem:[#allocation153_spill] sm:$0xff] %v15389_v0  ;;  %v15396_v27 = vsub.f32 %v14418_v28, %v22785_v36  ;;  %v15408_v37 = vsub.f32 %v14434_v33, %v22788_v31  ;;  %v45_v28 = vld [vmem:[%s21504_s2 + $0x70] sm:$0xff]  ;;  %v2919_v33 = vsel %vm231_vm0, %v96_v13, 0  ;;  %v22790_v31 = vand.u32 4294901760, %v15380_v20 }
  0x57   :  { %22784 = vst [vmem:[#allocation154_spill] sm:$0xff] %v15391_v16  ;;  %22786 = vst [vmem:[#allocation155_spill] sm:$0xff] %v15400_v26  ;;  %v95_v36 = vld [vmem:[%s21505_s3 + $0x70] sm:$0xff]  ;;  %v15427_v45 = vand.u32 4294901760, %v254_v11  ;;  %v15429_v5 = vand.u32 4294901760, %v2919_v33  ;;  %v15433_v53 = vand.u32 4294901760, %v15418_v60  ;;  %5827 = vmatprep.mubr.f32.mxu0 %v15400_v26 }
  0x58   :  { %22787 = vst [vmem:[#allocation156_spill] sm:$0xff] %v15402_v2  ;;  %22789 = vst [vmem:[#allocation157_spill] sm:$0xff] %v15418_v60  ;;  %v21785_v24 = vand.u32 4294901760, %v15396_v27  ;;  %v909_v7 = vsub.f32 %v15380_v20, %v22790_v31  ;;  %v21788_v1 = vand.u32 4294901760, %v15408_v37  ;;  %v15438_v13 = vand.u32 4294901760, %v45_v28  ;;  %528 = vmatmul.mubr.f32.gmra.mrb[12].mxu1 %v15402_v2 }
  0x59   :  { %22791 = vst [vmem:[#allocation158_spill] sm:$0xff] %v15427_v45  ;;  %22792 = vst [vmem:[#allocation159_spill] sm:$0xff] %v15429_v5  ;;  %v15440_v19 = vand.u32 4294901760, %v95_v36  ;;  %v15448_v12 = vsub.f32 %v254_v11, %v15427_v45  ;;  %v15451_v21 = vsub.f32 %v2919_v33, %v15429_v5  ;;  %v3191_v0 = vsub.f32 %v15418_v60, %v15433_v53 }
  0x5a   :  { %22793 = vst [vmem:[#allocation160_spill] sm:$0xff] %v15433_v53  ;;  %v903_v39 = vsub.f32 %v15396_v27, %v21785_v24  ;;  %22794 = vst [vmem:[#allocation161_spill] sm:$0xff] %v15438_v13  ;;  %v910_v31 = vand.u32 4294901760, %v909_v7  ;;  %v915_v25 = vsub.f32 %v15408_v37, %v21788_v1  ;;  %v48_v24 = vld [vmem:[%s21504_s2 + $0x88] sm:$0xff]  ;;  %v15460_v29 = vsub.f32 %v45_v28, %v15438_v13 }
  0x5b   :  { %22795 = vst [vmem:[#allocation162_spill] sm:$0xff] %v15440_v19  ;;  %22796 = vst [vmem:[#allocation163_spill] sm:$0xff] %v15448_v12  ;;  %v15463_v1 = vsub.f32 %v95_v36, %v15440_v19  ;;  %v15466_v33 = vand.u32 4294901760, %v15448_v12  ;;  %v15469_v5 = vand.u32 4294901760, %v15451_v21  ;;  %v15472_v26 = vand.u32 4294901760, %v3191_v0 }
  0x5c   :  { %22797 = vst [vmem:[#allocation164_spill] sm:$0xff] %v15451_v21  ;;  %v904_v7 = vand.u32 4294901760, %v903_v39  ;;  %22798 = vst [vmem:[#allocation165_spill] sm:$0xff] %v15460_v29  ;;  %v11910_v11 = vpack.c.bf16 %v910_v31, %v898_v9  ;;  %v916_v51 = vand.u32 4294901760, %v915_v25  ;;  %v15475_v39 = vand.u32 4294901760, %v15460_v29  ;;  %v98_v9 = vld [vmem:[%s21505_s3 + $0x88] sm:$0xff] }
  0x5d   :  { %22799 = vst [vmem:[#allocation166_spill] sm:$0xff] %v15463_v1  ;;  %22800 = vst [vmem:[#allocation167_spill] sm:$0xff] %v15466_v33  ;;  %v15478_v28 = vand.u32 4294901760, %v15463_v1  ;;  %v257_v36 = vsel %vm231_vm0, %v48_v24, 0  ;;  %v536_v31 = vsub.f32 %v15448_v12, %v15466_v33  ;;  %v3201_v0 = vsub.f32 %v15451_v21, %v15469_v5  ;;  %5833 = vmatmul.mubr.f32.gmra.mrb[12].mxu0 %v15472_v26 }
  0x5e   :  { %22801 = vst [vmem:[#allocation168_spill] sm:$0xff] %v15469_v5  ;;  %22802 = vst [vmem:[#allocation169_spill] sm:$0xff] %v15472_v26  ;;  %11911 = vmatprep.subr.bf16.mxu1 %v11910_v11  ;;  %v11912_v25 = vpack.c.bf16 %v916_v51, %v904_v7  ;;  %12487 = vmatprep.subr.bf16.mxu0 %v11910_v11  ;;  %v15488_v2 = vand.u32 4294901760, %v257_v36  ;;  %v542_v24 = vsub.f32 %v15460_v29, %v15475_v39  ;;  %v47_v26 = vld [vmem:[%s21504_s2 + $0x80] sm:$0xff] }
  0x5f   :  { %22803 = vst [vmem:[#allocation170_spill] sm:$0xff] %v15475_v39  ;;  %22804 = vst [vmem:[#allocation171_spill] sm:$0xff] %v15478_v28  ;;  %v3207_v53 = vsub.f32 %v15463_v1, %v15478_v28  ;;  %v22806_v60 = vand.u32 4294901760, %v14439_v34  ;;  %v22807_v7 = vand.u32 4294901760, %v14444_v35  ;;  %v15508_v5 = vand.u32 4294901760, %v536_v31 }
  0x60   :  { %22805 = vst [vmem:[#allocation172_spill] sm:$0xff] %v15488_v2  ;;  %11913 = vmatpush1.bf16.msra.mxu1 %v11912_v25  ;;  %v15510_v39 = vand.u32 4294901760, %v3201_v0  ;;  %12489 = vmatpush1.bf16.msra.mxu0 %v11912_v25  ;;  %v15513_v28 = vsub.f32 %v257_v36, %v15488_v2  ;;  %v15532_v25 = vand.u32 4294901760, %v47_v26  ;;  %v22816_v0 = vand.u32 4294901760, %v14460_v40 }
  0x61   :  { %v15498_v51 = vsub.f32 %v14439_v34, %v22806_v60  ;;  %v15503_v11 = vsub.f32 %v14444_v35, %v22807_v7  ;;  %22808 = vst [vmem:[#allocation173_spill] sm:$0xff] %v15508_v5  ;;  %v2922_v34 = vsel %vm231_vm0, %v98_v9, 0  ;;  %v97_v35 = vld [vmem:[%s21505_s3 + $0x80] sm:$0xff]  ;;  %v15519_v60 = vand.u32 4294901760, %v542_v24  ;;  %538 = vmatprep.mubr.f32.mxu1 %v15508_v5 }
  0x62   :  { %22809 = vst [vmem:[#allocation174_spill] sm:$0xff] %v15510_v39  ;;  %22810 = vst [vmem:[#allocation175_spill] sm:$0xff] %v15513_v28  ;;  %v15521_v7 = vand.u32 4294901760, %v3207_v53  ;;  %5843 = vmatprep.mubr.f32.mxu0 %v15510_v39  ;;  %v15528_v36 = vand.u32 4294901760, %v15513_v28  ;;  %v15530_v9 = vand.u32 4294901760, %v2922_v34  ;;  %v15537_v53 = vsub.f32 %v14460_v40, %v22816_v0 }
  0x63   :  { %22811 = vst [vmem:[#allocation176_spill] sm:$0xff] %v15519_v60  ;;  %v21815_v33 = vand.u32 4294901760, %v15498_v51  ;;  %v21816_v31 = vand.u32 4294901760, %v15503_v11  ;;  %22815 = vst [vmem:[#allocation180_spill] sm:$0xff] %v15532_v25  ;;  %544 = vmatmul.mubr.f32.gmra.mrb[14].mxu1 %v15519_v60  ;;  %v22817_v39 = vand.u32 4294901760, %v14465_v41  ;;  %v15552_v29 = vand.u32 4294901760, %v97_v35 }
  0x64   :  { %22812 = vst [vmem:[#allocation177_spill] sm:$0xff] %v15521_v7  ;;  %22813 = vst [vmem:[#allocation178_spill] sm:$0xff] %v15528_v36  ;;  %5849 = vmatmul.mubr.f32.gmra.mrb[14].mxu0 %v15521_v7  ;;  %v552_v40 = vsub.f32 %v15513_v28, %v15528_v36  ;;  %v15557_v0 = vsub.f32 %v2922_v34, %v15530_v9  ;;  %v15560_v60 = vsub.f32 %v47_v26, %v15532_v25 }
  0x65   :  { %22814 = vst [vmem:[#allocation179_spill] sm:$0xff] %v15530_v9  ;;  %v921_v24 = vsub.f32 %v15498_v51, %v21815_v33  ;;  %v933_v5 = vsub.f32 %v15503_v11, %v21816_v31  ;;  %v15550_v1 = vsub.f32 %v14465_v41, %v22817_v39  ;;  %22818 = vst [vmem:[#allocation181_spill] sm:$0xff] %v15552_v29  ;;  %v21828_v33 = vand.u32 4294901760, %v15537_v53  ;;  %v50_v31 = vld [vmem:[%s21504_s2 + $0x98] sm:$0xff] }
  0x66   :  { %22819 = vst [vmem:[#allocation182_spill] sm:$0xff] %v15557_v0  ;;  %22820 = vst [vmem:[#allocation183_spill] sm:$0xff] %v15560_v60  ;;  %v15568_v21 = vsub.f32 %v97_v35, %v15552_v29  ;;  %v15570_v36 = vand.u32 4294901760, %v552_v40  ;;  %v15573_v34 = vand.u32 4294901760, %v15557_v0  ;;  %v15576_v26 = vand.u32 4294901760, %v15560_v60  ;;  %v49_v35 = vld [vmem:[%s21504_s2 + $0x90] sm:$0xff] }
  0x67   :  { %v922_v7 = vand.u32 4294901760, %v921_v24  ;;  %v934_v41 = vand.u32 4294901760, %v933_v5  ;;  %v21835_v39 = vand.u32 4294901760, %v15550_v1  ;;  %v927_v28 = vsub.f32 %v15537_v53, %v21828_v33  ;;  %v100_v5 = vld [vmem:[%s21505_s3 + $0x98] sm:$0xff] }
  0x68   :  { %22821 = vst [vmem:[#allocation184_spill] sm:$0xff] %v15568_v21  ;;  %22822 = vst [vmem:[#allocation185_spill] sm:$0xff] %v15570_v36  ;;  %v15591_v12 = vand.u32 4294901760, %v15568_v21  ;;  %v260_v29 = vsel %vm231_vm0, %v50_v31, 0  ;;  %554 = vmatprep.mubr.f32.mxu1 %v15570_v36  ;;  %v3217_v33 = vsub.f32 %v15557_v0, %v15573_v34  ;;  %v558_v25 = vsub.f32 %v15560_v60, %v15576_v26 }
  0x69   :  { %22823 = vst [vmem:[#allocation186_spill] sm:$0xff] %v15573_v34  ;;  %22824 = vst [vmem:[#allocation187_spill] sm:$0xff] %v15576_v26  ;;  %v11914_v24 = vpack.c.bf16 %v934_v41, %v922_v7  ;;  %v939_v40 = vsub.f32 %v15550_v1, %v21835_v39  ;;  %v928_v9 = vand.u32 4294901760, %v927_v28  ;;  %v15599_v2 = vand.u32 4294901760, %v260_v29  ;;  %v99_v7 = vld [vmem:[%s21505_s3 + $0x90] sm:$0xff]  ;;  %v52_v28 = vld [vmem:[%s21504_s2 + $0xa8] sm:$0xff] }
  0x6a   :  { %22825 = vst [vmem:[#allocation188_spill] sm:$0xff] %v15591_v12  ;;  %v3223_v31 = vsub.f32 %v15568_v21, %v15591_v12  ;;  %v2925_v39 = vsel %vm231_vm0, %v100_v5, 0  ;;  %v15607_v36 = vand.u32 4294901760, %v49_v35  ;;  %v15612_v26 = vand.u32 4294901760, %v3217_v33  ;;  %v102_v33 = vld [vmem:[%s21505_s3 + $0xa8] sm:$0xff] }
  0x6b   :  { %22826 = vst [vmem:[#allocation189_spill] sm:$0xff] %v15599_v2  ;;  %11915 = vmatprep.subr.bf16.mxu1 %v11914_v24  ;;  %v940_v41 = vand.u32 4294901760, %v939_v40  ;;  %12491 = vmatprep.subr.bf16.mxu0 %v11914_v24  ;;  %v15614_v34 = vand.u32 4294901760, %v558_v25  ;;  %v15617_v60 = vsub.f32 %v260_v29, %v15599_v2  ;;  %v15619_v40 = vand.u32 4294901760, %v2925_v39 }
  0x6c   :  { %22827 = vst [vmem:[#allocation190_spill] sm:$0xff] %v15607_v36  ;;  %22828 = vst [vmem:[#allocation191_spill] sm:$0xff] %v15612_v26  ;;  %v15621_v12 = vand.u32 4294901760, %v3223_v31  ;;  %v15624_v5 = vsub.f32 %v49_v35, %v15607_v36  ;;  %v15626_v24 = vand.u32 4294901760, %v99_v7  ;;  %5859 = vmatprep.mubr.f32.mxu0 %v15612_v26  ;;  %v263_v25 = vsel %vm231_vm0, %v52_v28, 0  ;;  %v14152_v35 = vld [vmem:[%s21503_s4 + $0xa8] sm:$0xff] }
  0x6d   :  { %22829 = vst [vmem:[#allocation192_spill] sm:$0xff] %v15614_v34  ;;  %22830 = vst [vmem:[#allocation193_spill] sm:$0xff] %v15617_v60  ;;  %v11916_v0 = vpack.c.bf16 %v940_v41, %v928_v9  ;;  %560 = vmatmul.mubr.f32.gmra.mrb[16].mxu1 %v15614_v34  ;;  %v15634_v29 = vand.u32 4294901760, %v15617_v60  ;;  %v15637_v9 = vsub.f32 %v2925_v39, %v15619_v40  ;;  %v22837_v41 = vand.u32 4294901760, %v14470_v42  ;;  %v14153_v28 = vld [vmem:[%s21503_s4 + $0xb8] sm:$0xff] }
  0x6e   :  { %22831 = vst [vmem:[#allocation194_spill] sm:$0xff] %v15619_v40  ;;  %22832 = vst [vmem:[#allocation195_spill] sm:$0xff] %v15621_v12  ;;  %5865 = vmatmul.mubr.f32.gmra.mrb[16].mxu0 %v15621_v12  ;;  %v15649_v34 = vand.u32 4294901760, %v15624_v5  ;;  %v15652_v26 = vsub.f32 %v99_v7, %v15626_v24  ;;  %v15654_v39 = vand.u32 4294901760, %v263_v25  ;;  %v22841_v21 = vand.u32 4294901760, %v14491_v47 }
  0x6f   :  { %22833 = vst [vmem:[#allocation196_spill] sm:$0xff] %v15624_v5  ;;  %22834 = vst [vmem:[#allocation197_spill] sm:$0xff] %v15626_v24  ;;  %v15645_v31 = vsub.f32 %v14152_v35, %v22837_v41  ;;  %11917 = vmatpush1.bf16.msra.mxu1 %v11916_v0  ;;  %12493 = vmatpush1.bf16.msra.mxu0 %v11916_v0  ;;  %v568_v35 = vsub.f32 %v15617_v60, %v15634_v29  ;;  %v15666_v41 = vand.u32 4294901760, %v15637_v9  ;;  %v51_v0 = vld [vmem:[%s21504_s2 + $0xa0] sm:$0xff] }
  0x70   :  { %22835 = vst [vmem:[#allocation198_spill] sm:$0xff] %v15634_v29  ;;  %22836 = vst [vmem:[#allocation199_spill] sm:$0xff] %v15637_v9  ;;  %v15661_v42 = vsub.f32 %v14153_v28, %v22841_v21  ;;  %v2928_v12 = vsel %vm231_vm0, %v102_v33, 0  ;;  %v574_v24 = vsub.f32 %v15624_v5, %v15649_v34  ;;  %v15673_v36 = vand.u32 4294901760, %v15652_v26 }
  0x71   :  { %22838 = vst [vmem:[#allocation200_spill] sm:$0xff] %v15649_v34  ;;  %22839 = vst [vmem:[#allocation201_spill] sm:$0xff] %v15652_v26  ;;  %v21866_v7 = vand.u32 4294901760, %v15645_v31  ;;  %v15676_v47 = vsub.f32 %v263_v25, %v15654_v39  ;;  %v15682_v28 = vand.u32 4294901760, %v568_v35  ;;  %v3233_v33 = vsub.f32 %v15637_v9, %v15666_v41 }
  0x72   :  { %22840 = vst [vmem:[#allocation202_spill] sm:$0xff] %v15654_v39  ;;  %22842 = vst [vmem:[#allocation203_spill] sm:$0xff] %v15666_v41  ;;  %v15689_v29 = vand.u32 4294901760, %v2928_v12  ;;  %v15691_v5 = vand.u32 4294901760, %v574_v24  ;;  %v3239_v25 = vsub.f32 %v15652_v26, %v15673_v36  ;;  %v22849_v35 = vand.u32 4294901760, %v15661_v42  ;;  %v101_v41 = vld [vmem:[%s21505_s3 + $0xa0] sm:$0xff] }
  0x73   :  { %22843 = vst [vmem:[#allocation204_spill] sm:$0xff] %v15673_v36  ;;  %22844 = vst [vmem:[#allocation205_spill] sm:$0xff] %v15676_v47  ;;  %v945_v34 = vsub.f32 %v15645_v31, %v21866_v7  ;;  %v15696_v21 = vand.u32 4294901760, %v15676_v47  ;;  %570 = vmatprep.mubr.f32.mxu1 %v15682_v28  ;;  %v15705_v7 = vand.u32 4294901760, %v3233_v33  ;;  %v15710_v36 = vand.u32 4294901760, %v51_v0  ;;  %v54_v26 = vld [vmem:[%s21504_s2 + $0xb8] sm:$0xff] }
  0x74   :  { %22845 = vst [vmem:[#allocation206_spill] sm:$0xff] %v15682_v28  ;;  %22846 = vst [vmem:[#allocation207_spill] sm:$0xff] %v15689_v29  ;;  %v957_v60 = vsub.f32 %v15661_v42, %v22849_v35  ;;  %v15708_v9 = vsub.f32 %v2928_v12, %v15689_v29  ;;  %576 = vmatmul.mubr.f32.gmra.mrb[18].mxu1 %v15691_v5  ;;  %v15716_v35 = vand.u32 4294901760, %v3239_v25  ;;  %v22854_v12 = vand.u32 4294901760, %v14496_v48  ;;  %v104_v48 = vld [vmem:[%s21505_s3 + $0xb8] sm:$0xff] }
  0x75   :  { %22847 = vst [vmem:[#allocation208_spill] sm:$0xff] %v15691_v5  ;;  %22848 = vst [vmem:[#allocation209_spill] sm:$0xff] %v15696_v21  ;;  %v946_v24 = vand.u32 4294901760, %v945_v34  ;;  %v584_v39 = vsub.f32 %v15676_v47, %v15696_v21  ;;  %v14154_v34 = vld [vmem:[%s21503_s4 + $0xa0] sm:$0xff]  ;;  %5875 = vmatprep.mubr.f32.mxu0 %v15705_v7  ;;  %v15732_v25 = vsub.f32 %v51_v0, %v15710_v36  ;;  %v22857_v5 = vand.u32 4294901760, %v14501_v49 }
  0x76   :  { %22850 = vst [vmem:[#allocation210_spill] sm:$0xff] %v15705_v7  ;;  %22851 = vst [vmem:[#allocation211_spill] sm:$0xff] %v15708_v9  ;;  %v958_v28 = vand.u32 4294901760, %v957_v60  ;;  %v15725_v33 = vsub.f32 %v14154_v34, %v22854_v12  ;;  %v15729_v29 = vand.u32 4294901760, %v15708_v9  ;;  %v14155_v60 = vld [vmem:[%s21503_s4 + $0xb0] sm:$0xff]  ;;  %v15741_v47 = vand.u32 4294901760, %v101_v41  ;;  %5881 = vmatmul.mubr.f32.gmra.mrb[18].mxu0 %v15716_v35 }
  0x77   :  { %22852 = vst [vmem:[#allocation212_spill] sm:$0xff] %v15710_v36  ;;  %22853 = vst [vmem:[#allocation213_spill] sm:$0xff] %v15716_v35  ;;  %v15739_v21 = vsub.f32 %v14155_v60, %v22857_v5  ;;  %v53_v34 = vld [vmem:[%s21504_s2 + $0xb0] sm:$0xff]  ;;  %v15750_v0 = vand.u32 4294901760, %v584_v39  ;;  %v266_v49 = vsel %vm231_vm0, %v54_v26, 0  ;;  %v15757_v60 = vand.u32 4294901760, %v15732_v25 }
  0x78   :  { %22855 = vst [vmem:[#allocation214_spill] sm:$0xff] %v15729_v29  ;;  %22856 = vst [vmem:[#allocation215_spill] sm:$0xff] %v15732_v25  ;;  %v11918_v12 = vpack.c.bf16 %v958_v28, %v946_v24  ;;  %v21892_v7 = vand.u32 4294901760, %v15725_v33  ;;  %v3249_v5 = vsub.f32 %v15708_v9, %v15729_v29  ;;  %v15761_v40 = vsub.f32 %v101_v41, %v15741_v47  ;;  %v103_v36 = vld [vmem:[%s21505_s3 + $0xb0] sm:$0xff] }
  0x79   :  { %22858 = vst [vmem:[#allocation216_spill] sm:$0xff] %v15741_v47  ;;  %22859 = vst [vmem:[#allocation217_spill] sm:$0xff] %v15750_v0  ;;  %586 = vmatprep.mubr.f32.mxu1 %v15750_v0  ;;  %v15767_v28 = vand.u32 4294901760, %v266_v49  ;;  %v2931_v26 = vsel %vm231_vm0, %v104_v48, 0  ;;  %v15770_v24 = vand.u32 4294901760, %v53_v34  ;;  %v590_v41 = vsub.f32 %v15732_v25, %v15757_v60  ;;  %v56_v48 = vld [vmem:[%s21504_s2 + $0xc8] sm:$0xff] }
  0x7a   :  { %22860 = vst [vmem:[#allocation218_spill] sm:$0xff] %v15757_v60  ;;  %22861 = vst [vmem:[#allocation219_spill] sm:$0xff] %v15761_v40  ;;  %11919 = vmatprep.subr.bf16.mxu1 %v11918_v12  ;;  %v951_v39 = vsub.f32 %v15725_v33, %v21892_v7  ;;  %v15775_v35 = vand.u32 4294901760, %v3249_v5  ;;  %v22865_v0 = vand.u32 4294901760, %v15739_v21  ;;  %v15783_v7 = vand.u32 4294901760, %v15761_v40  ;;  %12495 = vmatprep.subr.bf16.mxu0 %v11918_v12 }
  0x7b   :  { %22862 = vst [vmem:[#allocation220_spill] sm:$0xff] %v15767_v28  ;;  %22863 = vst [vmem:[#allocation221_spill] sm:$0xff] %v15770_v24  ;;  %v15789_v47 = vsub.f32 %v266_v49, %v15767_v28  ;;  %v15791_v5 = vand.u32 4294901760, %v2931_v26  ;;  %v15794_v60 = vsub.f32 %v53_v34, %v15770_v24  ;;  %v15801_v2 = vand.u32 4294901760, %v103_v36 }
  0x7c   :  { %22864 = vst [vmem:[#allocation222_spill] sm:$0xff] %v15775_v35  ;;  %v963_v29 = vsub.f32 %v15739_v21, %v22865_v0  ;;  %22866 = vst [vmem:[#allocation223_spill] sm:$0xff] %v15783_v7  ;;  %v952_v9 = vand.u32 4294901760, %v951_v39  ;;  %5891 = vmatprep.mubr.f32.mxu0 %v15775_v35  ;;  %v15797_v0 = vand.u32 4294901760, %v590_v41  ;;  %v3255_v12 = vsub.f32 %v15761_v40, %v15783_v7 }
  0x7d   :  { %22867 = vst [vmem:[#allocation224_spill] sm:$0xff] %v15789_v47  ;;  %22868 = vst [vmem:[#allocation225_spill] sm:$0xff] %v15791_v5  ;;  %v15804_v39 = vand.u32 4294901760, %v15789_v47  ;;  %v15807_v49 = vsub.f32 %v2931_v26, %v15791_v5  ;;  %v15810_v28 = vand.u32 4294901760, %v15794_v60  ;;  %v269_v34 = vsel %vm231_vm0, %v56_v48, 0 }
  0x7e   :  { %22869 = vst [vmem:[#allocation226_spill] sm:$0xff] %v15794_v60  ;;  %22870 = vst [vmem:[#allocation227_spill] sm:$0xff] %v15797_v0  ;;  %v964_v25 = vand.u32 4294901760, %v963_v29  ;;  %v106_v29 = vld [vmem:[%s21505_s3 + $0xc8] sm:$0xff]  ;;  %592 = vmatmul.mubr.f32.gmra.mrb[20].mxu1 %v15797_v0  ;;  %v15817_v35 = vand.u32 4294901760, %v3255_v12  ;;  %v15820_v7 = vsub.f32 %v103_v36, %v15801_v2  ;;  %v15822_v40 = vand.u32 4294901760, %v269_v34 }
  0x7f   :  { %22871 = vst [vmem:[#allocation228_spill] sm:$0xff] %v15801_v2  ;;  %22872 = vst [vmem:[#allocation229_spill] sm:$0xff] %v15804_v39  ;;  %v600_v26 = vsub.f32 %v15789_v47, %v15804_v39  ;;  %v15827_v24 = vand.u32 4294901760, %v15807_v49  ;;  %v606_v48 = vsub.f32 %v15794_v60, %v15810_v28  ;;  %v22882_v39 = vand.u32 4294901760, %v14520_v55  ;;  %v57_v2 = vld [vmem:[%s21504_s2 + $0xd0] sm:$0xff] }
  0x80   :  { %22873 = vst [vmem:[#allocation230_spill] sm:$0xff] %v15807_v49  ;;  %22874 = vst [vmem:[#allocation231_spill] sm:$0xff] %v15810_v28  ;;  %v11920_v41 = vpack.c.bf16 %v964_v25, %v952_v9  ;;  %v14156_v9 = vld [vmem:[%s21503_s4 + $0xc8] sm:$0xff]  ;;  %v22879_v25 = vand.u32 4294901760, %v14515_v54  ;;  %5897 = vmatmul.mubr.f32.gmra.mrb[20].mxu0 %v15817_v35  ;;  %v15840_v36 = vand.u32 4294901760, %v15820_v7  ;;  %v15843_v0 = vsub.f32 %v269_v34, %v15822_v40  ;;  %v14157_v28 = vld [vmem:[%s21503_s4 + $0xd8] sm:$0xff] }
  0x81   :  { %22875 = vst [vmem:[#allocation232_spill] sm:$0xff] %v15817_v35  ;;  %22876 = vst [vmem:[#allocation233_spill] sm:$0xff] %v15820_v7  ;;  %v15850_v60 = vsub.f32 %v14157_v28, %v22882_v39  ;;  %v2934_v54 = vsel %vm231_vm0, %v106_v29, 0  ;;  %v3265_v34 = vsub.f32 %v15807_v49, %v15827_v24  ;;  %v15860_v35 = vand.u32 4294901760, %v606_v48  ;;  %v105_v39 = vld [vmem:[%s21505_s3 + $0xc0] sm:$0xff] }
  0x82   :  { %22877 = vst [vmem:[#allocation234_spill] sm:$0xff] %v15822_v40  ;;  %22878 = vst [vmem:[#allocation235_spill] sm:$0xff] %v15827_v24  ;;  %v15836_v12 = vsub.f32 %v14156_v9, %v22879_v25  ;;  %11921 = vmatpush1.bf16.msra.mxu1 %v11920_v41  ;;  %v55_v9 = vld [vmem:[%s21504_s2 + $0xc0] sm:$0xff]  ;;  %12497 = vmatpush1.bf16.msra.mxu0 %v11920_v41  ;;  %v15856_v25 = vand.u32 4294901760, %v600_v26  ;;  %v3271_v55 = vsub.f32 %v15820_v7, %v15840_v36 }
  0x83   :  { %22880 = vst [vmem:[#allocation236_spill] sm:$0xff] %v15840_v36  ;;  %22881 = vst [vmem:[#allocation237_spill] sm:$0xff] %v15843_v0  ;;  %v15866_v28 = vand.u32 4294901760, %v15843_v0  ;;  %v15869_v29 = vand.u32 4294901760, %v2934_v54  ;;  %v15872_v41 = vand.u32 4294901760, %v3265_v34  ;;  %v15877_v48 = vand.u32 4294901760, %v55_v9 }
  0x84   :  { %22883 = vst [vmem:[#allocation238_spill] sm:$0xff] %v15856_v25  ;;  %22884 = vst [vmem:[#allocation239_spill] sm:$0xff] %v15860_v35  ;;  %v21928_v47 = vand.u32 4294901760, %v15836_v12  ;;  %602 = vmatprep.mubr.f32.mxu1 %v15856_v25  ;;  %v14158_v36 = vld [vmem:[%s21503_s4 + $0xc0] sm:$0xff]  ;;  %v22889_v24 = vand.u32 4294901760, %v14525_v56  ;;  %v15890_v34 = vand.u32 4294901760, %v3271_v55 }
  0x85   :  { %22885 = vst [vmem:[#allocation240_spill] sm:$0xff] %v15866_v28  ;;  %22886 = vst [vmem:[#allocation241_spill] sm:$0xff] %v15869_v29  ;;  %608 = vmatmul.mubr.f32.gmra.mrb[22].mxu1 %v15860_v35  ;;  %v22892_v25 = vand.u32 4294901760, %v15850_v60  ;;  %v15898_v40 = vsub.f32 %v2934_v54, %v15869_v29  ;;  %v58_v56 = vld [vmem:[%s21504_s2 + $0xd8] sm:$0xff]  ;;  %5907 = vmatprep.mubr.f32.mxu0 %v15872_v41  ;;  %v14159_v35 = vld [vmem:[%s21503_s4 + $0xd0] sm:$0xff] }
  0x86   :  { %22887 = vst [vmem:[#allocation242_spill] sm:$0xff] %v15872_v41  ;;  %v969_v26 = vsub.f32 %v15836_v12, %v21928_v47  ;;  %22888 = vst [vmem:[#allocation243_spill] sm:$0xff] %v15877_v48  ;;  %v15884_v7 = vsub.f32 %v14158_v36, %v22889_v24  ;;  %v616_v47 = vsub.f32 %v15843_v0, %v15866_v28  ;;  %5913 = vmatmul.mubr.f32.gmra.mrb[22].mxu0 %v15890_v34  ;;  %v108_v55 = vld [vmem:[%s21505_s3 + $0xd8] sm:$0xff] }
  0x87   :  { %22891 = vst [vmem:[#allocation245_spill] sm:$0xff] %v15890_v34  ;;  %v981_v49 = vsub.f32 %v15850_v60, %v22892_v25  ;;  %22893 = vst [vmem:[#allocation246_spill] sm:$0xff] %v15898_v40  ;;  %v15905_v36 = vsub.f32 %v55_v9, %v15877_v48  ;;  %v22895_v25 = vand.u32 4294901760, %v14539_v61  ;;  %v15921_v9 = vand.u32 4294901760, %v105_v39 }
  0x88   :  { %22890 = vst [vmem:[#allocation244_spill] sm:$0xff] %v15884_v7  ;;  %v970_v24 = vand.u32 4294901760, %v969_v26  ;;  %v15916_v28 = vand.u32 4294901760, %v616_v47  ;;  %v15919_v26 = vand.u32 4294901760, %v15898_v40  ;;  %v22901_v61 = vand.u32 4294901760, %v15884_v7 }
  0x89   :  { %22894 = vst [vmem:[#allocation247_spill] sm:$0xff] %v15905_v36  ;;  %v15913_v54 = vsub.f32 %v14159_v35, %v22895_v25  ;;  %v982_v0 = vand.u32 4294901760, %v981_v49  ;;  %22899 = vst [vmem:[#allocation251_spill] sm:$0xff] %v15921_v9  ;;  %v15927_v41 = vand.u32 4294901760, %v15905_v36  ;;  %v272_v49 = vsel %vm231_vm0, %v58_v56, 0 }
  0x8a   :  { %22897 = vst [vmem:[#allocation249_spill] sm:$0xff] %v15916_v28  ;;  %22898 = vst [vmem:[#allocation250_spill] sm:$0xff] %v15919_v26  ;;  %v975_v35 = vsub.f32 %v15884_v7, %v22901_v61  ;;  %618 = vmatprep.mubr.f32.mxu1 %v15916_v28  ;;  %v3281_v34 = vsub.f32 %v15898_v40, %v15919_v26  ;;  %v15938_v48 = vsub.f32 %v105_v39, %v15921_v9  ;;  %v107_v61 = vld [vmem:[%s21505_s3 + $0xd0] sm:$0xff] }
  0x8b   :  { %22896 = vst [vmem:[#allocation248_spill] sm:$0xff] %v15913_v54  ;;  %22900 = vst [vmem:[#allocation252_spill] sm:$0xff] %v15927_v41  ;;  %v21958_v47 = vand.u32 4294901760, %v15913_v54  ;;  %v11922_v25 = vpack.c.bf16 %v982_v0, %v970_v24  ;;  %v15940_v29 = vand.u32 4294901760, %v272_v49  ;;  %v622_v56 = vsub.f32 %v15905_v36, %v15927_v41 }
  0x8c   :  { %22902 = vst [vmem:[#allocation253_spill] sm:$0xff] %v15938_v48  ;;  %v976_v0 = vand.u32 4294901760, %v975_v35  ;;  %v2937_v39 = vsel %vm231_vm0, %v108_v55, 0  ;;  %v15954_v28 = vand.u32 4294901760, %v3281_v34  ;;  %v15957_v26 = vand.u32 4294901760, %v15938_v48 }
  0x8d   :  { %22903 = vst [vmem:[#allocation254_spill] sm:$0xff] %v15940_v29  ;;  %v987_v24 = vsub.f32 %v15913_v54, %v21958_v47  ;;  %11923 = vmatprep.subr.bf16.mxu1 %v11922_v25  ;;  %12499 = vmatprep.subr.bf16.mxu0 %v11922_v25  ;;  %v15960_v40 = vsub.f32 %v272_v49, %v15940_v29  ;;  %v15962_v9 = vand.u32 4294901760, %v2937_v39  ;;  %v15964_v41 = vand.u32 4294901760, %v622_v56  ;;  %v14160_v25 = vld [vmem:[%s21503_s4 + $0xe8] sm:$0xff] }
  0x8e   :  { %22904 = vst [vmem:[#allocation255_spill] sm:$0xff] %v15954_v28  ;;  %22905 = vst [vmem:[#allocation256_spill] sm:$0xff] %v15957_v26  ;;  %v15966_v36 = vand.u32 4294901760, %v57_v2  ;;  %v15968_v47 = vand.u32 4294901760, %v107_v61  ;;  %5923 = vmatprep.mubr.f32.mxu0 %v15954_v28  ;;  %v3287_v34 = vsub.f32 %v15938_v48, %v15957_v26  ;;  %v22913_v56 = vand.u32 4294901760, %v14544_v62  ;;  %v60_v28 = vld [vmem:[%s21504_s2 + $0xe8] sm:$0xff] }
  0x8f   :  { %22906 = vst [vmem:[#allocation257_spill] sm:$0xff] %v15960_v40  ;;  %22907 = vst [vmem:[#allocation258_spill] sm:$0xff] %v15962_v9  ;;  %v988_v35 = vand.u32 4294901760, %v987_v24  ;;  %v15974_v55 = vand.u32 4294901760, %v15960_v40  ;;  %v15977_v49 = vsub.f32 %v2937_v39, %v15962_v9  ;;  %624 = vmatmul.mubr.f32.gmra.mrb[24].mxu1 %v15964_v41  ;;  %v14161_v9 = vld [vmem:[%s21503_s4 + $0xf8] sm:$0xff]  ;;  %v22917_v62 = vand.u32 4294901760, %v14549_v63 }
  0x90   :  { %22908 = vst [vmem:[#allocation259_spill] sm:$0xff] %v15964_v41  ;;  %22909 = vst [vmem:[#allocation260_spill] sm:$0xff] %v15966_v36  ;;  %v15984_v24 = vsub.f32 %v14160_v25, %v22913_v56  ;;  %v15991_v48 = vsub.f32 %v57_v2, %v15966_v36  ;;  %v15994_v39 = vsub.f32 %v107_v61, %v15968_v47  ;;  %v16003_v56 = vand.u32 4294901760, %v3287_v34 }
  0x91   :  { %22910 = vst [vmem:[#allocation261_spill] sm:$0xff] %v15968_v47  ;;  %22911 = vst [vmem:[#allocation262_spill] sm:$0xff] %v15974_v55  ;;  %v11924_v26 = vpack.c.bf16 %v988_v35, %v976_v0  ;;  %v16001_v25 = vsub.f32 %v14161_v9, %v22917_v62  ;;  %v632_v41 = vsub.f32 %v15960_v40, %v15974_v55  ;;  %v16008_v0 = vand.u32 4294901760, %v15977_v49  ;;  %v109_v47 = vld [vmem:[%s21505_s3 + $0xe0] sm:$0xff] }
  0x92   :  { %22912 = vst [vmem:[#allocation263_spill] sm:$0xff] %v15977_v49  ;;  %22914 = vst [vmem:[#allocation264_spill] sm:$0xff] %v15984_v24  ;;  %v21976_v2 = vand.u32 4294901760, %v15984_v24  ;;  %v16012_v61 = vand.u32 4294901760, %v15991_v48  ;;  %v16015_v35 = vand.u32 4294901760, %v15994_v39  ;;  %v275_v9 = vsel %vm231_vm0, %v60_v28, 0  ;;  %5929 = vmatmul.mubr.f32.gmra.mrb[24].mxu0 %v16003_v56 }
  0x93   :  { %22915 = vst [vmem:[#allocation265_spill] sm:$0xff] %v15991_v48  ;;  %22916 = vst [vmem:[#allocation266_spill] sm:$0xff] %v15994_v39  ;;  %11925 = vmatpush1.bf16.msra.mxu1 %v11924_v26  ;;  %12501 = vmatpush1.bf16.msra.mxu0 %v11924_v26  ;;  %v16020_v34 = vand.u32 4294901760, %v632_v41  ;;  %v3297_v62 = vsub.f32 %v15977_v49, %v16008_v0  ;;  %v16027_v55 = vand.u32 4294901760, %v275_v9  ;;  %v22925_v28 = vand.u32 4294901760, %v16001_v25 }
  0x94   :  { %22918 = vst [vmem:[#allocation267_spill] sm:$0xff] %v16001_v25  ;;  %22919 = vst [vmem:[#allocation268_spill] sm:$0xff] %v16003_v56  ;;  %v993_v26 = vsub.f32 %v15984_v24, %v21976_v2  ;;  %v638_v40 = vsub.f32 %v15991_v48, %v16012_v61  ;;  %v3303_v63 = vsub.f32 %v15994_v39, %v16015_v35  ;;  %v14162_v56 = vld [vmem:[%s21503_s4 + $0xe0] sm:$0xff]  ;;  %v110_v2 = vld [vmem:[%s21505_s3 + $0xe8] sm:$0xff] }
  0x95   :  { %22920 = vst [vmem:[#allocation269_spill] sm:$0xff] %v16008_v0  ;;  %22921 = vst [vmem:[#allocation270_spill] sm:$0xff] %v16012_v61  ;;  %v1005_v41 = vsub.f32 %v16001_v25, %v22925_v28  ;;  %v22926_v0 = vand.u32 4294901760, %v14570_v32  ;;  %634 = vmatprep.mubr.f32.mxu1 %v16020_v34  ;;  %v16050_v61 = vand.u32 4294901760, %v3297_v62  ;;  %v16053_v39 = vsub.f32 %v275_v9, %v16027_v55  ;;  %v14163_v32 = vld [vmem:[%s21503_s4 + $0xf0] sm:$0xff] }
  0x96   :  { %22922 = vst [vmem:[#allocation271_spill] sm:$0xff] %v16015_v35  ;;  %22923 = vst [vmem:[#allocation272_spill] sm:$0xff] %v16020_v34  ;;  %v59_v35 = vld [vmem:[%s21504_s2 + $0xe0] sm:$0xff]  ;;  %v994_v28 = vand.u32 4294901760, %v993_v26  ;;  %v16065_v36 = vand.u32 4294901760, %v638_v40  ;;  %v16067_v62 = vand.u32 4294901760, %v3303_v63 }
  0x97   :  { %22924 = vst [vmem:[#allocation273_spill] sm:$0xff] %v16027_v55  ;;  %v16041_v49 = vsub.f32 %v14162_v56, %v22926_v0  ;;  %22928 = vst [vmem:[#allocation275_spill] sm:$0xff] %v16050_v61  ;;  %v22930_v56 = vld [vmem:[#allocation13_spill] sm:$0xff]  ;;  %v1006_v26 = vand.u32 4294901760, %v1005_v41  ;;  %5939 = vmatprep.mubr.f32.mxu0 %v16050_v61  ;;  %v16079_v40 = vand.u32 4294901760, %v59_v35  ;;  %v16088_v61 = vand.u32 4294901760, %v109_v47 }
  0x98   :  { %22929 = vst [vmem:[#allocation276_spill] sm:$0xff] %v16053_v39  ;;  %v22931_v0 = vand.u32 4294901760, %v22930_v56  ;;  %22933 = vst [vmem:[#allocation277_spill] sm:$0xff] %v16065_v36  ;;  %v62_v34 = vld [vmem:[%s21504_s2 + $0xf8] sm:$0xff]  ;;  %640 = vmatmul.mubr.f32.gmra.mrb[26].mxu1 %v16065_v36  ;;  %5945 = vmatmul.mubr.f32.gmra.mrb[26].mxu0 %v16067_v62 }
  0x99   :  { %22927 = vst [vmem:[#allocation274_spill] sm:$0xff] %v16041_v49  ;;  %22934 = vst [vmem:[#allocation278_spill] sm:$0xff] %v16067_v62  ;;  %v21995_v9 = vand.u32 4294901760, %v16041_v49  ;;  %v11926_v63 = vpack.c.bf16 %v1006_v26, %v994_v28  ;;  %v112_v56 = vld [vmem:[%s21505_s3 + $0xf8] sm:$0xff]  ;;  %v16099_v28 = vsub.f32 %v59_v35, %v16079_v40  ;;  %v278_v26 = vsel %vm231_vm0, %v62_v34, 0  ;;  %v111_v35 = vld [vmem:[%s21505_s3 + $0xf0] sm:$0xff] }
  0x9a   :  { %v16060_v48 = vsub.f32 %v14163_v32, %v22931_v0  ;;  %v16075_v32 = vand.u32 4294901760, %v16053_v39  ;;  %v2940_v0 = vsel %vm231_vm0, %v110_v2, 0  ;;  %22936 = vst [vmem:[#allocation280_spill] sm:$0xff] %v16079_v40  ;;  %22938 = vst [vmem:[#allocation282_spill] sm:$0xff] %v16088_v61  ;;  %v16106_v5 = vsub.f32 %v109_v47, %v16088_v61 }
  0x9b   :  { %v999_v41 = vsub.f32 %v16041_v49, %v21995_v9  ;;  %v16086_v55 = vand.u32 4294901760, %v2940_v0  ;;  %22940 = vst [vmem:[#allocation283_spill] sm:$0xff] %v16099_v28  ;;  %11927 = vmatprep.subr.bf16.mxu1 %v11926_v63  ;;  %12503 = vmatprep.subr.bf16.mxu0 %v11926_v63  ;;  %v16108_v19 = vand.u32 4294901760, %v278_v26  ;;  %v2943_v47 = vsel %vm231_vm0, %v112_v56, 0 }
  0x9c   :  { %22932 = vst [vmem:[#allocation13_spill] sm:$0xff] %v16060_v48  ;;  %22935 = vst [vmem:[#allocation279_spill] sm:$0xff] %v16075_v32  ;;  %v648_v2 = vsub.f32 %v16053_v39, %v16075_v32  ;;  %v22939_v36 = vand.u32 4294901760, %v16060_v48  ;;  %v16126_v32 = vand.u32 4294901760, %v16106_v5  ;;  %v16131_v61 = vand.u32 4294901760, %v2943_v47 }
  0x9d   :  { %22937 = vst [vmem:[#allocation281_spill] sm:$0xff] %v16086_v55  ;;  %v1000_v9 = vand.u32 4294901760, %v999_v41  ;;  %v16103_v29 = vsub.f32 %v2940_v0, %v16086_v55  ;;  %22942 = vst [vmem:[#allocation285_spill] sm:$0xff] %v16106_v5  ;;  %v16119_v0 = vand.u32 4294901760, %v16099_v28  ;;  %v16129_v39 = vsub.f32 %v278_v26, %v16108_v19 }
  0x9e   :  { %v1011_v62 = vsub.f32 %v16060_v48, %v22939_v36  ;;  %22943 = vst [vmem:[#allocation286_spill] sm:$0xff] %v16108_v19  ;;  %v61_v36 = vld [vmem:[%s21504_s2 + $0xf0] sm:$0xff]  ;;  %v16116_v34 = vand.u32 4294901760, %v648_v2  ;;  %22947 = vst [vmem:[#allocation290_spill] sm:$0xff] %v16126_v32  ;;  %v16138_v56 = vand.u32 4294901760, %v111_v35  ;;  %v3319_v13 = vsub.f32 %v16106_v5, %v16126_v32  ;;  %v14164_v32 = vld [vmem:[%s21503_s4 + $0x108] sm:$0xff] }
  0x9f   :  { %22941 = vst [vmem:[#allocation284_spill] sm:$0xff] %v16103_v29  ;;  %22945 = vst [vmem:[#allocation288_spill] sm:$0xff] %v16119_v0  ;;  %v16123_v63 = vand.u32 4294901760, %v16103_v29  ;;  %v16136_v40 = vand.u32 4294901760, %v61_v36  ;;  %v16145_v26 = vand.u32 4294901760, %v16129_v39  ;;  %v16148_v19 = vsub.f32 %v2943_v47, %v16131_v61  ;;  %v64_v47 = vld [vmem:[%s21504_s2 + $0x108] sm:$0xff] }
  0xa0   :  { %22944 = vst [vmem:[#allocation287_spill] sm:$0xff] %v16116_v34  ;;  %v1012_v41 = vand.u32 4294901760, %v1011_v62  ;;  %22948 = vst [vmem:[#allocation291_spill] sm:$0xff] %v16129_v39  ;;  %650 = vmatprep.mubr.f32.mxu1 %v16116_v34  ;;  %v654_v62 = vsub.f32 %v16099_v28, %v16119_v0  ;;  %v16156_v34 = vsub.f32 %v111_v35, %v16138_v56  ;;  %v22957_v0 = vld [vmem:[#allocation14_spill] sm:$0xff] }
  0xa1   :  { %22946 = vst [vmem:[#allocation289_spill] sm:$0xff] %v16123_v63  ;;  %22949 = vst [vmem:[#allocation292_spill] sm:$0xff] %v16131_v61  ;;  %v3313_v55 = vsub.f32 %v16103_v29, %v16123_v63  ;;  %v22958_v63 = vand.u32 4294901760, %v22957_v0  ;;  %v16175_v35 = vand.u32 4294901760, %v16148_v19  ;;  %v281_v29 = vsel %vm231_vm0, %v64_v47, 0 }
  0xa2   :  { %v11928_v2 = vpack.c.bf16 %v1012_v41, %v1000_v9  ;;  %22950 = vst [vmem:[#allocation293_spill] sm:$0xff] %v16136_v40  ;;  %22951 = vst [vmem:[#allocation294_spill] sm:$0xff] %v16138_v56  ;;  %v16150_v9 = vand.u32 4294901760, %v654_v62  ;;  %v16153_v41 = vsub.f32 %v61_v36, %v16136_v40  ;;  %v664_v36 = vsub.f32 %v16129_v39, %v16145_v26  ;;  %v22969_v56 = vld [vmem:[#allocation17_spill] sm:$0xff] }
  0xa3   :  { %22952 = vst [vmem:[#allocation295_spill] sm:$0xff] %v16145_v26  ;;  %22953 = vst [vmem:[#allocation296_spill] sm:$0xff] %v16148_v19  ;;  %v16163_v5 = vsub.f32 %v14164_v32, %v22958_v63  ;;  %v16168_v62 = vand.u32 4294901760, %v3313_v55  ;;  %v16182_v32 = vand.u32 4294901760, %v16156_v34  ;;  %v22965_v55 = vld [vmem:[#allocation16_spill] sm:$0xff]  ;;  %v14166_v63 = vld [vmem:[%s21503_s4 + $0x100] sm:$0xff] }
  0xa4   :  { %11929 = vmatpush1.bf16.msra.mxu1 %v11928_v2  ;;  %22954 = vst [vmem:[#allocation297_spill] sm:$0xff] %v16150_v9  ;;  %12505 = vmatpush1.bf16.msra.mxu0 %v11928_v2  ;;  %22955 = vst [vmem:[#allocation298_spill] sm:$0xff] %v16153_v41  ;;  %v16170_v2 = vand.u32 4294901760, %v3319_v13  ;;  %v16179_v0 = vand.u32 4294901760, %v16153_v41  ;;  %v14165_v13 = vld [vmem:[%s21503_s4 + $0x118] sm:$0xff]  ;;  %v22966_v28 = vand.u32 4294901760, %v22965_v55 }
  0xa5   :  { %22956 = vst [vmem:[#allocation299_spill] sm:$0xff] %v16156_v34  ;;  %22959 = vst [vmem:[#allocation14_spill] sm:$0xff] %v16163_v5  ;;  %656 = vmatmul.mubr.f32.gmra.mrb[28].mxu1 %v16150_v9  ;;  %5955 = vmatprep.mubr.f32.mxu0 %v16168_v62  ;;  %v16193_v39 = vand.u32 4294901760, %v664_v36  ;;  %v3329_v9 = vsub.f32 %v16148_v19, %v16175_v35  ;;  %v22970_v40 = vand.u32 4294901760, %v22969_v56  ;;  %v114_v56 = vld [vmem:[%s21505_s3 + $0x108] sm:$0xff]  ;;  %v63_v55 = vld [vmem:[%s21504_s2 + $0x100] sm:$0xff] }
  0xa6   :  { %22960 = vst [vmem:[#allocation300_spill] sm:$0xff] %v16168_v62  ;;  %22961 = vst [vmem:[#allocation301_spill] sm:$0xff] %v16170_v2  ;;  %v16190_v26 = vsub.f32 %v14165_v13, %v22966_v28  ;;  %5961 = vmatmul.mubr.f32.gmra.mrb[28].mxu0 %v16170_v2  ;;  %v670_v28 = vsub.f32 %v16153_v41, %v16179_v0  ;;  %v3335_v36 = vsub.f32 %v16156_v34, %v16182_v32  ;;  %v14167_v62 = vld [vmem:[%s21503_s4 + $0x110] sm:$0xff] }
  0xa7   :  { %22962 = vst [vmem:[#allocation302_spill] sm:$0xff] %v16175_v35  ;;  %22963 = vst [vmem:[#allocation303_spill] sm:$0xff] %v16179_v0  ;;  %v16203_v61 = vsub.f32 %v14166_v63, %v22970_v40  ;;  %v22972_v13 = vand.u32 4294901760, %v16163_v5  ;;  %666 = vmatprep.mubr.f32.mxu1 %v16193_v39  ;;  %v16218_v40 = vand.u32 4294901760, %v3329_v9  ;;  %v16220_v63 = vand.u32 4294901760, %v281_v29  ;;  %v113_v9 = vld [vmem:[%s21505_s3 + $0x100] sm:$0xff] }
  0xa8   :  { %22964 = vst [vmem:[#allocation304_spill] sm:$0xff] %v16182_v32  ;;  %22967 = vst [vmem:[#allocation16_spill] sm:$0xff] %v16190_v26  ;;  %v22975_v32 = vld [vmem:[#allocation18_spill] sm:$0xff]  ;;  %v16238_v35 = vand.u32 4294901760, %v3335_v36  ;;  %v22980_v34 = vand.u32 4294901760, %v16190_v26 }
  0xa9   :  { %22968 = vst [vmem:[#allocation305_spill] sm:$0xff] %v16193_v39  ;;  %22971 = vst [vmem:[#allocation17_spill] sm:$0xff] %v16203_v61  ;;  %v1017_v47 = vsub.f32 %v16163_v5, %v22972_v13  ;;  %v22976_v13 = vand.u32 4294901760, %v22975_v32  ;;  %v16236_v39 = vand.u32 4294901760, %v670_v28  ;;  %5971 = vmatprep.mubr.f32.mxu0 %v16218_v40  ;;  %v16248_v32 = vsub.f32 %v281_v29, %v16220_v63  ;;  %v116_v29 = vld [vmem:[%s21505_s3 + $0x118] sm:$0xff] }
  0xaa   :  { %22973 = vst [vmem:[#allocation306_spill] sm:$0xff] %v16218_v40  ;;  %22974 = vst [vmem:[#allocation307_spill] sm:$0xff] %v16220_v63  ;;  %v1029_v41 = vsub.f32 %v16190_v26, %v22980_v34  ;;  %5977 = vmatmul.mubr.f32.gmra.mrb[30].mxu0 %v16238_v35  ;;  %v16259_v26 = vand.u32 4294901760, %v63_v55  ;;  %v16261_v40 = vand.u32 4294901760, %v113_v9 }
  0xab   :  { %v16228_v0 = vsub.f32 %v14167_v62, %v22976_v13  ;;  %22978 = vst [vmem:[#allocation308_spill] sm:$0xff] %v16236_v39  ;;  %22979 = vst [vmem:[#allocation309_spill] sm:$0xff] %v16238_v35  ;;  %v1018_v2 = vand.u32 4294901760, %v1017_v47  ;;  %v66_v62 = vld [vmem:[%s21504_s2 + $0x118] sm:$0xff]  ;;  %v22982_v13 = vand.u32 4294901760, %v16203_v61  ;;  %v2946_v47 = vsel %vm231_vm0, %v114_v56, 0  ;;  %672 = vmatmul.mubr.f32.gmra.mrb[30].mxu1 %v16236_v39 }
  0xac   :  { %22981 = vst [vmem:[#allocation310_spill] sm:$0xff] %v16248_v32  ;;  %v1030_v34 = vand.u32 4294901760, %v1029_v41  ;;  %v16257_v19 = vand.u32 4294901760, %v2946_v47  ;;  %22984 = vst [vmem:[#allocation312_spill] sm:$0xff] %v16259_v26  ;;  %v284_v41 = vsel %vm231_vm0, %v66_v62, 0  ;;  %v16280_v5 = vsub.f32 %v113_v9, %v16261_v40 }
  0xad   :  { %22977 = vst [vmem:[#allocation18_spill] sm:$0xff] %v16228_v0  ;;  %v1023_v28 = vsub.f32 %v16203_v61, %v22982_v13  ;;  %22985 = vst [vmem:[#allocation313_spill] sm:$0xff] %v16261_v40  ;;  %v16267_v13 = vand.u32 4294901760, %v16248_v32  ;;  %v22987_v56 = vand.u32 4294901760, %v16228_v0  ;;  %v16277_v61 = vsub.f32 %v63_v55, %v16259_v26 }
  0xae   :  { %22983 = vst [vmem:[#allocation311_spill] sm:$0xff] %v16257_v19  ;;  %v11930_v35 = vpack.c.bf16 %v1030_v34, %v1018_v2  ;;  %v16274_v63 = vsub.f32 %v2946_v47, %v16257_v19  ;;  %22990 = vst [vmem:[#allocation317_spill] sm:$0xff] %v16280_v5  ;;  %v2949_v2 = vsel %vm231_vm0, %v116_v29, 0  ;;  %v16297_v9 = vand.u32 4294901760, %v16280_v5 }
  0xaf   :  { %22986 = vst [vmem:[#allocation314_spill] sm:$0xff] %v16267_v13  ;;  %v1024_v36 = vand.u32 4294901760, %v1023_v28  ;;  %v1035_v39 = vsub.f32 %v16228_v0, %v22987_v56  ;;  %22989 = vst [vmem:[#allocation316_spill] sm:$0xff] %v16277_v61  ;;  %v65_v28 = vld [vmem:[%s21504_s2 + $0x110] sm:$0xff]  ;;  %v680_v48 = vsub.f32 %v16248_v32, %v16267_v13  ;;  %v16287_v0 = vand.u32 4294901760, %v284_v41 }
  0xb0   :  { %22988 = vst [vmem:[#allocation315_spill] sm:$0xff] %v16274_v63  ;;  %11931 = vmatprep.subr.bf16.mxu1 %v11930_v35  ;;  %v16291_v62 = vand.u32 4294901760, %v16274_v63  ;;  %v16294_v55 = vand.u32 4294901760, %v16277_v61  ;;  %22994 = vst [vmem:[#allocation321_spill] sm:$0xff] %v16297_v9  ;;  %12507 = vmatprep.subr.bf16.mxu0 %v11930_v35  ;;  %v16299_v47 = vand.u32 4294901760, %v2949_v2  ;;  %v16309_v32 = vand.u32 4294901760, %v65_v28 }
  0xb1   :  { %v1036_v56 = vand.u32 4294901760, %v1035_v39  ;;  %22991 = vst [vmem:[#allocation318_spill] sm:$0xff] %v16287_v0  ;;  %v115_v39 = vld [vmem:[%s21505_s3 + $0x110] sm:$0xff]  ;;  %v16304_v34 = vand.u32 4294901760, %v680_v48  ;;  %v16307_v13 = vsub.f32 %v284_v41, %v16287_v0  ;;  %v3351_v26 = vsub.f32 %v16280_v5, %v16297_v9  ;;  %v120_v0 = vld [vmem:[%s21505_s3 + $0x138] sm:$0xff] }
  0xb2   :  { %22992 = vst [vmem:[#allocation319_spill] sm:$0xff] %v16291_v62  ;;  %22993 = vst [vmem:[#allocation320_spill] sm:$0xff] %v16294_v55  ;;  %v3345_v40 = vsub.f32 %v16274_v63, %v16291_v62  ;;  %v686_v35 = vsub.f32 %v16277_v61, %v16294_v55  ;;  %v16318_v19 = vsub.f32 %v2949_v2, %v16299_v47  ;;  %v16327_v41 = vand.u32 4294901760, %v115_v39  ;;  %v23003_v55 = vld [vmem:[#allocation20_spill] sm:$0xff]  ;;  %v68_v2 = vld [vmem:[%s21504_s2 + $0x128] sm:$0xff] }
  0xb3   :  { %22995 = vst [vmem:[#allocation322_spill] sm:$0xff] %v16299_v47  ;;  %22996 = vst [vmem:[#allocation323_spill] sm:$0xff] %v16304_v34  ;;  %v11932_v29 = vpack.c.bf16 %v1036_v56, %v1024_v36  ;;  %682 = vmatprep.mubr.f32.mxu1 %v16304_v34  ;;  %v16322_v48 = vand.u32 4294901760, %v16307_v13  ;;  %v16325_v36 = vsub.f32 %v65_v28, %v16309_v32  ;;  %v14168_v56 = vld [vmem:[%s21503_s4 + $0x128] sm:$0xff]  ;;  %v23004_v9 = vand.u32 4294901760, %v23003_v55 }
  0xb4   :  { %22997 = vst [vmem:[#allocation324_spill] sm:$0xff] %v16307_v13  ;;  %22998 = vst [vmem:[#allocation325_spill] sm:$0xff] %v16309_v32  ;;  %v16339_v34 = vand.u32 4294901760, %v3345_v40  ;;  %v16341_v5 = vand.u32 4294901760, %v686_v35  ;;  %v16343_v28 = vand.u32 4294901760, %v3351_v26  ;;  %v16346_v61 = vand.u32 4294901760, %v16318_v19 }
  0xb5   :  { %22999 = vst [vmem:[#allocation326_spill] sm:$0xff] %v16318_v19  ;;  %11933 = vmatpush1.bf16.msra.mxu1 %v11932_v29  ;;  %23000 = vst [vmem:[#allocation327_spill] sm:$0xff] %v16322_v48  ;;  %v16334_v62 = vsub.f32 %v14168_v56, %v23004_v9  ;;  %12509 = vmatpush1.bf16.msra.mxu0 %v11932_v29  ;;  %v696_v63 = vsub.f32 %v16307_v13, %v16322_v48  ;;  %v16351_v55 = vand.u32 4294901760, %v16325_v36  ;;  %v14169_v29 = vld [vmem:[%s21503_s4 + $0x138] sm:$0xff]  ;;  %v14170_v40 = vld [vmem:[%s21503_s4 + $0x120] sm:$0xff] }
  0xb6   :  { %23001 = vst [vmem:[#allocation328_spill] sm:$0xff] %v16325_v36  ;;  %23002 = vst [vmem:[#allocation329_spill] sm:$0xff] %v16327_v41  ;;  %v16354_v9 = vsub.f32 %v115_v39, %v16327_v41  ;;  %5987 = vmatprep.mubr.f32.mxu0 %v16339_v34  ;;  %688 = vmatmul.mubr.f32.gmra.mrb[32].mxu1 %v16341_v5  ;;  %v3361_v26 = vsub.f32 %v16318_v19, %v16346_v61  ;;  %v23012_v35 = vld [vmem:[#allocation21_spill] sm:$0xff]  ;;  %v287_v39 = vsel %vm231_vm0, %v68_v2, 0 }
  0xb7   :  { %23005 = vst [vmem:[#allocation20_spill] sm:$0xff] %v16334_v62  ;;  %23006 = vst [vmem:[#allocation330_spill] sm:$0xff] %v16339_v34  ;;  %v23013_v56 = vand.u32 4294901760, %v23012_v35  ;;  %v23015_v34 = vld [vmem:[#allocation22_spill] sm:$0xff]  ;;  %5993 = vmatmul.mubr.f32.gmra.mrb[32].mxu0 %v16343_v28  ;;  %v702_v19 = vsub.f32 %v16325_v36, %v16351_v55  ;;  %v23020_v2 = vand.u32 4294901760, %v16334_v62 }
  0xb8   :  { %23007 = vst [vmem:[#allocation331_spill] sm:$0xff] %v16341_v5  ;;  %23008 = vst [vmem:[#allocation332_spill] sm:$0xff] %v16343_v28  ;;  %v23016_v13 = vand.u32 4294901760, %v23015_v34  ;;  %v118_v34 = vld [vmem:[%s21505_s3 + $0x128] sm:$0xff]  ;;  %v67_v28 = vld [vmem:[%s21504_s2 + $0x120] sm:$0xff] }
  0xb9   :  { %23009 = vst [vmem:[#allocation333_spill] sm:$0xff] %v16346_v61  ;;  %23010 = vst [vmem:[#allocation334_spill] sm:$0xff] %v16351_v55  ;;  %v16366_v48 = vsub.f32 %v14169_v29, %v23013_v56  ;;  %v16377_v61 = vand.u32 4294901760, %v696_v63  ;;  %v16382_v29 = vand.u32 4294901760, %v16354_v9  ;;  %v1041_v35 = vsub.f32 %v16334_v62, %v23020_v2  ;;  %v117_v56 = vld [vmem:[%s21505_s3 + $0x120] sm:$0xff] }
  0xba   :  { %23011 = vst [vmem:[#allocation335_spill] sm:$0xff] %v16354_v9  ;;  %v16374_v5 = vsub.f32 %v14170_v40, %v23016_v13  ;;  %v16390_v13 = vand.u32 4294901760, %v3361_v26  ;;  %v16393_v63 = vand.u32 4294901760, %v287_v39  ;;  %v16400_v55 = vand.u32 4294901760, %v702_v19  ;;  %v14171_v26 = vld [vmem:[%s21503_s4 + $0x130] sm:$0xff]  ;;  %v23024_v40 = vld [vmem:[#allocation25_spill] sm:$0xff] }
  0xbb   :  { %23014 = vst [vmem:[#allocation21_spill] sm:$0xff] %v16366_v48  ;;  %23018 = vst [vmem:[#allocation336_spill] sm:$0xff] %v16377_v61  ;;  %698 = vmatprep.mubr.f32.mxu1 %v16377_v61  ;;  %v3367_v2 = vsub.f32 %v16354_v9, %v16382_v29  ;;  %v1042_v36 = vand.u32 4294901760, %v1041_v35  ;;  %v23025_v41 = vand.u32 4294901760, %v23024_v40  ;;  %v23027_v19 = vand.u32 4294901760, %v16366_v48  ;;  %v70_v40 = vld [vmem:[%s21504_s2 + $0x138] sm:$0xff] }
  0xbc   :  { %23017 = vst [vmem:[#allocation22_spill] sm:$0xff] %v16374_v5  ;;  %23019 = vst [vmem:[#allocation337_spill] sm:$0xff] %v16382_v29  ;;  %6003 = vmatprep.mubr.f32.mxu0 %v16390_v13  ;;  %v16419_v35 = vsub.f32 %v287_v39, %v16393_v63  ;;  %v23029_v29 = vand.u32 4294901760, %v16374_v5  ;;  %704 = vmatmul.mubr.f32.gmra.mrb[34].mxu1 %v16400_v55  ;;  %v16434_v39 = vand.u32 4294901760, %v67_v28 }
  0xbd   :  { %23021 = vst [vmem:[#allocation338_spill] sm:$0xff] %v16390_v13  ;;  %23022 = vst [vmem:[#allocation339_spill] sm:$0xff] %v16393_v63  ;;  %v16409_v32 = vsub.f32 %v14171_v26, %v23025_v41  ;;  %v1053_v61 = vsub.f32 %v16366_v48, %v23027_v19  ;;  %v2952_v41 = vsel %vm231_vm0, %v118_v34, 0  ;;  %v16429_v26 = vand.u32 4294901760, %v3367_v2 }
  0xbe   :  { %23023 = vst [vmem:[#allocation340_spill] sm:$0xff] %v16400_v55  ;;  %23028 = vst [vmem:[#allocation341_spill] sm:$0xff] %v16419_v35  ;;  %v1047_v9 = vsub.f32 %v16374_v5, %v23029_v29  ;;  %v16432_v19 = vand.u32 4294901760, %v2952_v41  ;;  %v16437_v47 = vand.u32 4294901760, %v16419_v35  ;;  %v16439_v34 = vand.u32 4294901760, %v117_v56 }
  0xbf   :  { %23026 = vst [vmem:[#allocation25_spill] sm:$0xff] %v16409_v32  ;;  %23030 = vst [vmem:[#allocation342_spill] sm:$0xff] %v16429_v26  ;;  %v22132_v13 = vand.u32 4294901760, %v16409_v32  ;;  %v1054_v63 = vand.u32 4294901760, %v1053_v61  ;;  %6009 = vmatmul.mubr.f32.gmra.mrb[34].mxu0 %v16429_v26  ;;  %v16452_v61 = vsub.f32 %v67_v28, %v16434_v39 }
  0xc0   :  { %23031 = vst [vmem:[#allocation343_spill] sm:$0xff] %v16432_v19  ;;  %23032 = vst [vmem:[#allocation344_spill] sm:$0xff] %v16434_v39  ;;  %v1048_v29 = vand.u32 4294901760, %v1047_v9  ;;  %v16449_v55 = vsub.f32 %v2952_v41, %v16432_v19  ;;  %v290_v9 = vsel %vm231_vm0, %v70_v40, 0  ;;  %v712_v45 = vsub.f32 %v16419_v35, %v16437_v47 }
  0xc1   :  { %23033 = vst [vmem:[#allocation345_spill] sm:$0xff] %v16437_v47  ;;  %23034 = vst [vmem:[#allocation346_spill] sm:$0xff] %v16439_v34  ;;  %v1059_v2 = vsub.f32 %v16409_v32, %v22132_v13  ;;  %v11934_v49 = vpack.c.bf16 %v1054_v63, %v1042_v36  ;;  %v16458_v16 = vsub.f32 %v117_v56, %v16439_v34  ;;  %v16460_v26 = vand.u32 4294901760, %v290_v9  ;;  %v69_v13 = vld [vmem:[%s21504_s2 + $0x130] sm:$0xff] }
  0xc2   :  { %23035 = vst [vmem:[#allocation347_spill] sm:$0xff] %v16449_v55  ;;  %23036 = vst [vmem:[#allocation348_spill] sm:$0xff] %v16452_v61  ;;  %v16466_v19 = vand.u32 4294901760, %v16449_v55  ;;  %v16469_v28 = vand.u32 4294901760, %v16452_v61  ;;  %v2955_v36 = vsel %vm231_vm0, %v120_v0, 0  ;;  %v119_v63 = vld [vmem:[%s21505_s3 + $0x130] sm:$0xff] }
  0xc3   :  { %23037 = vst [vmem:[#allocation349_spill] sm:$0xff] %v16458_v16  ;;  %23038 = vst [vmem:[#allocation350_spill] sm:$0xff] %v16460_v26  ;;  %v1060_v41 = vand.u32 4294901760, %v1059_v2  ;;  %11935 = vmatprep.subr.bf16.mxu1 %v11934_v49  ;;  %v16475_v56 = vand.u32 4294901760, %v712_v45  ;;  %v16478_v40 = vand.u32 4294901760, %v16458_v16  ;;  %12511 = vmatprep.subr.bf16.mxu0 %v11934_v49  ;;  %v16481_v2 = vsub.f32 %v290_v9, %v16460_v26 }
  0xc4   :  { %23039 = vst [vmem:[#allocation351_spill] sm:$0xff] %v16466_v19  ;;  %23040 = vst [vmem:[#allocation352_spill] sm:$0xff] %v16469_v28  ;;  %v16483_v47 = vand.u32 4294901760, %v2955_v36  ;;  %v3377_v0 = vsub.f32 %v16449_v55, %v16466_v19  ;;  %v718_v34 = vsub.f32 %v16452_v61, %v16469_v28  ;;  %v16489_v39 = vand.u32 4294901760, %v69_v13 }
  0xc5   :  { %23041 = vst [vmem:[#allocation353_spill] sm:$0xff] %v16475_v56  ;;  %23042 = vst [vmem:[#allocation354_spill] sm:$0xff] %v16478_v40  ;;  %v11936_v35 = vpack.c.bf16 %v1060_v41, %v1048_v29  ;;  %714 = vmatprep.mubr.f32.mxu1 %v16475_v56  ;;  %v3383_v45 = vsub.f32 %v16458_v16, %v16478_v40  ;;  %v16495_v49 = vand.u32 4294901760, %v16481_v2  ;;  %v16500_v29 = vand.u32 4294901760, %v119_v63  ;;  %v14172_v56 = vld [vmem:[%s21503_s4 + $0x148] sm:$0xff]  ;;  %v23052_v40 = vld [vmem:[#allocation26_spill] sm:$0xff] }
  0xc6   :  { %23043 = vst [vmem:[#allocation355_spill] sm:$0xff] %v16481_v2  ;;  %23044 = vst [vmem:[#allocation356_spill] sm:$0xff] %v16483_v47  ;;  %v16498_v9 = vsub.f32 %v2955_v36, %v16483_v47  ;;  %v16502_v41 = vand.u32 4294901760, %v3377_v0  ;;  %v16504_v19 = vand.u32 4294901760, %v718_v34  ;;  %v16507_v28 = vsub.f32 %v69_v13, %v16489_v39 }
  0xc7   :  { %23045 = vst [vmem:[#allocation357_spill] sm:$0xff] %v16489_v39  ;;  %23046 = vst [vmem:[#allocation358_spill] sm:$0xff] %v16495_v49  ;;  %11937 = vmatpush1.bf16.msra.mxu1 %v11936_v35  ;;  %12513 = vmatpush1.bf16.msra.mxu0 %v11936_v35  ;;  %v23053_v16 = vand.u32 4294901760, %v23052_v40  ;;  %v16516_v36 = vand.u32 4294901760, %v3383_v45  ;;  %v728_v0 = vsub.f32 %v16481_v2, %v16495_v49  ;;  %v23059_v40 = vld [vmem:[#allocation27_spill] sm:$0xff] }
  0xc8   :  { %23047 = vst [vmem:[#allocation359_spill] sm:$0xff] %v16498_v9  ;;  %23048 = vst [vmem:[#allocation360_spill] sm:$0xff] %v16500_v29  ;;  %v16521_v34 = vand.u32 4294901760, %v16498_v9  ;;  %v16524_v35 = vsub.f32 %v119_v63, %v16500_v29  ;;  %6019 = vmatprep.mubr.f32.mxu0 %v16502_v41  ;;  %720 = vmatmul.mubr.f32.gmra.mrb[36].mxu1 %v16504_v19  ;;  %v16529_v13 = vand.u32 4294901760, %v16507_v28  ;;  %v23060_v45 = vand.u32 4294901760, %v23059_v40  ;;  %v14174_v63 = vld [vmem:[%s21503_s4 + $0x140] sm:$0xff] }
  0xc9   :  { %23049 = vst [vmem:[#allocation361_spill] sm:$0xff] %v16502_v41  ;;  %23050 = vst [vmem:[#allocation362_spill] sm:$0xff] %v16504_v19  ;;  %v16514_v61 = vsub.f32 %v14172_v56, %v23053_v16  ;;  %v14173_v56 = vld [vmem:[%s21503_s4 + $0x158] sm:$0xff]  ;;  %v72_v16 = vld [vmem:[%s21504_s2 + $0x148] sm:$0xff]  ;;  %6025 = vmatmul.mubr.f32.gmra.mrb[36].mxu0 %v16516_v36  ;;  %v16550_v55 = vand.u32 4294901760, %v728_v0 }
  0xca   :  { %23051 = vst [vmem:[#allocation363_spill] sm:$0xff] %v16507_v28  ;;  %23055 = vst [vmem:[#allocation364_spill] sm:$0xff] %v16516_v36  ;;  %v16537_v49 = vsub.f32 %v14173_v56, %v23060_v45  ;;  %v23062_v41 = vld [vmem:[#allocation29_spill] sm:$0xff]  ;;  %v3393_v56 = vsub.f32 %v16498_v9, %v16521_v34  ;;  %v16555_v40 = vand.u32 4294901760, %v16524_v35  ;;  %v734_v29 = vsub.f32 %v16507_v28, %v16529_v13  ;;  %v122_v39 = vld [vmem:[%s21505_s3 + $0x148] sm:$0xff] }
  0xcb   :  { %23054 = vst [vmem:[#allocation26_spill] sm:$0xff] %v16514_v61  ;;  %23056 = vst [vmem:[#allocation365_spill] sm:$0xff] %v16521_v34  ;;  %v23063_v2 = vand.u32 4294901760, %v23062_v41  ;;  %v14175_v41 = vld [vmem:[%s21503_s4 + $0x150] sm:$0xff]  ;;  %v23070_v0 = vand.u32 4294901760, %v16514_v61  ;;  %730 = vmatprep.mubr.f32.mxu1 %v16550_v55 }
  0xcc   :  { %23057 = vst [vmem:[#allocation366_spill] sm:$0xff] %v16524_v35  ;;  %23058 = vst [vmem:[#allocation367_spill] sm:$0xff] %v16529_v13  ;;  %v293_v13 = vsel %vm231_vm0, %v72_v16, 0  ;;  %v16584_v9 = vand.u32 4294901760, %v734_v29  ;;  %v23073_v28 = vand.u32 4294901760, %v16537_v49  ;;  %v74_v16 = vld [vmem:[%s21504_s2 + $0x158] sm:$0xff] }
  0xcd   :  { %23061 = vst [vmem:[#allocation27_spill] sm:$0xff] %v16537_v49  ;;  %v16544_v19 = vsub.f32 %v14174_v63, %v23063_v2  ;;  %23065 = vst [vmem:[#allocation368_spill] sm:$0xff] %v16550_v55  ;;  %v23067_v2 = vld [vmem:[#allocation30_spill] sm:$0xff]  ;;  %v1065_v36 = vsub.f32 %v16514_v61, %v23070_v0 }
  0xce   :  { %23066 = vst [vmem:[#allocation369_spill] sm:$0xff] %v16555_v40  ;;  %v23068_v45 = vand.u32 4294901760, %v23067_v2  ;;  %v16575_v2 = vand.u32 4294901760, %v3393_v56  ;;  %v71_v0 = vld [vmem:[%s21504_s2 + $0x140] sm:$0xff]  ;;  %23072 = vst [vmem:[#allocation371_spill] sm:$0xff] %v16584_v9  ;;  %v1077_v55 = vsub.f32 %v16537_v49, %v23073_v28  ;;  %736 = vmatmul.mubr.f32.gmra.mrb[38].mxu1 %v16584_v9 }
  0xcf   :  { %23064 = vst [vmem:[#allocation29_spill] sm:$0xff] %v16544_v19  ;;  %v1066_v34 = vand.u32 4294901760, %v1065_v36  ;;  %v23074_v56 = vand.u32 4294901760, %v16544_v19  ;;  %v16610_v25 = vand.u32 4294901760, %v71_v0 }
  0xd0   :  { %v16562_v63 = vsub.f32 %v14175_v41, %v23068_v45  ;;  %23071 = vst [vmem:[#allocation370_spill] sm:$0xff] %v16575_v2  ;;  %v3399_v41 = vsub.f32 %v16524_v35, %v16555_v40  ;;  %v121_v45 = vld [vmem:[%s21505_s3 + $0x140] sm:$0xff]  ;;  %6035 = vmatprep.mubr.f32.mxu0 %v16575_v2  ;;  %v16604_v40 = vand.u32 4294901760, %v293_v13  ;;  %v1078_v35 = vand.u32 4294901760, %v1077_v55 }
  0xd1   :  { %v1071_v47 = vsub.f32 %v16544_v19, %v23074_v56  ;;  %v2958_v56 = vsel %vm231_vm0, %v122_v39, 0  ;;  %23079 = vst [vmem:[#allocation375_spill] sm:$0xff] %v16610_v25  ;;  %v16619_v24 = vand.u32 4294901760, %v121_v45  ;;  %v296_v39 = vsel %vm231_vm0, %v74_v16, 0 }
  0xd2   :  { %23069 = vst [vmem:[#allocation30_spill] sm:$0xff] %v16562_v63  ;;  %v16599_v29 = vand.u32 4294901760, %v3399_v41  ;;  %v23076_v36 = vand.u32 4294901760, %v16562_v63  ;;  %23077 = vst [vmem:[#allocation373_spill] sm:$0xff] %v16604_v40  ;;  %v16608_v52 = vand.u32 4294901760, %v2958_v56  ;;  %v124_v41 = vld [vmem:[%s21505_s3 + $0x158] sm:$0xff]  ;;  %v11938_v55 = vpack.c.bf16 %v1078_v35, %v1066_v34 }
  0xd3   :  { %v1072_v26 = vand.u32 4294901760, %v1071_v47  ;;  %23081 = vst [vmem:[#allocation377_spill] sm:$0xff] %v16619_v24  ;;  %v16626_v9 = vsub.f32 %v71_v0, %v16610_v25  ;;  %v16628_v54 = vand.u32 4294901760, %v296_v39  ;;  %v16640_v34 = vsub.f32 %v121_v45, %v16619_v24 }
  0xd4   :  { %23075 = vst [vmem:[#allocation372_spill] sm:$0xff] %v16599_v29  ;;  %v1083_v28 = vsub.f32 %v16562_v63, %v23076_v36  ;;  %23078 = vst [vmem:[#allocation374_spill] sm:$0xff] %v16608_v52  ;;  %6041 = vmatmul.mubr.f32.gmra.mrb[38].mxu0 %v16599_v29  ;;  %v16617_v36 = vsub.f32 %v293_v13, %v16604_v40  ;;  %v16623_v47 = vsub.f32 %v2958_v56, %v16608_v52  ;;  %v123_v13 = vld [vmem:[%s21505_s3 + $0x150] sm:$0xff] }
  0xd5   :  { %23083 = vst [vmem:[#allocation379_spill] sm:$0xff] %v16626_v9  ;;  %23084 = vst [vmem:[#allocation380_spill] sm:$0xff] %v16628_v54  ;;  %v2961_v35 = vsel %vm231_vm0, %v124_v41, 0  ;;  %11939 = vmatprep.subr.bf16.mxu1 %v11938_v55  ;;  %12515 = vmatprep.subr.bf16.mxu0 %v11938_v55  ;;  %v16647_v56 = vand.u32 4294901760, %v16626_v9  ;;  %v16650_v25 = vsub.f32 %v296_v39, %v16628_v54  ;;  %v16657_v45 = vand.u32 4294901760, %v16640_v34 }
  0xd6   :  { %v1084_v2 = vand.u32 4294901760, %v1083_v28  ;;  %23080 = vst [vmem:[#allocation376_spill] sm:$0xff] %v16617_v36  ;;  %23082 = vst [vmem:[#allocation378_spill] sm:$0xff] %v16623_v47  ;;  %v73_v28 = vld [vmem:[%s21504_s2 + $0x150] sm:$0xff]  ;;  %v16637_v16 = vand.u32 4294901760, %v16617_v36  ;;  %v16644_v0 = vand.u32 4294901760, %v16623_v47 }
  0xd7   :  { %23086 = vst [vmem:[#allocation382_spill] sm:$0xff] %v16640_v34  ;;  %23088 = vst [vmem:[#allocation384_spill] sm:$0xff] %v16647_v56  ;;  %v16659_v41 = vand.u32 4294901760, %v73_v28  ;;  %v16661_v24 = vand.u32 4294901760, %v123_v13  ;;  %v750_v39 = vsub.f32 %v16626_v9, %v16647_v56  ;;  %v16668_v54 = vand.u32 4294901760, %v16650_v25 }
  0xd8   :  { %v11940_v29 = vpack.c.bf16 %v1084_v2, %v1072_v26  ;;  %23085 = vst [vmem:[#allocation381_spill] sm:$0xff] %v16637_v16  ;;  %23087 = vst [vmem:[#allocation383_spill] sm:$0xff] %v16644_v0  ;;  %v16652_v26 = vand.u32 4294901760, %v2961_v35  ;;  %v744_v2 = vsub.f32 %v16617_v36, %v16637_v16  ;;  %v3409_v55 = vsub.f32 %v16623_v47, %v16644_v0  ;;  %v14178_v47 = vld [vmem:[%s21503_s4 + $0x160] sm:$0xff] }
  0xd9   :  { %23089 = vst [vmem:[#allocation385_spill] sm:$0xff] %v16650_v25  ;;  %23091 = vst [vmem:[#allocation387_spill] sm:$0xff] %v16657_v45  ;;  %v16678_v36 = vsub.f32 %v73_v28, %v16659_v41  ;;  %v16681_v40 = vsub.f32 %v123_v13, %v16661_v24  ;;  %v16685_v56 = vand.u32 4294901760, %v750_v39  ;;  %v760_v9 = vsub.f32 %v16650_v25, %v16668_v54  ;;  %v23105_v39 = vld [vmem:[#allocation31_spill] sm:$0xff] }
  0xda   :  { %23090 = vst [vmem:[#allocation386_spill] sm:$0xff] %v16652_v26  ;;  %11941 = vmatpush1.bf16.msra.mxu1 %v11940_v29  ;;  %12517 = vmatpush1.bf16.msra.mxu0 %v11940_v29  ;;  %23092 = vst [vmem:[#allocation388_spill] sm:$0xff] %v16659_v41  ;;  %v16671_v52 = vsub.f32 %v2961_v35, %v16652_v26  ;;  %v16673_v16 = vand.u32 4294901760, %v744_v2  ;;  %v3415_v29 = vsub.f32 %v16640_v34, %v16657_v45  ;;  %v14177_v34 = vld [vmem:[%s21503_s4 + $0x178] sm:$0xff] }
  0xdb   :  { %23093 = vst [vmem:[#allocation389_spill] sm:$0xff] %v16661_v24  ;;  %23094 = vst [vmem:[#allocation390_spill] sm:$0xff] %v16668_v54  ;;  %v16683_v0 = vand.u32 4294901760, %v3409_v55  ;;  %v16696_v28 = vand.u32 4294901760, %v16678_v36  ;;  %v16699_v13 = vand.u32 4294901760, %v16681_v40  ;;  %v14176_v55 = vld [vmem:[%s21503_s4 + $0x168] sm:$0xff] }
  0xdc   :  { %23095 = vst [vmem:[#allocation391_spill] sm:$0xff] %v16671_v52  ;;  %23096 = vst [vmem:[#allocation392_spill] sm:$0xff] %v16673_v16  ;;  %v16690_v35 = vand.u32 4294901760, %v16671_v52  ;;  %746 = vmatprep.mubr.f32.mxu1 %v16673_v16  ;;  %v16693_v2 = vand.u32 4294901760, %v3415_v29  ;;  %v23106_v45 = vand.u32 4294901760, %v23105_v39  ;;  %v76_v16 = vld [vmem:[%s21504_s2 + $0x168] sm:$0xff] }
  0xdd   :  { %23097 = vst [vmem:[#allocation393_spill] sm:$0xff] %v16678_v36  ;;  %23098 = vst [vmem:[#allocation394_spill] sm:$0xff] %v16681_v40  ;;  %6051 = vmatprep.mubr.f32.mxu0 %v16683_v0  ;;  %752 = vmatmul.mubr.f32.gmra.mrb[40].mxu1 %v16685_v56  ;;  %v16713_v29 = vand.u32 4294901760, %v760_v9  ;;  %v23109_v39 = vld [vmem:[#allocation33_spill] sm:$0xff]  ;;  %v766_v9 = vsub.f32 %v16678_v36, %v16696_v28 }
  0xde   :  { %23099 = vst [vmem:[#allocation395_spill] sm:$0xff] %v16683_v0  ;;  %23100 = vst [vmem:[#allocation396_spill] sm:$0xff] %v16685_v56  ;;  %v16706_v54 = vsub.f32 %v14176_v55, %v23106_v45  ;;  %v3425_v25 = vsub.f32 %v16671_v52, %v16690_v35  ;;  %v23110_v45 = vand.u32 4294901760, %v23109_v39  ;;  %v23112_v0 = vld [vmem:[#allocation34_spill] sm:$0xff]  ;;  %6057 = vmatmul.mubr.f32.gmra.mrb[40].mxu0 %v16693_v2 }
  0xdf   :  { %23101 = vst [vmem:[#allocation397_spill] sm:$0xff] %v16690_v35  ;;  %23102 = vst [vmem:[#allocation398_spill] sm:$0xff] %v16693_v2  ;;  %v23113_v24 = vand.u32 4294901760, %v23112_v0  ;;  %v3431_v35 = vsub.f32 %v16681_v40, %v16699_v13  ;;  %762 = vmatprep.mubr.f32.mxu1 %v16713_v29  ;;  %v299_v2 = vsel %vm231_vm0, %v76_v16, 0  ;;  %v125_v39 = vld [vmem:[%s21505_s3 + $0x160] sm:$0xff] }
  0xe0   :  { %23103 = vst [vmem:[#allocation399_spill] sm:$0xff] %v16696_v28  ;;  %23104 = vst [vmem:[#allocation400_spill] sm:$0xff] %v16699_v13  ;;  %v16722_v55 = vsub.f32 %v14177_v34, %v23110_v45  ;;  %v14179_v34 = vld [vmem:[%s21503_s4 + $0x170] sm:$0xff]  ;;  %v23115_v45 = vand.u32 4294901760, %v14711_v6  ;;  %v75_v6 = vld [vmem:[%s21504_s2 + $0x160] sm:$0xff]  ;;  %v23120_v13 = vand.u32 4294901760, %v16706_v54 }
  0xe1   :  { %23107 = vst [vmem:[#allocation31_spill] sm:$0xff] %v16706_v54  ;;  %23108 = vst [vmem:[#allocation401_spill] sm:$0xff] %v16713_v29  ;;  %v16729_v56 = vsub.f32 %v14178_v47, %v23113_v24  ;;  %v126_v24 = vld [vmem:[%s21505_s3 + $0x168] sm:$0xff]  ;;  %v16748_v47 = vand.u32 4294901760, %v3425_v25  ;;  %v16774_v28 = vand.u32 4294901760, %v299_v2  ;;  %v78_v25 = vld [vmem:[%s21504_s2 + $0x178] sm:$0xff] }
  0xe2   :  { %23111 = vst [vmem:[#allocation33_spill] sm:$0xff] %v16722_v55  ;;  %v16742_v52 = vsub.f32 %v14179_v34, %v23115_v45  ;;  %v22243_v0 = vand.u32 4294901760, %v16722_v55  ;;  %v16756_v34 = vand.u32 4294901760, %v766_v9  ;;  %v16758_v45 = vand.u32 4294901760, %v3431_v35 }
  0xe3   :  { %23114 = vst [vmem:[#allocation34_spill] sm:$0xff] %v16729_v56  ;;  %23117 = vst [vmem:[#allocation403_spill] sm:$0xff] %v16748_v47  ;;  %v1089_v29 = vsub.f32 %v16706_v54, %v23120_v13  ;;  %6067 = vmatprep.mubr.f32.mxu0 %v16748_v47  ;;  %v23121_v9 = vand.u32 4294901760, %v16729_v56  ;;  %v2964_v13 = vsel %vm231_vm0, %v126_v24, 0  ;;  %v16790_v24 = vsub.f32 %v299_v2, %v16774_v28 }
  0xe4   :  { %23116 = vst [vmem:[#allocation402_spill] sm:$0xff] %v16742_v52  ;;  %23118 = vst [vmem:[#allocation404_spill] sm:$0xff] %v16756_v34  ;;  %v1101_v16 = vsub.f32 %v16722_v55, %v22243_v0  ;;  %768 = vmatmul.mubr.f32.gmra.mrb[42].mxu1 %v16756_v34  ;;  %6073 = vmatmul.mubr.f32.gmra.mrb[42].mxu0 %v16758_v45  ;;  %v23123_v40 = vand.u32 4294901760, %v16742_v52  ;;  %v16785_v36 = vand.u32 4294901760, %v2964_v13  ;;  %v16792_v7 = vand.u32 4294901760, %v125_v39  ;;  %v128_v34 = vld [vmem:[%s21505_s3 + $0x178] sm:$0xff] }
  0xe5   :  { %23119 = vst [vmem:[#allocation405_spill] sm:$0xff] %v16758_v45  ;;  %v1095_v35 = vsub.f32 %v16729_v56, %v23121_v9  ;;  %23122 = vst [vmem:[#allocation406_spill] sm:$0xff] %v16774_v28  ;;  %v1090_v47 = vand.u32 4294901760, %v1089_v29  ;;  %v16787_v9 = vand.u32 4294901760, %v75_v6  ;;  %v302_v57 = vsel %vm231_vm0, %v78_v25, 0 }
  0xe6   :  { %v1107_v0 = vsub.f32 %v16742_v52, %v23123_v40  ;;  %23124 = vst [vmem:[#allocation407_spill] sm:$0xff] %v16785_v36  ;;  %v1102_v41 = vand.u32 4294901760, %v1101_v16  ;;  %23126 = vst [vmem:[#allocation409_spill] sm:$0xff] %v16790_v24  ;;  %v16798_v45 = vsub.f32 %v2964_v13, %v16785_v36  ;;  %v16808_v2 = vsub.f32 %v125_v39, %v16792_v7 }
  0xe7   :  { %23125 = vst [vmem:[#allocation408_spill] sm:$0xff] %v16787_v9  ;;  %v1096_v26 = vand.u32 4294901760, %v1095_v35  ;;  %23127 = vst [vmem:[#allocation410_spill] sm:$0xff] %v16792_v7  ;;  %v16801_v40 = vsub.f32 %v75_v6, %v16787_v9  ;;  %v16805_v35 = vand.u32 4294901760, %v16790_v24  ;;  %v16810_v28 = vand.u32 4294901760, %v302_v57  ;;  %v127_v6 = vld [vmem:[%s21505_s3 + $0x170] sm:$0xff] }
  0xe8   :  { %v1108_v29 = vand.u32 4294901760, %v1107_v0  ;;  %23128 = vst [vmem:[#allocation411_spill] sm:$0xff] %v16798_v45  ;;  %v11942_v16 = vpack.c.bf16 %v1102_v41, %v1090_v47  ;;  %23131 = vst [vmem:[#allocation414_spill] sm:$0xff] %v16808_v2  ;;  %v77_v0 = vld [vmem:[%s21504_s2 + $0x170] sm:$0xff]  ;;  %v16819_v25 = vand.u32 4294901760, %v16798_v45  ;;  %v2967_v39 = vsel %vm231_vm0, %v128_v34, 0 }
  0xe9   :  { %23129 = vst [vmem:[#allocation412_spill] sm:$0xff] %v16801_v40  ;;  %23130 = vst [vmem:[#allocation413_spill] sm:$0xff] %v16805_v35  ;;  %v16822_v41 = vand.u32 4294901760, %v16801_v40  ;;  %v776_v47 = vsub.f32 %v16790_v24, %v16805_v35  ;;  %v16828_v7 = vand.u32 4294901760, %v16808_v2  ;;  %v16831_v9 = vsub.f32 %v302_v57, %v16810_v28 }
  0xea   :  { %23132 = vst [vmem:[#allocation415_spill] sm:$0xff] %v16810_v28  ;;  %v11944_v13 = vpack.c.bf16 %v1108_v29, %v1096_v26  ;;  %23133 = vst [vmem:[#allocation416_spill] sm:$0xff] %v16819_v25  ;;  %11943 = vmatprep.subr.bf16.mxu1 %v11942_v16  ;;  %12519 = vmatprep.subr.bf16.mxu0 %v11942_v16  ;;  %v16833_v26 = vand.u32 4294901760, %v2967_v39  ;;  %v3441_v29 = vsub.f32 %v16798_v45, %v16819_v25 }
  0xeb   :  { %23134 = vst [vmem:[#allocation417_spill] sm:$0xff] %v16822_v41  ;;  %23135 = vst [vmem:[#allocation418_spill] sm:$0xff] %v16828_v7  ;;  %v782_v34 = vsub.f32 %v16801_v40, %v16822_v41  ;;  %v16839_v36 = vand.u32 4294901760, %v77_v0  ;;  %v16841_v35 = vand.u32 4294901760, %v127_v6  ;;  %v16843_v16 = vand.u32 4294901760, %v776_v47  ;;  %v80_v41 = vld [vmem:[%s21504_s2 + $0x188] sm:$0xff] }
  0xec   :  { %23136 = vst [vmem:[#allocation419_spill] sm:$0xff] %v16831_v9  ;;  %23137 = vst [vmem:[#allocation420_spill] sm:$0xff] %v16833_v26  ;;  %11945 = vmatpush1.bf16.msra.mxu1 %v11944_v13  ;;  %12521 = vmatpush1.bf16.msra.mxu0 %v11944_v13  ;;  %v3447_v57 = vsub.f32 %v16808_v2, %v16828_v7  ;;  %v16848_v24 = vand.u32 4294901760, %v16831_v9  ;;  %v16851_v28 = vsub.f32 %v2967_v39, %v16833_v26 }
  0xed   :  { %23138 = vst [vmem:[#allocation421_spill] sm:$0xff] %v16839_v36  ;;  %23139 = vst [vmem:[#allocation422_spill] sm:$0xff] %v16841_v35  ;;  %v16856_v13 = vand.u32 4294901760, %v3441_v29  ;;  %v16858_v25 = vand.u32 4294901760, %v782_v34  ;;  %v16861_v47 = vsub.f32 %v77_v0, %v16839_v36  ;;  %v16864_v40 = vsub.f32 %v127_v6, %v16841_v35  ;;  %778 = vmatprep.mubr.f32.mxu1 %v16843_v16  ;;  %v14180_v29 = vld [vmem:[%s21503_s4 + $0x188] sm:$0xff] }
  0xee   :  { %23140 = vst [vmem:[#allocation423_spill] sm:$0xff] %v16843_v16  ;;  %23141 = vst [vmem:[#allocation424_spill] sm:$0xff] %v16848_v24  ;;  %v16867_v7 = vand.u32 4294901760, %v3447_v57  ;;  %v792_v39 = vsub.f32 %v16831_v9, %v16848_v24  ;;  %v16872_v2 = vand.u32 4294901760, %v16851_v28  ;;  %v16878_v0 = vsub.f32 %v14180_v29, %v14761_v3  ;;  %v130_v6 = vld [vmem:[%s21505_s3 + $0x188] sm:$0xff]  ;;  %v14181_v16 = vld [vmem:[%s21503_s4 + $0x180] sm:$0xff] }
  0xef   :  { %23142 = vst [vmem:[#allocation425_spill] sm:$0xff] %v16851_v28  ;;  %23143 = vst [vmem:[#allocation426_spill] sm:$0xff] %v16856_v13  ;;  %6083 = vmatprep.mubr.f32.mxu0 %v16856_v13  ;;  %784 = vmatmul.mubr.f32.gmra.mrb[44].mxu1 %v16858_v25  ;;  %v16886_v34 = vand.u32 4294901760, %v16861_v47  ;;  %v16889_v57 = vand.u32 4294901760, %v16864_v40  ;;  %v16895_v29 = vsub.f32 %v14181_v16, %v14780_v10  ;;  %v305_v24 = vsel %vm231_vm0, %v80_v41, 0  ;;  %v79_v3 = vld [vmem:[%s21504_s2 + $0x180] sm:$0xff] }
  0xf0   :  { %23144 = vst [vmem:[#allocation427_spill] sm:$0xff] %v16858_v25  ;;  %23145 = vst [vmem:[#allocation428_spill] sm:$0xff] %v16861_v47  ;;  %6089 = vmatmul.mubr.f32.gmra.mrb[44].mxu0 %v16867_v7  ;;  %v16899_v13 = vand.u32 4294901760, %v792_v39  ;;  %v3457_v25 = vsub.f32 %v16851_v28, %v16872_v2  ;;  %v16904_v9 = vand.u32 4294901760, %v16878_v0  ;;  %v16906_v45 = vand.u32 4294901760, %v305_v24 }
  0xf1   :  { %23146 = vst [vmem:[#allocation429_spill] sm:$0xff] %v16864_v40  ;;  %23147 = vst [vmem:[#allocation430_spill] sm:$0xff] %v16867_v7  ;;  %v798_v16 = vsub.f32 %v16861_v47, %v16886_v34  ;;  %v3463_v41 = vsub.f32 %v16864_v40, %v16889_v57  ;;  %v16916_v39 = vand.u32 4294901760, %v16895_v29  ;;  %v2970_v7 = vsel %vm231_vm0, %v130_v6, 0 }
  0xf2   :  { %23148 = vst [vmem:[#allocation431_spill] sm:$0xff] %v16872_v2  ;;  %23149 = vst [vmem:[#allocation432_spill] sm:$0xff] %v16886_v34  ;;  %v129_v2 = vld [vmem:[%s21505_s3 + $0x180] sm:$0xff]  ;;  %794 = vmatprep.mubr.f32.mxu1 %v16899_v13  ;;  %v16923_v28 = vand.u32 4294901760, %v3457_v25  ;;  %v1113_v10 = vsub.f32 %v16878_v0, %v16904_v9  ;;  %v16928_v34 = vsub.f32 %v305_v24, %v16906_v45  ;;  %v16938_v35 = vand.u32 4294901760, %v79_v3 }
  0xf3   :  { %23150 = vst [vmem:[#allocation433_spill] sm:$0xff] %v16889_v57  ;;  %23151 = vst [vmem:[#allocation434_spill] sm:$0xff] %v16899_v13  ;;  %v16930_v57 = vand.u32 4294901760, %v2970_v7  ;;  %v16932_v40 = vand.u32 4294901760, %v798_v16  ;;  %v16934_v47 = vand.u32 4294901760, %v3463_v41  ;;  %v1119_v6 = vsub.f32 %v16895_v29, %v16916_v39 }
  0xf4   :  { %23152 = vst [vmem:[#allocation435_spill] sm:$0xff] %v16904_v9  ;;  %23153 = vst [vmem:[#allocation436_spill] sm:$0xff] %v16906_v45  ;;  %6099 = vmatprep.mubr.f32.mxu0 %v16923_v28  ;;  %v1114_v25 = vand.u32 4294901760, %v1113_v10  ;;  %v16942_v13 = vand.u32 4294901760, %v16928_v34  ;;  %v16947_v9 = vand.u32 4294901760, %v129_v2  ;;  %v16952_v41 = vsub.f32 %v79_v3, %v16938_v35 }
  0xf5   :  { %23154 = vst [vmem:[#allocation437_spill] sm:$0xff] %v16916_v39  ;;  %23155 = vst [vmem:[#allocation438_spill] sm:$0xff] %v16923_v28  ;;  %v16945_v24 = vsub.f32 %v2970_v7, %v16930_v57  ;;  %800 = vmatmul.mubr.f32.gmra.mrb[46].mxu1 %v16932_v40  ;;  %6105 = vmatmul.mubr.f32.gmra.mrb[46].mxu0 %v16934_v47  ;;  %v1120_v16 = vand.u32 4294901760, %v1119_v6  ;;  %v23165_v39 = vld [vmem:[#allocation47_spill] sm:$0xff] }
  0xf6   :  { %23156 = vst [vmem:[#allocation439_spill] sm:$0xff] %v16928_v34  ;;  %23157 = vst [vmem:[#allocation440_spill] sm:$0xff] %v16930_v57  ;;  %v11946_v28 = vpack.c.bf16 %v23165_v39, %v14802_v22  ;;  %1115 = vmatprep.subr.mxu1 %v1114_v25  ;;  %v808_v10 = vsub.f32 %v16928_v34, %v16942_v13  ;;  %6420 = vmatprep.subr.mxu0 %v1114_v25  ;;  %v16965_v6 = vand.u32 4294901760, %v16952_v41 }
  0xf7   :  { %23158 = vst [vmem:[#allocation441_spill] sm:$0xff] %v16932_v40  ;;  %23159 = vst [vmem:[#allocation442_spill] sm:$0xff] %v16934_v47  ;;  %v16959_v7 = vand.u32 4294901760, %v16945_v24  ;;  %v16962_v57 = vsub.f32 %v129_v2, %v16947_v9  ;;  %1121 = vmatpush1.msra.mxu1 %v1120_v16  ;;  %6426 = vmatpush1.msra.mxu0 %v1120_v16 }
  0xf8   :  { %23160 = vst [vmem:[#allocation443_spill] sm:$0xff] %v16938_v35  ;;  %23161 = vst [vmem:[#allocation444_spill] sm:$0xff] %v16942_v13  ;;  %v16967_v3 = vand.u32 4294901760, %v808_v10  ;;  %11947 = vmatprep.subr.bf16.mxu1 %v11946_v28  ;;  %12523 = vmatprep.subr.bf16.mxu0 %v11946_v28  ;;  %v814_v25 = vsub.f32 %v16952_v41, %v16965_v6  ;;  %v16989_v28 = vpack.c.bf16 %v16366_v48, %v16334_v62  ;;  %v23215_v48 = vld [vmem:[#allocation181_spill] sm:$0xff] }
  0xf9   :  { %23162 = vst [vmem:[#allocation445_spill] sm:$0xff] %v16945_v24  ;;  %23163 = vst [vmem:[#allocation446_spill] sm:$0xff] %v16947_v9  ;;  %v3473_v40 = vsub.f32 %v16945_v24, %v16959_v7  ;;  %v16972_v47 = vand.u32 4294901760, %v16962_v57  ;;  %v17013_v13 = vpack.c.bf16 %v16742_v52, %v16729_v56  ;;  %v23183_v52 = vld [vmem:[#allocation64_spill] sm:$0xff]  ;;  %v23184_v56 = vld [vmem:[#allocation65_spill] sm:$0xff] }
  0xfa   :  { %23164 = vst [vmem:[#allocation447_spill] sm:$0xff] %v16952_v41  ;;  %23166 = vst [vmem:[#allocation47_spill] sm:$0xff] %v16959_v7  ;;  %810 = vmatprep.mubr.f32.mxu1 %v16967_v3  ;;  %v16981_v10 = vand.u32 4294901760, %v814_v25  ;;  %v17001_v25 = vpack.c.bf16 %v16562_v63, %v16544_v19  ;;  %v23178_v63 = vld [vmem:[#allocation88_spill] sm:$0xff]  ;;  %v23216_v62 = vld [vmem:[#allocation189_spill] sm:$0xff] }
  0xfb   :  { %23167 = vst [vmem:[#allocation448_spill] sm:$0xff] %v16962_v57  ;;  %23168 = vst [vmem:[#allocation449_spill] sm:$0xff] %v16965_v6  ;;  %v16977_v2 = vand.u32 4294901760, %v3473_v40  ;;  %v3479_v16 = vsub.f32 %v16962_v57, %v16972_v47  ;;  %v16997_v40 = vpack.c.bf16 %v16537_v49, %v16514_v61  ;;  %v17009_v6 = vpack.c.bf16 %v16722_v55, %v16706_v54  ;;  %v23177_v49 = vld [vmem:[#allocation46_spill] sm:$0xff]  ;;  %v23179_v61 = vld [vmem:[#allocation45_spill] sm:$0xff] }
  0xfc   :  { %23169 = vst [vmem:[#allocation450_spill] sm:$0xff] %v16967_v3  ;;  %23170 = vst [vmem:[#allocation451_spill] sm:$0xff] %v16972_v47  ;;  %816 = vmatmul.mubr.f32.gmra.mrb[48].mxu1 %v16981_v10  ;;  %v16993_v3 = vpack.c.bf16 %v16409_v32, %v16374_v5  ;;  %v11950_v19 = vpack.c.bf16 %v23178_v63, %v14960_v38  ;;  %v23182_v32 = vld [vmem:[#allocation67_spill] sm:$0xff]  ;;  %v11952_v55 = vpack.c.bf16 %v15043_v58, %v15033_v59  ;;  %v23208_v54 = vld [vmem:[#allocation161_spill] sm:$0xff] }
  0xfd   :  { %23171 = vst [vmem:[#allocation452_spill] sm:$0xff] %v16977_v2  ;;  %23172 = vst [vmem:[#allocation453_spill] sm:$0xff] %v16981_v10  ;;  %6115 = vmatprep.mubr.f32.mxu0 %v16977_v2  ;;  %v16984_v7 = vand.u32 4294901760, %v3479_v16  ;;  %v23174_v16 = vld [vmem:[#allocation44_spill] sm:$0xff]  ;;  %v23175_v10 = vld [vmem:[#allocation51_spill] sm:$0xff] }
  0xfe   :  { %1137 = vmatprep.mubr.f32.mxu1 %v23174_v16  ;;  %v23176_v2 = vld [vmem:[#allocation56_spill] sm:$0xff]  ;;  %v23181_v16 = vld [vmem:[#allocation63_spill] sm:$0xff] }
  0xff   :  { %23173 = vst [vmem:[#allocation454_spill] sm:$0xff] %v16984_v7  ;;  %6121 = vmatmul.mubr.f32.gmra.mrb[48].mxu0 %v16984_v7  ;;  %v11948_v47 = vpack.c.bf16 %v23176_v2, %v23175_v10  ;;  %v23180_v7 = vld [vmem:[#allocation48_spill] sm:$0xff] }
 0x100   :  { %6442 = vmatprep.mubr.f32.mxu0 %v23177_v49  ;;  %1139 = vmatmul.mubr.f32.vlgmr.msra.gmra.mrb[0].mxu1 %v23179_v61  ;;  %v11954_v49 = vpack.c.bf16 %v15178_v44, %v15167_v23  ;;  %v23185_v61 = vld [vmem:[#allocation70_spill] sm:$0xff] }
 0x101   :  { %11949 = vmatpush1.bf16.msra.mxu1 %v11948_v47  ;;  %1145 = vmatprep.mubr.f32.mxu1 %v23181_v16  ;;  %v23187_v16 = vld [vmem:[#allocation74_spill] sm:$0xff] }
 0x102   :  { %11951 = vmatprep.subr.bf16.mxu1 %v11950_v19 }
 0x103   :  { %6444 = vmatmul.mubr.f32.vlgmr.msra.gmra.mrb[0].mxu0 %v23180_v7  ;;  %v23186_v7 = vld [vmem:[#allocation73_spill] sm:$0xff] }
 0x104   :  { %6450 = vmatprep.mubr.f32.mxu0 %v23182_v32  ;;  %12525 = vmatpush1.bf16.msra.mxu0 %v11948_v47  ;;  %v11956_v32 = vpack.c.bf16 %v15196_v18, %v15191_v50  ;;  %v11958_v47 = vpack.c.bf16 %v15380_v20, %v15324_v14 }
 0x105   :  { %1147 = vmatmul.mubr.f32.gmra.mrb[2].mxu1 %v23183_v52  ;;  %12527 = vmatprep.subr.bf16.mxu0 %v11950_v19  ;;  %v23188_v52 = vld [vmem:[#allocation90_spill] sm:$0xff] }
 0x106   :  { %1153 = vmatprep.mubr.f32.mxu1 %v23185_v61  ;;  %11953 = vmatpush1.bf16.msra.mxu1 %v11952_v55  ;;  %v23189_v19 = vld [vmem:[#allocation94_spill] sm:$0xff] }
 0x107   :  { %6452 = vmatmul.mubr.f32.gmra.mrb[2].mxu0 %v23184_v56  ;;  %11955 = vmatprep.subr.bf16.mxu1 %v11954_v49  ;;  %v23190_v56 = vld [vmem:[#allocation95_spill] sm:$0xff] }
 0x108   :  { %6458 = vmatprep.mubr.f32.mxu0 %v23186_v7  ;;  %12529 = vmatpush1.bf16.msra.mxu0 %v11952_v55  ;;  %v11960_v7 = vpack.c.bf16 %v15408_v37, %v15396_v27  ;;  %v11962_v55 = vpack.c.bf16 %v15503_v11, %v15498_v51 }
 0x109   :  { %1155 = vmatmul.mubr.f32.gmra.mrb[4].mxu1 %v23187_v16  ;;  %12531 = vmatprep.subr.bf16.mxu0 %v11954_v49  ;;  %v23191_v16 = vld [vmem:[#allocation98_spill] sm:$0xff]  ;;  %v23192_v49 = vld [vmem:[#allocation113_spill] sm:$0xff] }
 0x10a   :  { %1161 = vmatprep.mubr.f32.mxu1 %v23189_v19  ;;  %11957 = vmatpush1.bf16.msra.mxu1 %v11956_v32  ;;  %v23193_v19 = vld [vmem:[#allocation109_spill] sm:$0xff] }
 0x10b   :  { %6460 = vmatmul.mubr.f32.gmra.mrb[4].mxu0 %v23188_v52  ;;  %11959 = vmatprep.subr.bf16.mxu1 %v11958_v47  ;;  %v23207_v52 = vld [vmem:[#allocation16_spill] sm:$0xff] }
 0x10c   :  { %6466 = vmatprep.mubr.f32.mxu0 %v23190_v56  ;;  %12533 = vmatpush1.bf16.msra.mxu0 %v11956_v32  ;;  %v11964_v56 = vpack.c.bf16 %v15550_v1, %v15537_v53  ;;  %v11966_v32 = vpack.c.bf16 %v15661_v42, %v15645_v31 }
 0x10d   :  { %1163 = vmatmul.mubr.f32.gmra.mrb[6].mxu1 %v15075_v43  ;;  %12535 = vmatprep.subr.bf16.mxu0 %v11958_v47  ;;  %v23194_v43 = vld [vmem:[#allocation119_spill] sm:$0xff]  ;;  %v11968_v47 = vpack.c.bf16 %v15739_v21, %v15725_v33 }
 0x10e   :  { %1169 = vmatprep.mubr.f32.mxu1 %v15132_v46  ;;  %11961 = vmatpush1.bf16.msra.mxu1 %v11960_v7  ;;  %v23200_v46 = vld [vmem:[#allocation139_spill] sm:$0xff] }
 0x10f   :  { %6468 = vmatmul.mubr.f32.gmra.mrb[6].mxu0 %v23191_v16  ;;  %11963 = vmatprep.subr.bf16.mxu1 %v11962_v55 }
 0x110   :  { %6474 = vmatprep.mubr.f32.mxu0 %v23192_v49  ;;  %12537 = vmatpush1.bf16.msra.mxu0 %v11960_v7  ;;  %v11970_v7 = vpack.c.bf16 %v15850_v60, %v15836_v12 }
 0x111   :  { %1171 = vmatmul.mubr.f32.gmra.mrb[8].mxu1 %v23193_v19  ;;  %12539 = vmatprep.subr.bf16.mxu0 %v11962_v55  ;;  %v23195_v55 = vld [vmem:[#allocation138_spill] sm:$0xff]  ;;  %v23199_v19 = vld [vmem:[#allocation267_spill] sm:$0xff] }
 0x112   :  { %1177 = vmatprep.mubr.f32.mxu1 %v15264_v30  ;;  %11965 = vmatpush1.bf16.msra.mxu1 %v11964_v56  ;;  %v23197_v30 = vld [vmem:[#allocation248_spill] sm:$0xff] }
 0x113   :  { %6476 = vmatmul.mubr.f32.gmra.mrb[8].mxu0 %v23194_v43  ;;  %11967 = vmatprep.subr.bf16.mxu1 %v11966_v32 }
 0x114   :  { %6482 = vmatprep.mubr.f32.mxu0 %v15274_v17  ;;  %12541 = vmatpush1.bf16.msra.mxu0 %v11964_v56  ;;  %v23196_v17 = vld [vmem:[#allocation244_spill] sm:$0xff] }
 0x115   :  { %1179 = vmatmul.mubr.f32.gmra.mrb[10].mxu1 %v15276_v15  ;;  %12543 = vmatprep.subr.bf16.mxu0 %v11966_v32  ;;  %v11972_v43 = vpack.c.bf16 %v23197_v30, %v23196_v17  ;;  %v23198_v56 = vld [vmem:[#allocation264_spill] sm:$0xff]  ;;  %v23201_v15 = vld [vmem:[#allocation154_spill] sm:$0xff] }
 0x116   :  { %1185 = vmatprep.mubr.f32.mxu1 %v15296_v4  ;;  %11969 = vmatpush1.bf16.msra.mxu1 %v11968_v47  ;;  %v11974_v49 = vpack.c.bf16 %v23199_v19, %v23198_v56  ;;  %v23202_v32 = vld [vmem:[#allocation158_spill] sm:$0xff]  ;;  %v23205_v4 = vld [vmem:[#allocation13_spill] sm:$0xff] }
 0x117   :  { %6484 = vmatmul.mubr.f32.gmra.mrb[10].mxu0 %v15285_v8  ;;  %11971 = vmatprep.subr.bf16.mxu1 %v11970_v7  ;;  %v23203_v8 = vld [vmem:[#allocation159_spill] sm:$0xff] }
 0x118   :  { %6490 = vmatprep.mubr.f32.mxu0 %v23195_v55  ;;  %12545 = vmatpush1.bf16.msra.mxu0 %v11968_v47  ;;  %v23204_v55 = vld [vmem:[#allocation274_spill] sm:$0xff] }
 0x119   :  { %1187 = vmatmul.mubr.f32.gmra.mrb[12].mxu1 %v23200_v46  ;;  %12547 = vmatprep.subr.bf16.mxu0 %v11970_v7  ;;  %v11976_v16 = vpack.c.bf16 %v23205_v4, %v23204_v55  ;;  %v23206_v47 = vld [vmem:[#allocation14_spill] sm:$0xff]  ;;  %v23210_v7 = vld [vmem:[#allocation172_spill] sm:$0xff] }
 0x11a   :  { %1193 = vmatprep.mubr.f32.mxu1 %v23202_v32  ;;  %11973 = vmatpush1.bf16.msra.mxu1 %v11972_v43  ;;  %v11978_v61 = vpack.c.bf16 %v23207_v52, %v23206_v47  ;;  %v23209_v46 = vld [vmem:[#allocation162_spill] sm:$0xff] }
 0x11b   :  { %6492 = vmatmul.mubr.f32.gmra.mrb[12].mxu0 %v23201_v15  ;;  %11975 = vmatprep.subr.bf16.mxu1 %v11974_v49  ;;  %v23211_v15 = vld [vmem:[#allocation179_spill] sm:$0xff]  ;;  %v23213_v32 = vld [vmem:[#allocation18_spill] sm:$0xff] }
 0x11c   :  { %6498 = vmatprep.mubr.f32.mxu0 %v23203_v8  ;;  %12549 = vmatpush1.bf16.msra.mxu0 %v11972_v43  ;;  %v23212_v8 = vld [vmem:[#allocation17_spill] sm:$0xff]  ;;  %v23214_v43 = vld [vmem:[#allocation180_spill] sm:$0xff] }
 0x11d   :  { %1195 = vmatmul.mubr.f32.gmra.mrb[14].mxu1 %v23208_v54  ;;  %12551 = vmatprep.subr.bf16.mxu0 %v11974_v49  ;;  %v11980_v5 = vpack.c.bf16 %v23213_v32, %v23212_v8  ;;  %v23217_v49 = vld [vmem:[#allocation194_spill] sm:$0xff]  ;;  %v23329_v54 = vld [vmem:[#allocation199_spill] sm:$0xff] }
 0x11e   :  { %1201 = vmatprep.mubr.f32.mxu1 %v23210_v7  ;;  %11977 = vmatpush1.bf16.msra.mxu1 %v11976_v16  ;;  %v23219_v7 = vld [vmem:[#allocation197_spill] sm:$0xff] }
 0x11f   :  { %6500 = vmatmul.mubr.f32.gmra.mrb[14].mxu0 %v23209_v46  ;;  %11979 = vmatprep.subr.bf16.mxu1 %v11978_v61  ;;  %v23327_v46 = vld [vmem:[#allocation184_spill] sm:$0xff] }
 0x120   :  { %6506 = vmatprep.mubr.f32.mxu0 %v23211_v15  ;;  %12553 = vmatpush1.bf16.msra.mxu0 %v11976_v16  ;;  %v23218_v15 = vld [vmem:[#allocation190_spill] sm:$0xff] }
 0x121   :  { %1203 = vmatmul.mubr.f32.gmra.mrb[16].mxu1 %v23214_v43  ;;  %12555 = vmatprep.subr.bf16.mxu0 %v11978_v61  ;;  %v23220_v16 = vld [vmem:[#allocation202_spill] sm:$0xff]  ;;  %v23221_v43 = vld [vmem:[#allocation207_spill] sm:$0xff]  ;;  %v23222_v61 = vld [vmem:[#allocation212_spill] sm:$0xff] }
 0x122   :  { %1209 = vmatprep.mubr.f32.mxu1 %v23216_v62  ;;  %11981 = vmatpush1.bf16.msra.mxu1 %v11980_v5  ;;  %v23321_v62 = vld [vmem:[#allocation166_spill] sm:$0xff] }
 0x123   :  { %6508 = vmatmul.mubr.f32.gmra.mrb[16].mxu0 %v23215_v48  ;;  %11983 = vmatprep.subr.bf16.mxu1 %v16989_v28  ;;  %v23323_v48 = vld [vmem:[#allocation182_spill] sm:$0xff] }
 0x124   :  { %6514 = vmatprep.mubr.f32.mxu0 %v23217_v49  ;;  %12557 = vmatpush1.bf16.msra.mxu0 %v11980_v5  ;;  %v23223_v5 = vld [vmem:[#allocation216_spill] sm:$0xff] }
 0x125   :  { %1211 = vmatmul.mubr.f32.gmra.mrb[18].mxu1 %v23218_v15  ;;  %12559 = vmatprep.subr.bf16.mxu0 %v16989_v28  ;;  %v23224_v15 = vld [vmem:[#allocation220_spill] sm:$0xff]  ;;  %v23225_v28 = vld [vmem:[#allocation225_spill] sm:$0xff] }
 0x126   :  { %1217 = vmatprep.mubr.f32.mxu1 %v23220_v16  ;;  %11985 = vmatpush1.bf16.msra.mxu1 %v16993_v3  ;;  %v23311_v16 = vld [vmem:[#allocation144_spill] sm:$0xff] }
 0x127   :  { %6516 = vmatmul.mubr.f32.gmra.mrb[18].mxu0 %v23219_v7  ;;  %11987 = vmatprep.subr.bf16.mxu1 %v16997_v40  ;;  %v23315_v7 = vld [vmem:[#allocation157_spill] sm:$0xff]  ;;  %v23317_v49 = vld [vmem:[#allocation164_spill] sm:$0xff] }
 0x128   :  { %6522 = vmatprep.mubr.f32.mxu0 %v23221_v43  ;;  %12561 = vmatpush1.bf16.msra.mxu0 %v16993_v3  ;;  %v23226_v43 = vld [vmem:[#allocation221_spill] sm:$0xff]  ;;  %v23227_v3 = vld [vmem:[#allocation228_spill] sm:$0xff] }
 0x129   :  { %1219 = vmatmul.mubr.f32.gmra.mrb[20].mxu1 %v23222_v61  ;;  %12563 = vmatprep.subr.bf16.mxu0 %v16997_v40  ;;  %v23228_v61 = vld [vmem:[#allocation234_spill] sm:$0xff]  ;;  %v23229_v40 = vld [vmem:[#allocation241_spill] sm:$0xff] }
 0x12a   :  { %1225 = vmatprep.mubr.f32.mxu1 %v23224_v15  ;;  %11989 = vmatpush1.bf16.msra.mxu1 %v17001_v25  ;;  %v23244_v15 = vld [vmem:[#allocation294_spill] sm:$0xff] }
 0x12b   :  { %6524 = vmatmul.mubr.f32.gmra.mrb[20].mxu0 %v23223_v5  ;;  %11991 = vmatprep.subr.bf16.mxu1 %v17009_v6  ;;  %v23246_v5 = vld [vmem:[#allocation311_spill] sm:$0xff] }
 0x12c   :  { %6530 = vmatprep.mubr.f32.mxu0 %v23225_v28  ;;  %12565 = vmatpush1.bf16.msra.mxu0 %v17001_v25  ;;  %v23230_v28 = vld [vmem:[#allocation243_spill] sm:$0xff] }
 0x12d   :  { %1227 = vmatmul.mubr.f32.gmra.mrb[22].mxu1 %v23226_v43  ;;  %12567 = vmatprep.subr.bf16.mxu0 %v17009_v6  ;;  %v23231_v25 = vld [vmem:[#allocation251_spill] sm:$0xff]  ;;  %v23232_v43 = vld [vmem:[#allocation254_spill] sm:$0xff] }
 0x12e   :  { %1233 = vmatprep.mubr.f32.mxu1 %v23228_v61  ;;  %11993 = vmatpush1.bf16.msra.mxu1 %v17013_v13  ;;  %v23233_v6 = vld [vmem:[#allocation258_spill] sm:$0xff]  ;;  %v23235_v61 = vld [vmem:[#allocation260_spill] sm:$0xff] }
 0x12f   :  { %6532 = vmatmul.mubr.f32.gmra.mrb[22].mxu0 %v23227_v3  ;;  %1483 = vmatprep.subr.mxu1 %v16878_v0  ;;  %v23242_v3 = vld [vmem:[#allocation292_spill] sm:$0xff] }
 0x130   :  { %6538 = vmatprep.mubr.f32.mxu0 %v23229_v40  ;;  %12569 = vmatpush1.bf16.msra.mxu0 %v17013_v13  ;;  %v23234_v40 = vld [vmem:[#allocation2_spill] sm:$0xff]  ;;  %v23236_v13 = vld [vmem:[#allocation261_spill] sm:$0xff] }
 0x131   :  { %1235 = vmatmul.mubr.f32.gmra.mrb[24].mxu1 %v23230_v28  ;;  %6788 = vmatprep.subr.mxu0 %v16878_v0  ;;  %v23237_v28 = vld [vmem:[#allocation273_spill] sm:$0xff] }
 0x132   :  { %1241 = vmatprep.mubr.f32.mxu1 %v23232_v43  ;;  %1486 = vmatpush1.msra.mxu1 %v16895_v29  ;;  %v23238_v0 = vld [vmem:[#allocation281_spill] sm:$0xff]  ;;  %v23240_v43 = vld [vmem:[#allocation282_spill] sm:$0xff] }
 0x133   :  { %6540 = vmatmul.mubr.f32.gmra.mrb[24].mxu0 %v23231_v25  ;;  %11995 = vmatprep.subr.bf16.mxu1 %v23234_v40  ;;  %v23239_v25 = vld [vmem:[#allocation280_spill] sm:$0xff] }
 0x134   :  { %6546 = vmatprep.mubr.f32.mxu0 %v23233_v6  ;;  %6791 = vmatpush1.msra.mxu0 %v16895_v29  ;;  %v23241_v6 = vld [vmem:[#allocation286_spill] sm:$0xff]  ;;  %v23243_v29 = vld [vmem:[#allocation293_spill] sm:$0xff] }
 0x135   :  { %1243 = vmatmul.mubr.f32.gmra.mrb[26].mxu1 %v23235_v61  ;;  %12571 = vmatprep.subr.bf16.mxu0 %v23234_v40  ;;  %v23245_v61 = vld [vmem:[#allocation307_spill] sm:$0xff] }
 0x136   :  { %1249 = vmatprep.mubr.f32.mxu1 %v23237_v28  ;;  %v23248_v28 = vld [vmem:[#allocation313_spill] sm:$0xff] }
 0x137   :  { %6548 = vmatmul.mubr.f32.gmra.mrb[26].mxu0 %v23236_v13  ;;  %v23247_v13 = vld [vmem:[#allocation312_spill] sm:$0xff] }
 0x138   :  { %6554 = vmatprep.mubr.f32.mxu0 %v23238_v0  ;;  %v23249_v0 = vld [vmem:[#allocation318_spill] sm:$0xff] }
 0x139   :  { %1251 = vmatmul.mubr.f32.gmra.mrb[28].mxu1 %v23239_v25  ;;  %v23250_v25 = vld [vmem:[#allocation322_spill] sm:$0xff] }
 0x13a   :  { %1257 = vmatprep.mubr.f32.mxu1 %v23241_v6  ;;  %v23252_v6 = vld [vmem:[#allocation329_spill] sm:$0xff] }
 0x13b   :  { %6556 = vmatmul.mubr.f32.gmra.mrb[28].mxu0 %v23240_v43  ;;  %v23251_v43 = vld [vmem:[#allocation325_spill] sm:$0xff] }
 0x13c   :  { %6562 = vmatprep.mubr.f32.mxu0 %v23242_v3  ;;  %v23253_v3 = vld [vmem:[#allocation339_spill] sm:$0xff] }
 0x13d   :  { %1259 = vmatmul.mubr.f32.gmra.mrb[30].mxu1 %v23243_v29  ;;  %v23254_v29 = vld [vmem:[#allocation343_spill] sm:$0xff] }
 0x13e   :  { %1265 = vmatprep.mubr.f32.mxu1 %v23245_v61  ;;  %v23256_v61 = vld [vmem:[#allocation346_spill] sm:$0xff] }
 0x13f   :  { %6564 = vmatmul.mubr.f32.gmra.mrb[30].mxu0 %v23244_v15  ;;  %v23255_v15 = vld [vmem:[#allocation344_spill] sm:$0xff] }
 0x140   :  { %6570 = vmatprep.mubr.f32.mxu0 %v23246_v5  ;;  %v23257_v5 = vld [vmem:[#allocation350_spill] sm:$0xff] }
 0x141   :  { %1267 = vmatmul.mubr.f32.gmra.mrb[32].mxu1 %v23247_v13  ;;  %v23258_v13 = vld [vmem:[#allocation356_spill] sm:$0xff] }
 0x142   :  { %1273 = vmatprep.mubr.f32.mxu1 %v23249_v0  ;;  %v23260_v0 = vld [vmem:[#allocation360_spill] sm:$0xff] }
 0x143   :  { %6572 = vmatmul.mubr.f32.gmra.mrb[32].mxu0 %v23248_v28  ;;  %v23259_v28 = vld [vmem:[#allocation357_spill] sm:$0xff] }
 0x144   :  { %6578 = vmatprep.mubr.f32.mxu0 %v23250_v25  ;;  %v23261_v25 = vld [vmem:[#allocation373_spill] sm:$0xff] }
 0x145   :  { %1275 = vmatmul.mubr.f32.gmra.mrb[34].mxu1 %v23251_v43  ;;  %v23262_v43 = vld [vmem:[#allocation374_spill] sm:$0xff] }
 0x146   :  { %1281 = vmatprep.mubr.f32.mxu1 %v23253_v3  ;;  %v23264_v3 = vld [vmem:[#allocation377_spill] sm:$0xff] }
 0x147   :  { %6580 = vmatmul.mubr.f32.gmra.mrb[34].mxu0 %v23252_v6  ;;  %v23263_v6 = vld [vmem:[#allocation375_spill] sm:$0xff] }
 0x148   :  { %6586 = vmatprep.mubr.f32.mxu0 %v23254_v29  ;;  %v23265_v29 = vld [vmem:[#allocation380_spill] sm:$0xff] }
 0x149   :  { %1283 = vmatmul.mubr.f32.gmra.mrb[36].mxu1 %v23255_v15  ;;  %v23266_v15 = vld [vmem:[#allocation386_spill] sm:$0xff] }
 0x14a   :  { %1289 = vmatprep.mubr.f32.mxu1 %v23257_v5  ;;  %v23268_v5 = vld [vmem:[#allocation389_spill] sm:$0xff] }
 0x14b   :  { %6588 = vmatmul.mubr.f32.gmra.mrb[36].mxu0 %v23256_v61  ;;  %v23267_v61 = vld [vmem:[#allocation388_spill] sm:$0xff] }
 0x14c   :  { %6594 = vmatprep.mubr.f32.mxu0 %v23258_v13  ;;  %v23269_v13 = vld [vmem:[#allocation406_spill] sm:$0xff] }
 0x14d   :  { %1291 = vmatmul.mubr.f32.gmra.mrb[38].mxu1 %v23259_v28  ;;  %v23270_v28 = vld [vmem:[#allocation407_spill] sm:$0xff] }
 0x14e   :  { %1297 = vmatprep.mubr.f32.mxu1 %v23261_v25  ;;  %v23272_v25 = vld [vmem:[#allocation410_spill] sm:$0xff] }
 0x14f   :  { %6596 = vmatmul.mubr.f32.gmra.mrb[38].mxu0 %v23260_v0  ;;  %v23271_v0 = vld [vmem:[#allocation408_spill] sm:$0xff] }
 0x150   :  { %6602 = vmatprep.mubr.f32.mxu0 %v23262_v43  ;;  %v23273_v43 = vld [vmem:[#allocation415_spill] sm:$0xff] }
 0x151   :  { %1299 = vmatmul.mubr.f32.gmra.mrb[40].mxu1 %v23263_v6  ;;  %v23309_v6 = vld [vmem:[#allocation137_spill] sm:$0xff] }
 0x152   :  { %1305 = vmatprep.mubr.f32.mxu1 %v23265_v29  ;;  %v23274_v29 = vld [vmem:[#allocation422_spill] sm:$0xff] }
 0x153   :  { %6604 = vmatmul.mubr.f32.gmra.mrb[40].mxu0 %v23264_v3  ;;  %v23305_v3 = vld [vmem:[#allocation133_spill] sm:$0xff] }
 0x154   :  { %6610 = vmatprep.mubr.f32.mxu0 %v23266_v15  ;;  %v23303_v15 = vld [vmem:[#allocation122_spill] sm:$0xff] }
 0x155   :  { %1307 = vmatmul.mubr.f32.gmra.mrb[42].mxu1 %v23267_v61  ;;  %v23275_v61 = vld [vmem:[#allocation440_spill] sm:$0xff] }
 0x156   :  { %1313 = vmatprep.mubr.f32.mxu1 %v23269_v13  ;;  %v23297_v13 = vld [vmem:[#allocation102_spill] sm:$0xff] }
 0x157   :  { %6612 = vmatmul.mubr.f32.gmra.mrb[42].mxu0 %v23268_v5  ;;  %v23299_v5 = vld [vmem:[#allocation118_spill] sm:$0xff] }
 0x158   :  { %6618 = vmatprep.mubr.f32.mxu0 %v23270_v28  ;;  %v23276_v28 = vld [vmem:[#allocation49_spill] sm:$0xff] }
 0x159   :  { %1315 = vmatmul.mubr.f32.gmra.mrb[44].mxu1 %v23271_v0  ;;  %v23277_v0 = vld [vmem:[#allocation52_spill] sm:$0xff] }
 0x15a   :  { %1321 = vmatprep.mubr.f32.mxu1 %v23273_v43  ;;  %v23279_v43 = vld [vmem:[#allocation53_spill] sm:$0xff] }
 0x15b   :  { %6620 = vmatmul.mubr.f32.gmra.mrb[44].mxu0 %v23272_v25  ;;  %v23278_v25 = vld [vmem:[#allocation50_spill] sm:$0xff] }
 0x15c   :  { %6626 = vmatprep.mubr.f32.mxu0 %v16833_v26  ;;  %v23280_v26 = vld [vmem:[#allocation3_spill] sm:$0xff] }
 0x15d   :  { %1323 = vmatmul.mubr.f32.gmra.mrb[46].mxu1 %v16839_v36  ;;  %v23281_v36 = vld [vmem:[#allocation66_spill] sm:$0xff] }
 0x15e   :  { %1329 = vmatprep.mubr.f32.mxu1 %v16906_v45  ;;  %v23293_v45 = vld [vmem:[#allocation100_spill] sm:$0xff] }
 0x15f   :  { %6628 = vmatmul.mubr.f32.gmra.mrb[46].mxu0 %v23274_v29  ;;  %v23282_v29 = vld [vmem:[#allocation72_spill] sm:$0xff] }
 0x160   :  { %6634 = vmatprep.mubr.f32.mxu0 %v23275_v61  ;;  %v23283_v61 = vld [vmem:[#allocation4_spill] sm:$0xff] }
 0x161   :  { %1331 = vmatmul.mubr.f32.gmra.mrb[48].mxu1 %v16938_v35  ;;  %v23284_v35 = vld [vmem:[#allocation68_spill] sm:$0xff] }
 0x162   :  { %1503 = vmatprep.mubr.f32.mxu1 %v23276_v28  ;;  %v23285_v28 = vld [vmem:[#allocation69_spill] sm:$0xff] }
 0x163   :  { %6636 = vmatmul.mubr.f32.gmra.mrb[48].mxu0 %v16947_v9  ;;  %v23291_v9 = vld [vmem:[#allocation93_spill] sm:$0xff] }
 0x164   :  { %6808 = vmatprep.mubr.f32.mxu0 %v23277_v0  ;;  %v23286_v0 = vld [vmem:[#allocation77_spill] sm:$0xff] }
 0x165   :  { %1506 = vmatmul.mubr.f32.vlgmr.msra.gmra.mrb[0].mxu1 %v23278_v25  ;;  %v23287_v25 = vld [vmem:[#allocation79_spill] sm:$0xff] }
 0x166   :  { %11997 = vmatpush1.bf16.msra.mxu1 %v23280_v26  ;;  %1513 = vmatprep.mubr.f32.mxu1 %v23281_v36  ;;  %v23289_v36 = vld [vmem:[#allocation6_spill] sm:$0xff] }
 0x167   :  { %6811 = vmatmul.mubr.f32.vlgmr.msra.gmra.mrb[0].mxu0 %v23279_v43  ;;  %11999 = vmatprep.subr.bf16.mxu1 %v23283_v61  ;;  %v23288_v43 = vld [vmem:[#allocation5_spill] sm:$0xff] }
 0x168   :  { %6818 = vmatprep.mubr.f32.mxu0 %v23282_v29  ;;  %12573 = vmatpush1.bf16.msra.mxu0 %v23280_v26  ;;  %v23290_v29 = vld [vmem:[#allocation80_spill] sm:$0xff] }
 0x169   :  { %1516 = vmatmul.mubr.f32.gmra.mrb[2].mxu1 %v23284_v35  ;;  %12575 = vmatprep.subr.bf16.mxu0 %v23283_v61  ;;  %v23292_v35 = vld [vmem:[#allocation99_spill] sm:$0xff] }
 0x16a   :  { %1523 = vmatprep.mubr.f32.mxu1 %v23286_v0  ;;  %12001 = vmatpush1.bf16.msra.mxu1 %v23288_v43  ;;  %v23295_v0 = vld [vmem:[#allocation8_spill] sm:$0xff] }
 0x16b   :  { %6821 = vmatmul.mubr.f32.gmra.mrb[2].mxu0 %v23285_v28  ;;  %12003 = vmatprep.subr.bf16.mxu1 %v23289_v36  ;;  %v23294_v28 = vld [vmem:[#allocation7_spill] sm:$0xff] }
 0x16c   :  { %6828 = vmatprep.mubr.f32.mxu0 %v23287_v25  ;;  %12577 = vmatpush1.bf16.msra.mxu0 %v23288_v43  ;;  %v23296_v25 = vld [vmem:[#allocation101_spill] sm:$0xff] }
 0x16d   :  { %1526 = vmatmul.mubr.f32.gmra.mrb[4].mxu1 %v23290_v29  ;;  %12579 = vmatprep.subr.bf16.mxu0 %v23289_v36  ;;  %v23298_v29 = vld [vmem:[#allocation112_spill] sm:$0xff] }
 0x16e   :  { %1533 = vmatprep.mubr.f32.mxu1 %v23292_v35  ;;  %12005 = vmatpush1.bf16.msra.mxu1 %v23294_v28  ;;  %v23301_v35 = vld [vmem:[#allocation10_spill] sm:$0xff] }
 0x16f   :  { %6831 = vmatmul.mubr.f32.gmra.mrb[4].mxu0 %v23291_v9  ;;  %12007 = vmatprep.subr.bf16.mxu1 %v23295_v0  ;;  %v23300_v9 = vld [vmem:[#allocation9_spill] sm:$0xff] }
 0x170   :  { %6838 = vmatprep.mubr.f32.mxu0 %v23293_v45  ;;  %12581 = vmatpush1.bf16.msra.mxu0 %v23294_v28  ;;  %v23302_v45 = vld [vmem:[#allocation116_spill] sm:$0xff] }
 0x171   :  { %1536 = vmatmul.mubr.f32.gmra.mrb[6].mxu1 %v23296_v25  ;;  %12583 = vmatprep.subr.bf16.mxu0 %v23295_v0  ;;  %v23304_v25 = vld [vmem:[#allocation131_spill] sm:$0xff] }
 0x172   :  { %1543 = vmatprep.mubr.f32.mxu1 %v23298_v29  ;;  %12009 = vmatpush1.bf16.msra.mxu1 %v23300_v9  ;;  %v23307_v29 = vld [vmem:[#allocation12_spill] sm:$0xff] }
 0x173   :  { %6841 = vmatmul.mubr.f32.gmra.mrb[6].mxu0 %v23297_v13  ;;  %12011 = vmatprep.subr.bf16.mxu1 %v23301_v35  ;;  %v23306_v13 = vld [vmem:[#allocation11_spill] sm:$0xff] }
 0x174   :  { %6848 = vmatprep.mubr.f32.mxu0 %v23299_v5  ;;  %12585 = vmatpush1.bf16.msra.mxu0 %v23300_v9  ;;  %v23308_v5 = vld [vmem:[#allocation134_spill] sm:$0xff] }
 0x175   :  { %1546 = vmatmul.mubr.f32.gmra.mrb[8].mxu1 %v23302_v45  ;;  %12587 = vmatprep.subr.bf16.mxu0 %v23301_v35  ;;  %v23310_v45 = vld [vmem:[#allocation142_spill] sm:$0xff] }
 0x176   :  { %1553 = vmatprep.mubr.f32.mxu1 %v23304_v25  ;;  %12013 = vmatpush1.bf16.msra.mxu1 %v23306_v13  ;;  %v23313_v25 = vld [vmem:[#allocation19_spill] sm:$0xff] }
 0x177   :  { %6851 = vmatmul.mubr.f32.gmra.mrb[8].mxu0 %v23303_v15  ;;  %12015 = vmatprep.subr.bf16.mxu1 %v23307_v29  ;;  %v23312_v15 = vld [vmem:[#allocation15_spill] sm:$0xff] }
 0x178   :  { %6858 = vmatprep.mubr.f32.mxu0 %v23305_v3  ;;  %12589 = vmatpush1.bf16.msra.mxu0 %v23306_v13  ;;  %v23314_v3 = vld [vmem:[#allocation145_spill] sm:$0xff] }
 0x179   :  { %1556 = vmatmul.mubr.f32.gmra.mrb[10].mxu1 %v23308_v5  ;;  %12591 = vmatprep.subr.bf16.mxu0 %v23307_v29  ;;  %v23316_v5 = vld [vmem:[#allocation163_spill] sm:$0xff] }
 0x17a   :  { %1563 = vmatprep.mubr.f32.mxu1 %v23310_v45  ;;  %12017 = vmatpush1.bf16.msra.mxu1 %v23312_v15  ;;  %v23319_v45 = vld [vmem:[#allocation24_spill] sm:$0xff] }
 0x17b   :  { %6861 = vmatmul.mubr.f32.gmra.mrb[10].mxu0 %v23309_v6  ;;  %12019 = vmatprep.subr.bf16.mxu1 %v23313_v25  ;;  %v23318_v6 = vld [vmem:[#allocation23_spill] sm:$0xff] }
 0x17c   :  { %6868 = vmatprep.mubr.f32.mxu0 %v23311_v16  ;;  %12593 = vmatpush1.bf16.msra.mxu0 %v23312_v15  ;;  %v23320_v16 = vld [vmem:[#allocation165_spill] sm:$0xff] }
 0x17d   :  { %1566 = vmatmul.mubr.f32.gmra.mrb[12].mxu1 %v23314_v3  ;;  %12595 = vmatprep.subr.bf16.mxu0 %v23313_v25  ;;  %v23322_v3 = vld [vmem:[#allocation175_spill] sm:$0xff] }
 0x17e   :  { %1573 = vmatprep.mubr.f32.mxu1 %v23316_v5  ;;  %12021 = vmatpush1.bf16.msra.mxu1 %v23318_v6  ;;  %v23325_v5 = vld [vmem:[#allocation32_spill] sm:$0xff] }
 0x17f   :  { %6871 = vmatmul.mubr.f32.gmra.mrb[12].mxu0 %v23315_v7  ;;  %12023 = vmatprep.subr.bf16.mxu1 %v23319_v45  ;;  %v23324_v7 = vld [vmem:[#allocation28_spill] sm:$0xff] }
 0x180   :  { %6878 = vmatprep.mubr.f32.mxu0 %v23317_v49  ;;  %12597 = vmatpush1.bf16.msra.mxu0 %v23318_v6  ;;  %v23326_v49 = vld [vmem:[#allocation183_spill] sm:$0xff] }
 0x181   :  { %1576 = vmatmul.mubr.f32.gmra.mrb[14].mxu1 %v23320_v16  ;;  %12599 = vmatprep.subr.bf16.mxu0 %v23319_v45  ;;  %v23328_v16 = vld [vmem:[#allocation193_spill] sm:$0xff] }
 0x182   :  { %1583 = vmatprep.mubr.f32.mxu1 %v23322_v3  ;;  %12025 = vmatpush1.bf16.msra.mxu1 %v23324_v7  ;;  %v23331_v3 = vld [vmem:[#allocation36_spill] sm:$0xff] }
 0x183   :  { %6881 = vmatmul.mubr.f32.gmra.mrb[14].mxu0 %v23321_v62  ;;  %12027 = vmatprep.subr.bf16.mxu1 %v23325_v5  ;;  %v23330_v62 = vld [vmem:[#allocation35_spill] sm:$0xff] }
 0x184   :  { %6888 = vmatprep.mubr.f32.mxu0 %v23323_v48  ;;  %12601 = vmatpush1.bf16.msra.mxu0 %v23324_v7  ;;  %v23332_v48 = vld [vmem:[#allocation196_spill] sm:$0xff]  ;;  %v23333_v7 = vld [vmem:[#allocation201_spill] sm:$0xff] }
 0x185   :  { %1586 = vmatmul.mubr.f32.gmra.mrb[16].mxu1 %v23326_v49  ;;  %12603 = vmatprep.subr.bf16.mxu0 %v23325_v5  ;;  %v23334_v49 = vld [vmem:[#allocation205_spill] sm:$0xff]  ;;  %v23335_v5 = vld [vmem:[#allocation211_spill] sm:$0xff] }
 0x186   :  { %1593 = vmatprep.mubr.f32.mxu1 %v23328_v16  ;;  %12029 = vmatpush1.bf16.msra.mxu1 %v23330_v62  ;;  %v23337_v16 = vld [vmem:[#allocation38_spill] sm:$0xff] }
 0x187   :  { %6891 = vmatmul.mubr.f32.gmra.mrb[16].mxu0 %v23327_v46  ;;  %12031 = vmatprep.subr.bf16.mxu1 %v23331_v3  ;;  %v23336_v46 = vld [vmem:[#allocation37_spill] sm:$0xff] }
 0x188   :  { %6898 = vmatprep.mubr.f32.mxu0 %v23329_v54  ;;  %12605 = vmatpush1.bf16.msra.mxu0 %v23330_v62  ;;  %v23338_v54 = vld [vmem:[#allocation215_spill] sm:$0xff] }
 0x189   :  { %1596 = vmatmul.mubr.f32.gmra.mrb[18].mxu1 %v23332_v48  ;;  %12607 = vmatprep.subr.bf16.mxu0 %v23331_v3  ;;  %v23339_v62 = vld [vmem:[#allocation219_spill] sm:$0xff]  ;;  %v23340_v48 = vld [vmem:[#allocation224_spill] sm:$0xff]  ;;  %v23341_v3 = vld [vmem:[#allocation230_spill] sm:$0xff] }
 0x18a   :  { %1603 = vmatprep.mubr.f32.mxu1 %v23334_v49  ;;  %12033 = vmatpush1.bf16.msra.mxu1 %v23336_v46  ;;  %v23343_v49 = vld [vmem:[#allocation41_spill] sm:$0xff] }
 0x18b   :  { %6901 = vmatmul.mubr.f32.gmra.mrb[18].mxu0 %v23333_v7  ;;  %12035 = vmatprep.subr.bf16.mxu1 %v23337_v16  ;;  %v23342_v7 = vld [vmem:[#allocation40_spill] sm:$0xff] }
 0x18c   :  { %6908 = vmatprep.mubr.f32.mxu0 %v23335_v5  ;;  %12609 = vmatpush1.bf16.msra.mxu0 %v23336_v46  ;;  %v23344_v5 = vld [vmem:[#allocation226_spill] sm:$0xff]  ;;  %v23345_v46 = vld [vmem:[#allocation233_spill] sm:$0xff] }
 0x18d   :  { %1606 = vmatmul.mubr.f32.gmra.mrb[20].mxu1 %v23338_v54  ;;  %12611 = vmatprep.subr.bf16.mxu0 %v23337_v16  ;;  %v23346_v54 = vld [vmem:[#allocation237_spill] sm:$0xff]  ;;  %v23347_v16 = vld [vmem:[#allocation246_spill] sm:$0xff] }
 0x18e   :  { %1613 = vmatprep.mubr.f32.mxu1 %v23340_v48  ;;  %12037 = vmatpush1.bf16.msra.mxu1 %v23342_v7  ;;  %v23349_v48 = vld [vmem:[#allocation39_spill] sm:$0xff] }
 0x18f   :  { %6911 = vmatmul.mubr.f32.gmra.mrb[20].mxu0 %v23339_v62  ;;  %12039 = vmatprep.subr.bf16.mxu1 %v23343_v49  ;;  %v23348_v62 = vld [vmem:[#allocation43_spill] sm:$0xff] }
 0x190   :  { %6918 = vmatprep.mubr.f32.mxu0 %v23341_v3  ;;  %12613 = vmatpush1.bf16.msra.mxu0 %v23342_v7  ;;  %v23350_v3 = vand.u32 4294901760, %v14802_v22  ;;  %v23351_v7 = vand.u32 4294901760, %v23165_v39  ;;  %v23358_v22 = vld [vmem:[#allocation266_spill] sm:$0xff]  ;;  %v23359_v39 = vld [vmem:[#allocation276_spill] sm:$0xff] }
 0x191   :  { %1616 = vmatmul.mubr.f32.gmra.mrb[22].mxu1 %v23344_v5  ;;  %12615 = vmatprep.subr.bf16.mxu0 %v23343_v49  ;;  %v23352_v5 = vld [vmem:[#allocation247_spill] sm:$0xff]  ;;  %v23356_v49 = vld [vmem:[#allocation42_spill] sm:$0xff] }
 0x192   :  { %1623 = vmatprep.mubr.f32.mxu1 %v23346_v54  ;;  %12041 = vmatpush1.bf16.msra.mxu1 %v23348_v62  ;;  %v12042_v45 = vpack.c.bf16 %v23351_v7, %v23350_v3  ;;  %v23354_v54 = vld [vmem:[#allocation257_spill] sm:$0xff]  ;;  %v23360_v7 = vld [vmem:[#allocation284_spill] sm:$0xff]  ;;  %v23361_v3 = vld [vmem:[#allocation283_spill] sm:$0xff] }
 0x193   :  { %6921 = vmatmul.mubr.f32.gmra.mrb[22].mxu0 %v23345_v46  ;;  %1849 = vmatprep.subr.mxu1 %v23349_v48  ;;  %v23353_v46 = vld [vmem:[#allocation253_spill] sm:$0xff] }
 0x194   :  { %6928 = vmatprep.mubr.f32.mxu0 %v23347_v16  ;;  %12617 = vmatpush1.bf16.msra.mxu0 %v23348_v62  ;;  %v23355_v16 = vld [vmem:[#allocation263_spill] sm:$0xff]  ;;  %v23357_v62 = vld [vmem:[#allocation265_spill] sm:$0xff] }
 0x195   :  { %1626 = vmatmul.mubr.f32.gmra.mrb[24].mxu1 %v23352_v5  ;;  %7154 = vmatprep.subr.mxu0 %v23349_v48  ;;  %v23362_v5 = vld [vmem:[#allocation285_spill] sm:$0xff] }
 0x196   :  { %1633 = vmatprep.mubr.f32.mxu1 %v23354_v54  ;;  %1851 = vmatpush1.msra.mxu1 %v23356_v49  ;;  %v23363_v54 = vld [vmem:[#allocation291_spill] sm:$0xff] }
 0x197   :  { %6931 = vmatmul.mubr.f32.gmra.mrb[24].mxu0 %v23353_v46  ;;  %12043 = vmatprep.subr.bf16.mxu1 %v12042_v45  ;;  %v23365_v46 = vld [vmem:[#allocation298_spill] sm:$0xff] }
 0x198   :  { %6938 = vmatprep.mubr.f32.mxu0 %v23355_v16  ;;  %7156 = vmatpush1.msra.mxu0 %v23356_v49  ;;  %v23364_v16 = vld [vmem:[#allocation296_spill] sm:$0xff]  ;;  %v23366_v49 = vld [vmem:[#allocation299_spill] sm:$0xff] }
 0x199   :  { %1636 = vmatmul.mubr.f32.gmra.mrb[26].mxu1 %v23357_v62  ;;  %12619 = vmatprep.subr.bf16.mxu0 %v12042_v45  ;;  %v23367_v62 = vld [vmem:[#allocation310_spill] sm:$0xff]  ;;  %v23368_v45 = vld [vmem:[#allocation315_spill] sm:$0xff] }
 0x19a   :  { %1643 = vmatprep.mubr.f32.mxu1 %v23359_v39  ;;  %v23370_v39 = vld [vmem:[#allocation317_spill] sm:$0xff] }
 0x19b   :  { %6941 = vmatmul.mubr.f32.gmra.mrb[26].mxu0 %v23358_v22  ;;  %v23369_v22 = vld [vmem:[#allocation316_spill] sm:$0xff] }
 0x19c   :  { %6948 = vmatprep.mubr.f32.mxu0 %v23360_v7  ;;  %v23371_v7 = vld [vmem:[#allocation324_spill] sm:$0xff] }
 0x19d   :  { %1646 = vmatmul.mubr.f32.gmra.mrb[28].mxu1 %v23361_v3  ;;  %v23372_v3 = vld [vmem:[#allocation326_spill] sm:$0xff] }
 0x19e   :  { %1653 = vmatprep.mubr.f32.mxu1 %v23363_v54  ;;  %v23374_v54 = vld [vmem:[#allocation335_spill] sm:$0xff] }
 0x19f   :  { %6951 = vmatmul.mubr.f32.gmra.mrb[28].mxu0 %v23362_v5  ;;  %v23373_v5 = vld [vmem:[#allocation328_spill] sm:$0xff] }
 0x1a0   :  { %6958 = vmatprep.mubr.f32.mxu0 %v23364_v16  ;;  %v23375_v16 = vld [vmem:[#allocation341_spill] sm:$0xff] }
 0x1a1   :  { %1656 = vmatmul.mubr.f32.gmra.mrb[30].mxu1 %v23365_v46  ;;  %v23376_v46 = vld [vmem:[#allocation347_spill] sm:$0xff] }
 0x1a2   :  { %1663 = vmatprep.mubr.f32.mxu1 %v23367_v62  ;;  %v23378_v62 = vld [vmem:[#allocation349_spill] sm:$0xff] }
 0x1a3   :  { %6961 = vmatmul.mubr.f32.gmra.mrb[30].mxu0 %v23366_v49  ;;  %v23377_v49 = vld [vmem:[#allocation348_spill] sm:$0xff] }
 0x1a4   :  { %6968 = vmatprep.mubr.f32.mxu0 %v23368_v45  ;;  %v23379_v45 = vld [vmem:[#allocation355_spill] sm:$0xff] }
 0x1a5   :  { %1666 = vmatmul.mubr.f32.gmra.mrb[32].mxu1 %v23369_v22  ;;  %v23380_v22 = vld [vmem:[#allocation359_spill] sm:$0xff] }
 0x1a6   :  { %1673 = vmatprep.mubr.f32.mxu1 %v23371_v7  ;;  %v23382_v7 = vld [vmem:[#allocation366_spill] sm:$0xff] }
 0x1a7   :  { %6971 = vmatmul.mubr.f32.gmra.mrb[32].mxu0 %v23370_v39  ;;  %v23381_v39 = vld [vmem:[#allocation363_spill] sm:$0xff] }
 0x1a8   :  { %6978 = vmatprep.mubr.f32.mxu0 %v23372_v3  ;;  %v23383_v3 = vld [vmem:[#allocation376_spill] sm:$0xff] }
 0x1a9   :  { %1676 = vmatmul.mubr.f32.gmra.mrb[34].mxu1 %v23373_v5  ;;  %v23384_v5 = vld [vmem:[#allocation378_spill] sm:$0xff] }
 0x1aa   :  { %1683 = vmatprep.mubr.f32.mxu1 %v23375_v16  ;;  %v23386_v16 = vld [vmem:[#allocation382_spill] sm:$0xff] }
 0x1ab   :  { %6981 = vmatmul.mubr.f32.gmra.mrb[34].mxu0 %v23374_v54  ;;  %v23385_v54 = vld [vmem:[#allocation379_spill] sm:$0xff] }
 0x1ac   :  { %6988 = vmatprep.mubr.f32.mxu0 %v23376_v46  ;;  %v23387_v46 = vld [vmem:[#allocation385_spill] sm:$0xff] }
 0x1ad   :  { %1686 = vmatmul.mubr.f32.gmra.mrb[36].mxu1 %v23377_v49  ;;  %v23388_v49 = vld [vmem:[#allocation391_spill] sm:$0xff] }
 0x1ae   :  { %1693 = vmatprep.mubr.f32.mxu1 %v23379_v45  ;;  %v23390_v45 = vld [vmem:[#allocation394_spill] sm:$0xff] }
 0x1af   :  { %6991 = vmatmul.mubr.f32.gmra.mrb[36].mxu0 %v23378_v62  ;;  %v23389_v62 = vld [vmem:[#allocation393_spill] sm:$0xff] }
 0x1b0   :  { %6998 = vmatprep.mubr.f32.mxu0 %v23380_v22  ;;  %v23391_v22 = vld [vmem:[#allocation409_spill] sm:$0xff] }
 0x1b1   :  { %1696 = vmatmul.mubr.f32.gmra.mrb[38].mxu1 %v23381_v39  ;;  %v23392_v39 = vld [vmem:[#allocation411_spill] sm:$0xff] }
 0x1b2   :  { %1703 = vmatprep.mubr.f32.mxu1 %v23383_v3  ;;  %v23394_v3 = vld [vmem:[#allocation414_spill] sm:$0xff] }
 0x1b3   :  { %7001 = vmatmul.mubr.f32.gmra.mrb[38].mxu0 %v23382_v7  ;;  %v23393_v7 = vld [vmem:[#allocation412_spill] sm:$0xff] }
 0x1b4   :  { %7008 = vmatprep.mubr.f32.mxu0 %v23384_v5  ;;  %v23395_v5 = vld [vmem:[#allocation419_spill] sm:$0xff] }
 0x1b5   :  { %1706 = vmatmul.mubr.f32.gmra.mrb[40].mxu1 %v23385_v54  ;;  %v23396_v54 = vld [vmem:[#allocation425_spill] sm:$0xff] }
 0x1b6   :  { %1713 = vmatprep.mubr.f32.mxu1 %v23387_v46  ;;  %v23398_v46 = vld [vmem:[#allocation429_spill] sm:$0xff] }
 0x1b7   :  { %7011 = vmatmul.mubr.f32.gmra.mrb[40].mxu0 %v23386_v16  ;;  %v23397_v16 = vld [vmem:[#allocation428_spill] sm:$0xff] }
 0x1b8   :  { %7018 = vmatprep.mubr.f32.mxu0 %v23388_v49  ;;  %v23630_v49 = vld [vmem:[#allocation282_spill] sm:$0xff] }
 0x1b9   :  { %1716 = vmatmul.mubr.f32.gmra.mrb[42].mxu1 %v23389_v62  ;;  %v23624_v62 = vld [vmem:[#allocation42_spill] sm:$0xff] }
 0x1ba   :  { %1723 = vmatprep.mubr.f32.mxu1 %v23391_v22  ;;  %v23399_v22 = vld [vmem:[#allocation54_spill] sm:$0xff] }
 0x1bb   :  { %7021 = vmatmul.mubr.f32.gmra.mrb[42].mxu0 %v23390_v45  ;;  %v23629_v45 = vld [vmem:[#allocation280_spill] sm:$0xff] }
 0x1bc   :  { %7028 = vmatprep.mubr.f32.mxu0 %v23392_v39  ;;  %v23405_v39 = vld [vmem:[#allocation55_spill] sm:$0xff] }
 0x1bd   :  { %1726 = vmatmul.mubr.f32.gmra.mrb[44].mxu1 %v23393_v7  ;;  %v23400_v7 = vand.u32 4294901760, %v23175_v10  ;;  %v23409_v10 = vand.u32 4294901760, %v15033_v59  ;;  %v23418_v59 = vand.u32 4294901760, %v15196_v18  ;;  %v23426_v18 = vand.u32 4294901760, %v15408_v37 }
 0x1be   :  { %1733 = vmatprep.mubr.f32.mxu1 %v23395_v5  ;;  %v23401_v5 = vand.u32 4294901760, %v23176_v2  ;;  %v23410_v2 = vand.u32 4294901760, %v15043_v58  ;;  %v23417_v58 = vand.u32 4294901760, %v15191_v50  ;;  %v23425_v50 = vand.u32 4294901760, %v15396_v27 }
 0x1bf   :  { %7031 = vmatmul.mubr.f32.gmra.mrb[44].mxu0 %v23394_v3  ;;  %v23433_v27 = vand.u32 4294901760, %v15537_v53  ;;  %v23434_v37 = vand.u32 4294901760, %v15550_v1  ;;  %v23441_v1 = vand.u32 4294901760, %v15725_v33  ;;  %v23442_v53 = vand.u32 4294901760, %v15739_v21 }
 0x1c0   :  { %7038 = vmatprep.mubr.f32.mxu0 %v23396_v54  ;;  %v12044_v3 = vpack.c.bf16 %v23401_v5, %v23400_v7  ;;  %v23402_v54 = vld [vmem:[#allocation57_spill] sm:$0xff]  ;;  %v12048_v5 = vpack.c.bf16 %v23410_v2, %v23409_v10  ;;  %v23414_v7 = vld [vmem:[#allocation76_spill] sm:$0xff]  ;;  %v23449_v21 = vand.u32 4294901760, %v23196_v17  ;;  %v23450_v33 = vand.u32 4294901760, %v23197_v30 }
 0x1c1   :  { %1736 = vmatmul.mubr.f32.gmra.mrb[46].mxu1 %v23397_v16  ;;  %v23403_v16 = vand.u32 4294901760, %v14960_v38  ;;  %v23411_v38 = vand.u32 4294901760, %v15167_v23  ;;  %v23419_v23 = vand.u32 4294901760, %v15324_v14  ;;  %v23422_v2 = vld [vmem:[#allocation96_spill] sm:$0xff]  ;;  %v23427_v14 = vand.u32 4294901760, %v15498_v51 }
 0x1c2   :  { %1743 = vmatprep.mubr.f32.mxu1 %v16928_v34  ;;  %v23435_v51 = vand.u32 4294901760, %v15645_v31  ;;  %v23443_v31 = vand.u32 4294901760, %v15836_v12  ;;  %v23452_v12 = vand.u32 4294901760, %v23199_v19  ;;  %v23457_v17 = vand.u32 4294901760, %v23204_v55 }
 0x1c3   :  { %7041 = vmatmul.mubr.f32.gmra.mrb[46].mxu0 %v23398_v46  ;;  %v23404_v46 = vand.u32 4294901760, %v23178_v63  ;;  %v23458_v30 = vand.u32 4294901760, %v23205_v4  ;;  %v23459_v19 = vand.u32 4294901760, %v23206_v47  ;;  %v23465_v4 = vand.u32 4294901760, %v23212_v8  ;;  %v23467_v47 = vld [vmem:[#allocation20_spill] sm:$0xff]  ;;  %v23475_v8 = vld [vmem:[#allocation22_spill] sm:$0xff] }
 0x1c4   :  { %7048 = vmatprep.mubr.f32.mxu0 %v16945_v24  ;;  %v23406_v24 = vld [vmem:[#allocation58_spill] sm:$0xff]  ;;  %v23466_v55 = vand.u32 4294901760, %v23213_v32  ;;  %v23476_v32 = vand.u32 4294901760, %v23475_v8  ;;  %v23487_v8 = vld [vmem:[#allocation29_spill] sm:$0xff] }
 0x1c5   :  { %1746 = vmatmul.mubr.f32.gmra.mrb[48].mxu1 %v16952_v41  ;;  %v12046_v34 = vpack.c.bf16 %v23404_v46, %v23403_v16  ;;  %v23407_v41 = vld [vmem:[#allocation71_spill] sm:$0xff]  ;;  %v23412_v46 = vand.u32 4294901760, %v15178_v44  ;;  %v23420_v44 = vand.u32 4294901760, %v15380_v20  ;;  %v23428_v20 = vand.u32 4294901760, %v15503_v11 }
 0x1c6   :  { %1869 = vmatprep.mubr.f32.mxu1 %v23399_v22  ;;  %v23408_v22 = vld [vmem:[#allocation78_spill] sm:$0xff]  ;;  %v23413_v16 = vld [vmem:[#allocation75_spill] sm:$0xff]  ;;  %v23436_v11 = vand.u32 4294901760, %v15661_v42  ;;  %v23444_v42 = vand.u32 4294901760, %v15850_v60  ;;  %v23451_v60 = vand.u32 4294901760, %v23198_v56  ;;  %v23460_v56 = vand.u32 4294901760, %v23207_v52 }
 0x1c7   :  { %7051 = vmatmul.mubr.f32.gmra.mrb[48].mxu0 %v16962_v57  ;;  %v12050_v63 = vpack.c.bf16 %v23412_v46, %v23411_v38  ;;  %v12054_v10 = vpack.c.bf16 %v23420_v44, %v23419_v23  ;;  %v23423_v38 = vld [vmem:[#allocation103_spill] sm:$0xff]  ;;  %v23424_v46 = vld [vmem:[#allocation104_spill] sm:$0xff]  ;;  %v23431_v23 = vld [vmem:[#allocation117_spill] sm:$0xff]  ;;  %v23468_v52 = vand.u32 4294901760, %v23467_v47 }
 0x1c8   :  { %7174 = vmatprep.mubr.f32.mxu0 %v23402_v54  ;;  %v23432_v44 = vld [vmem:[#allocation121_spill] sm:$0xff]  ;;  %v23479_v47 = vld [vmem:[#allocation26_spill] sm:$0xff] }
 0x1c9   :  { %1873 = vmatmul.mubr.f32.vlgmr.msra.gmra.mrb[0].mxu1 %v23405_v39  ;;  %v23618_v39 = vld [vmem:[#allocation43_spill] sm:$0xff]  ;;  %v23622_v54 = vld [vmem:[#allocation254_spill] sm:$0xff] }
 0x1ca   :  { %12045 = vmatpush1.bf16.msra.mxu1 %v12044_v3  ;;  %1881 = vmatprep.mubr.f32.mxu1 %v23407_v41  ;;  %v23415_v41 = vld [vmem:[#allocation81_spill] sm:$0xff]  ;;  %v23623_v57 = vld [vmem:[#allocation258_spill] sm:$0xff] }
 0x1cb   :  { %7178 = vmatmul.mubr.f32.vlgmr.msra.gmra.mrb[0].mxu0 %v23406_v24  ;;  %12047 = vmatprep.subr.bf16.mxu1 %v12046_v34  ;;  %v23620_v24 = vld [vmem:[#allocation243_spill] sm:$0xff] }
 0x1cc   :  { %7186 = vmatprep.mubr.f32.mxu0 %v23408_v22  ;;  %12621 = vmatpush1.bf16.msra.mxu0 %v12044_v3  ;;  %v23416_v22 = vld [vmem:[#allocation83_spill] sm:$0xff]  ;;  %v12052_v3 = vpack.c.bf16 %v23418_v59, %v23417_v58  ;;  %v12058_v58 = vpack.c.bf16 %v23428_v20, %v23427_v14  ;;  %v23439_v14 = vld [vmem:[#allocation136_spill] sm:$0xff] }
 0x1cd   :  { %1885 = vmatmul.mubr.f32.gmra.mrb[2].mxu1 %v23413_v16  ;;  %12623 = vmatprep.subr.bf16.mxu0 %v12046_v34  ;;  %v23421_v34 = vld [vmem:[#allocation84_spill] sm:$0xff]  ;;  %v23430_v59 = vld [vmem:[#allocation107_spill] sm:$0xff]  ;;  %v23616_v16 = vld [vmem:[#allocation234_spill] sm:$0xff] }
 0x1ce   :  { %1893 = vmatprep.mubr.f32.mxu1 %v23415_v41  ;;  %12049 = vmatpush1.bf16.msra.mxu1 %v12048_v5  ;;  %v23440_v20 = vld [vmem:[#allocation140_spill] sm:$0xff]  ;;  %v23614_v41 = vld [vmem:[#allocation221_spill] sm:$0xff] }
 0x1cf   :  { %7190 = vmatmul.mubr.f32.gmra.mrb[2].mxu0 %v23414_v7  ;;  %12051 = vmatprep.subr.bf16.mxu1 %v12050_v63  ;;  %v23617_v7 = vld [vmem:[#allocation241_spill] sm:$0xff] }
 0x1d0   :  { %7198 = vmatprep.mubr.f32.mxu0 %v23416_v22  ;;  %12625 = vmatpush1.bf16.msra.mxu0 %v12048_v5  ;;  %v12056_v5 = vpack.c.bf16 %v23426_v18, %v23425_v50  ;;  %v12062_v50 = vpack.c.bf16 %v23436_v11, %v23435_v51  ;;  %v23438_v18 = vld [vmem:[#allocation124_spill] sm:$0xff]  ;;  %v23447_v51 = vld [vmem:[#allocation146_spill] sm:$0xff] }
 0x1d1   :  { %1897 = vmatmul.mubr.f32.gmra.mrb[4].mxu1 %v23421_v34  ;;  %12627 = vmatprep.subr.bf16.mxu0 %v12050_v63  ;;  %v23429_v63 = vld [vmem:[#allocation106_spill] sm:$0xff]  ;;  %v23448_v11 = vld [vmem:[#allocation148_spill] sm:$0xff] }
 0x1d2   :  { %1905 = vmatprep.mubr.f32.mxu1 %v23423_v38  ;;  %12053 = vmatpush1.bf16.msra.mxu1 %v12052_v3  ;;  %v23610_v38 = vld [vmem:[#allocation220_spill] sm:$0xff] }
 0x1d3   :  { %7202 = vmatmul.mubr.f32.gmra.mrb[4].mxu0 %v23422_v2  ;;  %12055 = vmatprep.subr.bf16.mxu1 %v12054_v10  ;;  %v23615_v22 = vld [vmem:[#allocation228_spill] sm:$0xff] }
 0x1d4   :  { %7210 = vmatprep.mubr.f32.mxu0 %v23424_v46  ;;  %12629 = vmatpush1.bf16.msra.mxu0 %v12052_v3  ;;  %v12060_v3 = vpack.c.bf16 %v23434_v37, %v23433_v27  ;;  %v12066_v27 = vpack.c.bf16 %v23444_v42, %v23443_v31  ;;  %v23446_v37 = vld [vmem:[#allocation143_spill] sm:$0xff]  ;;  %v23456_v42 = vld [vmem:[#allocation168_spill] sm:$0xff] }
 0x1d5   :  { %1909 = vmatmul.mubr.f32.gmra.mrb[6].mxu1 %v23429_v63  ;;  %12631 = vmatprep.subr.bf16.mxu0 %v12054_v10  ;;  %v23437_v10 = vld [vmem:[#allocation120_spill] sm:$0xff]  ;;  %v23455_v31 = vld [vmem:[#allocation167_spill] sm:$0xff] }
 0x1d6   :  { %1917 = vmatprep.mubr.f32.mxu1 %v23431_v23  ;;  %12057 = vmatpush1.bf16.msra.mxu1 %v12056_v5  ;;  %v23606_v23 = vld [vmem:[#allocation37_spill] sm:$0xff]  ;;  %v23608_v63 = vld [vmem:[#allocation212_spill] sm:$0xff] }
 0x1d7   :  { %7214 = vmatmul.mubr.f32.gmra.mrb[6].mxu0 %v23430_v59  ;;  %12059 = vmatprep.subr.bf16.mxu1 %v12058_v58  ;;  %v23609_v59 = vld [vmem:[#allocation216_spill] sm:$0xff] }
 0x1d8   :  { %7222 = vmatprep.mubr.f32.mxu0 %v23432_v44  ;;  %12633 = vmatpush1.bf16.msra.mxu0 %v12056_v5  ;;  %v12064_v5 = vpack.c.bf16 %v23442_v53, %v23441_v1  ;;  %v12070_v1 = vpack.c.bf16 %v23452_v12, %v23451_v60  ;;  %v23454_v53 = vld [vmem:[#allocation160_spill] sm:$0xff]  ;;  %v23463_v60 = vld [vmem:[#allocation178_spill] sm:$0xff] }
 0x1d9   :  { %1921 = vmatmul.mubr.f32.gmra.mrb[8].mxu1 %v23437_v10  ;;  %12635 = vmatprep.subr.bf16.mxu0 %v12058_v58  ;;  %v23445_v58 = vld [vmem:[#allocation141_spill] sm:$0xff]  ;;  %v23464_v12 = vld [vmem:[#allocation186_spill] sm:$0xff]  ;;  %v23612_v46 = vld [vmem:[#allocation40_spill] sm:$0xff] }
 0x1da   :  { %1929 = vmatprep.mubr.f32.mxu1 %v23439_v14  ;;  %12061 = vmatpush1.bf16.msra.mxu1 %v12060_v3  ;;  %v23600_v14 = vld [vmem:[#allocation35_spill] sm:$0xff]  ;;  %v23602_v10 = vld [vmem:[#allocation190_spill] sm:$0xff] }
 0x1db   :  { %7226 = vmatmul.mubr.f32.gmra.mrb[8].mxu0 %v23438_v18  ;;  %12063 = vmatprep.subr.bf16.mxu1 %v12062_v50  ;;  %v23604_v18 = vld [vmem:[#allocation202_spill] sm:$0xff] }
 0x1dc   :  { %7234 = vmatprep.mubr.f32.mxu0 %v23440_v20  ;;  %12637 = vmatpush1.bf16.msra.mxu0 %v12060_v3  ;;  %v12068_v3 = vpack.c.bf16 %v23450_v33, %v23449_v21  ;;  %v12074_v21 = vpack.c.bf16 %v23460_v56, %v23459_v19  ;;  %v23462_v33 = vld [vmem:[#allocation171_spill] sm:$0xff]  ;;  %v23472_v56 = vld [vmem:[#allocation188_spill] sm:$0xff]  ;;  %v23607_v44 = vld [vmem:[#allocation38_spill] sm:$0xff] }
 0x1dd   :  { %1933 = vmatmul.mubr.f32.gmra.mrb[10].mxu1 %v23445_v58  ;;  %12639 = vmatprep.subr.bf16.mxu0 %v12062_v50  ;;  %v23453_v50 = vld [vmem:[#allocation149_spill] sm:$0xff]  ;;  %v23596_v58 = vld [vmem:[#allocation180_spill] sm:$0xff] }
 0x1de   :  { %1941 = vmatprep.mubr.f32.mxu1 %v23447_v51  ;;  %12065 = vmatpush1.bf16.msra.mxu1 %v12064_v5  ;;  %v23594_v51 = vld [vmem:[#allocation28_spill] sm:$0xff] }
 0x1df   :  { %7238 = vmatmul.mubr.f32.gmra.mrb[10].mxu0 %v23446_v37  ;;  %12067 = vmatprep.subr.bf16.mxu1 %v12066_v27  ;;  %v23598_v37 = vld [vmem:[#allocation189_spill] sm:$0xff]  ;;  %v23601_v20 = vld [vmem:[#allocation36_spill] sm:$0xff] }
 0x1e0   :  { %7246 = vmatprep.mubr.f32.mxu0 %v23448_v11  ;;  %12641 = vmatpush1.bf16.msra.mxu0 %v12064_v5  ;;  %v12072_v5 = vpack.c.bf16 %v23458_v30, %v23457_v17  ;;  %v23469_v17 = vld [vmem:[#allocation21_spill] sm:$0xff]  ;;  %v23595_v11 = vld [vmem:[#allocation32_spill] sm:$0xff] }
 0x1e1   :  { %1945 = vmatmul.mubr.f32.gmra.mrb[12].mxu1 %v23453_v50  ;;  %12643 = vmatprep.subr.bf16.mxu0 %v12066_v27  ;;  %v23461_v27 = vld [vmem:[#allocation170_spill] sm:$0xff]  ;;  %v23470_v30 = vand.u32 4294901760, %v23469_v17  ;;  %v23480_v17 = vand.u32 4294901760, %v23479_v47  ;;  %v23491_v47 = vld [vmem:[#allocation31_spill] sm:$0xff]  ;;  %v23590_v50 = vld [vmem:[#allocation161_spill] sm:$0xff] }
 0x1e2   :  { %1953 = vmatprep.mubr.f32.mxu1 %v23455_v31  ;;  %12069 = vmatpush1.bf16.msra.mxu1 %v12068_v3  ;;  %v23587_v31 = vld [vmem:[#allocation158_spill] sm:$0xff] }
 0x1e3   :  { %7250 = vmatmul.mubr.f32.gmra.mrb[12].mxu0 %v23454_v53  ;;  %12071 = vmatprep.subr.bf16.mxu1 %v12070_v1  ;;  %v12078_v19 = vpack.c.bf16 %v23470_v30, %v23468_v52  ;;  %v23481_v52 = vld [vmem:[#allocation27_spill] sm:$0xff]  ;;  %v23592_v53 = vld [vmem:[#allocation172_spill] sm:$0xff] }
 0x1e4   :  { %7258 = vmatprep.mubr.f32.mxu0 %v23456_v42  ;;  %12645 = vmatpush1.bf16.msra.mxu0 %v12068_v3  ;;  %v12076_v3 = vpack.c.bf16 %v23466_v55, %v23465_v4  ;;  %v23477_v4 = vld [vmem:[#allocation25_spill] sm:$0xff]  ;;  %v23482_v30 = vand.u32 4294901760, %v23481_v52  ;;  %v23492_v52 = vand.u32 4294901760, %v23491_v47  ;;  %v23503_v47 = vld [vmem:[#allocation231_spill] sm:$0xff]  ;;  %v23589_v42 = vld [vmem:[#allocation24_spill] sm:$0xff] }
 0x1e5   :  { %1957 = vmatmul.mubr.f32.gmra.mrb[14].mxu1 %v23461_v27  ;;  %12647 = vmatprep.subr.bf16.mxu0 %v12070_v1  ;;  %v23471_v1 = vld [vmem:[#allocation187_spill] sm:$0xff] }
 0x1e6   :  { %1965 = vmatprep.mubr.f32.mxu1 %v23463_v60  ;;  %12073 = vmatpush1.bf16.msra.mxu1 %v12072_v5  ;;  %v23473_v60 = vld [vmem:[#allocation198_spill] sm:$0xff]  ;;  %v23583_v27 = vld [vmem:[#allocation135_spill] sm:$0xff] }
 0x1e7   :  { %7262 = vmatmul.mubr.f32.gmra.mrb[14].mxu0 %v23462_v33  ;;  %12075 = vmatprep.subr.bf16.mxu1 %v12074_v21  ;;  %v23585_v33 = vld [vmem:[#allocation139_spill] sm:$0xff] }
 0x1e8   :  { %7270 = vmatprep.mubr.f32.mxu0 %v23464_v12  ;;  %12649 = vmatpush1.bf16.msra.mxu0 %v12072_v5  ;;  %v23474_v12 = vld [vmem:[#allocation203_spill] sm:$0xff]  ;;  %v23478_v5 = vand.u32 4294901760, %v23477_v4  ;;  %v23488_v4 = vand.u32 4294901760, %v23487_v8  ;;  %v23499_v8 = vld [vmem:[#allocation34_spill] sm:$0xff] }
 0x1e9   :  { %1969 = vmatmul.mubr.f32.gmra.mrb[16].mxu1 %v23471_v1  ;;  %12651 = vmatprep.subr.bf16.mxu0 %v12074_v21  ;;  %v12082_v1 = vpack.c.bf16 %v23482_v30, %v23480_v17  ;;  %v23483_v21 = vld [vmem:[#allocation200_spill] sm:$0xff]  ;;  %v23493_v17 = vld [vmem:[#allocation33_spill] sm:$0xff] }
 0x1ea   :  { %1977 = vmatprep.mubr.f32.mxu1 %v23473_v60  ;;  %12077 = vmatpush1.bf16.msra.mxu1 %v12076_v3  ;;  %v12080_v55 = vpack.c.bf16 %v23478_v5, %v23476_v32  ;;  %v23485_v60 = vld [vmem:[#allocation209_spill] sm:$0xff]  ;;  %v23489_v32 = vld [vmem:[#allocation30_spill] sm:$0xff]  ;;  %v23494_v30 = vand.u32 4294901760, %v23493_v17 }
 0x1eb   :  { %7274 = vmatmul.mubr.f32.gmra.mrb[16].mxu0 %v23472_v56  ;;  %12079 = vmatprep.subr.bf16.mxu1 %v12078_v19  ;;  %v23484_v56 = vld [vmem:[#allocation204_spill] sm:$0xff]  ;;  %v23506_v17 = vld [vmem:[#allocation250_spill] sm:$0xff] }
 0x1ec   :  { %7282 = vmatprep.mubr.f32.mxu0 %v23474_v12  ;;  %12653 = vmatpush1.bf16.msra.mxu0 %v12076_v3  ;;  %v23486_v12 = vld [vmem:[#allocation214_spill] sm:$0xff]  ;;  %v23490_v3 = vand.u32 4294901760, %v23489_v32  ;;  %v23500_v32 = vand.u32 4294901760, %v23499_v8  ;;  %v23509_v8 = vld [vmem:[#allocation256_spill] sm:$0xff] }
 0x1ed   :  { %1981 = vmatmul.mubr.f32.gmra.mrb[18].mxu1 %v23483_v21  ;;  %12655 = vmatprep.subr.bf16.mxu0 %v12078_v19  ;;  %v12086_v21 = vpack.c.bf16 %v23494_v30, %v23492_v52  ;;  %v23495_v19 = vld [vmem:[#allocation218_spill] sm:$0xff]  ;;  %v23504_v52 = vld [vmem:[#allocation236_spill] sm:$0xff]  ;;  %v23507_v30 = vld [vmem:[#allocation435_spill] sm:$0xff] }
 0x1ee   :  { %1989 = vmatprep.mubr.f32.mxu1 %v23485_v60  ;;  %12081 = vmatpush1.bf16.msra.mxu1 %v12080_v55  ;;  %v12084_v5 = vpack.c.bf16 %v23490_v3, %v23488_v4  ;;  %v23497_v60 = vld [vmem:[#allocation229_spill] sm:$0xff]  ;;  %v23501_v4 = vld [vmem:[#allocation402_spill] sm:$0xff] }
 0x1ef   :  { %7286 = vmatmul.mubr.f32.gmra.mrb[18].mxu0 %v23484_v56  ;;  %12083 = vmatprep.subr.bf16.mxu1 %v12082_v1  ;;  %v23496_v56 = vld [vmem:[#allocation223_spill] sm:$0xff] }
 0x1f0   :  { %7294 = vmatprep.mubr.f32.mxu0 %v23486_v12  ;;  %12657 = vmatpush1.bf16.msra.mxu0 %v12080_v55  ;;  %v23498_v12 = vld [vmem:[#allocation235_spill] sm:$0xff]  ;;  %v23502_v55 = vand.u32 4294901760, %v23501_v4  ;;  %v23513_v4 = vld [vmem:[#allocation270_spill] sm:$0xff] }
 0x1f1   :  { %1993 = vmatmul.mubr.f32.gmra.mrb[20].mxu1 %v23495_v19  ;;  %12659 = vmatprep.subr.bf16.mxu0 %v12082_v1  ;;  %v23505_v1 = vld [vmem:[#allocation240_spill] sm:$0xff]  ;;  %v23579_v19 = vld [vmem:[#allocation127_spill] sm:$0xff] }
 0x1f2   :  { %2001 = vmatprep.mubr.f32.mxu1 %v23497_v60  ;;  %12085 = vmatpush1.bf16.msra.mxu1 %v12084_v5  ;;  %v12088_v3 = vpack.c.bf16 %v23502_v55, %v23500_v32  ;;  %v23508_v60 = vld [vmem:[#allocation252_spill] sm:$0xff]  ;;  %v23511_v32 = vld [vmem:[#allocation269_spill] sm:$0xff]  ;;  %v23514_v55 = vld [vmem:[#allocation271_spill] sm:$0xff] }
 0x1f3   :  { %7298 = vmatmul.mubr.f32.gmra.mrb[20].mxu0 %v23496_v56  ;;  %12087 = vmatprep.subr.bf16.mxu1 %v12086_v21  ;;  %v23581_v56 = vld [vmem:[#allocation130_spill] sm:$0xff] }
 0x1f4   :  { %7306 = vmatprep.mubr.f32.mxu0 %v23498_v12  ;;  %12661 = vmatpush1.bf16.msra.mxu0 %v12084_v5  ;;  %v23510_v5 = vld [vmem:[#allocation262_spill] sm:$0xff]  ;;  %v23577_v12 = vld [vmem:[#allocation109_spill] sm:$0xff] }
 0x1f5   :  { %2005 = vmatmul.mubr.f32.gmra.mrb[22].mxu1 %v23503_v47  ;;  %12663 = vmatprep.subr.bf16.mxu0 %v12086_v21  ;;  %v23512_v21 = vld [vmem:[#allocation437_spill] sm:$0xff] }
 0x1f6   :  { %2013 = vmatprep.mubr.f32.mxu1 %v23505_v1  ;;  %12089 = vmatpush1.bf16.msra.mxu1 %v12088_v3  ;;  %v23522_v1 = vld [vmem:[#allocation304_spill] sm:$0xff]  ;;  %v23573_v47 = vld [vmem:[#allocation97_spill] sm:$0xff] }
 0x1f7   :  { %7310 = vmatmul.mubr.f32.gmra.mrb[22].mxu0 %v23504_v52  ;;  %2362 = vmatprep.subr.mxu1 %v23507_v30  ;;  %v23575_v52 = vld [vmem:[#allocation108_spill] sm:$0xff] }
 0x1f8   :  { %7318 = vmatprep.mubr.f32.mxu0 %v23506_v17  ;;  %12665 = vmatpush1.bf16.msra.mxu0 %v12088_v3  ;;  %v23515_v3 = vld [vmem:[#allocation279_spill] sm:$0xff]  ;;  %v23571_v17 = vld [vmem:[#allocation94_spill] sm:$0xff] }
 0x1f9   :  { %2017 = vmatmul.mubr.f32.gmra.mrb[24].mxu1 %v23508_v60  ;;  %7667 = vmatprep.subr.mxu0 %v23507_v30  ;;  %v23516_v30 = vld [vmem:[#allocation289_spill] sm:$0xff]  ;;  %v23517_v60 = vld [vmem:[#allocation288_spill] sm:$0xff] }
 0x1fa   :  { %2025 = vmatprep.mubr.f32.mxu1 %v23510_v5  ;;  %2366 = vmatpush1.msra.mxu1 %v23512_v21  ;;  %v23518_v5 = vld [vmem:[#allocation290_spill] sm:$0xff] }
 0x1fb   :  { %7322 = vmatmul.mubr.f32.gmra.mrb[24].mxu0 %v23509_v8  ;;  %12091 = vmatprep.subr.bf16.mxu1 %v23234_v40  ;;  %v23520_v8 = vld [vmem:[#allocation302_spill] sm:$0xff] }
 0x1fc   :  { %7330 = vmatprep.mubr.f32.mxu0 %v23511_v32  ;;  %7671 = vmatpush1.msra.mxu0 %v23512_v21  ;;  %v23519_v32 = vld [vmem:[#allocation295_spill] sm:$0xff] }
 0x1fd   :  { %2029 = vmatmul.mubr.f32.gmra.mrb[26].mxu1 %v23513_v4  ;;  %12667 = vmatprep.subr.bf16.mxu0 %v23234_v40  ;;  %v23521_v21 = vld [vmem:[#allocation303_spill] sm:$0xff]  ;;  %v23523_v4 = vld [vmem:[#allocation314_spill] sm:$0xff] }
 0x1fe   :  { %2037 = vmatprep.mubr.f32.mxu1 %v23515_v3  ;;  %v23524_v40 = vld [vmem:[#allocation319_spill] sm:$0xff]  ;;  %v23526_v3 = vld [vmem:[#allocation321_spill] sm:$0xff] }
 0x1ff   :  { %7334 = vmatmul.mubr.f32.gmra.mrb[26].mxu0 %v23514_v55  ;;  %v23525_v55 = vld [vmem:[#allocation320_spill] sm:$0xff] }
 0x200   :  { %7342 = vmatprep.mubr.f32.mxu0 %v23516_v30  ;;  %v23527_v30 = vld [vmem:[#allocation327_spill] sm:$0xff] }
 0x201   :  { %2041 = vmatmul.mubr.f32.gmra.mrb[28].mxu1 %v23517_v60  ;;  %v23528_v60 = vld [vmem:[#allocation333_spill] sm:$0xff] }
 0x202   :  { %2049 = vmatprep.mubr.f32.mxu1 %v23519_v32  ;;  %v23530_v32 = vld [vmem:[#allocation337_spill] sm:$0xff] }
 0x203   :  { %7346 = vmatmul.mubr.f32.gmra.mrb[28].mxu0 %v23518_v5  ;;  %v23529_v5 = vld [vmem:[#allocation334_spill] sm:$0xff] }
 0x204   :  { %7354 = vmatprep.mubr.f32.mxu0 %v23520_v8  ;;  %v23531_v8 = vld [vmem:[#allocation345_spill] sm:$0xff] }
 0x205   :  { %2053 = vmatmul.mubr.f32.gmra.mrb[30].mxu1 %v23521_v21  ;;  %v23532_v21 = vld [vmem:[#allocation351_spill] sm:$0xff] }
 0x206   :  { %2061 = vmatprep.mubr.f32.mxu1 %v23523_v4  ;;  %v23534_v4 = vld [vmem:[#allocation354_spill] sm:$0xff] }
 0x207   :  { %7358 = vmatmul.mubr.f32.gmra.mrb[30].mxu0 %v23522_v1  ;;  %v23533_v1 = vld [vmem:[#allocation352_spill] sm:$0xff] }
 0x208   :  { %7366 = vmatprep.mubr.f32.mxu0 %v23524_v40  ;;  %v23535_v40 = vld [vmem:[#allocation358_spill] sm:$0xff] }
 0x209   :  { %2065 = vmatmul.mubr.f32.gmra.mrb[32].mxu1 %v23525_v55  ;;  %v23536_v55 = vld [vmem:[#allocation365_spill] sm:$0xff] }
 0x20a   :  { %2073 = vmatprep.mubr.f32.mxu1 %v23527_v30  ;;  %v23538_v30 = vld [vmem:[#allocation369_spill] sm:$0xff] }
 0x20b   :  { %7370 = vmatmul.mubr.f32.gmra.mrb[32].mxu0 %v23526_v3  ;;  %v23537_v3 = vld [vmem:[#allocation367_spill] sm:$0xff] }
 0x20c   :  { %7378 = vmatprep.mubr.f32.mxu0 %v23528_v60  ;;  %v23539_v60 = vld [vmem:[#allocation381_spill] sm:$0xff] }
 0x20d   :  { %2077 = vmatmul.mubr.f32.gmra.mrb[34].mxu1 %v23529_v5  ;;  %v23540_v5 = vld [vmem:[#allocation383_spill] sm:$0xff] }
 0x20e   :  { %2085 = vmatprep.mubr.f32.mxu1 %v23531_v8  ;;  %v23542_v8 = vld [vmem:[#allocation387_spill] sm:$0xff] }
 0x20f   :  { %7382 = vmatmul.mubr.f32.gmra.mrb[34].mxu0 %v23530_v32  ;;  %v23541_v32 = vld [vmem:[#allocation384_spill] sm:$0xff] }
 0x210   :  { %7390 = vmatprep.mubr.f32.mxu0 %v23532_v21  ;;  %v23543_v21 = vld [vmem:[#allocation390_spill] sm:$0xff] }
 0x211   :  { %2089 = vmatmul.mubr.f32.gmra.mrb[36].mxu1 %v23533_v1  ;;  %v23544_v1 = vld [vmem:[#allocation397_spill] sm:$0xff] }
 0x212   :  { %2097 = vmatprep.mubr.f32.mxu1 %v23535_v40  ;;  %v23546_v40 = vld [vmem:[#allocation400_spill] sm:$0xff] }
 0x213   :  { %7394 = vmatmul.mubr.f32.gmra.mrb[36].mxu0 %v23534_v4  ;;  %v23545_v4 = vld [vmem:[#allocation399_spill] sm:$0xff] }
 0x214   :  { %7402 = vmatprep.mubr.f32.mxu0 %v23536_v55  ;;  %v23547_v55 = vld [vmem:[#allocation413_spill] sm:$0xff] }
 0x215   :  { %2101 = vmatmul.mubr.f32.gmra.mrb[38].mxu1 %v23537_v3  ;;  %v23548_v3 = vld [vmem:[#allocation416_spill] sm:$0xff] }
 0x216   :  { %2109 = vmatprep.mubr.f32.mxu1 %v23539_v60  ;;  %v23550_v60 = vld [vmem:[#allocation418_spill] sm:$0xff] }
 0x217   :  { %7406 = vmatmul.mubr.f32.gmra.mrb[38].mxu0 %v23538_v30  ;;  %v23549_v30 = vld [vmem:[#allocation417_spill] sm:$0xff] }
 0x218   :  { %7414 = vmatprep.mubr.f32.mxu0 %v23540_v5  ;;  %v23551_v5 = vld [vmem:[#allocation424_spill] sm:$0xff] }
 0x219   :  { %2113 = vmatmul.mubr.f32.gmra.mrb[40].mxu1 %v23541_v32  ;;  %v23552_v32 = vld [vmem:[#allocation431_spill] sm:$0xff] }
 0x21a   :  { %2121 = vmatprep.mubr.f32.mxu1 %v23543_v21  ;;  %v23554_v21 = vld [vmem:[#allocation433_spill] sm:$0xff] }
 0x21b   :  { %7418 = vmatmul.mubr.f32.gmra.mrb[40].mxu0 %v23542_v8  ;;  %v23553_v8 = vld [vmem:[#allocation432_spill] sm:$0xff] }
 0x21c   :  { %7426 = vmatprep.mubr.f32.mxu0 %v23544_v1  ;;  %v23555_v1 = vld [vmem:[#allocation444_spill] sm:$0xff] }
 0x21d   :  { %2125 = vmatmul.mubr.f32.gmra.mrb[42].mxu1 %v23545_v4  ;;  %v23556_v4 = vld [vmem:[#allocation47_spill] sm:$0xff] }
 0x21e   :  { %2133 = vmatprep.mubr.f32.mxu1 %v23547_v55  ;;  %v23558_v55 = vld [vmem:[#allocation451_spill] sm:$0xff] }
 0x21f   :  { %7430 = vmatmul.mubr.f32.gmra.mrb[42].mxu0 %v23546_v40  ;;  %v23557_v40 = vld [vmem:[#allocation449_spill] sm:$0xff] }
 0x220   :  { %7438 = vmatprep.mubr.f32.mxu0 %v23548_v3  ;;  %v23559_v3 = vld [vmem:[#allocation44_spill] sm:$0xff] }
 0x221   :  { %2137 = vmatmul.mubr.f32.gmra.mrb[44].mxu1 %v23549_v30  ;;  %v23560_v30 = vld [vmem:[#allocation46_spill] sm:$0xff] }
 0x222   :  { %2145 = vmatprep.mubr.f32.mxu1 %v23551_v5  ;;  %v23562_v5 = vld [vmem:[#allocation48_spill] sm:$0xff] }
 0x223   :  { %7442 = vmatmul.mubr.f32.gmra.mrb[44].mxu0 %v23550_v60  ;;  %v23561_v60 = vld [vmem:[#allocation45_spill] sm:$0xff] }
 0x224   :  { %7450 = vmatprep.mubr.f32.mxu0 %v23552_v32  ;;  %v23569_v32 = vld [vmem:[#allocation74_spill] sm:$0xff] }
 0x225   :  { %2149 = vmatmul.mubr.f32.gmra.mrb[46].mxu1 %v23553_v8  ;;  %v23563_v8 = vld [vmem:[#allocation63_spill] sm:$0xff] }
 0x226   :  { %2157 = vmatprep.mubr.f32.mxu1 %v23555_v1  ;;  %v23567_v1 = vld [vmem:[#allocation70_spill] sm:$0xff] }
 0x227   :  { %7454 = vmatmul.mubr.f32.gmra.mrb[46].mxu0 %v23554_v21  ;;  %v23564_v21 = vld [vmem:[#allocation67_spill] sm:$0xff] }
 0x228   :  { %7462 = vmatprep.mubr.f32.mxu0 %v23556_v4  ;;  %v23568_v4 = vld [vmem:[#allocation73_spill] sm:$0xff] }
 0x229   :  { %2161 = vmatmul.mubr.f32.gmra.mrb[48].mxu1 %v23557_v40  ;;  %v23565_v40 = vld [vmem:[#allocation64_spill] sm:$0xff] }
 0x22a   :  { %2382 = vmatprep.mubr.f32.mxu1 %v23559_v3 }
 0x22b   :  { %7466 = vmatmul.mubr.f32.gmra.mrb[48].mxu0 %v23558_v55  ;;  %v23566_v55 = vld [vmem:[#allocation65_spill] sm:$0xff] }
 0x22c   :  { %7687 = vmatprep.mubr.f32.mxu0 %v23560_v30 }
 0x22d   :  { %2384 = vmatmul.mubr.f32.vlgmr.msra.gmra.mrb[0].mxu1 %v23561_v60 }
 0x22e   :  { %12093 = vmatpush1.bf16.msra.mxu1 %v23280_v26  ;;  %2390 = vmatprep.mubr.f32.mxu1 %v23563_v8 }
 0x22f   :  { %7689 = vmatmul.mubr.f32.vlgmr.msra.gmra.mrb[0].mxu0 %v23562_v5  ;;  %12095 = vmatprep.subr.bf16.mxu1 %v23283_v61 }
 0x230   :  { %7695 = vmatprep.mubr.f32.mxu0 %v23564_v21  ;;  %12669 = vmatpush1.bf16.msra.mxu0 %v23280_v26  ;;  %v23570_v26 = vld [vmem:[#allocation90_spill] sm:$0xff] }
 0x231   :  { %2392 = vmatmul.mubr.f32.gmra.mrb[2].mxu1 %v23565_v40  ;;  %12671 = vmatprep.subr.bf16.mxu0 %v23283_v61  ;;  %v23572_v61 = vld [vmem:[#allocation95_spill] sm:$0xff] }
 0x232   :  { %2398 = vmatprep.mubr.f32.mxu1 %v23567_v1  ;;  %12097 = vmatpush1.bf16.msra.mxu1 %v23288_v43 }
 0x233   :  { %7697 = vmatmul.mubr.f32.gmra.mrb[2].mxu0 %v23566_v55  ;;  %12099 = vmatprep.subr.bf16.mxu1 %v23289_v36 }
 0x234   :  { %7703 = vmatprep.mubr.f32.mxu0 %v23568_v4  ;;  %12673 = vmatpush1.bf16.msra.mxu0 %v23288_v43  ;;  %v23574_v43 = vld [vmem:[#allocation98_spill] sm:$0xff] }
 0x235   :  { %2400 = vmatmul.mubr.f32.gmra.mrb[4].mxu1 %v23569_v32  ;;  %12675 = vmatprep.subr.bf16.mxu0 %v23289_v36  ;;  %v23576_v36 = vld [vmem:[#allocation113_spill] sm:$0xff] }
 0x236   :  { %2406 = vmatprep.mubr.f32.mxu1 %v23571_v17  ;;  %12101 = vmatpush1.bf16.msra.mxu1 %v23294_v28 }
 0x237   :  { %7705 = vmatmul.mubr.f32.gmra.mrb[4].mxu0 %v23570_v26  ;;  %12103 = vmatprep.subr.bf16.mxu1 %v23295_v0 }
 0x238   :  { %7711 = vmatprep.mubr.f32.mxu0 %v23572_v61  ;;  %12677 = vmatpush1.bf16.msra.mxu0 %v23294_v28  ;;  %v23578_v28 = vld [vmem:[#allocation119_spill] sm:$0xff] }
 0x239   :  { %2408 = vmatmul.mubr.f32.gmra.mrb[6].mxu1 %v23573_v47  ;;  %12679 = vmatprep.subr.bf16.mxu0 %v23295_v0  ;;  %v23580_v0 = vld [vmem:[#allocation129_spill] sm:$0xff] }
 0x23a   :  { %2414 = vmatprep.mubr.f32.mxu1 %v23575_v52  ;;  %12105 = vmatpush1.bf16.msra.mxu1 %v23300_v9 }
 0x23b   :  { %7713 = vmatmul.mubr.f32.gmra.mrb[6].mxu0 %v23574_v43  ;;  %12107 = vmatprep.subr.bf16.mxu1 %v23301_v35 }
 0x23c   :  { %7719 = vmatprep.mubr.f32.mxu0 %v23576_v36  ;;  %12681 = vmatpush1.bf16.msra.mxu0 %v23300_v9  ;;  %v23582_v9 = vld [vmem:[#allocation132_spill] sm:$0xff] }
 0x23d   :  { %2416 = vmatmul.mubr.f32.gmra.mrb[8].mxu1 %v23577_v12  ;;  %12683 = vmatprep.subr.bf16.mxu0 %v23301_v35  ;;  %v23584_v35 = vld [vmem:[#allocation138_spill] sm:$0xff] }
 0x23e   :  { %2422 = vmatprep.mubr.f32.mxu1 %v23579_v19  ;;  %12109 = vmatpush1.bf16.msra.mxu1 %v23306_v13 }
 0x23f   :  { %7721 = vmatmul.mubr.f32.gmra.mrb[8].mxu0 %v23578_v28  ;;  %12111 = vmatprep.subr.bf16.mxu1 %v23307_v29 }
 0x240   :  { %7727 = vmatprep.mubr.f32.mxu0 %v23580_v0  ;;  %12685 = vmatpush1.bf16.msra.mxu0 %v23306_v13  ;;  %v23586_v13 = vld [vmem:[#allocation154_spill] sm:$0xff] }
 0x241   :  { %2424 = vmatmul.mubr.f32.gmra.mrb[10].mxu1 %v23581_v56  ;;  %12687 = vmatprep.subr.bf16.mxu0 %v23307_v29  ;;  %v23588_v29 = vld [vmem:[#allocation159_spill] sm:$0xff] }
 0x242   :  { %2430 = vmatprep.mubr.f32.mxu1 %v23583_v27  ;;  %12113 = vmatpush1.bf16.msra.mxu1 %v23312_v15 }
 0x243   :  { %7729 = vmatmul.mubr.f32.gmra.mrb[10].mxu0 %v23582_v9  ;;  %12115 = vmatprep.subr.bf16.mxu1 %v23313_v25 }
 0x244   :  { %7735 = vmatprep.mubr.f32.mxu0 %v23584_v35  ;;  %12689 = vmatpush1.bf16.msra.mxu0 %v23312_v15  ;;  %v23591_v15 = vld [vmem:[#allocation162_spill] sm:$0xff] }
 0x245   :  { %2432 = vmatmul.mubr.f32.gmra.mrb[12].mxu1 %v23585_v33  ;;  %12691 = vmatprep.subr.bf16.mxu0 %v23313_v25  ;;  %v23593_v25 = vld [vmem:[#allocation179_spill] sm:$0xff] }
 0x246   :  { %2438 = vmatprep.mubr.f32.mxu1 %v23587_v31  ;;  %12117 = vmatpush1.bf16.msra.mxu1 %v23318_v6 }
 0x247   :  { %7737 = vmatmul.mubr.f32.gmra.mrb[12].mxu0 %v23586_v13  ;;  %12119 = vmatprep.subr.bf16.mxu1 %v23589_v42 }
 0x248   :  { %7743 = vmatprep.mubr.f32.mxu0 %v23588_v29  ;;  %12693 = vmatpush1.bf16.msra.mxu0 %v23318_v6  ;;  %v23597_v6 = vld [vmem:[#allocation181_spill] sm:$0xff] }
 0x249   :  { %2440 = vmatmul.mubr.f32.gmra.mrb[14].mxu1 %v23590_v50  ;;  %12695 = vmatprep.subr.bf16.mxu0 %v23589_v42  ;;  %v23599_v42 = vld [vmem:[#allocation194_spill] sm:$0xff] }
 0x24a   :  { %2446 = vmatprep.mubr.f32.mxu1 %v23592_v53  ;;  %12121 = vmatpush1.bf16.msra.mxu1 %v23594_v51 }
 0x24b   :  { %7745 = vmatmul.mubr.f32.gmra.mrb[14].mxu0 %v23591_v15  ;;  %12123 = vmatprep.subr.bf16.mxu1 %v23595_v11 }
 0x24c   :  { %7751 = vmatprep.mubr.f32.mxu0 %v23593_v25  ;;  %12697 = vmatpush1.bf16.msra.mxu0 %v23594_v51  ;;  %v23603_v51 = vld [vmem:[#allocation197_spill] sm:$0xff] }
 0x24d   :  { %2448 = vmatmul.mubr.f32.gmra.mrb[16].mxu1 %v23596_v58  ;;  %12699 = vmatprep.subr.bf16.mxu0 %v23595_v11  ;;  %v23605_v11 = vld [vmem:[#allocation207_spill] sm:$0xff] }
 0x24e   :  { %2454 = vmatprep.mubr.f32.mxu1 %v23598_v37  ;;  %12125 = vmatpush1.bf16.msra.mxu1 %v23600_v14 }
 0x24f   :  { %7753 = vmatmul.mubr.f32.gmra.mrb[16].mxu0 %v23597_v6  ;;  %12127 = vmatprep.subr.bf16.mxu1 %v23601_v20 }
 0x250   :  { %7759 = vmatprep.mubr.f32.mxu0 %v23599_v42  ;;  %12701 = vmatpush1.bf16.msra.mxu0 %v23600_v14  ;;  %v17602_v14 = vld [vmem:[%s21506_s5 + $0x8] sm:$0xff] }
 0x251   :  { %2456 = vmatmul.mubr.f32.gmra.mrb[18].mxu1 %v23602_v10  ;;  %12703 = vmatprep.subr.bf16.mxu0 %v23601_v20  ;;  %v17607_v20 = vld [vmem:[%s21506_s5 + $0x18] sm:$0xff]  ;;  %v22382_v34 = vand.u32 4294901760, %v17602_v14 }
 0x252   :  { %2462 = vmatprep.mubr.f32.mxu1 %v23604_v18  ;;  %12129 = vmatpush1.bf16.msra.mxu1 %v23606_v23  ;;  %v22381_v2 = vand.u32 4294901760, %v17607_v20 }
 0x253   :  { %7761 = vmatmul.mubr.f32.gmra.mrb[18].mxu0 %v23603_v51  ;;  %12131 = vmatprep.subr.bf16.mxu1 %v23607_v44 }
 0x254   :  { %7767 = vmatprep.mubr.f32.mxu0 %v23605_v11  ;;  %12705 = vmatpush1.bf16.msra.mxu0 %v23606_v23  ;;  %v23611_v23 = vld [vmem:[#allocation225_spill] sm:$0xff] }
 0x255   :  { %2464 = vmatmul.mubr.f32.gmra.mrb[20].mxu1 %v23608_v63  ;;  %12707 = vmatprep.subr.bf16.mxu0 %v23607_v44  ;;  %v23613_v44 = vld [vmem:[#allocation41_spill] sm:$0xff] }
 0x256   :  { %2470 = vmatprep.mubr.f32.mxu1 %v23610_v38  ;;  %12133 = vmatpush1.bf16.msra.mxu1 %v23612_v46 }
 0x257   :  { %7769 = vmatmul.mubr.f32.gmra.mrb[20].mxu0 %v23609_v59  ;;  %12135 = vmatprep.subr.bf16.mxu1 %v23613_v44 }
 0x258   :  { %7775 = vmatprep.mubr.f32.mxu0 %v23611_v23  ;;  %12709 = vmatpush1.bf16.msra.mxu0 %v23612_v46  ;;  %v17629_v46 = vpack.c.bf16 %v22381_v2, %v22382_v34  ;;  %v23626_v2 = vld [vmem:[#allocation261_spill] sm:$0xff] }
 0x259   :  { %2472 = vmatmul.mubr.f32.gmra.mrb[22].mxu1 %v23614_v41  ;;  %12711 = vmatprep.subr.bf16.mxu0 %v23613_v44  ;;  %v23621_v44 = vld [vmem:[#allocation251_spill] sm:$0xff]  ;;  %v23627_v34 = vld [vmem:[#allocation273_spill] sm:$0xff] }
 0x25a   :  { %2478 = vmatprep.mubr.f32.mxu1 %v23616_v16  ;;  %12137 = vmatpush1.bf16.msra.mxu1 %v23618_v39  ;;  %23619 = vst [vmem:[#allocation51_spill] sm:$0xff] %v17629_v46 }
 0x25b   :  { %7777 = vmatmul.mubr.f32.gmra.mrb[22].mxu0 %v23615_v22  ;;  %2679 = vmatprep.subr.mxu1 %v23349_v48 }
 0x25c   :  { %7783 = vmatprep.mubr.f32.mxu0 %v23617_v7  ;;  %12713 = vmatpush1.bf16.msra.mxu0 %v23618_v39  ;;  %v23625_v39 = vld [vmem:[#allocation260_spill] sm:$0xff] }
 0x25d   :  { %2480 = vmatmul.mubr.f32.gmra.mrb[24].mxu1 %v23620_v24  ;;  %7984 = vmatprep.subr.mxu0 %v23349_v48  ;;  %v23628_v48 = vld [vmem:[#allocation281_spill] sm:$0xff]  ;;  %v17711_v24 = vld [vmem:[%s21506_s5 + $0x20] sm:$0xff] }
 0x25e   :  { %2486 = vmatprep.mubr.f32.mxu1 %v23622_v54  ;;  %2681 = vmatpush1.msra.mxu1 %v23624_v62  ;;  %v23632_v54 = vld [vmem:[#allocation292_spill] sm:$0xff] }
 0x25f   :  { %7785 = vmatmul.mubr.f32.gmra.mrb[24].mxu0 %v23621_v44  ;;  %12139 = vmatprep.subr.bf16.mxu1 %v17629_v46  ;;  %v23634_v44 = vld [vmem:[#allocation294_spill] sm:$0xff] }
 0x260   :  { %7791 = vmatprep.mubr.f32.mxu0 %v23623_v57  ;;  %7986 = vmatpush1.msra.mxu0 %v23624_v62  ;;  %v23631_v57 = vld [vmem:[#allocation286_spill] sm:$0xff]  ;;  %v23633_v62 = vld [vmem:[#allocation293_spill] sm:$0xff] }
 0x261   :  { %2488 = vmatmul.mubr.f32.gmra.mrb[26].mxu1 %v23625_v39  ;;  %12715 = vmatprep.subr.bf16.mxu0 %v17629_v46  ;;  %v23635_v39 = vld [vmem:[#allocation307_spill] sm:$0xff] }
 0x262   :  { %2494 = vmatprep.mubr.f32.mxu1 %v23627_v34  ;;  %v23636_v46 = vld [vmem:[#allocation311_spill] sm:$0xff]  ;;  %v23638_v34 = vld [vmem:[#allocation313_spill] sm:$0xff] }
 0x263   :  { %7793 = vmatmul.mubr.f32.gmra.mrb[26].mxu0 %v23626_v2  ;;  %v23637_v2 = vld [vmem:[#allocation312_spill] sm:$0xff] }
 0x264   :  { %7799 = vmatprep.mubr.f32.mxu0 %v23628_v48  ;;  %v23639_v48 = vld [vmem:[#allocation318_spill] sm:$0xff] }
 0x265   :  { %2496 = vmatmul.mubr.f32.gmra.mrb[28].mxu1 %v23629_v45  ;;  %v23640_v45 = vld [vmem:[#allocation322_spill] sm:$0xff] }
 0x266   :  { %2502 = vmatprep.mubr.f32.mxu1 %v23631_v57  ;;  %v23642_v57 = vld [vmem:[#allocation329_spill] sm:$0xff] }
 0x267   :  { %7801 = vmatmul.mubr.f32.gmra.mrb[28].mxu0 %v23630_v49  ;;  %v23641_v49 = vld [vmem:[#allocation325_spill] sm:$0xff] }
 0x268   :  { %7807 = vmatprep.mubr.f32.mxu0 %v23632_v54  ;;  %v23643_v54 = vld [vmem:[#allocation339_spill] sm:$0xff] }
 0x269   :  { %2504 = vmatmul.mubr.f32.gmra.mrb[30].mxu1 %v23633_v62  ;;  %v23644_v62 = vld [vmem:[#allocation343_spill] sm:$0xff] }
 0x26a   :  { %2510 = vmatprep.mubr.f32.mxu1 %v23635_v39  ;;  %v23646_v39 = vld [vmem:[#allocation346_spill] sm:$0xff] }
 0x26b   :  { %7809 = vmatmul.mubr.f32.gmra.mrb[30].mxu0 %v23634_v44  ;;  %v23645_v44 = vld [vmem:[#allocation344_spill] sm:$0xff] }
 0x26c   :  { %7815 = vmatprep.mubr.f32.mxu0 %v23636_v46  ;;  %v23647_v46 = vld [vmem:[#allocation350_spill] sm:$0xff] }
 0x26d   :  { %2512 = vmatmul.mubr.f32.gmra.mrb[32].mxu1 %v23637_v2  ;;  %v23648_v2 = vld [vmem:[#allocation356_spill] sm:$0xff] }
 0x26e   :  { %2518 = vmatprep.mubr.f32.mxu1 %v23639_v48  ;;  %v23650_v48 = vld [vmem:[#allocation360_spill] sm:$0xff] }
 0x26f   :  { %7817 = vmatmul.mubr.f32.gmra.mrb[32].mxu0 %v23638_v34  ;;  %v23649_v34 = vld [vmem:[#allocation357_spill] sm:$0xff] }
 0x270   :  { %7823 = vmatprep.mubr.f32.mxu0 %v23640_v45  ;;  %v23651_v45 = vld [vmem:[#allocation373_spill] sm:$0xff] }
 0x271   :  { %2520 = vmatmul.mubr.f32.gmra.mrb[34].mxu1 %v23641_v49  ;;  %v23652_v49 = vld [vmem:[#allocation374_spill] sm:$0xff] }
 0x272   :  { %2526 = vmatprep.mubr.f32.mxu1 %v23643_v54  ;;  %v23654_v54 = vld [vmem:[#allocation377_spill] sm:$0xff] }
 0x273   :  { %7825 = vmatmul.mubr.f32.gmra.mrb[34].mxu0 %v23642_v57  ;;  %v23653_v57 = vld [vmem:[#allocation375_spill] sm:$0xff] }
 0x274   :  { %7831 = vmatprep.mubr.f32.mxu0 %v23644_v62  ;;  %v23655_v62 = vld [vmem:[#allocation380_spill] sm:$0xff] }
 0x275   :  { %2528 = vmatmul.mubr.f32.gmra.mrb[36].mxu1 %v23645_v44  ;;  %v23656_v44 = vld [vmem:[#allocation386_spill] sm:$0xff] }
 0x276   :  { %2534 = vmatprep.mubr.f32.mxu1 %v23647_v46  ;;  %v23658_v46 = vld [vmem:[#allocation389_spill] sm:$0xff] }
 0x277   :  { %7833 = vmatmul.mubr.f32.gmra.mrb[36].mxu0 %v23646_v39  ;;  %v23657_v39 = vld [vmem:[#allocation388_spill] sm:$0xff] }
 0x278   :  { %7839 = vmatprep.mubr.f32.mxu0 %v23648_v2  ;;  %v23659_v2 = vld [vmem:[#allocation406_spill] sm:$0xff] }
 0x279   :  { %2536 = vmatmul.mubr.f32.gmra.mrb[38].mxu1 %v23649_v34  ;;  %v23660_v34 = vld [vmem:[#allocation407_spill] sm:$0xff] }
 0x27a   :  { %2542 = vmatprep.mubr.f32.mxu1 %v23651_v45  ;;  %v23662_v45 = vld [vmem:[#allocation410_spill] sm:$0xff] }
 0x27b   :  { %7841 = vmatmul.mubr.f32.gmra.mrb[38].mxu0 %v23650_v48  ;;  %v23661_v48 = vld [vmem:[#allocation408_spill] sm:$0xff] }
 0x27c   :  { %7847 = vmatprep.mubr.f32.mxu0 %v23652_v49  ;;  %v23663_v49 = vld [vmem:[#allocation415_spill] sm:$0xff] }
 0x27d   :  { %2544 = vmatmul.mubr.f32.gmra.mrb[40].mxu1 %v23653_v57  ;;  %v23664_v57 = vld [vmem:[#allocation420_spill] sm:$0xff] }
 0x27e   :  { %2550 = vmatprep.mubr.f32.mxu1 %v23655_v62  ;;  %v23668_v62 = vld [vmem:[#allocation440_spill] sm:$0xff] }
 0x27f   :  { %7849 = vmatmul.mubr.f32.gmra.mrb[40].mxu0 %v23654_v54  ;;  %v17727_v54 = vld [vmem:[%s21506_s5 + $0x58] sm:$0xff] }
 0x280   :  { %7855 = vmatprep.mubr.f32.mxu0 %v23656_v44  ;;  %v17683_v44 = vld [vmem:[%s21506_s5] sm:$0xff] }
 0x281   :  { %2552 = vmatmul.mubr.f32.gmra.mrb[42].mxu1 %v23657_v39  ;;  %v17722_v39 = vld [vmem:[%s21506_s5 + $0x48] sm:$0xff] }
 0x282   :  { %2558 = vmatprep.mubr.f32.mxu1 %v23659_v2  ;;  %v23665_v2 = vld [vmem:[#allocation421_spill] sm:$0xff] }
 0x283   :  { %7857 = vmatmul.mubr.f32.gmra.mrb[42].mxu0 %v23658_v46  ;;  %v17688_v46 = vld [vmem:[%s21506_s5 + $0x10] sm:$0xff] }
 0x284   :  { %7863 = vmatprep.mubr.f32.mxu0 %v23660_v34  ;;  %v22386_v34 = vand.u32 4294901760, %v17683_v44 }
 0x285   :  { %2560 = vmatmul.mubr.f32.gmra.mrb[44].mxu1 %v23661_v48  ;;  %v23667_v48 = vld [vmem:[#allocation436_spill] sm:$0xff] }
 0x286   :  { %2566 = vmatprep.mubr.f32.mxu1 %v23663_v49  ;;  %v23666_v49 = vld [vmem:[#allocation422_spill] sm:$0xff] }
 0x287   :  { %7865 = vmatmul.mubr.f32.gmra.mrb[44].mxu0 %v23662_v45  ;;  %v17694_v45 = vld [vmem:[%s21506_s5 + $0x28] sm:$0xff] }
 0x288   :  { %7871 = vmatprep.mubr.f32.mxu0 %v23664_v57  ;;  %v17699_v57 = vld [vmem:[%s21506_s5 + $0x38] sm:$0xff]  ;;  %v23674_v22 = vand.u32 4294901760, %v17694_v45 }
 0x289   :  { %2568 = vmatmul.mubr.f32.gmra.mrb[46].mxu1 %v23665_v2  ;;  %v23671_v2 = vld [vmem:[#allocation446_spill] sm:$0xff]  ;;  %v23675_v41 = vand.u32 4294901760, %v17699_v57 }
 0x28a   :  { %2574 = vmatprep.mubr.f32.mxu1 %v23667_v48  ;;  %v23670_v48 = vld [vmem:[#allocation443_spill] sm:$0xff] }
 0x28b   :  { %7873 = vmatmul.mubr.f32.gmra.mrb[46].mxu0 %v23666_v49  ;;  %v17716_v49 = vld [vmem:[%s21506_s5 + $0x30] sm:$0xff]  ;;  %v17744_v23 = vpack.c.bf16 %v23675_v41, %v23674_v22  ;;  %v17762_v41 = vld [vmem:[%s21506_s5 + $0x68] sm:$0xff]  ;;  %v17767_v22 = vld [vmem:[%s21506_s5 + $0x78] sm:$0xff] }
 0x28c   :  { %7879 = vmatprep.mubr.f32.mxu0 %v23668_v62  ;;  %23669 = vst [vmem:[#allocation56_spill] sm:$0xff] %v17716_v49  ;;  %v23672_v62 = vand.u32 4294901760, %v17688_v46  ;;  %v22394_v16 = vand.u32 4294901760, %v17716_v49 }
 0x28d   :  { %2576 = vmatmul.mubr.f32.gmra.mrb[48].mxu1 %v23670_v48  ;;  %v22395_v48 = vand.u32 4294901760, %v17711_v24  ;;  %23676 = vst [vmem:[#allocation244_spill] sm:$0xff] %v17744_v23 }
 0x28e   :  { %2697 = vmatprep.mubr.f32.mxu1 %v23559_v3  ;;  %v17735_v7 = vpack.c.bf16 %v23672_v62, %v22386_v34  ;;  %v17751_v62 = vld [vmem:[%s21506_s5 + $0x40] sm:$0xff]  ;;  %v17756_v34 = vld [vmem:[%s21506_s5 + $0x50] sm:$0xff] }
 0x28f   :  { %7881 = vmatmul.mubr.f32.gmra.mrb[48].mxu0 %v23671_v2  ;;  %v17777_v2 = vpack.c.bf16 %v22394_v16, %v22395_v48  ;;  %v22405_v3 = vand.u32 4294901760, %v17751_v62  ;;  %v17794_v16 = vld [vmem:[%s21506_s5 + $0x60] sm:$0xff]  ;;  %v17799_v48 = vld [vmem:[%s21506_s5 + $0x70] sm:$0xff] }
 0x290   :  { %23673 = vst [vmem:[#allocation88_spill] sm:$0xff] %v17735_v7  ;;  %8002 = vmatprep.mubr.f32.mxu0 %v23560_v30 }
 0x291   :  { %2699 = vmatmul.mubr.f32.vlgmr.msra.gmra.mrb[0].mxu1 %v23561_v60  ;;  %23677 = vst [vmem:[#allocation248_spill] sm:$0xff] %v17777_v2  ;;  %v22404_v60 = vand.u32 4294901760, %v17756_v34 }
 0x292   :  { %12141 = vmatpush1.bf16.msra.mxu1 %v17735_v7  ;;  %2705 = vmatprep.mubr.f32.mxu1 %v23563_v8  ;;  %v23679_v8 = vand.u32 4294901760, %v17727_v54 }
 0x293   :  { %8004 = vmatmul.mubr.f32.vlgmr.msra.gmra.mrb[0].mxu0 %v23562_v5  ;;  %12143 = vmatprep.subr.bf16.mxu1 %v17744_v23  ;;  %v23678_v5 = vand.u32 4294901760, %v17722_v39  ;;  %v17821_v49 = vpack.c.bf16 %v22404_v60, %v22405_v3  ;;  %v17838_v60 = vld [vmem:[%s21506_s5 + $0x80] sm:$0xff]  ;;  %v17843_v3 = vld [vmem:[%s21506_s5 + $0x90] sm:$0xff] }
 0x294   :  { %8010 = vmatprep.mubr.f32.mxu0 %v23564_v21  ;;  %12717 = vmatpush1.bf16.msra.mxu0 %v17735_v7  ;;  %v22415_v21 = vand.u32 4294901760, %v17794_v16  ;;  %v23682_v7 = vand.u32 4294901760, %v17762_v41 }
 0x295   :  { %v17787_v30 = vpack.c.bf16 %v23679_v8, %v23678_v5  ;;  %2707 = vmatmul.mubr.f32.gmra.mrb[2].mxu1 %v23565_v40  ;;  %12719 = vmatprep.subr.bf16.mxu0 %v17744_v23  ;;  %v17806_v8 = vld [vmem:[%s21506_s5 + $0x88] sm:$0xff]  ;;  %v17811_v5 = vld [vmem:[%s21506_s5 + $0x98] sm:$0xff]  ;;  %23681 = vst [vmem:[#allocation267_spill] sm:$0xff] %v17821_v49  ;;  %v22414_v23 = vand.u32 4294901760, %v17799_v48  ;;  %v22425_v40 = vand.u32 4294901760, %v17838_v60 }
 0x296   :  { %2713 = vmatprep.mubr.f32.mxu1 %v23567_v1  ;;  %12145 = vmatpush1.bf16.msra.mxu1 %v17777_v2  ;;  %v23683_v1 = vand.u32 4294901760, %v17767_v22 }
 0x297   :  { %23680 = vst [vmem:[#allocation264_spill] sm:$0xff] %v17787_v30  ;;  %8012 = vmatmul.mubr.f32.gmra.mrb[2].mxu0 %v23566_v55  ;;  %12147 = vmatprep.subr.bf16.mxu1 %v17787_v30  ;;  %v17865_v55 = vpack.c.bf16 %v22414_v23, %v22415_v21  ;;  %v17882_v23 = vld [vmem:[%s21506_s5 + $0xa0] sm:$0xff]  ;;  %v17887_v21 = vld [vmem:[%s21506_s5 + $0xb0] sm:$0xff] }
 0x298   :  { %8018 = vmatprep.mubr.f32.mxu0 %v23568_v4  ;;  %12721 = vmatpush1.bf16.msra.mxu0 %v17777_v2  ;;  %v17831_v4 = vpack.c.bf16 %v23683_v1, %v23682_v7  ;;  %v17850_v7 = vld [vmem:[%s21506_s5 + $0xa8] sm:$0xff]  ;;  %v17855_v1 = vld [vmem:[%s21506_s5 + $0xb8] sm:$0xff]  ;;  %v23686_v2 = vand.u32 4294901760, %v17806_v8 }
 0x299   :  { %2715 = vmatmul.mubr.f32.gmra.mrb[4].mxu1 %v23569_v32  ;;  %12723 = vmatprep.subr.bf16.mxu0 %v17787_v30  ;;  %23685 = vst [vmem:[#allocation13_spill] sm:$0xff] %v17865_v55  ;;  %v22424_v30 = vand.u32 4294901760, %v17843_v3  ;;  %v22435_v32 = vand.u32 4294901760, %v17882_v23 }
 0x29a   :  { %23684 = vst [vmem:[#allocation274_spill] sm:$0xff] %v17831_v4  ;;  %2721 = vmatprep.mubr.f32.mxu1 %v23571_v17  ;;  %12149 = vmatpush1.bf16.msra.mxu1 %v17821_v49  ;;  %v23687_v17 = vand.u32 4294901760, %v17811_v5 }
 0x29b   :  { %8020 = vmatmul.mubr.f32.gmra.mrb[4].mxu0 %v23570_v26  ;;  %12151 = vmatprep.subr.bf16.mxu1 %v17831_v4  ;;  %v17909_v26 = vpack.c.bf16 %v22424_v30, %v22425_v40  ;;  %v17926_v30 = vld [vmem:[%s21506_s5 + $0xc0] sm:$0xff]  ;;  %v17931_v40 = vld [vmem:[%s21506_s5 + $0xd0] sm:$0xff] }
 0x29c   :  { %8026 = vmatprep.mubr.f32.mxu0 %v23572_v61  ;;  %12725 = vmatpush1.bf16.msra.mxu0 %v17821_v49  ;;  %v17875_v61 = vpack.c.bf16 %v23687_v17, %v23686_v2  ;;  %v17894_v2 = vld [vmem:[%s21506_s5 + $0xc8] sm:$0xff]  ;;  %v17899_v17 = vld [vmem:[%s21506_s5 + $0xd8] sm:$0xff]  ;;  %v23690_v49 = vand.u32 4294901760, %v17850_v7 }
 0x29d   :  { %2723 = vmatmul.mubr.f32.gmra.mrb[6].mxu1 %v23573_v47  ;;  %12727 = vmatprep.subr.bf16.mxu0 %v17831_v4  ;;  %23689 = vst [vmem:[#allocation16_spill] sm:$0xff] %v17909_v26  ;;  %v22434_v4 = vand.u32 4294901760, %v17887_v21  ;;  %v22442_v47 = vand.u32 4294901760, %v17926_v30 }
 0x29e   :  { %23688 = vst [vmem:[#allocation14_spill] sm:$0xff] %v17875_v61  ;;  %2729 = vmatprep.mubr.f32.mxu1 %v23575_v52  ;;  %12153 = vmatpush1.bf16.msra.mxu1 %v17865_v55  ;;  %v23691_v52 = vand.u32 4294901760, %v17855_v1 }
 0x29f   :  { %8028 = vmatmul.mubr.f32.gmra.mrb[6].mxu0 %v23574_v43  ;;  %12155 = vmatprep.subr.bf16.mxu1 %v17875_v61  ;;  %v17953_v43 = vpack.c.bf16 %v22434_v4, %v22435_v32  ;;  %v17970_v4 = vld [vmem:[%s21506_s5 + $0xe0] sm:$0xff]  ;;  %v17975_v32 = vld [vmem:[%s21506_s5 + $0xf0] sm:$0xff] }
 0x2a0   :  { %8034 = vmatprep.mubr.f32.mxu0 %v23576_v36  ;;  %12729 = vmatpush1.bf16.msra.mxu0 %v17865_v55  ;;  %v17919_v36 = vpack.c.bf16 %v23691_v52, %v23690_v49  ;;  %v17938_v49 = vld [vmem:[%s21506_s5 + $0xe8] sm:$0xff]  ;;  %v17943_v52 = vld [vmem:[%s21506_s5 + $0xf8] sm:$0xff]  ;;  %v23694_v55 = vand.u32 4294901760, %v17894_v2 }
 0x2a1   :  { %2731 = vmatmul.mubr.f32.gmra.mrb[8].mxu1 %v23577_v12  ;;  %12731 = vmatprep.subr.bf16.mxu0 %v17875_v61  ;;  %23693 = vst [vmem:[#allocation18_spill] sm:$0xff] %v17953_v43  ;;  %v22441_v61 = vand.u32 4294901760, %v17931_v40 }
 0x2a2   :  { %23692 = vst [vmem:[#allocation17_spill] sm:$0xff] %v17919_v36  ;;  %2737 = vmatprep.mubr.f32.mxu1 %v23579_v19  ;;  %12157 = vmatpush1.bf16.msra.mxu1 %v17909_v26  ;;  %v23695_v19 = vand.u32 4294901760, %v17899_v17 }
 0x2a3   :  { %8036 = vmatmul.mubr.f32.gmra.mrb[8].mxu0 %v23578_v28  ;;  %12159 = vmatprep.subr.bf16.mxu1 %v17919_v36  ;;  %v17997_v28 = vpack.c.bf16 %v22441_v61, %v22442_v47  ;;  %v23698_v61 = vand.u32 4294901760, %v17938_v49  ;;  %v23699_v47 = vand.u32 4294901760, %v17943_v52 }
 0x2a4   :  { %8042 = vmatprep.mubr.f32.mxu0 %v23580_v0  ;;  %12733 = vmatpush1.bf16.msra.mxu0 %v17909_v26  ;;  %v17963_v0 = vpack.c.bf16 %v23695_v19, %v23694_v55  ;;  %v17982_v19 = vld [vmem:[%s21506_s5 + $0x108] sm:$0xff]  ;;  %v17987_v55 = vld [vmem:[%s21506_s5 + $0x118] sm:$0xff]  ;;  %v18004_v26 = vld [vmem:[%s21506_s5 + $0x100] sm:$0xff] }
 0x2a5   :  { %2739 = vmatmul.mubr.f32.gmra.mrb[10].mxu1 %v23581_v56  ;;  %12735 = vmatprep.subr.bf16.mxu0 %v17919_v36  ;;  %23697 = vst [vmem:[#allocation3_spill] sm:$0xff] %v17997_v28  ;;  %v18017_v12 = vpack.c.bf16 %v23699_v47, %v23698_v61  ;;  %v18031_v56 = vld [vmem:[%s21506_s5 + $0x138] sm:$0xff]  ;;  %v23702_v36 = vand.u32 4294901760, %v17975_v32  ;;  %v23704_v61 = vand.u32 4294901760, %v17982_v19  ;;  %v23705_v47 = vand.u32 4294901760, %v17987_v55 }
 0x2a6   :  { %23696 = vst [vmem:[#allocation2_spill] sm:$0xff] %v17963_v0  ;;  %2745 = vmatprep.mubr.f32.mxu1 %v23583_v27  ;;  %12161 = vmatpush1.bf16.msra.mxu1 %v17953_v43  ;;  %v18009_v27 = vld [vmem:[%s21506_s5 + $0x110] sm:$0xff] }
 0x2a7   :  { %8044 = vmatmul.mubr.f32.gmra.mrb[10].mxu0 %v23582_v9  ;;  %12163 = vmatprep.subr.bf16.mxu1 %v17963_v0  ;;  %23700 = vst [vmem:[#allocation4_spill] sm:$0xff] %v18017_v12 }
 0x2a8   :  { %8050 = vmatprep.mubr.f32.mxu0 %v23584_v35  ;;  %12737 = vmatpush1.bf16.msra.mxu0 %v17953_v43  ;;  %v18026_v43 = vld [vmem:[%s21506_s5 + $0x128] sm:$0xff]  ;;  %v23701_v35 = vand.u32 4294901760, %v17970_v4 }
 0x2a9   :  { %2747 = vmatmul.mubr.f32.gmra.mrb[12].mxu1 %v23585_v33  ;;  %12739 = vmatprep.subr.bf16.mxu0 %v17963_v0  ;;  %v18048_v33 = vld [vmem:[%s21506_s5 + $0x120] sm:$0xff] }
 0x2aa   :  { %2753 = vmatprep.mubr.f32.mxu1 %v23587_v31  ;;  %12165 = vmatpush1.bf16.msra.mxu1 %v17997_v28  ;;  %v18043_v0 = vpack.c.bf16 %v23702_v36, %v23701_v35  ;;  %v18056_v31 = vpack.c.bf16 %v23705_v47, %v23704_v61  ;;  %v18063_v35 = vld [vmem:[%s21506_s5 + $0x130] sm:$0xff]  ;;  %v23707_v47 = vand.u32 4294901760, %v18004_v26  ;;  %v23708_v61 = vand.u32 4294901760, %v18009_v27 }
 0x2ab   :  { %8052 = vmatmul.mubr.f32.gmra.mrb[12].mxu0 %v23586_v13  ;;  %12167 = vmatprep.subr.bf16.mxu1 %v18017_v12  ;;  %v18073_v13 = vld [vmem:[%s21506_s5 + $0x158] sm:$0xff] }
 0x2ac   :  { %8058 = vmatprep.mubr.f32.mxu0 %v23588_v29  ;;  %23703 = vst [vmem:[#allocation5_spill] sm:$0xff] %v18043_v0  ;;  %12741 = vmatpush1.bf16.msra.mxu0 %v17997_v28  ;;  %23706 = vst [vmem:[#allocation6_spill] sm:$0xff] %v18056_v31  ;;  %v18068_v28 = vld [vmem:[%s21506_s5 + $0x148] sm:$0xff]  ;;  %v18083_v36 = vpack.c.bf16 %v23708_v61, %v23707_v47  ;;  %v23711_v47 = vand.u32 4294901760, %v18031_v56  ;;  %v18102_v29 = vld [vmem:[%s21506_s5 + $0x140] sm:$0xff] }
 0x2ad   :  { %2755 = vmatmul.mubr.f32.gmra.mrb[14].mxu1 %v23590_v50  ;;  %12743 = vmatprep.subr.bf16.mxu0 %v18017_v12  ;;  %v18107_v12 = vld [vmem:[%s21506_s5 + $0x150] sm:$0xff] }
 0x2ae   :  { %2761 = vmatprep.mubr.f32.mxu1 %v23592_v53  ;;  %23709 = vst [vmem:[#allocation7_spill] sm:$0xff] %v18083_v36  ;;  %12169 = vmatpush1.bf16.msra.mxu1 %v18043_v0  ;;  %v23710_v53 = vand.u32 4294901760, %v18026_v43 }
 0x2af   :  { %8060 = vmatmul.mubr.f32.gmra.mrb[14].mxu0 %v23591_v15  ;;  %12171 = vmatprep.subr.bf16.mxu1 %v18056_v31  ;;  %v23713_v15 = vand.u32 4294901760, %v17602_v14 }
 0x2b0   :  { %8066 = vmatprep.mubr.f32.mxu0 %v23593_v25  ;;  %12745 = vmatpush1.bf16.msra.mxu0 %v18043_v0  ;;  %v18097_v61 = vpack.c.bf16 %v23711_v47, %v23710_v53  ;;  %v23714_v0 = vand.u32 4294901760, %v17607_v20  ;;  %v18124_v47 = vld [vmem:[%s21506_s5 + $0x168] sm:$0xff]  ;;  %v18129_v25 = vld [vmem:[%s21506_s5 + $0x178] sm:$0xff] }
 0x2b1   :  { %v18112_v50 = vsub.f32 %v17602_v14, %v23713_v15  ;;  %2763 = vmatmul.mubr.f32.gmra.mrb[16].mxu1 %v23596_v58  ;;  %12747 = vmatprep.subr.bf16.mxu0 %v18056_v31  ;;  %v23717_v15 = vand.u32 4294901760, %v18063_v35  ;;  %v23720_v31 = vand.u32 4294901760, %v18073_v13 }
 0x2b2   :  { %23712 = vst [vmem:[#allocation8_spill] sm:$0xff] %v18097_v61  ;;  %v18117_v53 = vsub.f32 %v17607_v20, %v23714_v0  ;;  %2769 = vmatprep.mubr.f32.mxu1 %v23598_v37  ;;  %12173 = vmatpush1.bf16.msra.mxu1 %v18083_v36  ;;  %v23716_v0 = vand.u32 4294901760, %v18048_v33  ;;  %v23719_v20 = vand.u32 4294901760, %v18068_v28  ;;  %v22476_v37 = vand.u32 4294901760, %v18107_v12 }
 0x2b3   :  { %8068 = vmatmul.mubr.f32.gmra.mrb[16].mxu0 %v23597_v6  ;;  %v22477_v6 = vand.u32 4294901760, %v18102_v29  ;;  %12175 = vmatprep.subr.bf16.mxu1 %v18097_v61 }
 0x2b4   :  { %23715 = vst [vmem:[#allocation9_spill] sm:$0xff] %v18117_v53  ;;  %8074 = vmatprep.mubr.f32.mxu0 %v23599_v42  ;;  %v18139_v14 = vpack.c.bf16 %v23717_v15, %v23716_v0  ;;  %v18145_v58 = vpack.c.bf16 %v23720_v31, %v23719_v20  ;;  %12749 = vmatpush1.bf16.msra.mxu0 %v18083_v36  ;;  %v22478_v42 = vand.u32 4294901760, %v18124_v47  ;;  %v18156_v0 = vld [vmem:[%s21506_s5 + $0x160] sm:$0xff]  ;;  %v18161_v31 = vld [vmem:[%s21506_s5 + $0x170] sm:$0xff]  ;;  %v18198_v15 = vld [vmem:[%s21506_s5 + $0x188] sm:$0xff] }
 0x2b5   :  { %2771 = vmatmul.mubr.f32.gmra.mrb[18].mxu1 %v23602_v10  ;;  %12751 = vmatprep.subr.bf16.mxu0 %v18097_v61  ;;  %v18175_v9 = vpack.c.bf16 %v22476_v37, %v22477_v6  ;;  %v22484_v20 = vand.u32 4294901760, %v18156_v0  ;;  %v23723_v61 = vand.u32 4294901760, %v18129_v25  ;;  %v23726_v37 = vand.u32 4294901760, %v18117_v53  ;;  %v23790_v10 = vld [vmem:[#allocation389_spill] sm:$0xff] }
 0x2b6   :  { %23718 = vst [vmem:[#allocation10_spill] sm:$0xff] %v18139_v14  ;;  %23721 = vst [vmem:[#allocation11_spill] sm:$0xff] %v18145_v58  ;;  %2777 = vmatprep.mubr.f32.mxu1 %v23604_v18  ;;  %12177 = vmatpush1.bf16.msra.mxu1 %v18139_v14  ;;  %v23725_v18 = vand.u32 4294901760, %v18112_v50 }
 0x2b7   :  { %8076 = vmatmul.mubr.f32.gmra.mrb[18].mxu0 %v23603_v51  ;;  %23722 = vst [vmem:[#allocation12_spill] sm:$0xff] %v18175_v9  ;;  %12179 = vmatprep.subr.bf16.mxu1 %v18145_v58  ;;  %v18185_v36 = vpack.c.bf16 %v23723_v61, %v22478_v42  ;;  %v3502_v6 = vsub.f32 %v18117_v53, %v23726_v37  ;;  %v23727_v61 = vld [vmem:[#allocation225_spill] sm:$0xff]  ;;  %v18213_v42 = vand.u32 4294901760, %v18198_v15  ;;  %v23794_v51 = vand.u32 4294901760, %v17751_v62 }
 0x2b8   :  { %8082 = vmatprep.mubr.f32.mxu0 %v23605_v11  ;;  %12753 = vmatpush1.bf16.msra.mxu0 %v18139_v14  ;;  %v3490_v11 = vsub.f32 %v18112_v50, %v23725_v18  ;;  %v23728_v18 = vand.u32 4294901760, %v18161_v31 }
 0x2b9   :  { %23724 = vst [vmem:[#allocation15_spill] sm:$0xff] %v18185_v36  ;;  %2779 = vmatmul.mubr.f32.gmra.mrb[20].mxu1 %v23608_v63  ;;  %12755 = vmatprep.subr.bf16.mxu0 %v18145_v58  ;;  %23730 = vst [vmem:[#allocation23_spill] sm:$0xff] %v18213_v42  ;;  %v18218_v58 = vld [vmem:[%s21506_s5 + $0x180] sm:$0xff] }
 0x2ba   :  { %2785 = vmatprep.mubr.f32.mxu1 %v23610_v38  ;;  %12181 = vmatpush1.bf16.msra.mxu1 %v18175_v9  ;;  %v18208_v37 = vpack.c.bf16 %v23728_v18, %v22484_v20  ;;  %v3491_v14 = vand.u32 4294901760, %v3490_v11  ;;  %v3503_v38 = vand.u32 4294901760, %v3502_v6  ;;  %v23732_v18 = vld [vmem:[#allocation228_spill] sm:$0xff]  ;;  %v23733_v20 = vld [vmem:[#allocation234_spill] sm:$0xff]  ;;  %v18227_v63 = vand.u32 4294901760, %v18218_v58  ;;  %v23736_v11 = vld [vmem:[#allocation243_spill] sm:$0xff] }
 0x2bb   :  { %8084 = vmatmul.mubr.f32.gmra.mrb[20].mxu0 %v23609_v59  ;;  %12183 = vmatprep.subr.bf16.mxu1 %v18185_v36  ;;  %v23749_v59 = vld [vmem:[#allocation294_spill] sm:$0xff] }
 0x2bc   :  { %8090 = vmatprep.mubr.f32.mxu0 %v23727_v61  ;;  %23729 = vst [vmem:[#allocation19_spill] sm:$0xff] %v18208_v37  ;;  %12757 = vmatpush1.bf16.msra.mxu0 %v18175_v9  ;;  %v23731_v61 = vld [vmem:[#allocation221_spill] sm:$0xff]  ;;  %23735 = vst [vmem:[#allocation39_spill] sm:$0xff] %v18227_v63  ;;  %v12186_v6 = vpack.c.bf16 %v3503_v38, %v3491_v14 }
 0x2bd   :  { %2787 = vmatmul.mubr.f32.gmra.mrb[22].mxu1 %v23731_v61  ;;  %12759 = vmatprep.subr.bf16.mxu0 %v18185_v36  ;;  %v23734_v9 = vld [vmem:[#allocation241_spill] sm:$0xff]  ;;  %v23737_v36 = vld [vmem:[#allocation251_spill] sm:$0xff]  ;;  %v23738_v61 = vld [vmem:[#allocation254_spill] sm:$0xff] }
 0x2be   :  { %2793 = vmatprep.mubr.f32.mxu1 %v23733_v20  ;;  %12185 = vmatpush1.bf16.msra.mxu1 %v18208_v37  ;;  %v23739_v20 = vld [vmem:[#allocation258_spill] sm:$0xff]  ;;  %v23742_v38 = vld [vmem:[#allocation273_spill] sm:$0xff] }
 0x2bf   :  { %8092 = vmatmul.mubr.f32.gmra.mrb[22].mxu0 %v23732_v18  ;;  %3069 = vmatprep.subr.mxu1 %v18213_v42  ;;  %v23743_v14 = vld [vmem:[#allocation281_spill] sm:$0xff] }
 0x2c0   :  { %8098 = vmatprep.mubr.f32.mxu0 %v23734_v9  ;;  %12761 = vmatpush1.bf16.msra.mxu0 %v18208_v37  ;;  %v23740_v9 = vld [vmem:[#allocation260_spill] sm:$0xff]  ;;  %v23741_v37 = vld [vmem:[#allocation261_spill] sm:$0xff] }
 0x2c1   :  { %2795 = vmatmul.mubr.f32.gmra.mrb[24].mxu1 %v23736_v11  ;;  %8299 = vmatprep.subr.mxu0 %v18213_v42  ;;  %v23744_v11 = vld [vmem:[#allocation280_spill] sm:$0xff]  ;;  %v23748_v18 = vld [vmem:[#allocation293_spill] sm:$0xff] }
 0x2c2   :  { %2801 = vmatprep.mubr.f32.mxu1 %v23738_v61  ;;  %3071 = vmatpush1.msra.mxu1 %v18227_v63  ;;  %v23746_v61 = vld [vmem:[#allocation286_spill] sm:$0xff] }
 0x2c3   :  { %8100 = vmatmul.mubr.f32.gmra.mrb[24].mxu0 %v23737_v36  ;;  %12187 = vmatprep.subr.bf16.mxu1 %v12186_v6  ;;  %v23745_v36 = vld [vmem:[#allocation282_spill] sm:$0xff] }
 0x2c4   :  { %8106 = vmatprep.mubr.f32.mxu0 %v23739_v20  ;;  %8301 = vmatpush1.msra.mxu0 %v18227_v63  ;;  %v23747_v20 = vld [vmem:[#allocation292_spill] sm:$0xff] }
 0x2c5   :  { %2803 = vmatmul.mubr.f32.gmra.mrb[26].mxu1 %v23740_v9  ;;  %12763 = vmatprep.subr.bf16.mxu0 %v12186_v6  ;;  %v23750_v9 = vld [vmem:[#allocation307_spill] sm:$0xff] }
 0x2c6   :  { %2809 = vmatprep.mubr.f32.mxu1 %v23742_v38  ;;  %v23751_v6 = vld [vmem:[#allocation311_spill] sm:$0xff]  ;;  %v23753_v38 = vld [vmem:[#allocation313_spill] sm:$0xff] }
 0x2c7   :  { %8108 = vmatmul.mubr.f32.gmra.mrb[26].mxu0 %v23741_v37  ;;  %v23752_v37 = vld [vmem:[#allocation312_spill] sm:$0xff] }
 0x2c8   :  { %8114 = vmatprep.mubr.f32.mxu0 %v23743_v14  ;;  %v23754_v14 = vld [vmem:[#allocation318_spill] sm:$0xff] }
 0x2c9   :  { %2811 = vmatmul.mubr.f32.gmra.mrb[28].mxu1 %v23744_v11  ;;  %v23755_v11 = vld [vmem:[#allocation322_spill] sm:$0xff] }
 0x2ca   :  { %2817 = vmatprep.mubr.f32.mxu1 %v23746_v61  ;;  %v23757_v61 = vld [vmem:[#allocation329_spill] sm:$0xff] }
 0x2cb   :  { %8116 = vmatmul.mubr.f32.gmra.mrb[28].mxu0 %v23745_v36  ;;  %v23756_v36 = vld [vmem:[#allocation325_spill] sm:$0xff] }
 0x2cc   :  { %8122 = vmatprep.mubr.f32.mxu0 %v23747_v20  ;;  %v23758_v20 = vld [vmem:[#allocation339_spill] sm:$0xff] }
 0x2cd   :  { %2819 = vmatmul.mubr.f32.gmra.mrb[30].mxu1 %v23748_v18  ;;  %v23759_v18 = vld [vmem:[#allocation343_spill] sm:$0xff] }
 0x2ce   :  { %2825 = vmatprep.mubr.f32.mxu1 %v23750_v9  ;;  %v23761_v9 = vld [vmem:[#allocation346_spill] sm:$0xff] }
 0x2cf   :  { %8124 = vmatmul.mubr.f32.gmra.mrb[30].mxu0 %v23749_v59  ;;  %v23760_v59 = vld [vmem:[#allocation344_spill] sm:$0xff] }
 0x2d0   :  { %8130 = vmatprep.mubr.f32.mxu0 %v23751_v6  ;;  %v23762_v6 = vld [vmem:[#allocation350_spill] sm:$0xff] }
 0x2d1   :  { %2827 = vmatmul.mubr.f32.gmra.mrb[32].mxu1 %v23752_v37  ;;  %v23763_v37 = vld [vmem:[#allocation356_spill] sm:$0xff] }
 0x2d2   :  { %2833 = vmatprep.mubr.f32.mxu1 %v23754_v14  ;;  %v23765_v14 = vand.u32 4294901760, %v17683_v44 }
 0x2d3   :  { %8132 = vmatmul.mubr.f32.gmra.mrb[32].mxu0 %v23753_v38  ;;  %v23764_v38 = vld [vmem:[#allocation357_spill] sm:$0xff] }
 0x2d4   :  { %8138 = vmatprep.mubr.f32.mxu0 %v23755_v11 }
 0x2d5   :  { %2835 = vmatmul.mubr.f32.gmra.mrb[34].mxu1 %v23756_v36  ;;  %v18266_v36 = vsub.f32 %v17683_v44, %v23765_v14  ;;  %v23775_v44 = vld [vmem:[#allocation374_spill] sm:$0xff]  ;;  %v23776_v14 = vld [vmem:[#allocation375_spill] sm:$0xff] }
 0x2d6   :  { %2841 = vmatprep.mubr.f32.mxu1 %v23758_v20 }
 0x2d7   :  { %8140 = vmatmul.mubr.f32.gmra.mrb[34].mxu0 %v23757_v61  ;;  %23766 = vst [vmem:[#allocation20_spill] sm:$0xff] %v18266_v36  ;;  %v23767_v61 = vand.u32 4294901760, %v17688_v46 }
 0x2d8   :  { %8146 = vmatprep.mubr.f32.mxu0 %v23759_v18  ;;  %v23769_v18 = vld [vmem:[#allocation360_spill] sm:$0xff] }
 0x2d9   :  { %2843 = vmatmul.mubr.f32.gmra.mrb[36].mxu1 %v23760_v59  ;;  %v18271_v20 = vsub.f32 %v17688_v46, %v23767_v61  ;;  %v23770_v59 = vld [vmem:[#allocation373_spill] sm:$0xff]  ;;  %v23782_v46 = vld [vmem:[#allocation386_spill] sm:$0xff]  ;;  %v23783_v61 = vand.u32 4294901760, %v17722_v39 }
 0x2da   :  { %2849 = vmatprep.mubr.f32.mxu1 %v23762_v6  ;;  %v23771_v6 = vand.u32 4294901760, %v17694_v45 }
 0x2db   :  { %8148 = vmatmul.mubr.f32.gmra.mrb[36].mxu0 %v23761_v9  ;;  %23768 = vst [vmem:[#allocation21_spill] sm:$0xff] %v18271_v20 }
 0x2dc   :  { %8154 = vmatprep.mubr.f32.mxu0 %v23763_v37  ;;  %v18278_v37 = vsub.f32 %v17694_v45, %v23771_v6  ;;  %v23778_v45 = vld [vmem:[#allocation377_spill] sm:$0xff]  ;;  %v23779_v6 = vld [vmem:[#allocation380_spill] sm:$0xff] }
 0x2dd   :  { %2851 = vmatmul.mubr.f32.gmra.mrb[38].mxu1 %v23764_v38  ;;  %v23773_v38 = vand.u32 4294901760, %v17699_v57 }
 0x2de   :  { %2857 = vmatprep.mubr.f32.mxu1 %v23770_v59  ;;  %23772 = vst [vmem:[#allocation22_spill] sm:$0xff] %v18278_v37  ;;  %v23777_v59 = vand.u32 4294901760, %v17711_v24 }
 0x2df   :  { %8156 = vmatmul.mubr.f32.gmra.mrb[38].mxu0 %v23769_v18  ;;  %v18283_v9 = vsub.f32 %v17699_v57, %v23773_v38  ;;  %v23787_v57 = vld [vmem:[#allocation388_spill] sm:$0xff]  ;;  %v23788_v38 = vand.u32 4294901760, %v18266_v36 }
 0x2e0   :  { %8162 = vmatprep.mubr.f32.mxu0 %v23775_v44  ;;  %v18292_v18 = vsub.f32 %v17711_v24, %v23777_v59  ;;  %v23780_v44 = vld [vmem:[#allocation56_spill] sm:$0xff]  ;;  %v18307_v24 = vsub.f32 %v17722_v39, %v23783_v61  ;;  %v23785_v59 = vand.u32 4294901760, %v17727_v54  ;;  %v23791_v39 = vld [vmem:[#allocation406_spill] sm:$0xff]  ;;  %v23792_v61 = vand.u32 4294901760, %v18278_v37 }
 0x2e1   :  { %23774 = vst [vmem:[#allocation25_spill] sm:$0xff] %v18283_v9  ;;  %2859 = vmatmul.mubr.f32.gmra.mrb[40].mxu1 %v23776_v14  ;;  %v23781_v11 = vand.u32 4294901760, %v23780_v44 }
 0x2e2   :  { %2865 = vmatprep.mubr.f32.mxu1 %v23779_v6  ;;  %23784 = vst [vmem:[#allocation26_spill] sm:$0xff] %v18307_v24  ;;  %v18312_v6 = vsub.f32 %v17727_v54, %v23785_v59  ;;  %v3514_v54 = vsub.f32 %v18278_v37, %v23792_v61  ;;  %v23793_v59 = vand.u32 4294901760, %v18283_v9  ;;  %v23803_v37 = vand.u32 4294901760, %v18292_v18  ;;  %v23805_v61 = vld [vmem:[#allocation415_spill] sm:$0xff] }
 0x2e3   :  { %8164 = vmatmul.mubr.f32.gmra.mrb[40].mxu0 %v23778_v45  ;;  %v18301_v14 = vsub.f32 %v23780_v44, %v23781_v11  ;;  %v3496_v45 = vsub.f32 %v18266_v36, %v23788_v38  ;;  %v23789_v11 = vand.u32 4294901760, %v18271_v20 }
 0x2e4   :  { %8170 = vmatprep.mubr.f32.mxu0 %v23782_v46  ;;  %23786 = vst [vmem:[#allocation27_spill] sm:$0xff] %v18312_v6  ;;  %v23795_v46 = vld [vmem:[#allocation407_spill] sm:$0xff]  ;;  %v3515_v36 = vand.u32 4294901760, %v3514_v54 }
 0x2e5   :  { %2867 = vmatmul.mubr.f32.gmra.mrb[42].mxu1 %v23787_v57  ;;  %v3508_v44 = vsub.f32 %v18271_v20, %v23789_v11  ;;  %v3526_v57 = vsub.f32 %v18283_v9, %v23793_v59  ;;  %v18334_v11 = vsub.f32 %v17751_v62, %v23794_v51  ;;  %v23798_v59 = vand.u32 4294901760, %v17762_v41  ;;  %v23802_v62 = vld [vmem:[#allocation408_spill] sm:$0xff] }
 0x2e6   :  { %2873 = vmatprep.mubr.f32.mxu1 %v23791_v39  ;;  %v23796_v39 = vand.u32 4294901760, %v17756_v34  ;;  %v23800_v9 = vand.u32 4294901760, %v17767_v22 }
 0x2e7   :  { %8172 = vmatmul.mubr.f32.gmra.mrb[42].mxu0 %v23790_v10  ;;  %v18347_v38 = vsub.f32 %v17762_v41, %v23798_v59  ;;  %v3497_v10 = vand.u32 4294901760, %v3496_v45  ;;  %v3527_v41 = vand.u32 4294901760, %v3526_v57  ;;  %v23806_v59 = vand.u32 4294901760, %v18301_v14 }
 0x2e8   :  { %8178 = vmatprep.mubr.f32.mxu0 %v23795_v46  ;;  %v18341_v20 = vsub.f32 %v17756_v34, %v23796_v39  ;;  %v18352_v51 = vsub.f32 %v17767_v22, %v23800_v9  ;;  %v3509_v46 = vand.u32 4294901760, %v3508_v44  ;;  %v3520_v34 = vsub.f32 %v18292_v18, %v23803_v37  ;;  %v23804_v39 = vld [vmem:[#allocation410_spill] sm:$0xff]  ;;  %v23807_v22 = vld [vmem:[#allocation420_spill] sm:$0xff] }
 0x2e9   :  { %23799 = vst [vmem:[#allocation30_spill] sm:$0xff] %v18347_v38  ;;  %2875 = vmatmul.mubr.f32.gmra.mrb[44].mxu1 %v23802_v62  ;;  %v3532_v53 = vsub.f32 %v18301_v14, %v23806_v59  ;;  %v23808_v45 = vand.u32 4294901760, %v18307_v24  ;;  %v23809_v62 = vand.u32 4294901760, %v17794_v16  ;;  %v23810_v57 = vand.u32 4294901760, %v17799_v48 }
 0x2ea   :  { %23797 = vst [vmem:[#allocation29_spill] sm:$0xff] %v18341_v20  ;;  %23801 = vst [vmem:[#allocation31_spill] sm:$0xff] %v18352_v51  ;;  %2881 = vmatprep.mubr.f32.mxu1 %v23805_v61  ;;  %v23812_v59 = vand.u32 4294901760, %v18312_v6  ;;  %v23813_v37 = vand.u32 4294901760, %v17806_v8 }
 0x2eb   :  { %8180 = vmatmul.mubr.f32.gmra.mrb[44].mxu0 %v23804_v39  ;;  %v3538_v44 = vsub.f32 %v18307_v24, %v23808_v45  ;;  %v18372_v61 = vsub.f32 %v17794_v16, %v23809_v62  ;;  %v18377_v54 = vsub.f32 %v17799_v48, %v23810_v57  ;;  %v23814_v16 = vld [vmem:[#allocation421_spill] sm:$0xff]  ;;  %v12188_v62 = vpack.c.bf16 %v3509_v46, %v3497_v10  ;;  %v23819_v45 = vld [vmem:[#allocation422_spill] sm:$0xff] }
 0x2ec   :  { %8186 = vmatprep.mubr.f32.mxu0 %v23807_v22  ;;  %v3550_v9 = vsub.f32 %v18312_v6, %v23812_v59  ;;  %v18387_v39 = vsub.f32 %v17806_v8, %v23813_v37  ;;  %v3521_v24 = vand.u32 4294901760, %v3520_v34  ;;  %v23815_v48 = vand.u32 4294901760, %v17811_v5  ;;  %v23820_v6 = vld [vmem:[#allocation436_spill] sm:$0xff] }
 0x2ed   :  { %23811 = vst [vmem:[#allocation33_spill] sm:$0xff] %v18377_v54  ;;  %2883 = vmatmul.mubr.f32.gmra.mrb[46].mxu1 %v23814_v16  ;;  %v23817_v59 = vand.u32 4294901760, %v17838_v60  ;;  %v12190_v8 = vpack.c.bf16 %v3527_v41, %v3515_v36  ;;  %v3533_v37 = vand.u32 4294901760, %v3532_v53  ;;  %v23821_v16 = vand.u32 4294901760, %v18334_v11  ;;  %v23824_v34 = vld [vmem:[#allocation440_spill] sm:$0xff] }
 0x2ee   :  { %v18393_v57 = vsub.f32 %v17811_v5, %v23815_v48  ;;  %2889 = vmatprep.mubr.f32.mxu1 %v23820_v6  ;;  %v23822_v46 = vand.u32 4294901760, %v17843_v3  ;;  %v3539_v48 = vand.u32 4294901760, %v3538_v44  ;;  %v3551_v53 = vand.u32 4294901760, %v3550_v9  ;;  %v23828_v44 = vld [vmem:[#allocation443_spill] sm:$0xff] }
 0x2ef   :  { %v18398_v22 = vsub.f32 %v17838_v60, %v23817_v59  ;;  %8188 = vmatmul.mubr.f32.gmra.mrb[46].mxu0 %v23819_v45  ;;  %v3544_v10 = vsub.f32 %v18334_v11, %v23821_v16  ;;  %v23825_v60 = vand.u32 4294901760, %v18341_v20  ;;  %v23826_v41 = vand.u32 4294901760, %v18347_v38 }
 0x2f0   :  { %23816 = vst [vmem:[#allocation34_spill] sm:$0xff] %v18393_v57  ;;  %v18408_v5 = vsub.f32 %v17843_v3, %v23822_v46  ;;  %8194 = vmatprep.mubr.f32.mxu0 %v23824_v34  ;;  %v23827_v45 = vand.u32 4294901760, %v18352_v51  ;;  %v23829_v6 = vand.u32 4294901760, %v17850_v7  ;;  %v23830_v36 = vand.u32 4294901760, %v17855_v1 }
 0x2f1   :  { %23818 = vst [vmem:[#allocation402_spill] sm:$0xff] %v18398_v22  ;;  %v3556_v59 = vsub.f32 %v18341_v20, %v23825_v60  ;;  %v3562_v16 = vsub.f32 %v18347_v38, %v23826_v41  ;;  %2891 = vmatmul.mubr.f32.gmra.mrb[48].mxu1 %v23828_v44  ;;  %v23831_v38 = vld [vmem:[#allocation446_spill] sm:$0xff]  ;;  %v12192_v46 = vpack.c.bf16 %v3533_v37, %v3521_v24  ;;  %v3545_v44 = vand.u32 4294901760, %v3544_v10 }
 0x2f2   :  { %23823 = vst [vmem:[#allocation435_spill] sm:$0xff] %v18408_v5  ;;  %v3574_v3 = vsub.f32 %v18352_v51, %v23827_v45  ;;  %v18429_v9 = vsub.f32 %v17850_v7, %v23829_v6  ;;  %v18434_v41 = vsub.f32 %v17855_v1, %v23830_v36  ;;  %v23832_v45 = vld [vmem:[#allocation61_spill] sm:$0xff]  ;;  %v23833_v60 = vand.u32 4294901760, %v17882_v23  ;;  %v23834_v7 = vld [vmem:[#allocation59_spill] sm:$0xff] }
 0x2f3   :  { %8196 = vmatmul.mubr.f32.gmra.mrb[48].mxu0 %v23831_v38  ;;  %3091 = vmatprep.mubr.f32.mxu1 %v23832_v45  ;;  %v3557_v6 = vand.u32 4294901760, %v3556_v59  ;;  %v23835_v20 = vand.u32 4294901760, %v18372_v61  ;;  %v23836_v36 = vand.u32 4294901760, %v18377_v54  ;;  %v23837_v24 = vand.u32 4294901760, %v17887_v21 }
 0x2f4   :  { %v18442_v51 = vsub.f32 %v17882_v23, %v23833_v60  ;;  %8321 = vmatprep.mubr.f32.mxu0 %v23834_v7  ;;  %v12194_v10 = vpack.c.bf16 %v3551_v53, %v3539_v48  ;;  %v3563_v34 = vand.u32 4294901760, %v3562_v16  ;;  %v3575_v23 = vand.u32 4294901760, %v3574_v3  ;;  %v23839_v7 = vld [vmem:[#allocation62_spill] sm:$0xff]  ;;  %v23842_v53 = vld [vmem:[#allocation60_spill] sm:$0xff]  ;;  %v23846_v48 = vld [vmem:[#allocation87_spill] sm:$0xff] }
 0x2f5   :  { %v3568_v1 = vsub.f32 %v18372_v61, %v23835_v20  ;;  %v3580_v45 = vsub.f32 %v18377_v54, %v23836_v36  ;;  %v18454_v37 = vsub.f32 %v17887_v21, %v23837_v24  ;;  %v23838_v60 = vand.u32 4294901760, %v18387_v39  ;;  %3097 = vmatmul.mubr.f32.vlgmr.msra.gmra.mrb[50].mxu1 %v23839_v7 }
 0x2f6   :  { %v23840_v20 = vand.u32 4294901760, %v18393_v57  ;;  %v23841_v36 = vand.u32 4294901760, %v18398_v22  ;;  %12189 = vmatpush1.bf16.msra.mxu1 %v12188_v62  ;;  %v23843_v16 = vand.u32 4294901760, %v18408_v5  ;;  %3107 = vmatprep.mubr.f32.mxu1 %v23846_v48  ;;  %v12196_v21 = vpack.c.bf16 %v3557_v6, %v3545_v44 }
 0x2f7   :  { %v3586_v59 = vsub.f32 %v18387_v39, %v23838_v60  ;;  %8327 = vmatmul.mubr.f32.vlgmr.msra.gmra.mrb[0].mxu0 %v23842_v53  ;;  %v23844_v60 = vand.u32 4294901760, %v17894_v2  ;;  %v23847_v53 = vld [vmem:[#allocation82_spill] sm:$0xff]  ;;  %12191 = vmatprep.subr.bf16.mxu1 %v12190_v8  ;;  %v12198_v24 = vpack.c.bf16 %v3575_v23, %v3563_v34  ;;  %v23854_v23 = vld [vmem:[#allocation91_spill] sm:$0xff] }
 0x2f8   :  { %v3598_v38 = vsub.f32 %v18393_v57, %v23840_v20  ;;  %v3592_v54 = vsub.f32 %v18398_v22, %v23841_v36  ;;  %v3604_v3 = vsub.f32 %v18408_v5, %v23843_v16  ;;  %v23845_v20 = vand.u32 4294901760, %v17899_v17  ;;  %8337 = vmatprep.mubr.f32.mxu0 %v23847_v53  ;;  %12765 = vmatpush1.bf16.msra.mxu0 %v12188_v62 }
 0x2f9   :  { %v18476_v7 = vsub.f32 %v17894_v2, %v23844_v60  ;;  %v3569_v22 = vand.u32 4294901760, %v3568_v1  ;;  %v3581_v57 = vand.u32 4294901760, %v3580_v45  ;;  %v22523_v16 = vand.u32 4294901760, %v18454_v37  ;;  %12767 = vmatprep.subr.bf16.mxu0 %v12190_v8  ;;  %v23856_v8 = vld [vmem:[#allocation89_spill] sm:$0xff] }
 0x2fa   :  { %v18481_v36 = vsub.f32 %v17899_v17, %v23845_v20  ;;  %v3587_v5 = vand.u32 4294901760, %v3586_v59  ;;  %v23848_v2 = vand.u32 4294901760, %v17926_v30  ;;  %v23849_v17 = vand.u32 4294901760, %v17931_v40  ;;  %v23850_v20 = vld [vmem:[#allocation86_spill] sm:$0xff]  ;;  %12193 = vmatpush1.bf16.msra.mxu1 %v12192_v46 }
 0x2fb   :  { %3113 = vmatmul.mubr.f32.gmra.mrb[52].mxu1 %v23850_v20  ;;  %v3599_v44 = vand.u32 4294901760, %v3598_v38  ;;  %v3593_v6 = vand.u32 4294901760, %v3592_v54  ;;  %v23851_v62 = vand.u32 4294901760, %v18429_v9  ;;  %v23852_v1 = vand.u32 4294901760, %v18434_v41  ;;  %12195 = vmatprep.subr.bf16.mxu1 %v12194_v10 }
 0x2fc   :  { %v18489_v60 = vsub.f32 %v17926_v30, %v23848_v2  ;;  %v18494_v48 = vsub.f32 %v17931_v40, %v23849_v17  ;;  %v23853_v30 = vld [vmem:[#allocation85_spill] sm:$0xff]  ;;  %3123 = vmatprep.mubr.f32.mxu1 %v23854_v23  ;;  %v3605_v59 = vand.u32 4294901760, %v3604_v3  ;;  %v23855_v40 = vand.u32 4294901760, %v18442_v51  ;;  %12769 = vmatpush1.bf16.msra.mxu0 %v12192_v46 }
 0x2fd   :  { %v3610_v34 = vsub.f32 %v18429_v9, %v23851_v62  ;;  %v3622_v45 = vsub.f32 %v18434_v41, %v23852_v1  ;;  %8343 = vmatmul.mubr.f32.gmra.mrb[2].mxu0 %v23853_v30  ;;  %v22529_v38 = vand.u32 4294901760, %v18476_v7  ;;  %v3628_v2 = vsub.f32 %v18454_v37, %v22523_v16  ;;  %v23860_v16 = vld [vmem:[#allocation105_spill] sm:$0xff]  ;;  %12771 = vmatprep.subr.bf16.mxu0 %v12194_v10 }
 0x2fe   :  { %v3616_v53 = vsub.f32 %v18442_v51, %v23855_v40  ;;  %8353 = vmatprep.mubr.f32.mxu0 %v23856_v8  ;;  %v23857_v17 = vand.u32 4294901760, %v17938_v49  ;;  %v23858_v3 = vand.u32 4294901760, %v17943_v52  ;;  %v12200_v1 = vpack.c.bf16 %v3581_v57, %v3569_v22  ;;  %v23862_v22 = vld [vmem:[#allocation92_spill] sm:$0xff]  ;;  %v23863_v57 = vld [vmem:[#allocation111_spill] sm:$0xff]  ;;  %12197 = vmatpush1.bf16.msra.mxu1 %v12196_v21 }
 0x2ff   :  { %v22524_v30 = vand.u32 4294901760, %v18489_v60  ;;  %v23859_v40 = vand.u32 4294901760, %v17970_v4  ;;  %3129 = vmatmul.mubr.f32.gmra.mrb[54].mxu1 %v23860_v16  ;;  %v3623_v54 = vand.u32 4294901760, %v3622_v45  ;;  %v23864_v10 = vand.u32 4294901760, %v18481_v36  ;;  %v23865_v16 = vld [vmem:[#allocation110_spill] sm:$0xff]  ;;  %12199 = vmatprep.subr.bf16.mxu1 %v12198_v24 }
 0x300   :  { %v18517_v20 = vsub.f32 %v17938_v49, %v23857_v17  ;;  %v18522_v62 = vsub.f32 %v17943_v52, %v23858_v3  ;;  %v12202_v49 = vpack.c.bf16 %v3599_v44, %v3587_v5  ;;  %v3611_v17 = vand.u32 4294901760, %v3610_v34  ;;  %3139 = vmatprep.mubr.f32.mxu1 %v23863_v57  ;;  %12773 = vmatpush1.bf16.msra.mxu0 %v12196_v21  ;;  %v23869_v57 = vld [vmem:[#allocation115_spill] sm:$0xff] }
 0x301   :  { %v18529_v8 = vsub.f32 %v17970_v4, %v23859_v40  ;;  %v23861_v52 = vand.u32 4294901760, %v17975_v32  ;;  %8359 = vmatmul.mubr.f32.gmra.mrb[4].mxu0 %v23862_v22  ;;  %v12204_v3 = vpack.c.bf16 %v3605_v59, %v3593_v6  ;;  %v3617_v23 = vand.u32 4294901760, %v3616_v53  ;;  %12775 = vmatprep.subr.bf16.mxu0 %v12198_v24 }
 0x302   :  { %v3634_v4 = vsub.f32 %v18476_v7, %v22529_v38  ;;  %v3646_v5 = vsub.f32 %v18481_v36, %v23864_v10  ;;  %8369 = vmatprep.mubr.f32.mxu0 %v23865_v16  ;;  %v3629_v44 = vand.u32 4294901760, %v3628_v2  ;;  %v22527_v34 = vand.u32 4294901760, %v18522_v62  ;;  %12201 = vmatpush1.bf16.msra.mxu1 %v12200_v1 }
 0x303   :  { %v18535_v46 = vsub.f32 %v17975_v32, %v23861_v52  ;;  %v22528_v32 = vand.u32 4294901760, %v18517_v20  ;;  %v23866_v45 = vand.u32 4294901760, %v17982_v19  ;;  %v3640_v59 = vsub.f32 %v18489_v60, %v22524_v30  ;;  %3145 = vmatmul.mubr.f32.gmra.mrb[56].mxu1 %v23869_v57  ;;  %v23872_v30 = vld [vmem:[#allocation114_spill] sm:$0xff]  ;;  %12203 = vmatprep.subr.bf16.mxu1 %v12202_v49 }
 0x304   :  { %v23867_v53 = vand.u32 4294901760, %v18494_v48  ;;  %v22525_v2 = vand.u32 4294901760, %v18529_v8  ;;  %v23868_v52 = vand.u32 4294901760, %v17987_v55  ;;  %v23870_v10 = vand.u32 4294901760, %v18004_v26  ;;  %12777 = vmatpush1.bf16.msra.mxu0 %v12200_v1 }
 0x305   :  { %v18551_v6 = vsub.f32 %v17982_v19, %v23866_v45  ;;  %v12206_v19 = vpack.c.bf16 %v3623_v54, %v3611_v17  ;;  %v22526_v21 = vand.u32 4294901760, %v18535_v46  ;;  %v23871_v45 = vand.u32 4294901760, %v18009_v27  ;;  %8375 = vmatmul.mubr.f32.gmra.mrb[6].mxu0 %v23872_v30  ;;  %12779 = vmatprep.subr.bf16.mxu0 %v12202_v49 }
 0x306   :  { %v3652_v40 = vsub.f32 %v18494_v48, %v23867_v53  ;;  %v18563_v22 = vsub.f32 %v17987_v55, %v23868_v52  ;;  %v18570_v16 = vsub.f32 %v18004_v26, %v23870_v10  ;;  %v23873_v55 = vld [vmem:[#allocation126_spill] sm:$0xff]  ;;  %v3635_v52 = vand.u32 4294901760, %v3634_v4  ;;  %v23876_v10 = vld [vmem:[#allocation123_spill] sm:$0xff]  ;;  %12205 = vmatpush1.bf16.msra.mxu1 %v12204_v3 }
 0x307   :  { %v18575_v53 = vsub.f32 %v18009_v27, %v23871_v45  ;;  %3155 = vmatprep.mubr.f32.mxu1 %v23873_v55  ;;  %v3647_v57 = vand.u32 4294901760, %v3646_v5  ;;  %v23874_v24 = vand.u32 4294901760, %v18026_v43  ;;  %v23875_v17 = vand.u32 4294901760, %v18031_v56  ;;  %8385 = vmatprep.mubr.f32.mxu0 %v23876_v10  ;;  %v23880_v10 = vld [vmem:[#allocation150_spill] sm:$0xff] }
 0x308   :  { %v12208_v27 = vpack.c.bf16 %v3629_v44, %v3617_v23  ;;  %v3658_v30 = vsub.f32 %v18517_v20, %v22528_v32  ;;  %v3670_v4 = vsub.f32 %v18522_v62, %v22527_v34  ;;  %v3641_v5 = vand.u32 4294901760, %v3640_v59  ;;  %v23877_v44 = vld [vmem:[#allocation128_spill] sm:$0xff]  ;;  %v23882_v32 = vld [vmem:[#allocation147_spill] sm:$0xff]  ;;  %12781 = vmatpush1.bf16.msra.mxu0 %v12204_v3  ;;  %12207 = vmatprep.subr.bf16.mxu1 %v12206_v19 }
 0x309   :  { %v18582_v54 = vsub.f32 %v18026_v43, %v23874_v24  ;;  %v18587_v26 = vsub.f32 %v18031_v56, %v23875_v17  ;;  %v22535_v43 = vand.u32 4294901760, %v18551_v6  ;;  %v3653_v45 = vand.u32 4294901760, %v3652_v40  ;;  %3161 = vmatmul.mubr.f32.gmra.mrb[58].mxu1 %v23877_v44  ;;  %v23879_v17 = vld [vmem:[#allocation125_spill] sm:$0xff]  ;;  %12783 = vmatprep.subr.bf16.mxu0 %v12206_v19 }
 0x30a   :  { %v3664_v56 = vsub.f32 %v18529_v8, %v22525_v2  ;;  %v22534_v23 = vand.u32 4294901760, %v18563_v22  ;;  %v3676_v55 = vsub.f32 %v18535_v46, %v22526_v21  ;;  %v22532_v24 = vand.u32 4294901760, %v18570_v16  ;;  %8391 = vmatmul.mubr.f32.gmra.mrb[8].mxu0 %v23879_v17  ;;  %3171 = vmatprep.mubr.f32.mxu1 %v23880_v10 }
 0x30b   :  { %v22530_v1 = vand.u32 4294901760, %v18575_v53  ;;  %v23878_v59 = vand.u32 4294901760, %v18048_v33  ;;  %v12210_v2 = vpack.c.bf16 %v3647_v57, %v3635_v52  ;;  %v22531_v49 = vand.u32 4294901760, %v18582_v54  ;;  %8401 = vmatprep.mubr.f32.mxu0 %v23882_v32  ;;  %12209 = vmatpush1.bf16.msra.mxu1 %v12208_v27 }
 0x30c   :  { %v22533_v44 = vand.u32 4294901760, %v18587_v26  ;;  %v23881_v21 = vand.u32 4294901760, %v18063_v35  ;;  %v3659_v38 = vand.u32 4294901760, %v3658_v30  ;;  %v23883_v52 = vand.u32 4294901760, %v18068_v28  ;;  %v23885_v30 = vld [vmem:[#allocation152_spill] sm:$0xff]  ;;  %12785 = vmatpush1.bf16.msra.mxu0 %v12208_v27 }
 0x30d   :  { %v18610_v40 = vsub.f32 %v18048_v33, %v23878_v59  ;;  %v3671_v33 = vand.u32 4294901760, %v3670_v4  ;;  %v3682_v59 = vsub.f32 %v18551_v6, %v22535_v43  ;;  %v12212_v17 = vpack.c.bf16 %v3653_v45, %v3641_v5  ;;  %3177 = vmatmul.mubr.f32.gmra.mrb[60].mxu1 %v23885_v30  ;;  %v23886_v45 = vld [vmem:[#allocation151_spill] sm:$0xff]  ;;  %v23889_v30 = vld [vmem:[#allocation153_spill] sm:$0xff]  ;;  %12211 = vmatprep.subr.bf16.mxu1 %v12210_v2  ;;  %v23895_v43 = vld [vmem:[#allocation174_spill] sm:$0xff] }
 0x30e   :  { %v18619_v34 = vsub.f32 %v18063_v35, %v23881_v21  ;;  %v18628_v57 = vsub.f32 %v18068_v28, %v23883_v52  ;;  %v3665_v10 = vand.u32 4294901760, %v3664_v56  ;;  %v3694_v35 = vsub.f32 %v18563_v22, %v22534_v23  ;;  %8407 = vmatmul.mubr.f32.gmra.mrb[10].mxu0 %v23886_v45  ;;  %v23887_v56 = vld [vmem:[#allocation155_spill] sm:$0xff]  ;;  %12787 = vmatprep.subr.bf16.mxu0 %v12210_v2  ;;  %v23896_v2 = vld [vmem:[#allocation173_spill] sm:$0xff] }
 0x30f   :  { %v23884_v32 = vand.u32 4294901760, %v18073_v13  ;;  %v3677_v4 = vand.u32 4294901760, %v3676_v55  ;;  %v3688_v28 = vsub.f32 %v18570_v16, %v22532_v24  ;;  %v3700_v3 = vsub.f32 %v18575_v53, %v22530_v1  ;;  %3187 = vmatprep.mubr.f32.mxu1 %v23887_v56  ;;  %8417 = vmatprep.mubr.f32.mxu0 %v23889_v30  ;;  %v23894_v30 = vld [vmem:[#allocation156_spill] sm:$0xff] }
 0x310   :  { %v22545_v5 = vand.u32 4294901760, %v18610_v40  ;;  %v3718_v19 = vsub.f32 %v18587_v26, %v22533_v44  ;;  %v22537_v55 = vand.u32 4294901760, %v18619_v34  ;;  %v23888_v52 = vand.u32 4294901760, %v18102_v29  ;;  %12213 = vmatpush1.bf16.msra.mxu1 %v12212_v17  ;;  %12789 = vmatpush1.bf16.msra.mxu0 %v12212_v17 }
 0x311   :  { %v18636_v21 = vsub.f32 %v18073_v13, %v23884_v32  ;;  %v3706_v13 = vsub.f32 %v18582_v54, %v22531_v49  ;;  %v12214_v45 = vpack.c.bf16 %v3671_v33, %v3659_v38  ;;  %v3683_v56 = vand.u32 4294901760, %v3682_v59  ;;  %v23893_v59 = vld [vmem:[#allocation169_spill] sm:$0xff] }
 0x312   :  { %v18658_v32 = vsub.f32 %v18102_v29, %v23888_v52  ;;  %v22536_v1 = vand.u32 4294901760, %v18628_v57  ;;  %v23890_v49 = vand.u32 4294901760, %v18107_v12  ;;  %v3695_v44 = vand.u32 4294901760, %v3694_v35  ;;  %3193 = vmatmul.mubr.f32.gmra.mrb[62].mxu1 %v23893_v59  ;;  %8423 = vmatmul.mubr.f32.gmra.mrb[12].mxu0 %v23894_v30 }
 0x313   :  { %v22538_v23 = vand.u32 4294901760, %v18636_v21  ;;  %v23891_v29 = vand.u32 4294901760, %v18124_v47  ;;  %v23892_v38 = vand.u32 4294901760, %v18129_v25  ;;  %v3701_v27 = vand.u32 4294901760, %v3700_v3  ;;  %3203 = vmatprep.mubr.f32.mxu1 %v23895_v43  ;;  %8433 = vmatprep.mubr.f32.mxu0 %v23896_v2 }
 0x314   :  { %v18665_v24 = vsub.f32 %v18107_v12, %v23890_v49  ;;  %v12216_v12 = vpack.c.bf16 %v3677_v4, %v3665_v10  ;;  %v3689_v49 = vand.u32 4294901760, %v3688_v28  ;;  %v3712_v35 = vsub.f32 %v18610_v40, %v22545_v5  ;;  %12215 = vmatprep.subr.bf16.mxu1 %v12214_v45  ;;  %12791 = vmatprep.subr.bf16.mxu0 %v12214_v45  ;;  %v23989_v5 = vld [vmem:[#allocation31_spill] sm:$0xff] }
 0x315   :  { %v18671_v52 = vsub.f32 %v18124_v47, %v23891_v29  ;;  %v18676_v33 = vsub.f32 %v18129_v25, %v23892_v38  ;;  %v3707_v47 = vand.u32 4294901760, %v3706_v13  ;;  %v3719_v29 = vand.u32 4294901760, %v3718_v19 }
 0x316   :  { %v3724_v25 = vsub.f32 %v18619_v34, %v22537_v55  ;;  %v22544_v38 = vand.u32 4294901760, %v18658_v32  ;;  %v3730_v10 = vsub.f32 %v18628_v57, %v22536_v1  ;;  %v22543_v4 = vand.u32 4294901760, %v18665_v24  ;;  %v23899_v1 = vld [vmem:[#allocation177_spill] sm:$0xff]  ;;  %v23901_v55 = vld [vmem:[#allocation191_spill] sm:$0xff]  ;;  %12217 = vmatpush1.bf16.msra.mxu1 %v12216_v12  ;;  %12793 = vmatpush1.bf16.msra.mxu0 %v12216_v12  ;;  %v23905_v12 = vld [vmem:[#allocation210_spill] sm:$0xff] }
 0x317   :  { %v23897_v28 = vand.u32 4294901760, %v18156_v0  ;;  %v23898_v3 = vand.u32 4294901760, %v18161_v31  ;;  %v12218_v19 = vpack.c.bf16 %v3695_v44, %v3683_v56  ;;  %v3742_v59 = vsub.f32 %v18636_v21, %v22538_v23  ;;  %3209 = vmatmul.mubr.f32.gmra.mrb[64].mxu1 %v23899_v1  ;;  %v23902_v56 = vld [vmem:[#allocation185_spill] sm:$0xff] }
 0x318   :  { %v22542_v30 = vand.u32 4294901760, %v18671_v52  ;;  %v22539_v2 = vand.u32 4294901760, %v18676_v33  ;;  %3219 = vmatprep.mubr.f32.mxu1 %v23901_v55  ;;  %v3713_v17 = vand.u32 4294901760, %v3712_v35  ;;  %v3736_v44 = vsub.f32 %v18658_v32, %v22544_v38 }
 0x319   :  { %v18696_v43 = vsub.f32 %v18156_v0, %v23897_v28  ;;  %v18701_v13 = vsub.f32 %v18161_v31, %v23898_v3  ;;  %v12220_v0 = vpack.c.bf16 %v3701_v27, %v3689_v49  ;;  %v23900_v28 = vld [vmem:[#allocation176_spill] sm:$0xff]  ;;  %v12222_v31 = vpack.c.bf16 %v3719_v29, %v3707_v47  ;;  %12219 = vmatprep.subr.bf16.mxu1 %v12218_v19  ;;  %v23903_v29 = vld [vmem:[#allocation195_spill] sm:$0xff] }
 0x31a   :  { %8439 = vmatmul.mubr.f32.gmra.mrb[14].mxu0 %v23900_v28  ;;  %v3725_v3 = vand.u32 4294901760, %v3724_v25  ;;  %v3731_v23 = vand.u32 4294901760, %v3730_v10  ;;  %v3748_v1 = vsub.f32 %v18665_v24, %v22543_v4  ;;  %v3743_v55 = vand.u32 4294901760, %v3742_v59  ;;  %12795 = vmatprep.subr.bf16.mxu0 %v12218_v19  ;;  %v23904_v25 = vld [vmem:[#allocation192_spill] sm:$0xff]  ;;  %v23906_v28 = vld [vmem:[#allocation206_spill] sm:$0xff]  ;;  %v23987_v4 = vld [vmem:[#allocation29_spill] sm:$0xff] }
 0x31b   :  { %8449 = vmatprep.mubr.f32.mxu0 %v23902_v56  ;;  %v22541_v45 = vand.u32 4294901760, %v18696_v43  ;;  %v22540_v49 = vand.u32 4294901760, %v18701_v13  ;;  %v3754_v27 = vsub.f32 %v18671_v52, %v22542_v30  ;;  %v3766_v35 = vsub.f32 %v18676_v33, %v22539_v2  ;;  %3225 = vmatmul.mubr.f32.gmra.mrb[66].mxu1 %v23903_v29  ;;  %v23986_v30 = vld [vmem:[#allocation70_spill] sm:$0xff] }
 0x31c   :  { %v18728_v47 = vsub.f32 %v18198_v15, %v18213_v42  ;;  %3235 = vmatprep.mubr.f32.mxu1 %v23905_v12  ;;  %v12224_v10 = vpack.c.bf16 %v3725_v3, %v3713_v17  ;;  %v3737_v59 = vand.u32 4294901760, %v3736_v44  ;;  %12221 = vmatpush1.bf16.msra.mxu1 %v12220_v0  ;;  %v3749_v56 = vand.u32 4294901760, %v3748_v1  ;;  %v23907_v1 = vld [vmem:[#allocation213_spill] sm:$0xff]  ;;  %v23909_v12 = vld [vmem:[#allocation222_spill] sm:$0xff] }
 0x31d   :  { %v3760_v2 = vsub.f32 %v18696_v43, %v22541_v45  ;;  %v3772_v15 = vsub.f32 %v18701_v13, %v22540_v49  ;;  %v18742_v19 = vsub.f32 %v18218_v58, %v18227_v63  ;;  %12797 = vmatpush1.bf16.msra.mxu0 %v12220_v0  ;;  %12223 = vmatprep.subr.bf16.mxu1 %v12222_v31  ;;  %v3755_v3 = vand.u32 4294901760, %v3754_v27  ;;  %v23985_v45 = vld [vmem:[#allocation73_spill] sm:$0xff] }
 0x31e   :  { %8455 = vmatmul.mubr.f32.gmra.mrb[16].mxu0 %v23904_v25  ;;  %v12226_v17 = vpack.c.bf16 %v3743_v55, %v3731_v23  ;;  %v3767_v44 = vand.u32 4294901760, %v3766_v35  ;;  %v18745_v29 = vand.u32 4294901760, %v18728_v47  ;;  %12799 = vmatprep.subr.bf16.mxu0 %v12222_v31  ;;  %v23908_v25 = vld [vmem:[#allocation208_spill] sm:$0xff]  ;;  %v12228_v58 = vpack.c.bf16 %v3749_v56, %v3737_v59  ;;  %v23913_v35 = vld [vmem:[#allocation227_spill] sm:$0xff]  ;;  %v23916_v56 = vld [vmem:[#allocation245_spill] sm:$0xff] }
 0x31f   :  { %8465 = vmatprep.mubr.f32.mxu0 %v23906_v28  ;;  %3241 = vmatmul.mubr.f32.gmra.mrb[68].mxu1 %v23907_v1  ;;  %v23910_v28 = vld [vmem:[#allocation217_spill] sm:$0xff]  ;;  %v3761_v49 = vand.u32 4294901760, %v3760_v2  ;;  %v3773_v0 = vand.u32 4294901760, %v3772_v15  ;;  %v18752_v23 = vand.u32 4294901760, %v18742_v19  ;;  %v23912_v31 = vld [vmem:[#allocation232_spill] sm:$0xff]  ;;  %v23914_v1 = vld [vmem:[#allocation242_spill] sm:$0xff]  ;;  %v12244_v38 = vpack.c.bf16 %v23987_v4, %v18334_v11 }
 0x320   :  { %3251 = vmatprep.mubr.f32.mxu1 %v23909_v12  ;;  %12225 = vmatpush1.bf16.msra.mxu1 %v12224_v10  ;;  %v12230_v55 = vpack.c.bf16 %v3767_v44, %v3755_v3  ;;  %v3778_v27 = vsub.f32 %v18728_v47, %v18745_v29  ;;  %v23917_v15 = vld [vmem:[#allocation239_spill] sm:$0xff]  ;;  %v23919_v3 = vld [vmem:[#allocation249_spill] sm:$0xff] }
 0x321   :  { %23911 = vst [vmem:[#allocation437_spill] sm:$0xff] %v18752_v23  ;;  %12801 = vmatpush1.bf16.msra.mxu0 %v12224_v10  ;;  %12227 = vmatprep.subr.bf16.mxu1 %v12226_v17  ;;  %v12232_v2 = vpack.c.bf16 %v3773_v0, %v3761_v49  ;;  %v3784_v59 = vsub.f32 %v18742_v19, %v18752_v23  ;;  %v23920_v49 = vld [vmem:[#allocation9_spill] sm:$0xff]  ;;  %v23923_v0 = vld [vmem:[#allocation275_spill] sm:$0xff] }
 0x322   :  { %8471 = vmatmul.mubr.f32.gmra.mrb[18].mxu0 %v23908_v25  ;;  %12803 = vmatprep.subr.bf16.mxu0 %v12226_v17  ;;  %v23915_v25 = vld [vmem:[#allocation238_spill] sm:$0xff]  ;;  %v3779_v10 = vand.u32 4294901760, %v3778_v27  ;;  %v23918_v17 = vld [vmem:[#allocation255_spill] sm:$0xff]  ;;  %v12234_v12 = vpack.c.bf16 %v23920_v49, %v18112_v50 }
 0x323   :  { %8481 = vmatprep.mubr.f32.mxu0 %v23910_v28  ;;  %3257 = vmatmul.mubr.f32.gmra.mrb[70].mxu1 %v23912_v31  ;;  %v3785_v44 = vand.u32 4294901760, %v3784_v59  ;;  %v23921_v28 = vld [vmem:[#allocation268_spill] sm:$0xff]  ;;  %v23925_v27 = vld [vmem:[#allocation278_spill] sm:$0xff]  ;;  %v23926_v31 = vld [vmem:[#allocation277_spill] sm:$0xff] }
 0x324   :  { %3267 = vmatprep.mubr.f32.mxu1 %v23914_v1  ;;  %12229 = vmatpush1.bf16.msra.mxu1 %v12228_v58  ;;  %v23928_v1 = vld [vmem:[#allocation287_spill] sm:$0xff]  ;;  %v23931_v59 = vld [vmem:[#allocation306_spill] sm:$0xff] }
 0x325   :  { %12805 = vmatpush1.bf16.msra.mxu0 %v12228_v58  ;;  %12231 = vmatprep.subr.bf16.mxu1 %v12230_v55  ;;  %v23922_v58 = vld [vmem:[#allocation259_spill] sm:$0xff] }
 0x326   :  { %8487 = vmatmul.mubr.f32.gmra.mrb[20].mxu0 %v23913_v35  ;;  %12807 = vmatprep.subr.bf16.mxu0 %v12230_v55  ;;  %v23924_v55 = vld [vmem:[#allocation272_spill] sm:$0xff] }
 0x327   :  { %8497 = vmatprep.mubr.f32.mxu0 %v23915_v25  ;;  %3273 = vmatmul.mubr.f32.gmra.mrb[72].mxu1 %v23916_v56  ;;  %v23927_v35 = vld [vmem:[#allocation300_spill] sm:$0xff]  ;;  %v23929_v25 = vld [vmem:[#allocation301_spill] sm:$0xff] }
 0x328   :  { %3283 = vmatprep.mubr.f32.mxu1 %v23918_v17  ;;  %12233 = vmatpush1.bf16.msra.mxu1 %v12232_v2  ;;  %v23933_v56 = vld [vmem:[#allocation309_spill] sm:$0xff]  ;;  %v23935_v17 = vld [vmem:[#allocation330_spill] sm:$0xff] }
 0x329   :  { %12809 = vmatpush1.bf16.msra.mxu0 %v12232_v2  ;;  %3780 = vmatprep.subr.mxu1 %v3779_v10  ;;  %v23930_v2 = vld [vmem:[#allocation297_spill] sm:$0xff] }
 0x32a   :  { %8503 = vmatmul.mubr.f32.gmra.mrb[22].mxu0 %v23917_v15  ;;  %9010 = vmatprep.subr.mxu0 %v3779_v10  ;;  %v23932_v10 = vld [vmem:[#allocation305_spill] sm:$0xff]  ;;  %v23934_v15 = vld [vmem:[#allocation308_spill] sm:$0xff] }
 0x32b   :  { %8513 = vmatprep.mubr.f32.mxu0 %v23919_v3  ;;  %3289 = vmatmul.mubr.f32.gmra.mrb[74].mxu1 %v23921_v28  ;;  %v23936_v3 = vld [vmem:[#allocation323_spill] sm:$0xff]  ;;  %v23939_v28 = vld [vmem:[#allocation338_spill] sm:$0xff] }
 0x32c   :  { %3299 = vmatprep.mubr.f32.mxu1 %v23923_v0  ;;  %3786 = vmatpush1.msra.mxu1 %v3785_v44  ;;  %v23941_v0 = vld [vmem:[#allocation342_spill] sm:$0xff] }
 0x32d   :  { %9016 = vmatpush1.msra.mxu0 %v3785_v44  ;;  %12235 = vmatprep.subr.bf16.mxu1 %v12234_v12  ;;  %v23937_v44 = vld [vmem:[#allocation332_spill] sm:$0xff] }
 0x32e   :  { %8519 = vmatmul.mubr.f32.gmra.mrb[24].mxu0 %v23922_v58  ;;  %12811 = vmatprep.subr.bf16.mxu0 %v12234_v12  ;;  %v23938_v12 = vld [vmem:[#allocation331_spill] sm:$0xff]  ;;  %v23940_v58 = vld [vmem:[#allocation336_spill] sm:$0xff] }
 0x32f   :  { %8529 = vmatprep.mubr.f32.mxu0 %v23924_v55  ;;  %3305 = vmatmul.mubr.f32.gmra.mrb[76].mxu1 %v23925_v27  ;;  %v23942_v55 = vld [vmem:[#allocation340_spill] sm:$0xff]  ;;  %v23943_v27 = vld [vmem:[#allocation361_spill] sm:$0xff] }
 0x330   :  { %3315 = vmatprep.mubr.f32.mxu1 %v23927_v35  ;;  %v23945_v35 = vld [vmem:[#allocation364_spill] sm:$0xff] }
 0x332   :  { %8535 = vmatmul.mubr.f32.gmra.mrb[26].mxu0 %v23926_v31  ;;  %v23944_v31 = vld [vmem:[#allocation353_spill] sm:$0xff] }
 0x333   :  { %8545 = vmatprep.mubr.f32.mxu0 %v23928_v1  ;;  %3321 = vmatmul.mubr.f32.gmra.mrb[78].mxu1 %v23929_v25  ;;  %v23946_v1 = vld [vmem:[#allocation362_spill] sm:$0xff] }
 0x334   :  { %3331 = vmatprep.mubr.f32.mxu1 %v23931_v59  ;;  %v23947_v25 = vld [vmem:[#allocation370_spill] sm:$0xff]  ;;  %v23949_v59 = vld [vmem:[#allocation372_spill] sm:$0xff] }
 0x336   :  { %8551 = vmatmul.mubr.f32.gmra.mrb[28].mxu0 %v23930_v2  ;;  %v23948_v2 = vld [vmem:[#allocation368_spill] sm:$0xff] }
 0x337   :  { %8561 = vmatprep.mubr.f32.mxu0 %v23932_v10  ;;  %3337 = vmatmul.mubr.f32.gmra.mrb[80].mxu1 %v23933_v56  ;;  %v23950_v10 = vld [vmem:[#allocation371_spill] sm:$0xff] }
 0x338   :  { %3347 = vmatprep.mubr.f32.mxu1 %v23935_v17  ;;  %v23951_v56 = vld [vmem:[#allocation395_spill] sm:$0xff]  ;;  %v23953_v17 = vld [vmem:[#allocation398_spill] sm:$0xff] }
 0x33a   :  { %8567 = vmatmul.mubr.f32.gmra.mrb[30].mxu0 %v23934_v15  ;;  %v23952_v15 = vld [vmem:[#allocation392_spill] sm:$0xff] }
 0x33b   :  { %8577 = vmatprep.mubr.f32.mxu0 %v23936_v3  ;;  %3353 = vmatmul.mubr.f32.gmra.mrb[82].mxu1 %v23937_v44  ;;  %v23954_v3 = vld [vmem:[#allocation396_spill] sm:$0xff]  ;;  %v23955_v44 = vld [vmem:[#allocation403_spill] sm:$0xff] }
 0x33c   :  { %3363 = vmatprep.mubr.f32.mxu1 %v23939_v28  ;;  %v23957_v28 = vld [vmem:[#allocation405_spill] sm:$0xff] }
 0x33e   :  { %8583 = vmatmul.mubr.f32.gmra.mrb[32].mxu0 %v23938_v12  ;;  %v23956_v12 = vld [vmem:[#allocation401_spill] sm:$0xff] }
 0x33f   :  { %8593 = vmatprep.mubr.f32.mxu0 %v23940_v58  ;;  %3369 = vmatmul.mubr.f32.gmra.mrb[84].mxu1 %v23941_v0  ;;  %v23958_v58 = vld [vmem:[#allocation404_spill] sm:$0xff]  ;;  %v23959_v0 = vld [vmem:[#allocation426_spill] sm:$0xff] }
 0x340   :  { %3379 = vmatprep.mubr.f32.mxu1 %v23943_v27  ;;  %v23961_v27 = vld [vmem:[#allocation430_spill] sm:$0xff] }
 0x342   :  { %8599 = vmatmul.mubr.f32.gmra.mrb[34].mxu0 %v23942_v55  ;;  %v23960_v55 = vld [vmem:[#allocation423_spill] sm:$0xff] }
 0x343   :  { %8609 = vmatprep.mubr.f32.mxu0 %v23944_v31  ;;  %3385 = vmatmul.mubr.f32.gmra.mrb[86].mxu1 %v23945_v35  ;;  %v23962_v31 = vld [vmem:[#allocation427_spill] sm:$0xff]  ;;  %v23963_v35 = vld [vmem:[#allocation438_spill] sm:$0xff] }
 0x344   :  { %3395 = vmatprep.mubr.f32.mxu1 %v23947_v25  ;;  %v23965_v25 = vld [vmem:[#allocation442_spill] sm:$0xff] }
 0x346   :  { %8615 = vmatmul.mubr.f32.gmra.mrb[36].mxu0 %v23946_v1  ;;  %v23964_v1 = vld [vmem:[#allocation434_spill] sm:$0xff] }
 0x347   :  { %8625 = vmatprep.mubr.f32.mxu0 %v23948_v2  ;;  %3401 = vmatmul.mubr.f32.gmra.mrb[88].mxu1 %v23949_v59  ;;  %v23966_v2 = vld [vmem:[#allocation441_spill] sm:$0xff]  ;;  %v23967_v59 = vld [vmem:[#allocation452_spill] sm:$0xff] }
 0x348   :  { %3411 = vmatprep.mubr.f32.mxu1 %v23951_v56  ;;  %v23969_v56 = vld [vmem:[#allocation454_spill] sm:$0xff] }
 0x34a   :  { %8631 = vmatmul.mubr.f32.gmra.mrb[38].mxu0 %v23950_v10  ;;  %v23968_v10 = vld [vmem:[#allocation450_spill] sm:$0xff] }
 0x34b   :  { %8641 = vmatprep.mubr.f32.mxu0 %v23952_v15  ;;  %3417 = vmatmul.mubr.f32.gmra.mrb[90].mxu1 %v23953_v17  ;;  %v23970_v15 = vld [vmem:[#allocation453_spill] sm:$0xff]  ;;  %v23971_v17 = vld [vmem:[#allocation46_spill] sm:$0xff] }
 0x34c   :  { %3427 = vmatprep.mubr.f32.mxu1 %v23955_v44  ;;  %v23973_v44 = vld [vmem:[#allocation21_spill] sm:$0xff] }
 0x34e   :  { %8647 = vmatmul.mubr.f32.gmra.mrb[40].mxu0 %v23954_v3  ;;  %v23972_v3 = vld [vmem:[#allocation20_spill] sm:$0xff] }
 0x34f   :  { %8657 = vmatprep.mubr.f32.mxu0 %v23956_v12  ;;  %3433 = vmatmul.mubr.f32.gmra.mrb[92].mxu1 %v23957_v28  ;;  %v12236_v12 = vpack.c.bf16 %v23973_v44, %v23972_v3  ;;  %v23974_v28 = vld [vmem:[#allocation44_spill] sm:$0xff] }
 0x350   :  { %3443 = vmatprep.mubr.f32.mxu1 %v23959_v0  ;;  %v23976_v0 = vld [vmem:[#allocation25_spill] sm:$0xff] }
 0x352   :  { %8663 = vmatmul.mubr.f32.gmra.mrb[42].mxu0 %v23958_v58  ;;  %v23975_v58 = vld [vmem:[#allocation22_spill] sm:$0xff] }
 0x353   :  { %8673 = vmatprep.mubr.f32.mxu0 %v23960_v55  ;;  %3449 = vmatmul.mubr.f32.gmra.mrb[94].mxu1 %v23961_v27  ;;  %v12238_v55 = vpack.c.bf16 %v23976_v0, %v23975_v58  ;;  %v23977_v27 = vld [vmem:[#allocation48_spill] sm:$0xff] }
 0x354   :  { %3459 = vmatprep.mubr.f32.mxu1 %v23963_v35  ;;  %v23979_v35 = vld [vmem:[#allocation67_spill] sm:$0xff] }
 0x356   :  { %8679 = vmatmul.mubr.f32.gmra.mrb[44].mxu0 %v23962_v31  ;;  %v23978_v31 = vld [vmem:[#allocation45_spill] sm:$0xff] }
 0x357   :  { %8689 = vmatprep.mubr.f32.mxu0 %v23964_v1  ;;  %3465 = vmatmul.mubr.f32.gmra.mrb[96].mxu1 %v23965_v25  ;;  %v23980_v1 = vld [vmem:[#allocation63_spill] sm:$0xff]  ;;  %v12240_v25 = vpack.c.bf16 %v18301_v14, %v18292_v18 }
 0x358   :  { %3475 = vmatprep.mubr.f32.mxu1 %v23967_v59  ;;  %v23982_v59 = vld [vmem:[#allocation27_spill] sm:$0xff] }
 0x35a   :  { %8695 = vmatmul.mubr.f32.gmra.mrb[46].mxu0 %v23966_v2  ;;  %v23981_v2 = vld [vmem:[#allocation26_spill] sm:$0xff] }
 0x35b   :  { %8705 = vmatprep.mubr.f32.mxu0 %v23968_v10  ;;  %3481 = vmatmul.mubr.f32.gmra.mrb[98].mxu1 %v23969_v56  ;;  %v12242_v10 = vpack.c.bf16 %v23982_v59, %v23981_v2  ;;  %v23983_v56 = vld [vmem:[#allocation65_spill] sm:$0xff] }
 0x35c   :  { %3802 = vmatprep.mubr.f32.mxu1 %v23971_v17  ;;  %v24003_v17 = vld [vmem:[#allocation435_spill] sm:$0xff] }
 0x35e   :  { %8711 = vmatmul.mubr.f32.gmra.mrb[48].mxu0 %v23970_v15  ;;  %v23984_v15 = vld [vmem:[#allocation64_spill] sm:$0xff] }
 0x35f   :  { %9032 = vmatprep.mubr.f32.mxu0 %v23974_v28  ;;  %3804 = vmatmul.mubr.f32.vlgmr.msra.gmra.mrb[50].mxu1 %v23977_v27 }
 0x360   :  { %12237 = vmatpush1.bf16.msra.mxu1 %v12236_v12  ;;  %3810 = vmatprep.mubr.f32.mxu1 %v23979_v35  ;;  %v23990_v35 = vld [vmem:[#allocation90_spill] sm:$0xff] }
 0x361   :  { %12239 = vmatprep.subr.bf16.mxu1 %v12238_v55 }
 0x362   :  { %9034 = vmatmul.mubr.f32.vlgmr.msra.gmra.mrb[0].mxu0 %v23978_v31 }
 0x363   :  { %9040 = vmatprep.mubr.f32.mxu0 %v23980_v1  ;;  %12813 = vmatpush1.bf16.msra.mxu0 %v12236_v12  ;;  %v23988_v12 = vld [vmem:[#allocation30_spill] sm:$0xff] }
 0x364   :  { %3812 = vmatmul.mubr.f32.gmra.mrb[52].mxu1 %v23983_v56  ;;  %12815 = vmatprep.subr.bf16.mxu0 %v12238_v55  ;;  %v12246_v1 = vpack.c.bf16 %v23989_v5, %v23988_v12  ;;  %v23991_v56 = vld [vmem:[#allocation74_spill] sm:$0xff]  ;;  %v23992_v55 = vld [vmem:[#allocation95_spill] sm:$0xff]  ;;  %v18846_v31 = vpop.f32.mrb[0].mxu1 }
 0x365   :  { %3818 = vmatprep.mubr.f32.mxu1 %v23985_v45  ;;  %12241 = vmatpush1.bf16.msra.mxu1 %v12240_v25  ;;  %23995 = vst [vmem:[#allocation24_spill] sm:$0xff] %v18846_v31  ;;  %v18850_v28 = vpop.f32.mrb[1].mxu1 }
 0x366   :  { %9042 = vmatmul.mubr.f32.gmra.mrb[2].mxu0 %v23984_v15  ;;  %12243 = vmatprep.subr.bf16.mxu1 %v12242_v10  ;;  %v23993_v15 = vld [vmem:[#allocation94_spill] sm:$0xff]  ;;  %23997 = vst [vmem:[#allocation28_spill] sm:$0xff] %v18850_v28  ;;  %v12254_v28 = vpack.c.bf16 %v18434_v41, %v18429_v9 }
 0x367   :  { %9048 = vmatprep.mubr.f32.mxu0 %v23986_v30  ;;  %12817 = vmatpush1.bf16.msra.mxu0 %v12240_v25  ;;  %v23994_v30 = vld [vmem:[#allocation33_spill] sm:$0xff]  ;;  %v23996_v25 = vld [vmem:[#allocation34_spill] sm:$0xff] }
 0x368   :  { %3820 = vmatmul.mubr.f32.gmra.mrb[54].mxu1 %v23990_v35  ;;  %12819 = vmatprep.subr.bf16.mxu0 %v12242_v10  ;;  %v12248_v45 = vpack.c.bf16 %v23994_v30, %v18372_v61  ;;  %v12250_v27 = vpack.c.bf16 %v23996_v25, %v18387_v39  ;;  %v23998_v10 = vld [vmem:[#allocation98_spill] sm:$0xff] }
 0x369   :  { %3826 = vmatprep.mubr.f32.mxu1 %v23992_v55  ;;  %12245 = vmatpush1.bf16.msra.mxu1 %v12244_v38  ;;  %v24000_v55 = vld [vmem:[#allocation113_spill] sm:$0xff]  ;;  %v24002_v35 = vld [vmem:[#allocation402_spill] sm:$0xff] }
 0x36a   :  { %9050 = vmatmul.mubr.f32.gmra.mrb[4].mxu0 %v23991_v56  ;;  %12247 = vmatprep.subr.bf16.mxu1 %v12246_v1  ;;  %v23999_v56 = vld [vmem:[#allocation97_spill] sm:$0xff]  ;;  %v12252_v31 = vpack.c.bf16 %v24003_v17, %v24002_v35 }
 0x36b   :  { %9056 = vmatprep.mubr.f32.mxu0 %v23993_v15  ;;  %12821 = vmatpush1.bf16.msra.mxu0 %v12244_v38  ;;  %v24001_v15 = vld [vmem:[#allocation108_spill] sm:$0xff]  ;;  %v18858_v38 = vpop.f32.mrb[2].mxu1 }
 0x36c   :  { %3828 = vmatmul.mubr.f32.gmra.mrb[56].mxu1 %v23998_v10  ;;  %12823 = vmatprep.subr.bf16.mxu0 %v12246_v1  ;;  %24004 = vst [vmem:[#allocation32_spill] sm:$0xff] %v18858_v38  ;;  %v18862_v23 = vpop.f32.mrb[3].mxu1  ;;  %v24006_v1 = vld [vmem:[#allocation119_spill] sm:$0xff]  ;;  %v12256_v38 = vpack.c.bf16 %v18454_v37, %v18442_v51 }
 0x36d   :  { %3834 = vmatprep.mubr.f32.mxu1 %v24000_v55  ;;  %12249 = vmatpush1.bf16.msra.mxu1 %v12248_v45  ;;  %24005 = vst [vmem:[#allocation35_spill] sm:$0xff] %v18862_v23  ;;  %v24008_v55 = vld [vmem:[#allocation129_spill] sm:$0xff]  ;;  %v12258_v23 = vpack.c.bf16 %v18481_v36, %v18476_v7 }
 0x36e   :  { %9058 = vmatmul.mubr.f32.gmra.mrb[6].mxu0 %v23999_v56  ;;  %12251 = vmatprep.subr.bf16.mxu1 %v12250_v27  ;;  %v24007_v56 = vld [vmem:[#allocation109_spill] sm:$0xff] }
 0x36f   :  { %9064 = vmatprep.mubr.f32.mxu0 %v24001_v15  ;;  %12825 = vmatpush1.bf16.msra.mxu0 %v12248_v45  ;;  %v24009_v15 = vld [vmem:[#allocation127_spill] sm:$0xff]  ;;  %v18870_v45 = vpop.f32.mrb[4].mxu1 }
 0x370   :  { %3836 = vmatmul.mubr.f32.gmra.mrb[58].mxu1 %v24006_v1  ;;  %12827 = vmatprep.subr.bf16.mxu0 %v12250_v27  ;;  %24010 = vst [vmem:[#allocation36_spill] sm:$0xff] %v18870_v45  ;;  %v18874_v10 = vpop.f32.mrb[5].mxu1  ;;  %v24012_v27 = vld [vmem:[#allocation132_spill] sm:$0xff]  ;;  %v12260_v45 = vpack.c.bf16 %v18494_v48, %v18489_v60 }
 0x371   :  { %3842 = vmatprep.mubr.f32.mxu1 %v24008_v55  ;;  %12253 = vmatpush1.bf16.msra.mxu1 %v12252_v31  ;;  %24011 = vst [vmem:[#allocation37_spill] sm:$0xff] %v18874_v10  ;;  %v24014_v55 = vld [vmem:[#allocation138_spill] sm:$0xff]  ;;  %v12262_v10 = vpack.c.bf16 %v18522_v62, %v18517_v20 }
 0x372   :  { %9066 = vmatmul.mubr.f32.gmra.mrb[8].mxu0 %v24007_v56  ;;  %12255 = vmatprep.subr.bf16.mxu1 %v12254_v28  ;;  %v24013_v56 = vld [vmem:[#allocation130_spill] sm:$0xff] }
 0x373   :  { %9072 = vmatprep.mubr.f32.mxu0 %v24009_v15  ;;  %12829 = vmatpush1.bf16.msra.mxu0 %v12252_v31  ;;  %v24015_v15 = vld [vmem:[#allocation135_spill] sm:$0xff]  ;;  %v18882_v31 = vpop.f32.mrb[6].mxu1 }
 0x374   :  { %3844 = vmatmul.mubr.f32.gmra.mrb[60].mxu1 %v24012_v27  ;;  %12831 = vmatprep.subr.bf16.mxu0 %v12254_v28  ;;  %24016 = vst [vmem:[#allocation38_spill] sm:$0xff] %v18882_v31  ;;  %v18886_v1 = vpop.f32.mrb[7].mxu1  ;;  %v24018_v28 = vld [vmem:[#allocation154_spill] sm:$0xff]  ;;  %v12264_v31 = vpack.c.bf16 %v18535_v46, %v18529_v8 }
 0x375   :  { %3850 = vmatprep.mubr.f32.mxu1 %v24014_v55  ;;  %12257 = vmatpush1.bf16.msra.mxu1 %v12256_v38  ;;  %24017 = vst [vmem:[#allocation40_spill] sm:$0xff] %v18886_v1  ;;  %v24020_v55 = vld [vmem:[#allocation159_spill] sm:$0xff]  ;;  %v12266_v1 = vpack.c.bf16 %v18563_v22, %v18551_v6 }
 0x376   :  { %9074 = vmatmul.mubr.f32.gmra.mrb[10].mxu0 %v24013_v56  ;;  %12259 = vmatprep.subr.bf16.mxu1 %v12258_v23  ;;  %v24019_v56 = vld [vmem:[#allocation139_spill] sm:$0xff] }
 0x377   :  { %9080 = vmatprep.mubr.f32.mxu0 %v24015_v15  ;;  %12833 = vmatpush1.bf16.msra.mxu0 %v12256_v38  ;;  %v24021_v15 = vld [vmem:[#allocation158_spill] sm:$0xff]  ;;  %v18894_v38 = vpop.f32.mrb[8].mxu1 }
 0x378   :  { %3852 = vmatmul.mubr.f32.gmra.mrb[62].mxu1 %v24018_v28  ;;  %12835 = vmatprep.subr.bf16.mxu0 %v12258_v23  ;;  %24022 = vst [vmem:[#allocation41_spill] sm:$0xff] %v18894_v38  ;;  %v18898_v27 = vpop.f32.mrb[9].mxu1  ;;  %v24024_v23 = vld [vmem:[#allocation162_spill] sm:$0xff]  ;;  %v12268_v38 = vpack.c.bf16 %v18575_v53, %v18570_v16 }
 0x379   :  { %3858 = vmatprep.mubr.f32.mxu1 %v24020_v55  ;;  %12261 = vmatpush1.bf16.msra.mxu1 %v12260_v45  ;;  %24023 = vst [vmem:[#allocation43_spill] sm:$0xff] %v18898_v27  ;;  %v24026_v55 = vld [vmem:[#allocation179_spill] sm:$0xff]  ;;  %v12270_v27 = vpack.c.bf16 %v18587_v26, %v18582_v54 }
 0x37a   :  { %9082 = vmatmul.mubr.f32.gmra.mrb[12].mxu0 %v24019_v56  ;;  %12263 = vmatprep.subr.bf16.mxu1 %v12262_v10  ;;  %v24025_v56 = vld [vmem:[#allocation161_spill] sm:$0xff] }
 0x37b   :  { %9088 = vmatprep.mubr.f32.mxu0 %v24021_v15  ;;  %12837 = vmatpush1.bf16.msra.mxu0 %v12260_v45  ;;  %v24027_v15 = vld [vmem:[#allocation172_spill] sm:$0xff]  ;;  %v18906_v45 = vpop.f32.mrb[10].mxu1 }
 0x37c   :  { %3860 = vmatmul.mubr.f32.gmra.mrb[64].mxu1 %v24024_v23  ;;  %12839 = vmatprep.subr.bf16.mxu0 %v12262_v10  ;;  %24028 = vst [vmem:[#allocation42_spill] sm:$0xff] %v18906_v45  ;;  %v18910_v28 = vpop.f32.mrb[11].mxu1  ;;  %v24030_v10 = vld [vmem:[#allocation181_spill] sm:$0xff]  ;;  %v12272_v45 = vpack.c.bf16 %v18619_v34, %v18610_v40 }
 0x37d   :  { %3866 = vmatprep.mubr.f32.mxu1 %v24026_v55  ;;  %12265 = vmatpush1.bf16.msra.mxu1 %v12264_v31  ;;  %24029 = vst [vmem:[#allocation56_spill] sm:$0xff] %v18910_v28  ;;  %v24032_v55 = vld [vmem:[#allocation194_spill] sm:$0xff]  ;;  %v12274_v28 = vpack.c.bf16 %v18636_v21, %v18628_v57 }
 0x37e   :  { %9090 = vmatmul.mubr.f32.gmra.mrb[14].mxu0 %v24025_v56  ;;  %12267 = vmatprep.subr.bf16.mxu1 %v12266_v1  ;;  %v24031_v56 = vld [vmem:[#allocation180_spill] sm:$0xff] }
 0x37f   :  { %9096 = vmatprep.mubr.f32.mxu0 %v24027_v15  ;;  %12841 = vmatpush1.bf16.msra.mxu0 %v12264_v31  ;;  %v24033_v15 = vld [vmem:[#allocation189_spill] sm:$0xff]  ;;  %v18918_v31 = vpop.f32.mrb[12].mxu1 }
 0x380   :  { %3868 = vmatmul.mubr.f32.gmra.mrb[66].mxu1 %v24030_v10  ;;  %12843 = vmatprep.subr.bf16.mxu0 %v12266_v1  ;;  %24034 = vst [vmem:[#allocation61_spill] sm:$0xff] %v18918_v31  ;;  %v18922_v23 = vpop.f32.mrb[13].mxu1  ;;  %v24036_v1 = vld [vmem:[#allocation197_spill] sm:$0xff]  ;;  %v12276_v31 = vpack.c.bf16 %v18665_v24, %v18658_v32 }
 0x381   :  { %3874 = vmatprep.mubr.f32.mxu1 %v24032_v55  ;;  %12269 = vmatpush1.bf16.msra.mxu1 %v12268_v38  ;;  %24035 = vst [vmem:[#allocation59_spill] sm:$0xff] %v18922_v23  ;;  %v24038_v55 = vld [vmem:[#allocation207_spill] sm:$0xff]  ;;  %v12278_v23 = vpack.c.bf16 %v18676_v33, %v18671_v52 }
 0x382   :  { %9098 = vmatmul.mubr.f32.gmra.mrb[16].mxu0 %v24031_v56  ;;  %12271 = vmatprep.subr.bf16.mxu1 %v12270_v27  ;;  %v24037_v56 = vld [vmem:[#allocation190_spill] sm:$0xff] }
 0x383   :  { %9104 = vmatprep.mubr.f32.mxu0 %v24033_v15  ;;  %12845 = vmatpush1.bf16.msra.mxu0 %v12268_v38  ;;  %v24039_v15 = vld [vmem:[#allocation202_spill] sm:$0xff]  ;;  %v18930_v38 = vpop.f32.mrb[14].mxu1 }
 0x384   :  { %3876 = vmatmul.mubr.f32.gmra.mrb[68].mxu1 %v24036_v1  ;;  %12847 = vmatprep.subr.bf16.mxu0 %v12270_v27  ;;  %24040 = vst [vmem:[#allocation62_spill] sm:$0xff] %v18930_v38  ;;  %v18934_v10 = vpop.f32.mrb[15].mxu1  ;;  %v24042_v27 = vld [vmem:[#allocation216_spill] sm:$0xff]  ;;  %v12280_v38 = vpack.c.bf16 %v18701_v13, %v18696_v43 }
 0x385   :  { %3882 = vmatprep.mubr.f32.mxu1 %v24038_v55  ;;  %12273 = vmatpush1.bf16.msra.mxu1 %v12272_v45  ;;  %24041 = vst [vmem:[#allocation60_spill] sm:$0xff] %v18934_v10  ;;  %v24044_v55 = vld [vmem:[#allocation225_spill] sm:$0xff]  ;;  %v24048_v10 = vld [vmem:[#allocation228_spill] sm:$0xff] }
 0x386   :  { %9106 = vmatmul.mubr.f32.gmra.mrb[18].mxu0 %v24037_v56  ;;  %12275 = vmatprep.subr.bf16.mxu1 %v12274_v28  ;;  %v24043_v56 = vld [vmem:[#allocation212_spill] sm:$0xff] }
 0x387   :  { %9112 = vmatprep.mubr.f32.mxu0 %v24039_v15  ;;  %12849 = vmatpush1.bf16.msra.mxu0 %v12272_v45  ;;  %v24045_v15 = vld [vmem:[#allocation220_spill] sm:$0xff]  ;;  %v18942_v45 = vpop.f32.mrb[16].mxu1 }
 0x388   :  { %3884 = vmatmul.mubr.f32.gmra.mrb[70].mxu1 %v24042_v27  ;;  %12851 = vmatprep.subr.bf16.mxu0 %v12274_v28  ;;  %24046 = vst [vmem:[#allocation87_spill] sm:$0xff] %v18942_v45  ;;  %v18944_v1 = vpop.f32.mrb[17].mxu1  ;;  %v24049_v28 = vld [vmem:[#allocation221_spill] sm:$0xff]  ;;  %v24155_v27 = vld [vmem:[#allocation102_spill] sm:$0xff] }
 0x389   :  { %3890 = vmatprep.mubr.f32.mxu1 %v24044_v55  ;;  %12277 = vmatpush1.bf16.msra.mxu1 %v12276_v31  ;;  %24047 = vst [vmem:[#allocation82_spill] sm:$0xff] %v18944_v1  ;;  %v24051_v55 = vld [vmem:[#allocation234_spill] sm:$0xff]  ;;  %v24055_v1 = vld [vmem:[#allocation243_spill] sm:$0xff] }
 0x38a   :  { %9114 = vmatmul.mubr.f32.gmra.mrb[20].mxu0 %v24043_v56  ;;  %12279 = vmatprep.subr.bf16.mxu1 %v12278_v23  ;;  %v24050_v56 = vld [vmem:[#allocation241_spill] sm:$0xff] }
 0x38b   :  { %9120 = vmatprep.mubr.f32.mxu0 %v24045_v15  ;;  %12853 = vmatpush1.bf16.msra.mxu0 %v12276_v31  ;;  %v18950_v15 = vpop.f32.mrb[18].mxu1  ;;  %v24054_v31 = vld [vmem:[#allocation251_spill] sm:$0xff] }
 0x38c   :  { %3892 = vmatmul.mubr.f32.gmra.mrb[72].mxu1 %v24048_v10  ;;  %12855 = vmatprep.subr.bf16.mxu0 %v12278_v23  ;;  %24052 = vst [vmem:[#allocation86_spill] sm:$0xff] %v18950_v15  ;;  %v18953_v45 = vpop.f32.mrb[19].mxu1  ;;  %v24056_v23 = vld [vmem:[#allocation258_spill] sm:$0xff] }
 0x38d   :  { %3898 = vmatprep.mubr.f32.mxu1 %v24050_v56  ;;  %12281 = vmatpush1.bf16.msra.mxu1 %v12280_v38  ;;  %24053 = vst [vmem:[#allocation85_spill] sm:$0xff] %v18953_v45  ;;  %v24061_v45 = vld [vmem:[#allocation261_spill] sm:$0xff]  ;;  %v24069_v56 = vld [vmem:[#allocation292_spill] sm:$0xff] }
 0x38e   :  { %9122 = vmatmul.mubr.f32.gmra.mrb[22].mxu0 %v24049_v28  ;;  %4148 = vmatprep.subr.mxu1 %v18728_v47  ;;  %v24057_v28 = vld [vmem:[#allocation254_spill] sm:$0xff] }
 0x38f   :  { %9128 = vmatprep.mubr.f32.mxu0 %v24051_v55  ;;  %12857 = vmatpush1.bf16.msra.mxu0 %v12280_v38  ;;  %v18961_v55 = vpop.f32.mrb[20].mxu1  ;;  %v24059_v38 = vld [vmem:[#allocation51_spill] sm:$0xff] }
 0x390   :  { %3900 = vmatmul.mubr.f32.gmra.mrb[74].mxu1 %v24054_v31  ;;  %9378 = vmatprep.subr.mxu0 %v18728_v47  ;;  %24058 = vst [vmem:[#allocation91_spill] sm:$0xff] %v18961_v55  ;;  %v18965_v15 = vpop.f32.mrb[21].mxu1  ;;  %v24062_v47 = vld [vmem:[#allocation260_spill] sm:$0xff]  ;;  %v24067_v55 = vld [vmem:[#allocation282_spill] sm:$0xff] }
 0x391   :  { %3906 = vmatprep.mubr.f32.mxu1 %v24056_v23  ;;  %4151 = vmatpush1.msra.mxu1 %v18742_v19  ;;  %24060 = vst [vmem:[#allocation89_spill] sm:$0xff] %v18965_v15  ;;  %v24064_v23 = vld [vmem:[#allocation273_spill] sm:$0xff]  ;;  %v24070_v15 = vld [vmem:[#allocation286_spill] sm:$0xff] }
 0x392   :  { %9130 = vmatmul.mubr.f32.gmra.mrb[24].mxu0 %v24055_v1  ;;  %12283 = vmatprep.subr.bf16.mxu1 %v24059_v38  ;;  %v24063_v1 = vld [vmem:[#allocation281_spill] sm:$0xff] }
 0x393   :  { %9136 = vmatprep.mubr.f32.mxu0 %v24057_v28  ;;  %9381 = vmatpush1.msra.mxu0 %v18742_v19  ;;  %v18972_v28 = vpop.f32.mrb[22].mxu1  ;;  %v24068_v19 = vld [vmem:[#allocation280_spill] sm:$0xff] }
 0x394   :  { %3908 = vmatmul.mubr.f32.gmra.mrb[76].mxu1 %v24061_v45  ;;  %12859 = vmatprep.subr.bf16.mxu0 %v24059_v38  ;;  %24065 = vst [vmem:[#allocation105_spill] sm:$0xff] %v18972_v28  ;;  %v18974_v31 = vpop.f32.mrb[23].mxu1  ;;  %v24076_v28 = vld [vmem:[#allocation307_spill] sm:$0xff] }
 0x395   :  { %3914 = vmatprep.mubr.f32.mxu1 %v24063_v1  ;;  %24066 = vst [vmem:[#allocation92_spill] sm:$0xff] %v18974_v31  ;;  %v18980_v45 = vpop.f32.mrb[24].mxu1  ;;  %v24074_v1 = vld [vmem:[#allocation293_spill] sm:$0xff] }
 0x396   :  { %9138 = vmatmul.mubr.f32.gmra.mrb[26].mxu0 %v24062_v47  ;;  %24071 = vst [vmem:[#allocation111_spill] sm:$0xff] %v18980_v45  ;;  %v18982_v10 = vpop.f32.mrb[25].mxu1  ;;  %v24073_v47 = vld [vmem:[#allocation294_spill] sm:$0xff] }
 0x397   :  { %9144 = vmatprep.mubr.f32.mxu0 %v24064_v23  ;;  %24072 = vst [vmem:[#allocation110_spill] sm:$0xff] %v18982_v10  ;;  %v24075_v23 = vld [vmem:[#allocation311_spill] sm:$0xff]  ;;  %v24082_v45 = vld [vmem:[#allocation318_spill] sm:$0xff] }
 0x398   :  { %3916 = vmatmul.mubr.f32.gmra.mrb[78].mxu1 %v24067_v55  ;;  %v18988_v31 = vpop.f32.mrb[26].mxu1 }
 0x399   :  { %3922 = vmatprep.mubr.f32.mxu1 %v24069_v56  ;;  %24077 = vst [vmem:[#allocation115_spill] sm:$0xff] %v18988_v31  ;;  %v18990_v55 = vpop.f32.mrb[27].mxu1  ;;  %v24080_v56 = vld [vmem:[#allocation312_spill] sm:$0xff]  ;;  %v24088_v31 = vld [vmem:[#allocation339_spill] sm:$0xff] }
 0x39a   :  { %9146 = vmatmul.mubr.f32.gmra.mrb[28].mxu0 %v24068_v19  ;;  %24078 = vst [vmem:[#allocation114_spill] sm:$0xff] %v18990_v55  ;;  %v24079_v19 = vld [vmem:[#allocation313_spill] sm:$0xff] }
 0x39b   :  { %9152 = vmatprep.mubr.f32.mxu0 %v24070_v15  ;;  %v24081_v15 = vld [vmem:[#allocation322_spill] sm:$0xff] }
 0x39c   :  { %3924 = vmatmul.mubr.f32.gmra.mrb[80].mxu1 %v24073_v47  ;;  %v18996_v10 = vpop.f32.mrb[28].mxu1 }
 0x39d   :  { %3930 = vmatprep.mubr.f32.mxu1 %v24075_v23  ;;  %24083 = vst [vmem:[#allocation126_spill] sm:$0xff] %v18996_v10  ;;  %v18998_v47 = vpop.f32.mrb[29].mxu1  ;;  %v24086_v23 = vld [vmem:[#allocation325_spill] sm:$0xff]  ;;  %v24094_v10 = vld [vmem:[#allocation350_spill] sm:$0xff] }
 0x39e   :  { %9154 = vmatmul.mubr.f32.gmra.mrb[30].mxu0 %v24074_v1  ;;  %24084 = vst [vmem:[#allocation123_spill] sm:$0xff] %v18998_v47  ;;  %v24085_v1 = vld [vmem:[#allocation329_spill] sm:$0xff] }
 0x39f   :  { %9160 = vmatprep.mubr.f32.mxu0 %v24076_v28  ;;  %v24087_v28 = vld [vmem:[#allocation343_spill] sm:$0xff] }
 0x3a0   :  { %3932 = vmatmul.mubr.f32.gmra.mrb[82].mxu1 %v24079_v19  ;;  %v19004_v55 = vpop.f32.mrb[30].mxu1 }
 0x3a1   :  { %3938 = vmatprep.mubr.f32.mxu1 %v24081_v15  ;;  %24089 = vst [vmem:[#allocation128_spill] sm:$0xff] %v19004_v55  ;;  %v19006_v19 = vpop.f32.mrb[31].mxu1  ;;  %v24092_v15 = vld [vmem:[#allocation344_spill] sm:$0xff]  ;;  %v24100_v55 = vld [vmem:[#allocation373_spill] sm:$0xff] }
 0x3a2   :  { %9162 = vmatmul.mubr.f32.gmra.mrb[32].mxu0 %v24080_v56  ;;  %24090 = vst [vmem:[#allocation125_spill] sm:$0xff] %v19006_v19  ;;  %v24091_v56 = vld [vmem:[#allocation346_spill] sm:$0xff] }
 0x3a3   :  { %9168 = vmatprep.mubr.f32.mxu0 %v24082_v45  ;;  %v24093_v45 = vld [vmem:[#allocation356_spill] sm:$0xff] }
 0x3a4   :  { %3940 = vmatmul.mubr.f32.gmra.mrb[84].mxu1 %v24085_v1  ;;  %v19012_v47 = vpop.f32.mrb[32].mxu1 }
 0x3a5   :  { %3946 = vmatprep.mubr.f32.mxu1 %v24087_v28  ;;  %24095 = vst [vmem:[#allocation150_spill] sm:$0xff] %v19012_v47  ;;  %v19014_v1 = vpop.f32.mrb[33].mxu1  ;;  %v24098_v28 = vld [vmem:[#allocation357_spill] sm:$0xff]  ;;  %v24106_v47 = vld [vmem:[#allocation380_spill] sm:$0xff] }
 0x3a6   :  { %9170 = vmatmul.mubr.f32.gmra.mrb[34].mxu0 %v24086_v23  ;;  %24096 = vst [vmem:[#allocation147_spill] sm:$0xff] %v19014_v1  ;;  %v24097_v23 = vld [vmem:[#allocation360_spill] sm:$0xff] }
 0x3a7   :  { %9176 = vmatprep.mubr.f32.mxu0 %v24088_v31  ;;  %v24099_v31 = vld [vmem:[#allocation374_spill] sm:$0xff] }
 0x3a8   :  { %3948 = vmatmul.mubr.f32.gmra.mrb[86].mxu1 %v24091_v56  ;;  %v19020_v19 = vpop.f32.mrb[34].mxu1 }
 0x3a9   :  { %3954 = vmatprep.mubr.f32.mxu1 %v24093_v45  ;;  %24101 = vst [vmem:[#allocation152_spill] sm:$0xff] %v19020_v19  ;;  %v19022_v56 = vpop.f32.mrb[35].mxu1  ;;  %v24104_v45 = vld [vmem:[#allocation375_spill] sm:$0xff]  ;;  %v24112_v19 = vld [vmem:[#allocation406_spill] sm:$0xff] }
 0x3aa   :  { %9178 = vmatmul.mubr.f32.gmra.mrb[36].mxu0 %v24092_v15  ;;  %24102 = vst [vmem:[#allocation151_spill] sm:$0xff] %v19022_v56  ;;  %v24103_v15 = vld [vmem:[#allocation377_spill] sm:$0xff] }
 0x3ab   :  { %9184 = vmatprep.mubr.f32.mxu0 %v24094_v10  ;;  %v24105_v10 = vld [vmem:[#allocation386_spill] sm:$0xff] }
 0x3ac   :  { %3956 = vmatmul.mubr.f32.gmra.mrb[88].mxu1 %v24097_v23  ;;  %v19028_v1 = vpop.f32.mrb[36].mxu1 }
 0x3ad   :  { %3962 = vmatprep.mubr.f32.mxu1 %v24099_v31  ;;  %24107 = vst [vmem:[#allocation155_spill] sm:$0xff] %v19028_v1  ;;  %v19030_v23 = vpop.f32.mrb[37].mxu1  ;;  %v24110_v31 = vld [vmem:[#allocation388_spill] sm:$0xff]  ;;  %v24118_v1 = vld [vmem:[#allocation415_spill] sm:$0xff] }
 0x3ae   :  { %9186 = vmatmul.mubr.f32.gmra.mrb[38].mxu0 %v24098_v28  ;;  %24108 = vst [vmem:[#allocation153_spill] sm:$0xff] %v19030_v23  ;;  %v24109_v28 = vld [vmem:[#allocation389_spill] sm:$0xff] }
 0x3af   :  { %9192 = vmatprep.mubr.f32.mxu0 %v24100_v55  ;;  %v24111_v55 = vld [vmem:[#allocation407_spill] sm:$0xff] }
 0x3b0   :  { %3964 = vmatmul.mubr.f32.gmra.mrb[90].mxu1 %v24103_v15  ;;  %v19036_v56 = vpop.f32.mrb[38].mxu1 }
 0x3b1   :  { %3970 = vmatprep.mubr.f32.mxu1 %v24105_v10  ;;  %24113 = vst [vmem:[#allocation169_spill] sm:$0xff] %v19036_v56  ;;  %v19038_v15 = vpop.f32.mrb[39].mxu1  ;;  %v24116_v10 = vld [vmem:[#allocation408_spill] sm:$0xff] }
 0x3b2   :  { %9194 = vmatmul.mubr.f32.gmra.mrb[40].mxu0 %v24104_v45  ;;  %24114 = vst [vmem:[#allocation156_spill] sm:$0xff] %v19038_v15  ;;  %v24115_v45 = vld [vmem:[#allocation410_spill] sm:$0xff]  ;;  %v24124_v56 = vld [vmem:[#allocation436_spill] sm:$0xff] }
 0x3b3   :  { %9200 = vmatprep.mubr.f32.mxu0 %v24106_v47  ;;  %v24117_v47 = vld [vmem:[#allocation420_spill] sm:$0xff] }
 0x3b4   :  { %3972 = vmatmul.mubr.f32.gmra.mrb[92].mxu1 %v24109_v28  ;;  %v19044_v23 = vpop.f32.mrb[40].mxu1 }
 0x3b5   :  { %3978 = vmatprep.mubr.f32.mxu1 %v24111_v55  ;;  %24119 = vst [vmem:[#allocation174_spill] sm:$0xff] %v19044_v23  ;;  %v19046_v28 = vpop.f32.mrb[41].mxu1  ;;  %v24122_v55 = vld [vmem:[#allocation421_spill] sm:$0xff] }
 0x3b6   :  { %9202 = vmatmul.mubr.f32.gmra.mrb[42].mxu0 %v24110_v31  ;;  %24120 = vst [vmem:[#allocation173_spill] sm:$0xff] %v19046_v28  ;;  %v24121_v31 = vld [vmem:[#allocation422_spill] sm:$0xff]  ;;  %v24130_v23 = vld [vmem:[#allocation49_spill] sm:$0xff] }
 0x3b7   :  { %9208 = vmatprep.mubr.f32.mxu0 %v24112_v19  ;;  %v24123_v19 = vld [vmem:[#allocation440_spill] sm:$0xff] }
 0x3b8   :  { %3980 = vmatmul.mubr.f32.gmra.mrb[94].mxu1 %v24115_v45  ;;  %v19052_v15 = vpop.f32.mrb[42].mxu1 }
 0x3b9   :  { %3986 = vmatprep.mubr.f32.mxu1 %v24117_v47  ;;  %24125 = vst [vmem:[#allocation177_spill] sm:$0xff] %v19052_v15  ;;  %v19054_v45 = vpop.f32.mrb[43].mxu1  ;;  %v24128_v47 = vld [vmem:[#allocation443_spill] sm:$0xff]  ;;  %v24136_v15 = vld [vmem:[#allocation72_spill] sm:$0xff] }
 0x3ba   :  { %9210 = vmatmul.mubr.f32.gmra.mrb[44].mxu0 %v24116_v10  ;;  %24126 = vst [vmem:[#allocation176_spill] sm:$0xff] %v19054_v45  ;;  %v24127_v10 = vld [vmem:[#allocation446_spill] sm:$0xff] }
 0x3bb   :  { %9216 = vmatprep.mubr.f32.mxu0 %v24118_v1  ;;  %v24129_v1 = vld [vmem:[#allocation52_spill] sm:$0xff]  ;;  %v24137_v45 = vld [vmem:[#allocation66_spill] sm:$0xff] }
 0x3bc   :  { %3988 = vmatmul.mubr.f32.gmra.mrb[96].mxu1 %v24121_v31  ;;  %v19060_v28 = vpop.f32.mrb[44].mxu1 }
 0x3bd   :  { %3994 = vmatprep.mubr.f32.mxu1 %v24123_v19  ;;  %24131 = vst [vmem:[#allocation191_spill] sm:$0xff] %v19060_v28  ;;  %v19062_v31 = vpop.f32.mrb[45].mxu1  ;;  %v24134_v19 = vld [vmem:[#allocation50_spill] sm:$0xff]  ;;  %v24141_v28 = vld [vmem:[#allocation69_spill] sm:$0xff] }
 0x3be   :  { %9218 = vmatmul.mubr.f32.gmra.mrb[46].mxu0 %v24122_v55  ;;  %24132 = vst [vmem:[#allocation185_spill] sm:$0xff] %v19062_v31  ;;  %v24133_v55 = vld [vmem:[#allocation53_spill] sm:$0xff] }
 0x3bf   :  { %9224 = vmatprep.mubr.f32.mxu0 %v24124_v56  ;;  %v24135_v56 = vld [vmem:[#allocation88_spill] sm:$0xff]  ;;  %v24144_v31 = vld [vmem:[#allocation77_spill] sm:$0xff] }
 0x3c0   :  { %3996 = vmatmul.mubr.f32.gmra.mrb[98].mxu1 %v24127_v10  ;;  %v19069_v10 = vpop.f32.mrb[46].mxu1 }
 0x3c1   :  { %4168 = vmatprep.mubr.f32.mxu1 %v24129_v1  ;;  %24138 = vst [vmem:[#allocation195_spill] sm:$0xff] %v19069_v10  ;;  %v24139_v1 = vld [vmem:[#allocation244_spill] sm:$0xff] }
 0x3c2   :  { %9226 = vmatmul.mubr.f32.gmra.mrb[48].mxu0 %v24128_v47  ;;  %v24147_v10 = vld [vmem:[#allocation264_spill] sm:$0xff] }
 0x3c3   :  { %9398 = vmatprep.mubr.f32.mxu0 %v24130_v23  ;;  %v19073_v23 = vpop.f32.mrb[47].mxu1 }
 0x3c4   :  { %4171 = vmatmul.mubr.f32.vlgmr.msra.gmra.mrb[50].mxu1 %v24133_v55  ;;  %24140 = vst [vmem:[#allocation192_spill] sm:$0xff] %v19073_v23  ;;  %v24142_v55 = vld [vmem:[#allocation68_spill] sm:$0xff]  ;;  %v24149_v23 = vld [vmem:[#allocation93_spill] sm:$0xff] }
 0x3c5   :  { %12285 = vmatpush1.bf16.msra.mxu1 %v24135_v56  ;;  %4178 = vmatprep.mubr.f32.mxu1 %v24136_v15  ;;  %v24145_v15 = vld [vmem:[#allocation248_spill] sm:$0xff] }
 0x3c6   :  { %9401 = vmatmul.mubr.f32.vlgmr.msra.gmra.mrb[0].mxu0 %v24134_v19  ;;  %12287 = vmatprep.subr.bf16.mxu1 %v24139_v1  ;;  %v24143_v19 = vld [vmem:[#allocation79_spill] sm:$0xff] }
 0x3c7   :  { %9408 = vmatprep.mubr.f32.mxu0 %v24137_v45  ;;  %12861 = vmatpush1.bf16.msra.mxu0 %v24135_v56  ;;  %v19081_v45 = vpop.f32.mrb[48].mxu1 }
 0x3c8   :  { %4181 = vmatmul.mubr.f32.gmra.mrb[52].mxu1 %v24141_v28  ;;  %12863 = vmatprep.subr.bf16.mxu0 %v24139_v1  ;;  %24146 = vst [vmem:[#allocation210_spill] sm:$0xff] %v19081_v45  ;;  %v19085_v47 = vpop.f32.mrb[49].mxu1  ;;  %v24150_v28 = vld [vmem:[#allocation80_spill] sm:$0xff]  ;;  %v24154_v45 = vld [vmem:[#allocation274_spill] sm:$0xff] }
 0x3c9   :  { %4188 = vmatprep.mubr.f32.mxu1 %v24143_v19  ;;  %12289 = vmatpush1.bf16.msra.mxu1 %v24145_v15  ;;  %24148 = vst [vmem:[#allocation206_spill] sm:$0xff] %v19085_v47  ;;  %v24152_v19 = vld [vmem:[#allocation99_spill] sm:$0xff]  ;;  %v24156_v47 = vld [vmem:[#allocation101_spill] sm:$0xff] }
 0x3ca   :  { %9411 = vmatmul.mubr.f32.gmra.mrb[2].mxu0 %v24142_v55  ;;  %12291 = vmatprep.subr.bf16.mxu1 %v24147_v10  ;;  %v24151_v55 = vld [vmem:[#allocation100_spill] sm:$0xff] }
 0x3cb   :  { %9418 = vmatprep.mubr.f32.mxu0 %v24144_v31  ;;  %12865 = vmatpush1.bf16.msra.mxu0 %v24145_v15  ;;  %v24153_v31 = vld [vmem:[#allocation267_spill] sm:$0xff] }
 0x3cc   :  { %4191 = vmatmul.mubr.f32.gmra.mrb[54].mxu1 %v24149_v23  ;;  %12867 = vmatprep.subr.bf16.mxu0 %v24147_v10  ;;  %v24157_v23 = vld [vmem:[#allocation118_spill] sm:$0xff]  ;;  %v24158_v10 = vld [vmem:[#allocation112_spill] sm:$0xff] }
 0x3cd   :  { %4198 = vmatprep.mubr.f32.mxu1 %v24151_v55  ;;  %12293 = vmatpush1.bf16.msra.mxu1 %v24153_v31  ;;  %v24160_v55 = vld [vmem:[#allocation14_spill] sm:$0xff] }
 0x3ce   :  { %9421 = vmatmul.mubr.f32.gmra.mrb[4].mxu0 %v24150_v28  ;;  %12295 = vmatprep.subr.bf16.mxu1 %v24154_v45  ;;  %v24159_v28 = vld [vmem:[#allocation13_spill] sm:$0xff] }
 0x3cf   :  { %9428 = vmatprep.mubr.f32.mxu0 %v24152_v19  ;;  %12869 = vmatpush1.bf16.msra.mxu0 %v24153_v31  ;;  %v24161_v19 = vld [vmem:[#allocation122_spill] sm:$0xff]  ;;  %v24162_v31 = vld [vmem:[#allocation116_spill] sm:$0xff] }
 0x3d0   :  { %4201 = vmatmul.mubr.f32.gmra.mrb[56].mxu1 %v24155_v27  ;;  %12871 = vmatprep.subr.bf16.mxu0 %v24154_v45  ;;  %v24163_v27 = vld [vmem:[#allocation133_spill] sm:$0xff]  ;;  %v24164_v45 = vld [vmem:[#allocation131_spill] sm:$0xff] }
 0x3d1   :  { %4208 = vmatprep.mubr.f32.mxu1 %v24157_v23  ;;  %12297 = vmatpush1.bf16.msra.mxu1 %v24159_v28  ;;  %v24167_v23 = vld [vmem:[#allocation137_spill] sm:$0xff] }
 0x3d2   :  { %9431 = vmatmul.mubr.f32.gmra.mrb[6].mxu0 %v24156_v47  ;;  %12299 = vmatprep.subr.bf16.mxu1 %v24160_v55  ;;  %v24165_v47 = vld [vmem:[#allocation16_spill] sm:$0xff] }
 0x3d3   :  { %9438 = vmatprep.mubr.f32.mxu0 %v24158_v10  ;;  %12873 = vmatpush1.bf16.msra.mxu0 %v24159_v28  ;;  %v24166_v10 = vld [vmem:[#allocation17_spill] sm:$0xff]  ;;  %v24168_v28 = vld [vmem:[#allocation134_spill] sm:$0xff] }
 0x3d4   :  { %4211 = vmatmul.mubr.f32.gmra.mrb[58].mxu1 %v24161_v19  ;;  %12875 = vmatprep.subr.bf16.mxu0 %v24160_v55  ;;  %v24169_v19 = vld [vmem:[#allocation144_spill] sm:$0xff]  ;;  %v24170_v55 = vld [vmem:[#allocation142_spill] sm:$0xff] }
 0x3d5   :  { %4218 = vmatprep.mubr.f32.mxu1 %v24163_v27  ;;  %12301 = vmatpush1.bf16.msra.mxu1 %v24165_v47  ;;  %v24173_v27 = vld [vmem:[#allocation157_spill] sm:$0xff] }
 0x3d6   :  { %9441 = vmatmul.mubr.f32.gmra.mrb[8].mxu0 %v24162_v31  ;;  %12303 = vmatprep.subr.bf16.mxu1 %v24166_v10  ;;  %v24171_v31 = vld [vmem:[#allocation18_spill] sm:$0xff] }
 0x3d7   :  { %9448 = vmatprep.mubr.f32.mxu0 %v24164_v45  ;;  %12877 = vmatpush1.bf16.msra.mxu0 %v24165_v47  ;;  %v24172_v45 = vld [vmem:[#allocation2_spill] sm:$0xff]  ;;  %v24174_v47 = vld [vmem:[#allocation145_spill] sm:$0xff] }
 0x3d8   :  { %4221 = vmatmul.mubr.f32.gmra.mrb[60].mxu1 %v24167_v23  ;;  %12879 = vmatprep.subr.bf16.mxu0 %v24166_v10  ;;  %v24175_v23 = vld [vmem:[#allocation164_spill] sm:$0xff]  ;;  %v24176_v10 = vld [vmem:[#allocation163_spill] sm:$0xff] }
 0x3d9   :  { %4228 = vmatprep.mubr.f32.mxu1 %v24169_v19  ;;  %12305 = vmatpush1.bf16.msra.mxu1 %v24171_v31  ;;  %v24179_v19 = vld [vmem:[#allocation166_spill] sm:$0xff] }
 0x3da   :  { %9451 = vmatmul.mubr.f32.gmra.mrb[10].mxu0 %v24168_v28  ;;  %12307 = vmatprep.subr.bf16.mxu1 %v24172_v45  ;;  %v24177_v28 = vld [vmem:[#allocation3_spill] sm:$0xff] }
 0x3db   :  { %9458 = vmatprep.mubr.f32.mxu0 %v24170_v55  ;;  %12881 = vmatpush1.bf16.msra.mxu0 %v24171_v31  ;;  %v24178_v55 = vld [vmem:[#allocation4_spill] sm:$0xff]  ;;  %v24180_v31 = vld [vmem:[#allocation165_spill] sm:$0xff] }
 0x3dc   :  { %4231 = vmatmul.mubr.f32.gmra.mrb[62].mxu1 %v24173_v27  ;;  %12883 = vmatprep.subr.bf16.mxu0 %v24172_v45  ;;  %v24181_v27 = vld [vmem:[#allocation182_spill] sm:$0xff]  ;;  %v24182_v45 = vld [vmem:[#allocation175_spill] sm:$0xff] }
 0x3dd   :  { %4238 = vmatprep.mubr.f32.mxu1 %v24175_v23  ;;  %12309 = vmatpush1.bf16.msra.mxu1 %v24177_v28  ;;  %v24185_v23 = vld [vmem:[#allocation184_spill] sm:$0xff] }
 0x3de   :  { %9461 = vmatmul.mubr.f32.gmra.mrb[12].mxu0 %v24174_v47  ;;  %12311 = vmatprep.subr.bf16.mxu1 %v24178_v55  ;;  %v24183_v47 = vld [vmem:[#allocation5_spill] sm:$0xff] }
 0x3df   :  { %9468 = vmatprep.mubr.f32.mxu0 %v24176_v10  ;;  %12885 = vmatpush1.bf16.msra.mxu0 %v24177_v28  ;;  %v24184_v10 = vld [vmem:[#allocation6_spill] sm:$0xff]  ;;  %v24186_v28 = vld [vmem:[#allocation183_spill] sm:$0xff] }
 0x3e0   :  { %4241 = vmatmul.mubr.f32.gmra.mrb[64].mxu1 %v24179_v19  ;;  %12887 = vmatprep.subr.bf16.mxu0 %v24178_v55  ;;  %v24187_v19 = vld [vmem:[#allocation199_spill] sm:$0xff]  ;;  %v24188_v55 = vld [vmem:[#allocation193_spill] sm:$0xff] }
 0x3e1   :  { %4248 = vmatprep.mubr.f32.mxu1 %v24181_v27  ;;  %12313 = vmatpush1.bf16.msra.mxu1 %v24183_v47  ;;  %v24191_v27 = vld [vmem:[#allocation201_spill] sm:$0xff] }
 0x3e2   :  { %9471 = vmatmul.mubr.f32.gmra.mrb[14].mxu0 %v24180_v31  ;;  %12315 = vmatprep.subr.bf16.mxu1 %v24184_v10  ;;  %v24189_v31 = vld [vmem:[#allocation7_spill] sm:$0xff] }
 0x3e3   :  { %9478 = vmatprep.mubr.f32.mxu0 %v24182_v45  ;;  %12889 = vmatpush1.bf16.msra.mxu0 %v24183_v47  ;;  %v24190_v45 = vld [vmem:[#allocation8_spill] sm:$0xff] }
 0x3e4   :  { %4251 = vmatmul.mubr.f32.gmra.mrb[66].mxu1 %v24185_v23  ;;  %12891 = vmatprep.subr.bf16.mxu0 %v24184_v10  ;;  %v24192_v47 = vld [vmem:[#allocation196_spill] sm:$0xff]  ;;  %v24193_v23 = vld [vmem:[#allocation211_spill] sm:$0xff]  ;;  %v24194_v10 = vld [vmem:[#allocation205_spill] sm:$0xff] }
 0x3e5   :  { %4258 = vmatprep.mubr.f32.mxu1 %v24187_v19  ;;  %12317 = vmatpush1.bf16.msra.mxu1 %v24189_v31  ;;  %v24197_v19 = vld [vmem:[#allocation219_spill] sm:$0xff] }
 0x3e6   :  { %9481 = vmatmul.mubr.f32.gmra.mrb[16].mxu0 %v24186_v28  ;;  %12319 = vmatprep.subr.bf16.mxu1 %v24190_v45  ;;  %v24195_v28 = vld [vmem:[#allocation10_spill] sm:$0xff] }
 0x3e7   :  { %9488 = vmatprep.mubr.f32.mxu0 %v24188_v55  ;;  %12893 = vmatpush1.bf16.msra.mxu0 %v24189_v31  ;;  %v24196_v55 = vld [vmem:[#allocation11_spill] sm:$0xff] }
 0x3e8   :  { %4261 = vmatmul.mubr.f32.gmra.mrb[68].mxu1 %v24191_v27  ;;  %12895 = vmatprep.subr.bf16.mxu0 %v24190_v45  ;;  %v24198_v31 = vld [vmem:[#allocation215_spill] sm:$0xff]  ;;  %v24199_v27 = vld [vmem:[#allocation230_spill] sm:$0xff]  ;;  %v24200_v45 = vld [vmem:[#allocation224_spill] sm:$0xff] }
 0x3e9   :  { %4268 = vmatprep.mubr.f32.mxu1 %v24193_v23  ;;  %12321 = vmatpush1.bf16.msra.mxu1 %v24195_v28  ;;  %v24203_v23 = vld [vmem:[#allocation233_spill] sm:$0xff] }
 0x3ea   :  { %9491 = vmatmul.mubr.f32.gmra.mrb[18].mxu0 %v24192_v47  ;;  %12323 = vmatprep.subr.bf16.mxu1 %v24196_v55  ;;  %v24201_v47 = vld [vmem:[#allocation12_spill] sm:$0xff] }
 0x3eb   :  { %9498 = vmatprep.mubr.f32.mxu0 %v24194_v10  ;;  %12897 = vmatpush1.bf16.msra.mxu0 %v24195_v28  ;;  %v24202_v10 = vld [vmem:[#allocation15_spill] sm:$0xff]  ;;  %v24204_v28 = vld [vmem:[#allocation226_spill] sm:$0xff] }
 0x3ec   :  { %4271 = vmatmul.mubr.f32.gmra.mrb[70].mxu1 %v24197_v19  ;;  %12899 = vmatprep.subr.bf16.mxu0 %v24196_v55  ;;  %v24205_v19 = vld [vmem:[#allocation246_spill] sm:$0xff]  ;;  %v24206_v55 = vld [vmem:[#allocation237_spill] sm:$0xff] }
 0x3ed   :  { %4278 = vmatprep.mubr.f32.mxu1 %v24199_v27  ;;  %12325 = vmatpush1.bf16.msra.mxu1 %v24201_v47  ;;  %v24209_v27 = vand.u32 4294901760, %v23920_v49  ;;  %v24216_v49 = vld [vmem:[#allocation284_spill] sm:$0xff] }
 0x3ee   :  { %9501 = vmatmul.mubr.f32.gmra.mrb[20].mxu0 %v24198_v31  ;;  %12327 = vmatprep.subr.bf16.mxu1 %v24202_v10  ;;  %v24207_v31 = vld [vmem:[#allocation19_spill] sm:$0xff] }
 0x3ef   :  { %9508 = vmatprep.mubr.f32.mxu0 %v24200_v45  ;;  %12901 = vmatpush1.bf16.msra.mxu0 %v24201_v47  ;;  %v24208_v45 = vand.u32 4294901760, %v18112_v50  ;;  %v24215_v50 = vld [vmem:[#allocation265_spill] sm:$0xff] }
 0x3f0   :  { %4281 = vmatmul.mubr.f32.gmra.mrb[72].mxu1 %v24203_v23  ;;  %12903 = vmatprep.subr.bf16.mxu0 %v24202_v10  ;;  %v24210_v23 = vld [vmem:[#allocation253_spill] sm:$0xff] }
 0x3f1   :  { %4288 = vmatprep.mubr.f32.mxu1 %v24205_v19  ;;  %12329 = vmatpush1.bf16.msra.mxu1 %v24207_v31  ;;  %v12330_v47 = vpack.c.bf16 %v24209_v27, %v24208_v45  ;;  %v24212_v19 = vld [vmem:[#allocation263_spill] sm:$0xff]  ;;  %v24217_v45 = vld [vmem:[#allocation276_spill] sm:$0xff]  ;;  %v24218_v27 = vld [vmem:[#allocation285_spill] sm:$0xff] }
 0x3f2   :  { %9511 = vmatmul.mubr.f32.gmra.mrb[22].mxu0 %v24204_v28  ;;  %4514 = vmatprep.subr.mxu1 %v18213_v42  ;;  %v24211_v28 = vld [vmem:[#allocation247_spill] sm:$0xff] }
 0x3f3   :  { %9518 = vmatprep.mubr.f32.mxu0 %v24206_v55  ;;  %12905 = vmatpush1.bf16.msra.mxu0 %v24207_v31  ;;  %v24213_v55 = vld [vmem:[#allocation257_spill] sm:$0xff]  ;;  %v24214_v31 = vld [vmem:[#allocation266_spill] sm:$0xff] }
 0x3f4   :  { %4291 = vmatmul.mubr.f32.gmra.mrb[74].mxu1 %v24210_v23  ;;  %9744 = vmatprep.subr.mxu0 %v18213_v42  ;;  %v24219_v23 = vld [vmem:[#allocation283_spill] sm:$0xff]  ;;  %v24266_v42 = vld [vmem:[#allocation58_spill] sm:$0xff] }
 0x3f5   :  { %4298 = vmatprep.mubr.f32.mxu1 %v24212_v19  ;;  %4516 = vmatpush1.msra.mxu1 %v18227_v63  ;;  %v24221_v19 = vld [vmem:[#allocation291_spill] sm:$0xff] }
 0x3f6   :  { %9521 = vmatmul.mubr.f32.gmra.mrb[24].mxu0 %v24211_v28  ;;  %12331 = vmatprep.subr.bf16.mxu1 %v12330_v47  ;;  %v24220_v28 = vld [vmem:[#allocation296_spill] sm:$0xff] }
 0x3f7   :  { %9528 = vmatprep.mubr.f32.mxu0 %v24213_v55  ;;  %9746 = vmatpush1.msra.mxu0 %v18227_v63  ;;  %v24222_v55 = vld [vmem:[#allocation299_spill] sm:$0xff]  ;;  %v24223_v63 = vld [vmem:[#allocation298_spill] sm:$0xff] }
 0x3f8   :  { %4301 = vmatmul.mubr.f32.gmra.mrb[76].mxu1 %v24214_v31  ;;  %12907 = vmatprep.subr.bf16.mxu0 %v12330_v47  ;;  %v24224_v31 = vld [vmem:[#allocation315_spill] sm:$0xff]  ;;  %v24225_v47 = vld [vmem:[#allocation310_spill] sm:$0xff] }
 0x3f9   :  { %4308 = vmatprep.mubr.f32.mxu1 %v24216_v49  ;;  %v24227_v49 = vld [vmem:[#allocation316_spill] sm:$0xff] }
 0x3fa   :  { %9531 = vmatmul.mubr.f32.gmra.mrb[26].mxu0 %v24215_v50  ;;  %v24226_v50 = vld [vmem:[#allocation317_spill] sm:$0xff] }
 0x3fb   :  { %9538 = vmatprep.mubr.f32.mxu0 %v24217_v45  ;;  %v24228_v45 = vld [vmem:[#allocation326_spill] sm:$0xff] }
 0x3fc   :  { %4311 = vmatmul.mubr.f32.gmra.mrb[78].mxu1 %v24218_v27  ;;  %v24229_v27 = vld [vmem:[#allocation324_spill] sm:$0xff] }
 0x3fd   :  { %4318 = vmatprep.mubr.f32.mxu1 %v24220_v28  ;;  %v24231_v28 = vld [vmem:[#allocation328_spill] sm:$0xff] }
 0x3fe   :  { %9541 = vmatmul.mubr.f32.gmra.mrb[28].mxu0 %v24219_v23  ;;  %v24230_v23 = vld [vmem:[#allocation335_spill] sm:$0xff] }
 0x3ff   :  { %9548 = vmatprep.mubr.f32.mxu0 %v24221_v19  ;;  %v24232_v19 = vld [vmem:[#allocation347_spill] sm:$0xff] }
 0x400   :  { %4321 = vmatmul.mubr.f32.gmra.mrb[80].mxu1 %v24222_v55  ;;  %v24233_v55 = vld [vmem:[#allocation341_spill] sm:$0xff] }
 0x401   :  { %4328 = vmatprep.mubr.f32.mxu1 %v24224_v31  ;;  %v24235_v31 = vld [vmem:[#allocation348_spill] sm:$0xff] }
 0x402   :  { %9551 = vmatmul.mubr.f32.gmra.mrb[30].mxu0 %v24223_v63  ;;  %v24234_v63 = vld [vmem:[#allocation349_spill] sm:$0xff] }
 0x403   :  { %9558 = vmatprep.mubr.f32.mxu0 %v24225_v47  ;;  %v24236_v47 = vld [vmem:[#allocation359_spill] sm:$0xff] }
 0x404   :  { %4331 = vmatmul.mubr.f32.gmra.mrb[82].mxu1 %v24226_v50  ;;  %v24237_v50 = vld [vmem:[#allocation355_spill] sm:$0xff] }
 0x405   :  { %4338 = vmatprep.mubr.f32.mxu1 %v24228_v45  ;;  %v24239_v45 = vld [vmem:[#allocation363_spill] sm:$0xff] }
 0x406   :  { %9561 = vmatmul.mubr.f32.gmra.mrb[32].mxu0 %v24227_v49  ;;  %v24238_v49 = vld [vmem:[#allocation366_spill] sm:$0xff] }
 0x407   :  { %9568 = vmatprep.mubr.f32.mxu0 %v24229_v27  ;;  %v24240_v27 = vld [vmem:[#allocation378_spill] sm:$0xff] }
 0x408   :  { %4341 = vmatmul.mubr.f32.gmra.mrb[84].mxu1 %v24230_v23  ;;  %v24241_v23 = vld [vmem:[#allocation376_spill] sm:$0xff] }
 0x409   :  { %4348 = vmatprep.mubr.f32.mxu1 %v24232_v19  ;;  %v24243_v19 = vld [vmem:[#allocation379_spill] sm:$0xff] }
 0x40a   :  { %9571 = vmatmul.mubr.f32.gmra.mrb[34].mxu0 %v24231_v28  ;;  %v24242_v28 = vld [vmem:[#allocation382_spill] sm:$0xff] }
 0x40b   :  { %9578 = vmatprep.mubr.f32.mxu0 %v24233_v55  ;;  %v24244_v55 = vld [vmem:[#allocation391_spill] sm:$0xff] }
 0x40c   :  { %4351 = vmatmul.mubr.f32.gmra.mrb[86].mxu1 %v24234_v63  ;;  %v24245_v63 = vld [vmem:[#allocation385_spill] sm:$0xff] }
 0x40d   :  { %4358 = vmatprep.mubr.f32.mxu1 %v24236_v47  ;;  %v24247_v47 = vld [vmem:[#allocation393_spill] sm:$0xff] }
 0x40e   :  { %9581 = vmatmul.mubr.f32.gmra.mrb[36].mxu0 %v24235_v31  ;;  %v24246_v31 = vld [vmem:[#allocation394_spill] sm:$0xff] }
 0x40f   :  { %9588 = vmatprep.mubr.f32.mxu0 %v24237_v50  ;;  %v24248_v50 = vld [vmem:[#allocation411_spill] sm:$0xff] }
 0x410   :  { %4361 = vmatmul.mubr.f32.gmra.mrb[88].mxu1 %v24238_v49  ;;  %v24249_v49 = vld [vmem:[#allocation409_spill] sm:$0xff] }
 0x411   :  { %4368 = vmatprep.mubr.f32.mxu1 %v24240_v27  ;;  %v24251_v27 = vld [vmem:[#allocation412_spill] sm:$0xff] }
 0x412   :  { %9591 = vmatmul.mubr.f32.gmra.mrb[38].mxu0 %v24239_v45  ;;  %v24250_v45 = vld [vmem:[#allocation414_spill] sm:$0xff] }
 0x413   :  { %9598 = vmatprep.mubr.f32.mxu0 %v24241_v23  ;;  %v24252_v23 = vld [vmem:[#allocation425_spill] sm:$0xff] }
 0x414   :  { %4371 = vmatmul.mubr.f32.gmra.mrb[90].mxu1 %v24242_v28  ;;  %v24253_v28 = vld [vmem:[#allocation419_spill] sm:$0xff] }
 0x415   :  { %4378 = vmatprep.mubr.f32.mxu1 %v24244_v55  ;;  %v24255_v55 = vld [vmem:[#allocation428_spill] sm:$0xff] }
 0x416   :  { %9601 = vmatmul.mubr.f32.gmra.mrb[40].mxu0 %v24243_v19  ;;  %v24254_v19 = vld [vmem:[#allocation429_spill] sm:$0xff] }
 0x417   :  { %9608 = vmatprep.mubr.f32.mxu0 %v24245_v63  ;;  %v24256_v63 = vld [vmem:[#allocation445_spill] sm:$0xff] }
 0x418   :  { %4381 = vmatmul.mubr.f32.gmra.mrb[92].mxu1 %v24246_v31  ;;  %v24257_v31 = vld [vmem:[#allocation439_spill] sm:$0xff] }
 0x419   :  { %4388 = vmatprep.mubr.f32.mxu1 %v24248_v50  ;;  %v24259_v50 = vld [vmem:[#allocation447_spill] sm:$0xff] }
 0x41a   :  { %9611 = vmatmul.mubr.f32.gmra.mrb[42].mxu0 %v24247_v47  ;;  %v24258_v47 = vld [vmem:[#allocation448_spill] sm:$0xff] }
 0x41b   :  { %9618 = vmatprep.mubr.f32.mxu0 %v24249_v49  ;;  %v24260_v49 = vld [vmem:[#allocation57_spill] sm:$0xff] }
 0x41c   :  { %4391 = vmatmul.mubr.f32.gmra.mrb[94].mxu1 %v24250_v45  ;;  %v24261_v45 = vand.u32 4294901760, %v23972_v3  ;;  %v24270_v3 = vand.u32 4294901760, %v18292_v18  ;;  %v24278_v18 = vand.u32 4294901760, %v18334_v11  ;;  %v24286_v11 = vand.u32 4294901760, %v18372_v61 }
 0x41d   :  { %4398 = vmatprep.mubr.f32.mxu1 %v24252_v23  ;;  %v24294_v61 = vand.u32 4294901760, %v24002_v35  ;;  %v24303_v35 = vand.u32 4294901760, %v18454_v37  ;;  %v24311_v37 = vand.u32 4294901760, %v18494_v48  ;;  %v24319_v48 = vand.u32 4294901760, %v18535_v46 }
 0x41e   :  { %9621 = vmatmul.mubr.f32.gmra.mrb[44].mxu0 %v24251_v27  ;;  %v24262_v27 = vand.u32 4294901760, %v23973_v44  ;;  %v24271_v44 = vand.u32 4294901760, %v18301_v14  ;;  %v24279_v14 = vand.u32 4294901760, %v23987_v4  ;;  %v24287_v4 = vand.u32 4294901760, %v23994_v30 }
 0x41f   :  { %9628 = vmatprep.mubr.f32.mxu0 %v24253_v28  ;;  %v24263_v28 = vld [vmem:[#allocation54_spill] sm:$0xff]  ;;  %v24295_v30 = vand.u32 4294901760, %v24003_v17  ;;  %v24302_v17 = vand.u32 4294901760, %v18442_v51  ;;  %v24310_v51 = vand.u32 4294901760, %v18489_v60  ;;  %v24318_v60 = vand.u32 4294901760, %v18529_v8 }
 0x420   :  { %4401 = vmatmul.mubr.f32.gmra.mrb[96].mxu1 %v24254_v19  ;;  %v12332_v23 = vpack.c.bf16 %v24262_v27, %v24261_v45  ;;  %v24264_v19 = vand.u32 4294901760, %v23975_v58  ;;  %v24272_v58 = vand.u32 4294901760, %v23981_v2  ;;  %v24275_v27 = vld [vmem:[#allocation75_spill] sm:$0xff]  ;;  %v24280_v2 = vand.u32 4294901760, %v23988_v12 }
 0x421   :  { %4408 = vmatprep.mubr.f32.mxu1 %v24256_v63  ;;  %v24289_v12 = vand.u32 4294901760, %v23996_v25  ;;  %v24297_v25 = vand.u32 4294901760, %v18434_v41  ;;  %v24305_v41 = vand.u32 4294901760, %v18481_v36  ;;  %v24313_v36 = vand.u32 4294901760, %v18522_v62 }
 0x422   :  { %9631 = vmatmul.mubr.f32.gmra.mrb[46].mxu0 %v24255_v55  ;;  %v24265_v55 = vand.u32 4294901760, %v23976_v0  ;;  %v24273_v0 = vand.u32 4294901760, %v23982_v59  ;;  %v24281_v59 = vand.u32 4294901760, %v23989_v5  ;;  %v24288_v5 = vand.u32 4294901760, %v18387_v39 }
 0x423   :  { %9638 = vmatprep.mubr.f32.mxu0 %v24257_v31  ;;  %v24267_v31 = vld [vmem:[#allocation55_spill] sm:$0xff]  ;;  %v24296_v39 = vand.u32 4294901760, %v18429_v9  ;;  %v24304_v9 = vand.u32 4294901760, %v18476_v7  ;;  %v24312_v7 = vand.u32 4294901760, %v18517_v20  ;;  %v24320_v20 = vand.u32 4294901760, %v18551_v6 }
 0x424   :  { %4411 = vmatmul.mubr.f32.gmra.mrb[98].mxu1 %v24258_v47  ;;  %v12334_v63 = vpack.c.bf16 %v24265_v55, %v24264_v19  ;;  %v24268_v47 = vld [vmem:[#allocation78_spill] sm:$0xff]  ;;  %v12338_v45 = vpack.c.bf16 %v24273_v0, %v24272_v58  ;;  %v24277_v19 = vld [vmem:[#allocation81_spill] sm:$0xff]  ;;  %v12342_v55 = vpack.c.bf16 %v24281_v59, %v24280_v2  ;;  %v24306_v59 = vld [vmem:[#allocation143_spill] sm:$0xff]  ;;  %v24321_v62 = vand.u32 4294901760, %v18563_v22 }
 0x425   :  { %4534 = vmatprep.mubr.f32.mxu1 %v24260_v49  ;;  %v12336_v49 = vpack.c.bf16 %v24271_v44, %v24270_v3  ;;  %v12344_v3 = vpack.c.bf16 %v24287_v4, %v24286_v11  ;;  %v12346_v44 = vpack.c.bf16 %v24289_v12, %v24288_v5  ;;  %v24291_v58 = vld [vmem:[#allocation106_spill] sm:$0xff]  ;;  %v24292_v0 = vld [vmem:[#allocation121_spill] sm:$0xff]  ;;  %v12354_v2 = vpack.c.bf16 %v24305_v41, %v24304_v9  ;;  %v24314_v11 = vld [vmem:[#allocation160_spill] sm:$0xff] }
 0x426   :  { %9641 = vmatmul.mubr.f32.gmra.mrb[48].mxu0 %v24259_v50  ;;  %v24269_v50 = vld [vmem:[#allocation71_spill] sm:$0xff]  ;;  %v24315_v4 = vld [vmem:[#allocation149_spill] sm:$0xff]  ;;  %v12360_v12 = vpack.c.bf16 %v24319_v48, %v24318_v60  ;;  %v24326_v8 = vand.u32 4294901760, %v18570_v16  ;;  %v24327_v46 = vand.u32 4294901760, %v18575_v53  ;;  %v24328_v6 = vand.u32 4294901760, %v18582_v54  ;;  %v24369_v48 = vld [vmem:[#allocation304_spill] sm:$0xff] }
 0x427   :  { %9764 = vmatprep.mubr.f32.mxu0 %v24263_v28  ;;  %v24276_v28 = vld [vmem:[#allocation83_spill] sm:$0xff]  ;;  %v24329_v22 = vand.u32 4294901760, %v18587_v26  ;;  %v24334_v16 = vand.u32 4294901760, %v18610_v40  ;;  %v24335_v53 = vand.u32 4294901760, %v18619_v34  ;;  %v24336_v54 = vand.u32 4294901760, %v18628_v57 }
 0x428   :  { %4538 = vmatmul.mubr.f32.vlgmr.msra.gmra.mrb[50].mxu1 %v24266_v42  ;;  %v24274_v42 = vld [vmem:[#allocation76_spill] sm:$0xff]  ;;  %v24317_v5 = vld [vmem:[#allocation167_spill] sm:$0xff]  ;;  %v24337_v26 = vand.u32 4294901760, %v18636_v21  ;;  %v24342_v34 = vand.u32 4294901760, %v18658_v32  ;;  %v24343_v40 = vand.u32 4294901760, %v18665_v24  ;;  %v24344_v57 = vand.u32 4294901760, %v18671_v52 }
 0x429   :  { %12333 = vmatpush1.bf16.msra.mxu1 %v12332_v23  ;;  %4546 = vmatprep.mubr.f32.mxu1 %v24268_v47  ;;  %v24284_v47 = vld [vmem:[#allocation104_spill] sm:$0xff]  ;;  %v24345_v21 = vand.u32 4294901760, %v18676_v33  ;;  %v24346_v41 = vld [vmem:[#allocation223_spill] sm:$0xff]  ;;  %v24350_v24 = vand.u32 4294901760, %v18696_v43  ;;  %v24351_v32 = vand.u32 4294901760, %v18701_v13  ;;  %v24358_v13 = vld [vmem:[#allocation269_spill] sm:$0xff] }
 0x42a   :  { %9768 = vmatmul.mubr.f32.vlgmr.msra.gmra.mrb[0].mxu0 %v24267_v31  ;;  %12335 = vmatprep.subr.bf16.mxu1 %v12334_v63  ;;  %v24283_v31 = vld [vmem:[#allocation84_spill] sm:$0xff]  ;;  %v24353_v33 = vld [vmem:[#allocation231_spill] sm:$0xff] }
 0x42b   :  { %9776 = vmatprep.mubr.f32.mxu0 %v24269_v50  ;;  %12909 = vmatpush1.bf16.msra.mxu0 %v12332_v23  ;;  %v12340_v23 = vpack.c.bf16 %v24279_v14, %v24278_v18  ;;  %v24285_v50 = vld [vmem:[#allocation103_spill] sm:$0xff]  ;;  %v24300_v18 = vld [vmem:[#allocation140_spill] sm:$0xff]  ;;  %v12374_v9 = vpack.c.bf16 %v24345_v21, %v24344_v57 }
 0x42c   :  { %4550 = vmatmul.mubr.f32.gmra.mrb[52].mxu1 %v24274_v42  ;;  %12911 = vmatprep.subr.bf16.mxu0 %v12334_v63  ;;  %v24282_v63 = vld [vmem:[#allocation96_spill] sm:$0xff]  ;;  %v12348_v42 = vpack.c.bf16 %v24295_v30, %v24294_v61  ;;  %v12364_v61 = vpack.c.bf16 %v24327_v46, %v24326_v8  ;;  %v12366_v30 = vpack.c.bf16 %v24329_v22, %v24328_v6  ;;  %v24368_v60 = vld [vmem:[#allocation295_spill] sm:$0xff]  ;;  %v24380_v46 = vld [vmem:[#allocation345_spill] sm:$0xff] }
 0x42d   :  { %4558 = vmatprep.mubr.f32.mxu1 %v24276_v28  ;;  %12337 = vmatpush1.bf16.msra.mxu1 %v12336_v49  ;;  %v24298_v28 = vld [vmem:[#allocation124_spill] sm:$0xff]  ;;  %v24379_v8 = vld [vmem:[#allocation351_spill] sm:$0xff]  ;;  %v24383_v22 = vld [vmem:[#allocation365_spill] sm:$0xff] }
 0x42e   :  { %9780 = vmatmul.mubr.f32.gmra.mrb[2].mxu0 %v24275_v27  ;;  %12339 = vmatprep.subr.bf16.mxu1 %v12338_v45  ;;  %v12350_v27 = vpack.c.bf16 %v24297_v25, %v24296_v39  ;;  %v24301_v14 = vld [vmem:[#allocation136_spill] sm:$0xff]  ;;  %v24331_v39 = vld [vmem:[#allocation187_spill] sm:$0xff] }
 0x42f   :  { %9788 = vmatprep.mubr.f32.mxu0 %v24277_v19  ;;  %12913 = vmatpush1.bf16.msra.mxu0 %v12336_v49  ;;  %v24290_v49 = vld [vmem:[#allocation107_spill] sm:$0xff]  ;;  %v24299_v19 = vld [vmem:[#allocation120_spill] sm:$0xff] }
 0x430   :  { %4562 = vmatmul.mubr.f32.gmra.mrb[54].mxu1 %v24282_v63  ;;  %12915 = vmatprep.subr.bf16.mxu0 %v12338_v45  ;;  %v24293_v45 = vld [vmem:[#allocation117_spill] sm:$0xff]  ;;  %v24308_v63 = vld [vmem:[#allocation148_spill] sm:$0xff]  ;;  %v24332_v25 = vld [vmem:[#allocation203_spill] sm:$0xff] }
 0x431   :  { %4570 = vmatprep.mubr.f32.mxu1 %v24284_v47  ;;  %12341 = vmatpush1.bf16.msra.mxu1 %v12340_v23  ;;  %v12356_v47 = vpack.c.bf16 %v24311_v37, %v24310_v51  ;;  %v24352_v52 = vld [vmem:[#allocation236_spill] sm:$0xff]  ;;  %v24403_v21 = vld [vmem:[#allocation47_spill] sm:$0xff] }
 0x432   :  { %9792 = vmatmul.mubr.f32.gmra.mrb[4].mxu0 %v24283_v31  ;;  %12343 = vmatprep.subr.bf16.mxu1 %v12342_v55  ;;  %v24309_v31 = vld [vmem:[#allocation146_spill] sm:$0xff]  ;;  %v24355_v51 = vld [vmem:[#allocation240_spill] sm:$0xff] }
 0x433   :  { %9800 = vmatprep.mubr.f32.mxu0 %v24285_v50  ;;  %12917 = vmatpush1.bf16.msra.mxu0 %v12340_v23  ;;  %v12352_v23 = vpack.c.bf16 %v24303_v35, %v24302_v17  ;;  %v12358_v50 = vpack.c.bf16 %v24313_v36, %v24312_v7  ;;  %v24340_v17 = vld [vmem:[#allocation214_spill] sm:$0xff]  ;;  %v24341_v35 = vld [vmem:[#allocation209_spill] sm:$0xff]  ;;  %v24356_v37 = vld [vmem:[#allocation256_spill] sm:$0xff] }
 0x434   :  { %4574 = vmatmul.mubr.f32.gmra.mrb[56].mxu1 %v24290_v49  ;;  %12919 = vmatprep.subr.bf16.mxu0 %v12342_v55  ;;  %v24307_v55 = vld [vmem:[#allocation141_spill] sm:$0xff]  ;;  %v24322_v49 = vld [vmem:[#allocation171_spill] sm:$0xff]  ;;  %v24357_v43 = vld [vmem:[#allocation252_spill] sm:$0xff] }
 0x435   :  { %4582 = vmatprep.mubr.f32.mxu1 %v24292_v0  ;;  %12345 = vmatpush1.bf16.msra.mxu1 %v12344_v3  ;;  %v24324_v0 = vld [vmem:[#allocation186_spill] sm:$0xff]  ;;  %v24360_v7 = vld [vmem:[#allocation437_spill] sm:$0xff]  ;;  %v24361_v36 = vld [vmem:[#allocation271_spill] sm:$0xff] }
 0x436   :  { %9804 = vmatmul.mubr.f32.gmra.mrb[6].mxu0 %v24291_v58  ;;  %12347 = vmatprep.subr.bf16.mxu1 %v12346_v44  ;;  %v24323_v58 = vld [vmem:[#allocation170_spill] sm:$0xff]  ;;  %v24382_v6 = vld [vmem:[#allocation352_spill] sm:$0xff] }
 0x437   :  { %9812 = vmatprep.mubr.f32.mxu0 %v24293_v45  ;;  %12921 = vmatpush1.bf16.msra.mxu0 %v12344_v3  ;;  %v24316_v3 = vld [vmem:[#allocation168_spill] sm:$0xff]  ;;  %v24325_v45 = vld [vmem:[#allocation178_spill] sm:$0xff] }
 0x438   :  { %4586 = vmatmul.mubr.f32.gmra.mrb[58].mxu1 %v24298_v28  ;;  %12923 = vmatprep.subr.bf16.mxu0 %v12346_v44  ;;  %v12362_v44 = vpack.c.bf16 %v24321_v62, %v24320_v20  ;;  %v12368_v28 = vpack.c.bf16 %v24335_v53, %v24334_v16  ;;  %v24371_v20 = vld [vmem:[#allocation319_spill] sm:$0xff]  ;;  %v24373_v62 = vld [vmem:[#allocation321_spill] sm:$0xff]  ;;  %v24390_v53 = vld [vmem:[#allocation384_spill] sm:$0xff] }
 0x439   :  { %4594 = vmatprep.mubr.f32.mxu1 %v24300_v18  ;;  %12349 = vmatpush1.bf16.msra.mxu1 %v12348_v42  ;;  %v24338_v18 = vld [vmem:[#allocation204_spill] sm:$0xff]  ;;  %v24389_v16 = vld [vmem:[#allocation387_spill] sm:$0xff] }
 0x43a   :  { %9816 = vmatmul.mubr.f32.gmra.mrb[8].mxu0 %v24299_v19  ;;  %12351 = vmatprep.subr.bf16.mxu1 %v12350_v27  ;;  %v12370_v19 = vpack.c.bf16 %v24337_v26, %v24336_v54  ;;  %v24392_v54 = vld [vmem:[#allocation390_spill] sm:$0xff]  ;;  %v24393_v26 = vld [vmem:[#allocation400_spill] sm:$0xff] }
 0x43b   :  { %9824 = vmatprep.mubr.f32.mxu0 %v24301_v14  ;;  %12925 = vmatpush1.bf16.msra.mxu0 %v12348_v42  ;;  %v24330_v42 = vld [vmem:[#allocation188_spill] sm:$0xff] }
 0x43c   :  { %4598 = vmatmul.mubr.f32.gmra.mrb[60].mxu1 %v24306_v59  ;;  %12927 = vmatprep.subr.bf16.mxu0 %v12350_v27  ;;  %v24333_v27 = vld [vmem:[#allocation198_spill] sm:$0xff]  ;;  %v24339_v14 = vld [vmem:[#allocation200_spill] sm:$0xff]  ;;  %v24348_v59 = vld [vmem:[#allocation235_spill] sm:$0xff] }
 0x43d   :  { %4606 = vmatprep.mubr.f32.mxu1 %v24308_v63  ;;  %12353 = vmatpush1.bf16.msra.mxu1 %v12352_v23  ;;  %v12376_v63 = vpack.c.bf16 %v24351_v32, %v24350_v24  ;;  %v24402_v57 = vld [vmem:[#allocation432_spill] sm:$0xff]  ;;  %v24410_v32 = vld [vmem:[#allocation45_spill] sm:$0xff] }
 0x43e   :  { %9828 = vmatmul.mubr.f32.gmra.mrb[10].mxu0 %v24307_v55  ;;  %12355 = vmatprep.subr.bf16.mxu1 %v12354_v2  ;;  %v24349_v55 = vld [vmem:[#allocation229_spill] sm:$0xff]  ;;  %v24409_v24 = vld [vmem:[#allocation48_spill] sm:$0xff] }
 0x43f   :  { %9836 = vmatprep.mubr.f32.mxu0 %v24309_v31  ;;  %12929 = vmatpush1.bf16.msra.mxu0 %v12352_v23  ;;  %v12372_v23 = vpack.c.bf16 %v24343_v40, %v24342_v34  ;;  %v24354_v31 = vld [vmem:[#allocation250_spill] sm:$0xff]  ;;  %v24399_v34 = vld [vmem:[#allocation431_spill] sm:$0xff]  ;;  %v24400_v40 = vld [vmem:[#allocation424_spill] sm:$0xff] }
 0x440   :  { %4610 = vmatmul.mubr.f32.gmra.mrb[62].mxu1 %v24314_v11  ;;  %12931 = vmatprep.subr.bf16.mxu0 %v12354_v2  ;;  %v24347_v2 = vld [vmem:[#allocation218_spill] sm:$0xff]  ;;  %v24363_v11 = vld [vmem:[#allocation289_spill] sm:$0xff] }
 0x441   :  { %4618 = vmatprep.mubr.f32.mxu1 %v24316_v3  ;;  %12357 = vmatpush1.bf16.msra.mxu1 %v12356_v47  ;;  %v24366_v3 = vld [vmem:[#allocation288_spill] sm:$0xff] }
 0x442   :  { %9840 = vmatmul.mubr.f32.gmra.mrb[12].mxu0 %v24315_v4  ;;  %12359 = vmatprep.subr.bf16.mxu1 %v12358_v50  ;;  %v24365_v4 = vld [vmem:[#allocation290_spill] sm:$0xff] }
 0x443   :  { %9848 = vmatprep.mubr.f32.mxu0 %v24317_v5  ;;  %12933 = vmatpush1.bf16.msra.mxu0 %v12356_v47  ;;  %v24359_v47 = vld [vmem:[#allocation262_spill] sm:$0xff] }
 0x444   :  { %4622 = vmatmul.mubr.f32.gmra.mrb[64].mxu1 %v24322_v49  ;;  %12935 = vmatprep.subr.bf16.mxu0 %v12358_v50  ;;  %v24362_v50 = vld [vmem:[#allocation270_spill] sm:$0xff]  ;;  %v24375_v49 = vld [vmem:[#allocation333_spill] sm:$0xff] }
 0x445   :  { %4630 = vmatprep.mubr.f32.mxu1 %v24324_v0  ;;  %12361 = vmatpush1.bf16.msra.mxu1 %v12360_v12  ;;  %v24367_v5 = vld [vmem:[#allocation302_spill] sm:$0xff]  ;;  %v24377_v0 = vld [vmem:[#allocation337_spill] sm:$0xff] }
 0x446   :  { %9852 = vmatmul.mubr.f32.gmra.mrb[14].mxu0 %v24323_v58  ;;  %12363 = vmatprep.subr.bf16.mxu1 %v12362_v44  ;;  %v24376_v58 = vld [vmem:[#allocation327_spill] sm:$0xff] }
 0x447   :  { %9860 = vmatprep.mubr.f32.mxu0 %v24325_v45  ;;  %12937 = vmatpush1.bf16.msra.mxu0 %v12360_v12  ;;  %v24370_v12 = vld [vmem:[#allocation303_spill] sm:$0xff]  ;;  %v24378_v45 = vld [vmem:[#allocation334_spill] sm:$0xff] }
 0x448   :  { %4634 = vmatmul.mubr.f32.gmra.mrb[66].mxu1 %v24330_v42  ;;  %12939 = vmatprep.subr.bf16.mxu0 %v12362_v44  ;;  %v24374_v44 = vld [vmem:[#allocation320_spill] sm:$0xff]  ;;  %v24385_v42 = vld [vmem:[#allocation369_spill] sm:$0xff] }
 0x449   :  { %4642 = vmatprep.mubr.f32.mxu1 %v24332_v25  ;;  %12365 = vmatpush1.bf16.msra.mxu1 %v12364_v61  ;;  %v24387_v25 = vld [vmem:[#allocation383_spill] sm:$0xff] }
 0x44a   :  { %9864 = vmatmul.mubr.f32.gmra.mrb[16].mxu0 %v24331_v39  ;;  %12367 = vmatprep.subr.bf16.mxu1 %v12366_v30  ;;  %v24386_v39 = vld [vmem:[#allocation367_spill] sm:$0xff] }
 0x44b   :  { %9872 = vmatprep.mubr.f32.mxu0 %v24333_v27  ;;  %12941 = vmatpush1.bf16.msra.mxu0 %v12364_v61  ;;  %v24381_v61 = vld [vmem:[#allocation354_spill] sm:$0xff]  ;;  %v24388_v27 = vld [vmem:[#allocation381_spill] sm:$0xff] }
 0x44c   :  { %4646 = vmatmul.mubr.f32.gmra.mrb[68].mxu1 %v24338_v18  ;;  %12943 = vmatprep.subr.bf16.mxu0 %v12366_v30  ;;  %v24384_v30 = vld [vmem:[#allocation358_spill] sm:$0xff]  ;;  %v24395_v18 = vld [vmem:[#allocation416_spill] sm:$0xff] }
 0x44d   :  { %4654 = vmatprep.mubr.f32.mxu1 %v24340_v17  ;;  %12369 = vmatpush1.bf16.msra.mxu1 %v12368_v28  ;;  %v24397_v17 = vld [vmem:[#allocation418_spill] sm:$0xff] }
 0x44e   :  { %9876 = vmatmul.mubr.f32.gmra.mrb[18].mxu0 %v24339_v14  ;;  %12371 = vmatprep.subr.bf16.mxu1 %v12370_v19  ;;  %v24396_v14 = vld [vmem:[#allocation413_spill] sm:$0xff] }
 0x44f   :  { %9884 = vmatprep.mubr.f32.mxu0 %v24341_v35  ;;  %12945 = vmatpush1.bf16.msra.mxu0 %v12368_v28  ;;  %v24391_v28 = vld [vmem:[#allocation397_spill] sm:$0xff] }
 0x450   :  { %4658 = vmatmul.mubr.f32.gmra.mrb[70].mxu1 %v24346_v41  ;;  %12947 = vmatprep.subr.bf16.mxu0 %v12370_v19  ;;  %v24394_v19 = vld [vmem:[#allocation399_spill] sm:$0xff]  ;;  %v24398_v35 = vld [vmem:[#allocation417_spill] sm:$0xff] }
 0x451   :  { %4666 = vmatprep.mubr.f32.mxu1 %v24348_v59  ;;  %12373 = vmatpush1.bf16.msra.mxu1 %v12372_v23  ;;  %v24405_v41 = vld [vmem:[#allocation451_spill] sm:$0xff]  ;;  %v24407_v59 = vld [vmem:[#allocation46_spill] sm:$0xff] }
 0x452   :  { %9888 = vmatmul.mubr.f32.gmra.mrb[20].mxu0 %v24347_v2  ;;  %12375 = vmatprep.subr.bf16.mxu1 %v12374_v9  ;;  %v24406_v2 = vld [vmem:[#allocation449_spill] sm:$0xff] }
 0x453   :  { %9896 = vmatprep.mubr.f32.mxu0 %v24349_v55  ;;  %12949 = vmatpush1.bf16.msra.mxu0 %v12372_v23  ;;  %v24401_v23 = vld [vmem:[#allocation433_spill] sm:$0xff]  ;;  %v24408_v55 = vld [vmem:[#allocation44_spill] sm:$0xff] }
 0x454   :  { %4670 = vmatmul.mubr.f32.gmra.mrb[72].mxu1 %v24352_v52  ;;  %12951 = vmatprep.subr.bf16.mxu0 %v12374_v9  ;;  %v24404_v9 = vld [vmem:[#allocation444_spill] sm:$0xff]  ;;  %v24412_v52 = vld [vmem:[#allocation63_spill] sm:$0xff] }
 0x455   :  { %4678 = vmatprep.mubr.f32.mxu1 %v24354_v31  ;;  %12377 = vmatpush1.bf16.msra.mxu1 %v12376_v63  ;;  %v24414_v31 = vld [vmem:[#allocation64_spill] sm:$0xff] }
 0x456   :  { %9900 = vmatmul.mubr.f32.gmra.mrb[22].mxu0 %v24353_v33  ;;  %5027 = vmatprep.subr.mxu1 %v18745_v29  ;;  %v24413_v33 = vld [vmem:[#allocation65_spill] sm:$0xff] }
 0x457   :  { %9908 = vmatprep.mubr.f32.mxu0 %v24355_v51  ;;  %12953 = vmatpush1.bf16.msra.mxu0 %v12376_v63  ;;  %v24411_v63 = vld [vmem:[#allocation67_spill] sm:$0xff]  ;;  %v24415_v51 = vld [vmem:[#allocation73_spill] sm:$0xff] }
 0x458   :  { %4682 = vmatmul.mubr.f32.gmra.mrb[74].mxu1 %v24356_v37  ;;  %10257 = vmatprep.subr.mxu0 %v18745_v29  ;;  %v24364_v29 = vld [vmem:[#allocation279_spill] sm:$0xff]  ;;  %v24416_v37 = vld [vmem:[#allocation70_spill] sm:$0xff] }
 0x459   :  { %4690 = vmatprep.mubr.f32.mxu1 %v24358_v13  ;;  %5031 = vmatpush1.msra.mxu1 %v24360_v7  ;;  %v24418_v13 = vld [vmem:[#allocation90_spill] sm:$0xff] }
 0x45a   :  { %9912 = vmatmul.mubr.f32.gmra.mrb[24].mxu0 %v24357_v43  ;;  %12379 = vmatprep.subr.bf16.mxu1 %v24059_v38  ;;  %v24417_v43 = vld [vmem:[#allocation264_spill] sm:$0xff] }
 0x45b   :  { %9920 = vmatprep.mubr.f32.mxu0 %v24359_v47  ;;  %10261 = vmatpush1.msra.mxu0 %v24360_v7  ;;  %v24420_v47 = vld [vmem:[#allocation95_spill] sm:$0xff] }
 0x45c   :  { %4694 = vmatmul.mubr.f32.gmra.mrb[76].mxu1 %v24361_v36  ;;  %12955 = vmatprep.subr.bf16.mxu0 %v24059_v38  ;;  %v24372_v38 = vld [vmem:[#allocation314_spill] sm:$0xff]  ;;  %v24422_v7 = vld [vmem:[#allocation267_spill] sm:$0xff] }
 0x45d   :  { %4702 = vmatprep.mubr.f32.mxu1 %v24363_v11  ;;  %v24423_v36 = vld [vmem:[#allocation274_spill] sm:$0xff]  ;;  %v24426_v11 = vld [vmem:[#allocation113_spill] sm:$0xff] }
 0x45e   :  { %9924 = vmatmul.mubr.f32.gmra.mrb[26].mxu0 %v24362_v50  ;;  %v24424_v50 = vld [vmem:[#allocation98_spill] sm:$0xff] }
 0x45f   :  { %9932 = vmatprep.mubr.f32.mxu0 %v24364_v29  ;;  %v24427_v29 = vld [vmem:[#allocation108_spill] sm:$0xff] }
 0x460   :  { %4706 = vmatmul.mubr.f32.gmra.mrb[78].mxu1 %v24365_v4  ;;  %v24428_v4 = vld [vmem:[#allocation13_spill] sm:$0xff] }
 0x461   :  { %4714 = vmatprep.mubr.f32.mxu1 %v24367_v5  ;;  %v24430_v5 = vld [vmem:[#allocation119_spill] sm:$0xff] }
 0x462   :  { %9936 = vmatmul.mubr.f32.gmra.mrb[28].mxu0 %v24366_v3  ;;  %v24429_v3 = vld [vmem:[#allocation14_spill] sm:$0xff] }
 0x463   :  { %9944 = vmatprep.mubr.f32.mxu0 %v24368_v60  ;;  %v24431_v60 = vld [vmem:[#allocation109_spill] sm:$0xff] }
 0x464   :  { %4718 = vmatmul.mubr.f32.gmra.mrb[80].mxu1 %v24369_v48  ;;  %v24432_v48 = vld [vmem:[#allocation129_spill] sm:$0xff] }
 0x465   :  { %4726 = vmatprep.mubr.f32.mxu1 %v24371_v20  ;;  %v24434_v20 = vld [vmem:[#allocation16_spill] sm:$0xff] }
 0x466   :  { %9948 = vmatmul.mubr.f32.gmra.mrb[30].mxu0 %v24370_v12  ;;  %v24433_v12 = vld [vmem:[#allocation127_spill] sm:$0xff] }
 0x467   :  { %9956 = vmatprep.mubr.f32.mxu0 %v24372_v38  ;;  %v24435_v38 = vld [vmem:[#allocation17_spill] sm:$0xff] }
 0x468   :  { %4730 = vmatmul.mubr.f32.gmra.mrb[82].mxu1 %v24373_v62  ;;  %v24436_v62 = vld [vmem:[#allocation132_spill] sm:$0xff] }
 0x469   :  { %4738 = vmatprep.mubr.f32.mxu1 %v24375_v49  ;;  %v24438_v49 = vld [vmem:[#allocation138_spill] sm:$0xff] }
 0x46a   :  { %9960 = vmatmul.mubr.f32.gmra.mrb[32].mxu0 %v24374_v44  ;;  %v24437_v44 = vld [vmem:[#allocation130_spill] sm:$0xff] }
 0x46b   :  { %9968 = vmatprep.mubr.f32.mxu0 %v24376_v58  ;;  %v24439_v58 = vld [vmem:[#allocation135_spill] sm:$0xff] }
 0x46c   :  { %4742 = vmatmul.mubr.f32.gmra.mrb[84].mxu1 %v24377_v0  ;;  %v24440_v0 = vld [vmem:[#allocation18_spill] sm:$0xff] }
 0x46d   :  { %4750 = vmatprep.mubr.f32.mxu1 %v24379_v8  ;;  %v24442_v8 = vld [vmem:[#allocation154_spill] sm:$0xff] }
 0x46e   :  { %9972 = vmatmul.mubr.f32.gmra.mrb[34].mxu0 %v24378_v45  ;;  %v24441_v45 = vld [vmem:[#allocation2_spill] sm:$0xff] }
 0x46f   :  { %9980 = vmatprep.mubr.f32.mxu0 %v24380_v46  ;;  %v24443_v46 = vld [vmem:[#allocation139_spill] sm:$0xff] }
 0x470   :  { %4754 = vmatmul.mubr.f32.gmra.mrb[86].mxu1 %v24381_v61  ;;  %v24444_v61 = vld [vmem:[#allocation159_spill] sm:$0xff] }
 0x471   :  { %4762 = vmatprep.mubr.f32.mxu1 %v24383_v22  ;;  %v24446_v22 = vld [vmem:[#allocation3_spill] sm:$0xff] }
 0x472   :  { %9984 = vmatmul.mubr.f32.gmra.mrb[36].mxu0 %v24382_v6  ;;  %v24445_v6 = vld [vmem:[#allocation158_spill] sm:$0xff] }
 0x473   :  { %9992 = vmatprep.mubr.f32.mxu0 %v24384_v30  ;;  %v24447_v30 = vld [vmem:[#allocation4_spill] sm:$0xff] }
 0x474   :  { %4766 = vmatmul.mubr.f32.gmra.mrb[88].mxu1 %v24385_v42  ;;  %v24448_v42 = vld [vmem:[#allocation162_spill] sm:$0xff] }
 0x475   :  { %4774 = vmatprep.mubr.f32.mxu1 %v24387_v25  ;;  %v24450_v25 = vld [vmem:[#allocation179_spill] sm:$0xff] }
 0x476   :  { %9996 = vmatmul.mubr.f32.gmra.mrb[38].mxu0 %v24386_v39  ;;  %v24449_v39 = vld [vmem:[#allocation161_spill] sm:$0xff] }
 0x477   :  { %10004 = vmatprep.mubr.f32.mxu0 %v24388_v27  ;;  %v24451_v27 = vld [vmem:[#allocation172_spill] sm:$0xff] }
 0x478   :  { %4778 = vmatmul.mubr.f32.gmra.mrb[90].mxu1 %v24389_v16  ;;  %v24452_v16 = vld [vmem:[#allocation5_spill] sm:$0xff] }
 0x479   :  { %4786 = vmatprep.mubr.f32.mxu1 %v24391_v28  ;;  %v24454_v28 = vld [vmem:[#allocation181_spill] sm:$0xff] }
 0x47a   :  { %10008 = vmatmul.mubr.f32.gmra.mrb[40].mxu0 %v24390_v53  ;;  %v24453_v53 = vld [vmem:[#allocation6_spill] sm:$0xff] }
 0x47b   :  { %10016 = vmatprep.mubr.f32.mxu0 %v24392_v54  ;;  %v24455_v54 = vld [vmem:[#allocation180_spill] sm:$0xff] }
 0x47c   :  { %4790 = vmatmul.mubr.f32.gmra.mrb[92].mxu1 %v24393_v26  ;;  %v24456_v26 = vld [vmem:[#allocation194_spill] sm:$0xff] }
 0x47d   :  { %4798 = vmatprep.mubr.f32.mxu1 %v24395_v18  ;;  %v24458_v18 = vld [vmem:[#allocation7_spill] sm:$0xff] }
 0x47e   :  { %10020 = vmatmul.mubr.f32.gmra.mrb[42].mxu0 %v24394_v19  ;;  %v24457_v19 = vld [vmem:[#allocation189_spill] sm:$0xff] }
 0x47f   :  { %10028 = vmatprep.mubr.f32.mxu0 %v24396_v14  ;;  %v24459_v14 = vld [vmem:[#allocation8_spill] sm:$0xff] }
 0x480   :  { %4802 = vmatmul.mubr.f32.gmra.mrb[94].mxu1 %v24397_v17  ;;  %v24460_v17 = vld [vmem:[#allocation197_spill] sm:$0xff] }
 0x481   :  { %4810 = vmatprep.mubr.f32.mxu1 %v24399_v34  ;;  %v24462_v34 = vld [vmem:[#allocation207_spill] sm:$0xff] }
 0x482   :  { %10032 = vmatmul.mubr.f32.gmra.mrb[44].mxu0 %v24398_v35  ;;  %v24461_v35 = vld [vmem:[#allocation190_spill] sm:$0xff] }
 0x483   :  { %10040 = vmatprep.mubr.f32.mxu0 %v24400_v40  ;;  %v24463_v40 = vld [vmem:[#allocation202_spill] sm:$0xff] }
 0x484   :  { %4814 = vmatmul.mubr.f32.gmra.mrb[96].mxu1 %v24401_v23  ;;  %v24464_v23 = vld [vmem:[#allocation10_spill] sm:$0xff] }
 0x485   :  { %4822 = vmatprep.mubr.f32.mxu1 %v24403_v21  ;;  %v24466_v21 = vld [vmem:[#allocation216_spill] sm:$0xff] }
 0x486   :  { %10044 = vmatmul.mubr.f32.gmra.mrb[46].mxu0 %v24402_v57  ;;  %v24465_v57 = vld [vmem:[#allocation11_spill] sm:$0xff] }
 0x487   :  { %10052 = vmatprep.mubr.f32.mxu0 %v24404_v9  ;;  %v24467_v9 = vld [vmem:[#allocation212_spill] sm:$0xff] }
 0x488   :  { %4826 = vmatmul.mubr.f32.gmra.mrb[98].mxu1 %v24405_v41  ;;  %v24468_v41 = vld [vmem:[#allocation225_spill] sm:$0xff] }
 0x489   :  { %5047 = vmatprep.mubr.f32.mxu1 %v24407_v59 }
 0x48a   :  { %10056 = vmatmul.mubr.f32.gmra.mrb[48].mxu0 %v24406_v2  ;;  %v24469_v2 = vld [vmem:[#allocation220_spill] sm:$0xff] }
 0x48b   :  { %10277 = vmatprep.mubr.f32.mxu0 %v24408_v55 }
 0x48c   :  { %5049 = vmatmul.mubr.f32.vlgmr.msra.gmra.mrb[50].mxu1 %v24409_v24 }
 0x48d   :  { %12381 = vmatpush1.bf16.msra.mxu1 %v24135_v56  ;;  %5055 = vmatprep.mubr.f32.mxu1 %v24411_v63 }
 0x48e   :  { %10279 = vmatmul.mubr.f32.vlgmr.msra.gmra.mrb[0].mxu0 %v24410_v32  ;;  %12383 = vmatprep.subr.bf16.mxu1 %v24139_v1 }
 0x48f   :  { %10285 = vmatprep.mubr.f32.mxu0 %v24412_v52  ;;  %12957 = vmatpush1.bf16.msra.mxu0 %v24135_v56  ;;  %v24419_v56 = vld [vmem:[#allocation74_spill] sm:$0xff] }
 0x490   :  { %5057 = vmatmul.mubr.f32.gmra.mrb[52].mxu1 %v24413_v33  ;;  %12959 = vmatprep.subr.bf16.mxu0 %v24139_v1  ;;  %v24421_v1 = vld [vmem:[#allocation94_spill] sm:$0xff] }
 0x491   :  { %5063 = vmatprep.mubr.f32.mxu1 %v24415_v51  ;;  %12385 = vmatpush1.bf16.msra.mxu1 %v24145_v15 }
 0x492   :  { %10287 = vmatmul.mubr.f32.gmra.mrb[2].mxu0 %v24414_v31  ;;  %12387 = vmatprep.subr.bf16.mxu1 %v24417_v43 }
 0x493   :  { %10293 = vmatprep.mubr.f32.mxu0 %v24416_v37  ;;  %12961 = vmatpush1.bf16.msra.mxu0 %v24145_v15  ;;  %v24425_v15 = vld [vmem:[#allocation97_spill] sm:$0xff] }
 0x494   :  { %5065 = vmatmul.mubr.f32.gmra.mrb[54].mxu1 %v24418_v13  ;;  %12963 = vmatprep.subr.bf16.mxu0 %v24417_v43  ;;  %v24470_v43 = vld [vmem:[#allocation12_spill] sm:$0xff] }
 0x495   :  { %5071 = vmatprep.mubr.f32.mxu1 %v24420_v47  ;;  %12389 = vmatpush1.bf16.msra.mxu1 %v24422_v7 }
 0x496   :  { %10295 = vmatmul.mubr.f32.gmra.mrb[4].mxu0 %v24419_v56  ;;  %12391 = vmatprep.subr.bf16.mxu1 %v24423_v36 }
 0x497   :  { %10301 = vmatprep.mubr.f32.mxu0 %v24421_v1  ;;  %12965 = vmatpush1.bf16.msra.mxu0 %v24422_v7  ;;  %v24471_v7 = vld [vmem:[#allocation228_spill] sm:$0xff] }
 0x498   :  { %5073 = vmatmul.mubr.f32.gmra.mrb[56].mxu1 %v24424_v50  ;;  %12967 = vmatprep.subr.bf16.mxu0 %v24423_v36  ;;  %v24472_v36 = vld [vmem:[#allocation221_spill] sm:$0xff] }
 0x499   :  { %5079 = vmatprep.mubr.f32.mxu1 %v24426_v11  ;;  %12393 = vmatpush1.bf16.msra.mxu1 %v24428_v4 }
 0x49a   :  { %10303 = vmatmul.mubr.f32.gmra.mrb[6].mxu0 %v24425_v15  ;;  %12395 = vmatprep.subr.bf16.mxu1 %v24429_v3 }
 0x49b   :  { %10309 = vmatprep.mubr.f32.mxu0 %v24427_v29  ;;  %12969 = vmatpush1.bf16.msra.mxu0 %v24428_v4  ;;  %v24473_v4 = vld [vmem:[#allocation241_spill] sm:$0xff] }
 0x49c   :  { %5081 = vmatmul.mubr.f32.gmra.mrb[58].mxu1 %v24430_v5  ;;  %12971 = vmatprep.subr.bf16.mxu0 %v24429_v3  ;;  %v24474_v3 = vld [vmem:[#allocation234_spill] sm:$0xff] }
 0x49d   :  { %5087 = vmatprep.mubr.f32.mxu1 %v24432_v48  ;;  %12397 = vmatpush1.bf16.msra.mxu1 %v24434_v20 }
 0x49e   :  { %10311 = vmatmul.mubr.f32.gmra.mrb[8].mxu0 %v24431_v60  ;;  %12399 = vmatprep.subr.bf16.mxu1 %v24435_v38 }
 0x49f   :  { %10317 = vmatprep.mubr.f32.mxu0 %v24433_v12  ;;  %12973 = vmatpush1.bf16.msra.mxu0 %v24434_v20  ;;  %v24475_v20 = vld [vmem:[#allocation19_spill] sm:$0xff] }
 0x4a0   :  { %5089 = vmatmul.mubr.f32.gmra.mrb[60].mxu1 %v24436_v62  ;;  %12975 = vmatprep.subr.bf16.mxu0 %v24435_v38  ;;  %v24476_v38 = vld [vmem:[#allocation23_spill] sm:$0xff] }
 0x4a1   :  { %5095 = vmatprep.mubr.f32.mxu1 %v24438_v49  ;;  %12401 = vmatpush1.bf16.msra.mxu1 %v24440_v0 }
 0x4a2   :  { %10319 = vmatmul.mubr.f32.gmra.mrb[10].mxu0 %v24437_v44  ;;  %12403 = vmatprep.subr.bf16.mxu1 %v24441_v45 }
 0x4a3   :  { %10325 = vmatprep.mubr.f32.mxu0 %v24439_v58  ;;  %12977 = vmatpush1.bf16.msra.mxu0 %v24440_v0  ;;  %v24477_v0 = vld [vmem:[#allocation251_spill] sm:$0xff] }
 0x4a4   :  { %5097 = vmatmul.mubr.f32.gmra.mrb[62].mxu1 %v24442_v8  ;;  %12979 = vmatprep.subr.bf16.mxu0 %v24441_v45  ;;  %v24478_v45 = vld [vmem:[#allocation243_spill] sm:$0xff] }
 0x4a5   :  { %5103 = vmatprep.mubr.f32.mxu1 %v24444_v61  ;;  %12405 = vmatpush1.bf16.msra.mxu1 %v24446_v22 }
 0x4a6   :  { %10327 = vmatmul.mubr.f32.gmra.mrb[12].mxu0 %v24443_v46  ;;  %12407 = vmatprep.subr.bf16.mxu1 %v24447_v30 }
 0x4a7   :  { %10333 = vmatprep.mubr.f32.mxu0 %v24445_v6  ;;  %12981 = vmatpush1.bf16.msra.mxu0 %v24446_v22  ;;  %v24479_v22 = vld [vmem:[#allocation258_spill] sm:$0xff] }
 0x4a8   :  { %5105 = vmatmul.mubr.f32.gmra.mrb[64].mxu1 %v24448_v42  ;;  %12983 = vmatprep.subr.bf16.mxu0 %v24447_v30  ;;  %v24481_v30 = vld [vmem:[#allocation39_spill] sm:$0xff] }
 0x4a9   :  { %5111 = vmatprep.mubr.f32.mxu1 %v24450_v25  ;;  %12409 = vmatpush1.bf16.msra.mxu1 %v24452_v16 }
 0x4aa   :  { %10335 = vmatmul.mubr.f32.gmra.mrb[14].mxu0 %v24449_v39  ;;  %12411 = vmatprep.subr.bf16.mxu1 %v24453_v53 }
 0x4ab   :  { %10341 = vmatprep.mubr.f32.mxu0 %v24451_v27  ;;  %12985 = vmatpush1.bf16.msra.mxu0 %v24452_v16  ;;  %v24482_v16 = vld [vmem:[#allocation261_spill] sm:$0xff] }
 0x4ac   :  { %5113 = vmatmul.mubr.f32.gmra.mrb[66].mxu1 %v24454_v28  ;;  %12987 = vmatprep.subr.bf16.mxu0 %v24453_v53  ;;  %v24483_v53 = vld [vmem:[#allocation260_spill] sm:$0xff] }
 0x4ad   :  { %5119 = vmatprep.mubr.f32.mxu1 %v24456_v26  ;;  %12413 = vmatpush1.bf16.msra.mxu1 %v24458_v18 }
 0x4ae   :  { %10343 = vmatmul.mubr.f32.gmra.mrb[16].mxu0 %v24455_v54  ;;  %12415 = vmatprep.subr.bf16.mxu1 %v24459_v14 }
 0x4af   :  { %10349 = vmatprep.mubr.f32.mxu0 %v24457_v19  ;;  %12989 = vmatpush1.bf16.msra.mxu0 %v24458_v18  ;;  %v24484_v18 = vld [vmem:[#allocation281_spill] sm:$0xff] }
 0x4b0   :  { %5121 = vmatmul.mubr.f32.gmra.mrb[68].mxu1 %v24460_v17  ;;  %12991 = vmatprep.subr.bf16.mxu0 %v24459_v14  ;;  %v24485_v14 = vld [vmem:[#allocation273_spill] sm:$0xff] }
 0x4b1   :  { %5127 = vmatprep.mubr.f32.mxu1 %v24462_v34  ;;  %12417 = vmatpush1.bf16.msra.mxu1 %v24464_v23 }
 0x4b2   :  { %10351 = vmatmul.mubr.f32.gmra.mrb[18].mxu0 %v24461_v35  ;;  %12419 = vmatprep.subr.bf16.mxu1 %v24465_v57 }
 0x4b3   :  { %10357 = vmatprep.mubr.f32.mxu0 %v24463_v40  ;;  %12993 = vmatpush1.bf16.msra.mxu0 %v24464_v23  ;;  %v24486_v23 = vld [vmem:[#allocation282_spill] sm:$0xff] }
 0x4b4   :  { %5129 = vmatmul.mubr.f32.gmra.mrb[70].mxu1 %v24466_v21  ;;  %12995 = vmatprep.subr.bf16.mxu0 %v24465_v57  ;;  %v24487_v57 = vld [vmem:[#allocation280_spill] sm:$0xff] }
 0x4b5   :  { %5135 = vmatprep.mubr.f32.mxu1 %v24468_v41  ;;  %12421 = vmatpush1.bf16.msra.mxu1 %v24470_v43 }
 0x4b6   :  { %10359 = vmatmul.mubr.f32.gmra.mrb[20].mxu0 %v24467_v9  ;;  %12423 = vmatprep.subr.bf16.mxu1 %v24202_v10 }
 0x4b7   :  { %10365 = vmatprep.mubr.f32.mxu0 %v24469_v2  ;;  %12997 = vmatpush1.bf16.msra.mxu0 %v24470_v43  ;;  %v24488_v43 = vld [vmem:[#allocation292_spill] sm:$0xff] }
 0x4b8   :  { %5137 = vmatmul.mubr.f32.gmra.mrb[72].mxu1 %v24471_v7  ;;  %12999 = vmatprep.subr.bf16.mxu0 %v24202_v10  ;;  %v24480_v10 = vld [vmem:[#allocation254_spill] sm:$0xff] }
 0x4b9   :  { %5143 = vmatprep.mubr.f32.mxu1 %v24473_v4  ;;  %12425 = vmatpush1.bf16.msra.mxu1 %v24475_v20 }
 0x4ba   :  { %10367 = vmatmul.mubr.f32.gmra.mrb[22].mxu0 %v24472_v36  ;;  %5344 = vmatprep.subr.mxu1 %v24476_v38 }
 0x4bb   :  { %10373 = vmatprep.mubr.f32.mxu0 %v24474_v3  ;;  %13001 = vmatpush1.bf16.msra.mxu0 %v24475_v20  ;;  %v24489_v20 = vld [vmem:[#allocation286_spill] sm:$0xff] }
 0x4bc   :  { %5145 = vmatmul.mubr.f32.gmra.mrb[74].mxu1 %v24477_v0  ;;  %10574 = vmatprep.subr.mxu0 %v24476_v38  ;;  %v24490_v38 = vld [vmem:[#allocation294_spill] sm:$0xff] }
 0x4bd   :  { %5151 = vmatprep.mubr.f32.mxu1 %v24479_v22  ;;  %5346 = vmatpush1.msra.mxu1 %v24481_v30 }
 0x4be   :  { %10375 = vmatmul.mubr.f32.gmra.mrb[24].mxu0 %v24478_v45 }
 0x4bf   :  { %10381 = vmatprep.mubr.f32.mxu0 %v24480_v10  ;;  %10576 = vmatpush1.msra.mxu0 %v24481_v30  ;;  %v24491_v10 = vld [vmem:[#allocation293_spill] sm:$0xff]  ;;  %v24492_v30 = vld [vmem:[#allocation311_spill] sm:$0xff] }
 0x4c0   :  { %5153 = vmatmul.mubr.f32.gmra.mrb[76].mxu1 %v24482_v16  ;;  %v24493_v16 = vld [vmem:[#allocation307_spill] sm:$0xff] }
 0x4c1   :  { %5159 = vmatprep.mubr.f32.mxu1 %v24484_v18  ;;  %v24495_v18 = vld [vmem:[#allocation312_spill] sm:$0xff] }
 0x4c2   :  { %10383 = vmatmul.mubr.f32.gmra.mrb[26].mxu0 %v24483_v53  ;;  %v24494_v53 = vld [vmem:[#allocation313_spill] sm:$0xff] }
 0x4c3   :  { %10389 = vmatprep.mubr.f32.mxu0 %v24485_v14  ;;  %v24496_v14 = vld [vmem:[#allocation322_spill] sm:$0xff] }
 0x4c4   :  { %5161 = vmatmul.mubr.f32.gmra.mrb[78].mxu1 %v24486_v23  ;;  %v24497_v23 = vld [vmem:[#allocation318_spill] sm:$0xff] }
 0x4c5   :  { %5167 = vmatprep.mubr.f32.mxu1 %v24488_v43  ;;  %v24499_v43 = vld [vmem:[#allocation325_spill] sm:$0xff] }
 0x4c6   :  { %10391 = vmatmul.mubr.f32.gmra.mrb[28].mxu0 %v24487_v57  ;;  %v24498_v57 = vld [vmem:[#allocation329_spill] sm:$0xff] }
 0x4c7   :  { %10397 = vmatprep.mubr.f32.mxu0 %v24489_v20  ;;  %v24500_v20 = vld [vmem:[#allocation343_spill] sm:$0xff] }
 0x4c8   :  { %5169 = vmatmul.mubr.f32.gmra.mrb[80].mxu1 %v24490_v38  ;;  %v24501_v38 = vld [vmem:[#allocation339_spill] sm:$0xff] }
 0x4c9   :  { %5175 = vmatprep.mubr.f32.mxu1 %v24492_v30  ;;  %v24503_v30 = vld [vmem:[#allocation344_spill] sm:$0xff] }
 0x4ca   :  { %10399 = vmatmul.mubr.f32.gmra.mrb[30].mxu0 %v24491_v10  ;;  %v24502_v10 = vld [vmem:[#allocation346_spill] sm:$0xff] }
 0x4cb   :  { %10405 = vmatprep.mubr.f32.mxu0 %v24493_v16  ;;  %v24504_v16 = vld [vmem:[#allocation356_spill] sm:$0xff] }
 0x4cc   :  { %5177 = vmatmul.mubr.f32.gmra.mrb[82].mxu1 %v24494_v53  ;;  %v24505_v53 = vld [vmem:[#allocation350_spill] sm:$0xff] }
 0x4cd   :  { %5183 = vmatprep.mubr.f32.mxu1 %v24496_v14  ;;  %v24507_v14 = vld [vmem:[#allocation357_spill] sm:$0xff] }
 0x4ce   :  { %10407 = vmatmul.mubr.f32.gmra.mrb[32].mxu0 %v24495_v18  ;;  %v24506_v18 = vld [vmem:[#allocation360_spill] sm:$0xff] }
 0x4cf   :  { %10413 = vmatprep.mubr.f32.mxu0 %v24497_v23  ;;  %v24508_v23 = vld [vmem:[#allocation374_spill] sm:$0xff] }
 0x4d0   :  { %5185 = vmatmul.mubr.f32.gmra.mrb[84].mxu1 %v24498_v57  ;;  %v24509_v57 = vld [vmem:[#allocation373_spill] sm:$0xff] }
 0x4d1   :  { %5191 = vmatprep.mubr.f32.mxu1 %v24500_v20  ;;  %v24511_v20 = vld [vmem:[#allocation375_spill] sm:$0xff] }
 0x4d2   :  { %10415 = vmatmul.mubr.f32.gmra.mrb[34].mxu0 %v24499_v43  ;;  %v24510_v43 = vld [vmem:[#allocation377_spill] sm:$0xff] }
 0x4d3   :  { %10421 = vmatprep.mubr.f32.mxu0 %v24501_v38  ;;  %v24512_v38 = vld [vmem:[#allocation386_spill] sm:$0xff] }
 0x4d4   :  { %5193 = vmatmul.mubr.f32.gmra.mrb[86].mxu1 %v24502_v10  ;;  %v24513_v10 = vld [vmem:[#allocation380_spill] sm:$0xff] }
 0x4d5   :  { %5199 = vmatprep.mubr.f32.mxu1 %v24504_v16  ;;  %v24515_v16 = vld [vmem:[#allocation388_spill] sm:$0xff] }
 0x4d6   :  { %10423 = vmatmul.mubr.f32.gmra.mrb[36].mxu0 %v24503_v30  ;;  %v24514_v30 = vld [vmem:[#allocation389_spill] sm:$0xff] }
 0x4d7   :  { %10429 = vmatprep.mubr.f32.mxu0 %v24505_v53  ;;  %v24516_v53 = vld [vmem:[#allocation407_spill] sm:$0xff] }
 0x4d8   :  { %5201 = vmatmul.mubr.f32.gmra.mrb[88].mxu1 %v24506_v18  ;;  %v24517_v18 = vld [vmem:[#allocation406_spill] sm:$0xff] }
 0x4d9   :  { %5207 = vmatprep.mubr.f32.mxu1 %v24508_v23  ;;  %v24519_v23 = vld [vmem:[#allocation408_spill] sm:$0xff] }
 0x4da   :  { %10431 = vmatmul.mubr.f32.gmra.mrb[38].mxu0 %v24507_v14  ;;  %v24518_v14 = vld [vmem:[#allocation410_spill] sm:$0xff] }
 0x4db   :  { %10437 = vmatprep.mubr.f32.mxu0 %v24509_v57  ;;  %v24520_v57 = vld [vmem:[#allocation420_spill] sm:$0xff] }
 0x4dc   :  { %5209 = vmatmul.mubr.f32.gmra.mrb[90].mxu1 %v24510_v43  ;;  %v24521_v43 = vld [vmem:[#allocation415_spill] sm:$0xff] }
 0x4dd   :  { %5215 = vmatprep.mubr.f32.mxu1 %v24512_v38  ;;  %v24523_v38 = vld [vmem:[#allocation421_spill] sm:$0xff] }
 0x4de   :  { %10439 = vmatmul.mubr.f32.gmra.mrb[40].mxu0 %v24511_v20  ;;  %v24522_v20 = vld [vmem:[#allocation422_spill] sm:$0xff] }
 0x4df   :  { %10445 = vmatprep.mubr.f32.mxu0 %v24513_v10  ;;  %v24524_v10 = vld [vmem:[#allocation440_spill] sm:$0xff] }
 0x4e0   :  { %5217 = vmatmul.mubr.f32.gmra.mrb[92].mxu1 %v24514_v30  ;;  %v24525_v30 = vld [vmem:[#allocation436_spill] sm:$0xff] }
 0x4e1   :  { %5223 = vmatprep.mubr.f32.mxu1 %v24516_v53  ;;  %v24527_v53 = vld [vmem:[#allocation443_spill] sm:$0xff] }
 0x4e2   :  { %10447 = vmatmul.mubr.f32.gmra.mrb[42].mxu0 %v24515_v16  ;;  %v24526_v16 = vld [vmem:[#allocation446_spill] sm:$0xff] }
 0x4e3   :  { %10453 = vmatprep.mubr.f32.mxu0 %v24517_v18 }
 0x4e4   :  { %5225 = vmatmul.mubr.f32.gmra.mrb[94].mxu1 %v24518_v14 }
 0x4e5   :  { %5231 = vmatprep.mubr.f32.mxu1 %v24520_v57 }
 0x4e6   :  { %10455 = vmatmul.mubr.f32.gmra.mrb[44].mxu0 %v24519_v23 }
 0x4e7   :  { %10461 = vmatprep.mubr.f32.mxu0 %v24521_v43 }
 0x4e8   :  { %5233 = vmatmul.mubr.f32.gmra.mrb[96].mxu1 %v24522_v20 }
 0x4e9   :  { %5239 = vmatprep.mubr.f32.mxu1 %v24524_v10 }
 0x4ea   :  { %10463 = vmatmul.mubr.f32.gmra.mrb[46].mxu0 %v24523_v38 }
 0x4eb   :  { %10469 = vmatprep.mubr.f32.mxu0 %v24525_v30 }
 0x4ec   :  { %5241 = vmatmul.mubr.f32.gmra.mrb[98].mxu1 %v24526_v16 }
 0x4ed   :  { %5362 = vmatprep.mubr.f32.mxu1 %v24407_v59  ;;  %v24528_v59 = vld [vmem:[#allocation254_spill] sm:$0xff] }
 0x4ee   :  { %10471 = vmatmul.mubr.f32.gmra.mrb[48].mxu0 %v24527_v53 }
 0x4ef   :  { %10592 = vmatprep.mubr.f32.mxu0 %v24408_v55  ;;  %v24529_v55 = vld [vmem:[#allocation261_spill] sm:$0xff] }
 0x4f0   :  { %5364 = vmatmul.mubr.f32.vlgmr.msra.gmra.mrb[50].mxu1 %v24409_v24  ;;  %v24530_v24 = vld [vmem:[#allocation260_spill] sm:$0xff] }
 0x4f1   :  { %5370 = vmatprep.mubr.f32.mxu1 %v24411_v63  ;;  %v24532_v63 = vld [vmem:[#allocation273_spill] sm:$0xff] }
 0x4f2   :  { %10594 = vmatmul.mubr.f32.vlgmr.msra.gmra.mrb[0].mxu0 %v24410_v32  ;;  %v24531_v32 = vld [vmem:[#allocation281_spill] sm:$0xff] }
 0x4f3   :  { %10600 = vmatprep.mubr.f32.mxu0 %v24412_v52  ;;  %v24533_v52 = vld [vmem:[#allocation282_spill] sm:$0xff] }
 0x4f4   :  { %5372 = vmatmul.mubr.f32.gmra.mrb[52].mxu1 %v24413_v33  ;;  %v24534_v33 = vld [vmem:[#allocation280_spill] sm:$0xff] }
 0x4f5   :  { %5378 = vmatprep.mubr.f32.mxu1 %v24415_v51  ;;  %v24536_v51 = vld [vmem:[#allocation286_spill] sm:$0xff] }
 0x4f6   :  { %10602 = vmatmul.mubr.f32.gmra.mrb[2].mxu0 %v24414_v31  ;;  %v24535_v31 = vld [vmem:[#allocation292_spill] sm:$0xff] }
 0x4f7   :  { %10608 = vmatprep.mubr.f32.mxu0 %v24416_v37  ;;  %v24537_v37 = vld [vmem:[#allocation294_spill] sm:$0xff] }
 0x4f8   :  { %5380 = vmatmul.mubr.f32.gmra.mrb[54].mxu1 %v24418_v13  ;;  %v24538_v13 = vld [vmem:[#allocation293_spill] sm:$0xff] }
 0x4f9   :  { %5386 = vmatprep.mubr.f32.mxu1 %v24420_v47  ;;  %v24540_v47 = vld [vmem:[#allocation307_spill] sm:$0xff] }
 0x4fa   :  { %10610 = vmatmul.mubr.f32.gmra.mrb[4].mxu0 %v24419_v56  ;;  %v24539_v56 = vld [vmem:[#allocation311_spill] sm:$0xff] }
 0x4fb   :  { %10616 = vmatprep.mubr.f32.mxu0 %v24421_v1  ;;  %v24541_v1 = vld [vmem:[#allocation313_spill] sm:$0xff] }
 0x4fc   :  { %5388 = vmatmul.mubr.f32.gmra.mrb[56].mxu1 %v24424_v50  ;;  %v24542_v50 = vld [vmem:[#allocation312_spill] sm:$0xff] }
 0x4fd   :  { %5394 = vmatprep.mubr.f32.mxu1 %v24426_v11  ;;  %v24544_v11 = vld [vmem:[#allocation318_spill] sm:$0xff] }
 0x4fe   :  { %10618 = vmatmul.mubr.f32.gmra.mrb[6].mxu0 %v24425_v15  ;;  %v24543_v15 = vld [vmem:[#allocation322_spill] sm:$0xff] }
 0x4ff   :  { %10624 = vmatprep.mubr.f32.mxu0 %v24427_v29  ;;  %v24545_v29 = vld [vmem:[#allocation329_spill] sm:$0xff] }
 0x500   :  { %5396 = vmatmul.mubr.f32.gmra.mrb[58].mxu1 %v24430_v5  ;;  %v24546_v5 = vld [vmem:[#allocation325_spill] sm:$0xff] }
 0x501   :  { %5402 = vmatprep.mubr.f32.mxu1 %v24432_v48  ;;  %v24548_v48 = vld [vmem:[#allocation339_spill] sm:$0xff] }
 0x502   :  { %10626 = vmatmul.mubr.f32.gmra.mrb[8].mxu0 %v24431_v60  ;;  %v24547_v60 = vld [vmem:[#allocation343_spill] sm:$0xff] }
 0x503   :  { %10632 = vmatprep.mubr.f32.mxu0 %v24433_v12  ;;  %v24549_v12 = vld [vmem:[#allocation346_spill] sm:$0xff] }
 0x504   :  { %5404 = vmatmul.mubr.f32.gmra.mrb[60].mxu1 %v24436_v62  ;;  %v24550_v62 = vld [vmem:[#allocation344_spill] sm:$0xff] }
 0x505   :  { %5410 = vmatprep.mubr.f32.mxu1 %v24438_v49  ;;  %v24552_v49 = vld [vmem:[#allocation350_spill] sm:$0xff] }
 0x506   :  { %10634 = vmatmul.mubr.f32.gmra.mrb[10].mxu0 %v24437_v44  ;;  %v24551_v44 = vld [vmem:[#allocation356_spill] sm:$0xff] }
 0x507   :  { %10640 = vmatprep.mubr.f32.mxu0 %v24439_v58  ;;  %v24553_v58 = vld [vmem:[#allocation360_spill] sm:$0xff] }
 0x508   :  { %5412 = vmatmul.mubr.f32.gmra.mrb[62].mxu1 %v24442_v8  ;;  %v24554_v8 = vld [vmem:[#allocation357_spill] sm:$0xff] }
 0x509   :  { %5418 = vmatprep.mubr.f32.mxu1 %v24444_v61  ;;  %v24556_v61 = vld [vmem:[#allocation373_spill] sm:$0xff] }
 0x50a   :  { %10642 = vmatmul.mubr.f32.gmra.mrb[12].mxu0 %v24443_v46  ;;  %v24555_v46 = vld [vmem:[#allocation374_spill] sm:$0xff] }
 0x50b   :  { %10648 = vmatprep.mubr.f32.mxu0 %v24445_v6  ;;  %v24557_v6 = vld [vmem:[#allocation377_spill] sm:$0xff] }
 0x50c   :  { %5420 = vmatmul.mubr.f32.gmra.mrb[64].mxu1 %v24448_v42  ;;  %v24558_v42 = vld [vmem:[#allocation375_spill] sm:$0xff] }
 0x50d   :  { %5426 = vmatprep.mubr.f32.mxu1 %v24450_v25  ;;  %v24560_v25 = vld [vmem:[#allocation380_spill] sm:$0xff] }
 0x50e   :  { %10650 = vmatmul.mubr.f32.gmra.mrb[14].mxu0 %v24449_v39  ;;  %v24559_v39 = vld [vmem:[#allocation386_spill] sm:$0xff] }
 0x50f   :  { %10656 = vmatprep.mubr.f32.mxu0 %v24451_v27  ;;  %v24561_v27 = vld [vmem:[#allocation389_spill] sm:$0xff] }
 0x510   :  { %5428 = vmatmul.mubr.f32.gmra.mrb[66].mxu1 %v24454_v28  ;;  %v24562_v28 = vld [vmem:[#allocation388_spill] sm:$0xff] }
 0x511   :  { %5434 = vmatprep.mubr.f32.mxu1 %v24456_v26  ;;  %v19675_v26 = vld [vmem:[%s21507_s6] sm:$0xff] }
 0x512   :  { %10658 = vmatmul.mubr.f32.gmra.mrb[16].mxu0 %v24455_v54  ;;  %v24563_v54 = vld [vmem:[#allocation407_spill] sm:$0xff] }
 0x513   :  { %10664 = vmatprep.mubr.f32.mxu0 %v24457_v19  ;;  %v19680_v19 = vld [vmem:[%s21508_s7] sm:$0xff] }
 0x514   :  { %5436 = vmatmul.mubr.f32.gmra.mrb[68].mxu1 %v24460_v17  ;;  %v19685_v17 = vld [vmem:[%s21507_s6 + $0x8] sm:$0xff] }
 0x515   :  { %5442 = vmatprep.mubr.f32.mxu1 %v24462_v34  ;;  %v19695_v34 = vld [vmem:[%s21507_s6 + $0x10] sm:$0xff] }
 0x516   :  { %10666 = vmatmul.mubr.f32.gmra.mrb[18].mxu0 %v24461_v35  ;;  %v19690_v35 = vld [vmem:[%s21508_s7 + $0x8] sm:$0xff] }
 0x517   :  { %10672 = vmatprep.mubr.f32.mxu0 %v24463_v40  ;;  %v19700_v40 = vld [vmem:[%s21508_s7 + $0x10] sm:$0xff] }
 0x518   :  { %5444 = vmatmul.mubr.f32.gmra.mrb[70].mxu1 %v24466_v21  ;;  %v10892_v21 = vmul.f32 %v19675_v26, %v19675_v26 }
 0x519   :  { %5450 = vmatprep.mubr.f32.mxu1 %v24468_v41  ;;  %v19709_v41 = vld [vmem:[%s21507_s6 + $0x18] sm:$0xff] }
 0x51a   :  { %10674 = vmatmul.mubr.f32.gmra.mrb[20].mxu0 %v24467_v9  ;;  %v10942_v9 = vmul.f32 %v19680_v19, %v19680_v19 }
 0x51b   :  { %10680 = vmatprep.mubr.f32.mxu0 %v24469_v2  ;;  %v19714_v2 = vld [vmem:[%s21508_s7 + $0x18] sm:$0xff] }
 0x51c   :  { %5452 = vmatmul.mubr.f32.gmra.mrb[72].mxu1 %v24471_v7  ;;  %v10893_v7 = vmul.f32 %v19685_v17, %v19685_v17 }
 0x51d   :  { %5458 = vmatprep.mubr.f32.mxu1 %v24473_v4  ;;  %v19723_v4 = vld [vmem:[%s21507_s6 + $0x20] sm:$0xff] }
 0x51e   :  { %10682 = vmatmul.mubr.f32.gmra.mrb[22].mxu0 %v24472_v36  ;;  %v10943_v36 = vmul.f32 %v19690_v35, %v19690_v35 }
 0x51f   :  { %10688 = vmatprep.mubr.f32.mxu0 %v24474_v3  ;;  %v19728_v3 = vld [vmem:[%s21508_s7 + $0x20] sm:$0xff] }
 0x520   :  { %5460 = vmatmul.mubr.f32.gmra.mrb[74].mxu1 %v24477_v0  ;;  %v10894_v0 = vmul.f32 %v19695_v34, %v19695_v34 }
 0x521   :  { %5466 = vmatprep.mubr.f32.mxu1 %v24479_v22  ;;  %v19737_v22 = vld [vmem:[%s21507_s6 + $0x28] sm:$0xff] }
 0x522   :  { %10690 = vmatmul.mubr.f32.gmra.mrb[24].mxu0 %v24478_v45  ;;  %v10944_v45 = vmul.f32 %v19700_v40, %v19700_v40 }
 0x523   :  { %10696 = vmatprep.mubr.f32.mxu0 %v24528_v59  ;;  %v10897_v59 = vmul.f32 %v19737_v22, %v19737_v22 }
 0x524   :  { %5468 = vmatmul.mubr.f32.gmra.mrb[76].mxu1 %v24529_v55 }
 0x525   :  { %5474 = vmatprep.mubr.f32.mxu1 %v24531_v32  ;;  %v19784_v32 = vld [vmem:[%s21508_s7 + $0x40] sm:$0xff] }
 0x526   :  { %10698 = vmatmul.mubr.f32.gmra.mrb[26].mxu0 %v24530_v24  ;;  %v19779_v24 = vld [vmem:[%s21507_s6 + $0x40] sm:$0xff] }
 0x527   :  { %10704 = vmatprep.mubr.f32.mxu0 %v24532_v63  ;;  %v10994_v63 = vadd.f32 %v10944_v45, %v10894_v0  ;;  %v10805_v0 = vld [vmem:[%s21507_s6 + $0x68] sm:$0xff] }
 0x528   :  { %5476 = vmatmul.mubr.f32.gmra.mrb[78].mxu1 %v24533_v52  ;;  %v10855_v45 = vld [vmem:[%s21508_s7 + $0x68] sm:$0xff] }
 0x529   :  { %5482 = vmatprep.mubr.f32.mxu1 %v24535_v31  ;;  %v10801_v31 = vld [vmem:[%s21507_s6 + $0x48] sm:$0xff] }
 0x52a   :  { %10706 = vmatmul.mubr.f32.gmra.mrb[28].mxu0 %v24534_v33 }
 0x52b   :  { %10712 = vmatprep.mubr.f32.mxu0 %v24536_v51  ;;  %v10851_v51 = vld [vmem:[%s21508_s7 + $0x48] sm:$0xff] }
 0x52c   :  { %5484 = vmatmul.mubr.f32.gmra.mrb[80].mxu1 %v24537_v37 }
 0x52d   :  { %5490 = vmatprep.mubr.f32.mxu1 %v24539_v56 }
 0x52e   :  { %10714 = vmatmul.mubr.f32.gmra.mrb[30].mxu0 %v24538_v13 }
 0x52f   :  { %10720 = vmatprep.mubr.f32.mxu0 %v24540_v47  ;;  %v10802_v47 = vld [vmem:[%s21507_s6 + $0x50] sm:$0xff] }
 0x530   :  { %5492 = vmatmul.mubr.f32.gmra.mrb[82].mxu1 %v24541_v1  ;;  %v10852_v1 = vld [vmem:[%s21508_s7 + $0x50] sm:$0xff] }
 0x531   :  { %5498 = vmatprep.mubr.f32.mxu1 %v24543_v15 }
 0x532   :  { %10722 = vmatmul.mubr.f32.gmra.mrb[32].mxu0 %v24542_v50 }
 0x533   :  { %10728 = vmatprep.mubr.f32.mxu0 %v24544_v11  ;;  %v10900_v11 = vmul.f32 %v19779_v24, %v19779_v24 }
 0x534   :  { %5500 = vmatmul.mubr.f32.gmra.mrb[84].mxu1 %v24545_v29  ;;  %v10950_v29 = vmul.f32 %v19784_v32, %v19784_v32 }
 0x535   :  { %5506 = vmatprep.mubr.f32.mxu1 %v24547_v60  ;;  %v10853_v60 = vld [vmem:[%s21508_s7 + $0x58] sm:$0xff] }
 0x536   :  { %10730 = vmatmul.mubr.f32.gmra.mrb[34].mxu0 %v24546_v5  ;;  %v10803_v5 = vld [vmem:[%s21507_s6 + $0x58] sm:$0xff] }
 0x537   :  { %10736 = vmatprep.mubr.f32.mxu0 %v24548_v48 }
 0x538   :  { %5508 = vmatmul.mubr.f32.gmra.mrb[86].mxu1 %v24549_v12 }
 0x539   :  { %5514 = vmatprep.mubr.f32.mxu1 %v24551_v44  ;;  %v10951_v44 = vmul.f32 %v10851_v51, %v10851_v51  ;;  %v10808_v51 = vld [vmem:[%s21507_s6 + $0x80] sm:$0xff] }
 0x53a   :  { %10738 = vmatmul.mubr.f32.gmra.mrb[36].mxu0 %v24550_v62  ;;  %v10901_v62 = vmul.f32 %v10801_v31, %v10801_v31  ;;  %v10955_v31 = vmul.f32 %v10855_v45, %v10855_v45  ;;  %v10864_v45 = vld [vmem:[%s21508_s7 + $0xb0] sm:$0xff] }
 0x53b   :  { %10744 = vmatprep.mubr.f32.mxu0 %v24552_v49  ;;  %v11044_v49 = vadd.f32 1e-20, %v10994_v63  ;;  %v10857_v63 = vld [vmem:[%s21508_s7 + $0x78] sm:$0xff] }
 0x53c   :  { %5516 = vmatmul.mubr.f32.gmra.mrb[88].mxu1 %v24553_v58 }
 0x53d   :  { %5522 = vmatprep.mubr.f32.mxu1 %v24555_v46  ;;  %v10952_v46 = vmul.f32 %v10852_v1, %v10852_v1  ;;  %v10809_v1 = vld [vmem:[%s21507_s6 + $0x88] sm:$0xff] }
 0x53e   :  { %10746 = vmatmul.mubr.f32.gmra.mrb[38].mxu0 %v24554_v8  ;;  %v10902_v8 = vmul.f32 %v10802_v47, %v10802_v47 }
 0x53f   :  { %10752 = vmatprep.mubr.f32.mxu0 %v24556_v61 }
 0x540   :  { %5524 = vmatmul.mubr.f32.gmra.mrb[90].mxu1 %v24557_v6 }
 0x541   :  { %5530 = vmatprep.mubr.f32.mxu1 %v24559_v39  ;;  %v10953_v39 = vmul.f32 %v10853_v60, %v10853_v60  ;;  %v10860_v60 = vld [vmem:[%s21508_s7 + $0x90] sm:$0xff] }
 0x542   :  { %10754 = vmatmul.mubr.f32.gmra.mrb[40].mxu0 %v24558_v42  ;;  %v10903_v42 = vmul.f32 %v10803_v5, %v10803_v5  ;;  %v10810_v5 = vld [vmem:[%s21507_s6 + $0x90] sm:$0xff] }
 0x543   :  { %10760 = vmatprep.mubr.f32.mxu0 %v24560_v25 }
 0x544   :  { %5532 = vmatmul.mubr.f32.gmra.mrb[92].mxu1 %v24561_v27  ;;  %v11000_v27 = vadd.f32 %v10950_v29, %v10900_v11  ;;  %v10957_v29 = vmul.f32 %v10857_v63, %v10857_v63 }
 0x545   :  { %5538 = vmatprep.mubr.f32.mxu1 %v24563_v54  ;;  %v11001_v54 = vadd.f32 %v10951_v44, %v10901_v62  ;;  %v10811_v44 = vld [vmem:[%s21507_s6 + $0x98] sm:$0xff] }
 0x546   :  { %10762 = vmatmul.mubr.f32.gmra.mrb[42].mxu0 %v24562_v28 }
 0x547   :  { %10768 = vmatprep.mubr.f32.mxu0 %v24517_v18  ;;  %v19751_v18 = vld [vmem:[%s21507_s6 + $0x30] sm:$0xff] }
 0x548   :  { %5540 = vmatmul.mubr.f32.gmra.mrb[94].mxu1 %v24518_v14  ;;  %v19756_v14 = vld [vmem:[%s21508_s7 + $0x30] sm:$0xff]  ;;  %v10898_v52 = vmul.f32 %v19751_v18, %v19751_v18 }
 0x549   :  { %5546 = vmatprep.mubr.f32.mxu1 %v24520_v57  ;;  %v10896_v57 = vmul.f32 %v19723_v4, %v19723_v4  ;;  %v10948_v33 = vmul.f32 %v19756_v14, %v19756_v14 }
 0x54a   :  { %10770 = vmatmul.mubr.f32.gmra.mrb[44].mxu0 %v24519_v23  ;;  %v10992_v23 = vadd.f32 %v10942_v9, %v10892_v21  ;;  %v10804_v21 = vld [vmem:[%s21507_s6 + $0x60] sm:$0xff] }
 0x54b   :  { %10776 = vmatprep.mubr.f32.mxu0 %v24521_v43  ;;  %v10946_v43 = vmul.f32 %v19728_v3, %v19728_v3  ;;  %v10998_v58 = vadd.f32 %v10948_v33, %v10898_v52  ;;  %v10854_v9 = vld [vmem:[%s21508_s7 + $0x60] sm:$0xff]  ;;  %v11051_v52 = vadd.f32 1e-20, %v11001_v54  ;;  %v10905_v33 = vmul.f32 %v10805_v0, %v10805_v0  ;;  %v10863_v54 = vld [vmem:[%s21508_s7 + $0xa8] sm:$0xff]  ;;  %v10814_v0 = vld [vmem:[%s21507_s6 + $0xb0] sm:$0xff] }
 0x54c   :  { %5548 = vmatmul.mubr.f32.gmra.mrb[96].mxu1 %v24522_v20  ;;  %v19765_v20 = vld [vmem:[%s21507_s6 + $0x38] sm:$0xff]  ;;  %v11042_v50 = vadd.f32 1e-20, %v10992_v23  ;;  %v10806_v23 = vld [vmem:[%s21507_s6 + $0x70] sm:$0xff] }
 0x54d   :  { %5554 = vmatprep.mubr.f32.mxu1 %v24524_v10  ;;  %v19742_v10 = vld [vmem:[%s21508_s7 + $0x28] sm:$0xff]  ;;  %v10899_v13 = vmul.f32 %v19765_v20, %v19765_v20  ;;  %v10996_v15 = vadd.f32 %v10946_v43, %v10896_v57  ;;  %v10856_v57 = vld [vmem:[%s21508_s7 + $0x70] sm:$0xff]  ;;  %v11050_v43 = vadd.f32 1e-20, %v11000_v27  ;;  %v10960_v27 = vmul.f32 %v10860_v60, %v10860_v60 }
 0x54e   :  { %10778 = vmatmul.mubr.f32.gmra.mrb[46].mxu0 %v24523_v38  ;;  %v19770_v38 = vld [vmem:[%s21508_s7 + $0x38] sm:$0xff]  ;;  %v10947_v55 = vmul.f32 %v19742_v10, %v19742_v10  ;;  %14052 = vrcp.f32 %v11042_v50  ;;  %v10956_v47 = vmul.f32 %v10856_v57, %v10856_v57  ;;  %v10859_v50 = vld [vmem:[%s21508_s7 + $0x88] sm:$0xff] }
 0x54f   :  { %10784 = vmatprep.mubr.f32.mxu0 %v24525_v30  ;;  %v10993_v30 = vadd.f32 %v10943_v36, %v10893_v7  ;;  %v10949_v56 = vmul.f32 %v19770_v38, %v19770_v38  ;;  %v11046_v25 = vadd.f32 1e-20, %v10996_v15  ;;  %v11048_v7 = vadd.f32 1e-20, %v10998_v58 }
 0x550   :  { %5556 = vmatmul.mubr.f32.gmra.mrb[98].mxu1 %v24526_v16  ;;  %v10895_v16 = vmul.f32 %v19709_v41, %v19709_v41  ;;  %v10997_v12 = vadd.f32 %v10947_v55, %v10897_v59  ;;  %v11002_v36 = vadd.f32 %v10952_v46, %v10902_v8  ;;  %v10954_v59 = vmul.f32 %v10854_v9, %v10854_v9  ;;  %v10807_v55 = vld [vmem:[%s21507_s6 + $0x78] sm:$0xff] }
 0x551   :  { %v11043_v48 = vadd.f32 1e-20, %v10993_v30  ;;  %v10999_v6 = vadd.f32 %v10949_v56, %v10899_v13  ;;  %v10904_v30 = vmul.f32 %v10804_v21, %v10804_v21  ;;  %v10906_v56 = vmul.f32 %v10806_v23, %v10806_v23 }
 0x552   :  { %10786 = vmatmul.mubr.f32.gmra.mrb[48].mxu0 %v24527_v53  ;;  %v10945_v53 = vmul.f32 %v19714_v2, %v19714_v2  ;;  %v11047_v28 = vadd.f32 1e-20, %v10997_v12  ;;  %v11052_v13 = vadd.f32 1e-20, %v11002_v36  ;;  %v10907_v11 = vmul.f32 %v10807_v55, %v10807_v55 }
 0x553   :  { %14054 = vrcp.f32 %v11043_v48  ;;  %v11004_v48 = vadd.f32 %v10954_v59, %v10904_v30  ;;  %v10908_v12 = vmul.f32 %v10808_v51, %v10808_v51  ;;  %v11005_v58 = vadd.f32 %v10955_v31, %v10905_v33  ;;  %v10815_v30 = vld [vmem:[%s21507_s6 + $0xb8] sm:$0xff] }
 0x554   :  { %v10995_v37 = vadd.f32 %v10945_v53, %v10895_v16  ;;  %14056 = vrcp.f32 %v11044_v49  ;;  %v11049_v16 = vadd.f32 1e-20, %v10999_v6  ;;  %v11003_v53 = vadd.f32 %v10953_v39, %v10903_v42  ;;  %v10861_v49 = vld [vmem:[%s21508_s7 + $0x98] sm:$0xff]  ;;  %v10862_v6 = vld [vmem:[%s21508_s7 + $0xa0] sm:$0xff] }
 0x555   :  { %v10909_v8 = vmul.f32 %v10809_v1, %v10809_v1  ;;  %v10959_v46 = vmul.f32 %v10859_v50, %v10859_v50  ;;  %v11006_v39 = vadd.f32 %v10956_v47, %v10906_v56  ;;  %v11007_v9 = vadd.f32 %v10957_v29, %v10907_v11  ;;  %v10865_v59 = vld [vmem:[%s21508_s7 + $0xb8] sm:$0xff] }
 0x556   :  { %v11045_v61 = vadd.f32 1e-20, %v10995_v37  ;;  %v10858_v37 = vld [vmem:[%s21508_s7 + $0x80] sm:$0xff]  ;;  %v11053_v15 = vadd.f32 1e-20, %v11003_v53  ;;  %v10961_v36 = vmul.f32 %v10861_v49, %v10861_v49  ;;  %v10963_v31 = vmul.f32 %v10863_v54, %v10863_v54  ;;  %v10818_v54 = vld [vmem:[%s21507_s6 + $0xd0] sm:$0xff] }
 0x557   :  { %v10958_v62 = vmul.f32 %v10858_v37, %v10858_v37  ;;  %v11054_v53 = vadd.f32 1e-20, %v11004_v48  ;;  %v11055_v63 = vadd.f32 1e-20, %v11005_v58  ;;  %v11056_v37 = vadd.f32 1e-20, %v11006_v39 }
 0x558   :  { %14058 = vrcp.f32 %v11045_v61  ;;  %v10812_v61 = vld [vmem:[%s21507_s6 + $0xa0] sm:$0xff]  ;;  %v19870_v42 = vpop.eup %14052  ;;  %v10914_v56 = vmul.f32 %v10814_v0, %v10814_v0  ;;  %v10964_v47 = vmul.f32 %v10864_v45, %v10864_v45  ;;  %v11057_v50 = vadd.f32 1e-20, %v11007_v9  ;;  %v10867_v39 = vld [vmem:[%s21508_s7 + $0xc8] sm:$0xff]  ;;  %v10868_v9 = vld [vmem:[%s21508_s7 + $0xd0] sm:$0xff] }
 0x559   :  { %14060 = vrcp.f32 %v11046_v25  ;;  %v10910_v25 = vmul.f32 %v10810_v5, %v10810_v5  ;;  %v11008_v23 = vadd.f32 %v10958_v62, %v10908_v12  ;;  %v10912_v57 = vmul.f32 %v10812_v61, %v10812_v61  ;;  %v10816_v49 = vld [vmem:[%s21507_s6 + $0xc0] sm:$0xff] }
 0x55a   :  { %14062 = vrcp.f32 %v11047_v28  ;;  %v10813_v28 = vld [vmem:[%s21507_s6 + $0xa8] sm:$0xff]  ;;  %v10915_v11 = vmul.f32 %v10815_v30, %v10815_v30  ;;  %v10965_v29 = vmul.f32 %v10865_v59, %v10865_v59  ;;  %v10866_v58 = vld [vmem:[%s21508_s7 + $0xc0] sm:$0xff]  ;;  %v11014_v61 = vadd.f32 %v10964_v47, %v10914_v56 }
 0x55b   :  { %14064 = vrcp.f32 %v11048_v7  ;;  %v10911_v7 = vmul.f32 %v10811_v44, %v10811_v44  ;;  %v10913_v33 = vmul.f32 %v10813_v28, %v10813_v28  ;;  %v11058_v60 = vadd.f32 1e-20, %v11008_v23  ;;  %v10869_v23 = vld [vmem:[%s21508_s7 + $0xd8] sm:$0xff]  ;;  %v10871_v56 = vld [vmem:[%s21508_s7 + $0xe8] sm:$0xff] }
 0x55c   :  { %14066 = vrcp.f32 %v11049_v16  ;;  %v11015_v28 = vadd.f32 %v10965_v29, %v10915_v11  ;;  %v10916_v0 = vmul.f32 %v10816_v49, %v10816_v49  ;;  %v10966_v45 = vmul.f32 %v10866_v58, %v10866_v58  ;;  %v10822_v11 = vld [vmem:[%s21507_s6 + $0xf0] sm:$0xff]  ;;  %v10873_v49 = vld [vmem:[%s21508_s7 + $0xf8] sm:$0xff] }
 0x55d   :  { %14068 = vrcp.f32 %v11050_v43  ;;  %v19878_v21 = vpop.eup %14054  ;;  %v10962_v43 = vmul.f32 %v10862_v6, %v10862_v6  ;;  %v11013_v44 = vadd.f32 %v10963_v31, %v10913_v33  ;;  %v10817_v6 = vld [vmem:[%s21507_s6 + $0xc8] sm:$0xff]  ;;  %v10967_v59 = vmul.f32 %v10867_v39, %v10867_v39  ;;  %v10872_v29 = vld [vmem:[%s21508_s7 + $0xf0] sm:$0xff]  ;;  %v10874_v39 = vld [vmem:[%s21508_s7 + $0x100] sm:$0xff] }
 0x55e   :  { %14070 = vrcp.f32 %v11051_v52  ;;  %v19886_v16 = vpop.eup %14056  ;;  %v11009_v52 = vadd.f32 %v10959_v46, %v10909_v8  ;;  %v10917_v30 = vmul.f32 %v10817_v6, %v10817_v6  ;;  %v11064_v33 = vadd.f32 1e-20, %v11014_v61  ;;  %v10824_v6 = vld [vmem:[%s21507_s6 + $0x100] sm:$0xff] }
 0x55f   :  { %14072 = vrcp.f32 %v11052_v13  ;;  %v11010_v13 = vadd.f32 %v10960_v27, %v10910_v25  ;;  %v11012_v48 = vadd.f32 %v10962_v43, %v10912_v57  ;;  %v11063_v43 = vadd.f32 1e-20, %v11013_v44  ;;  %v10823_v44 = vld [vmem:[%s21507_s6 + $0xf8] sm:$0xff] }
 0x560   :  { %14074 = vrcp.f32 %v11053_v15  ;;  %v11011_v15 = vadd.f32 %v10961_v36, %v10911_v7  ;;  %v11059_v62 = vadd.f32 1e-20, %v11009_v52  ;;  %v10870_v52 = vld [vmem:[%s21508_s7 + $0xe0] sm:$0xff]  ;;  %v10918_v31 = vmul.f32 %v10818_v54, %v10818_v54 }
 0x561   :  { %14076 = vrcp.f32 %v11054_v53  ;;  %v11060_v46 = vadd.f32 1e-20, %v11010_v13  ;;  %v11062_v36 = vadd.f32 1e-20, %v11012_v48  ;;  %v10819_v53 = vld [vmem:[%s21507_s6 + $0xd8] sm:$0xff]  ;;  %v10821_v13 = vld [vmem:[%s21507_s6 + $0xe8] sm:$0xff]  ;;  %v11017_v58 = vadd.f32 %v10967_v59, %v10917_v30 }
 0x562   :  { %v19894_v55 = vpop.eup %14058  ;;  %14078 = vrcp.f32 %v11055_v63  ;;  %v11061_v27 = vadd.f32 1e-20, %v11011_v15  ;;  %v10820_v63 = vld [vmem:[%s21507_s6 + $0xe0] sm:$0xff]  ;;  %v11065_v47 = vadd.f32 1e-20, %v11015_v28  ;;  %v10969_v15 = vmul.f32 %v10869_v23, %v10869_v23  ;;  %v10826_v30 = vld [vmem:[%s21507_s6 + $0x110] sm:$0xff] }
 0x563   :  { %v19896_v51 = vpop.eup %14060  ;;  %14080 = vrcp.f32 %v11056_v37  ;;  %v10968_v37 = vmul.f32 %v10868_v9, %v10868_v9  ;;  %v10920_v48 = vmul.f32 %v10820_v63, %v10820_v63  ;;  %v10971_v61 = vmul.f32 %v10871_v56, %v10871_v56  ;;  %v10876_v59 = vld [vmem:[%s21508_s7 + $0x110] sm:$0xff]  ;;  %v10877_v56 = vld [vmem:[%s21508_s7 + $0x118] sm:$0xff] }
 0x564   :  { %v19898_v1 = vpop.eup %14062  ;;  %14082 = vrcp.f32 %v11057_v50  ;;  %v10919_v50 = vmul.f32 %v10819_v53, %v10819_v53  ;;  %v10922_v54 = vmul.f32 %v10822_v11, %v10822_v11  ;;  %v10972_v9 = vmul.f32 %v10872_v29, %v10872_v29 }
 0x565   :  { %v19900_v5 = vpop.eup %14064  ;;  %14084 = vrcp.f32 %v11058_v60  ;;  %v11016_v60 = vadd.f32 %v10966_v45, %v10916_v0  ;;  %v11018_v28 = vadd.f32 %v10968_v37, %v10918_v31  ;;  %v10875_v0 = vld [vmem:[%s21508_s7 + $0x108] sm:$0xff]  ;;  %v10923_v23 = vmul.f32 %v10823_v44, %v10823_v44 }
 0x566   :  { %v19902_v12 = vpop.eup %14066  ;;  %14086 = vrcp.f32 %v11059_v62  ;;  %v10970_v62 = vmul.f32 %v10870_v52, %v10870_v52  ;;  %v11019_v53 = vadd.f32 %v10969_v15, %v10919_v50  ;;  %v10924_v31 = vmul.f32 %v10824_v6, %v10824_v6 }
 0x567   :  { %v19910_v8 = vpop.eup %14068  ;;  %14088 = vrcp.f32 %v11060_v46  ;;  %v10921_v46 = vmul.f32 %v10821_v13, %v10821_v13  ;;  %v11066_v52 = vadd.f32 1e-20, %v11016_v60  ;;  %v10974_v37 = vmul.f32 %v10874_v39, %v10874_v39  ;;  %v10827_v13 = vld [vmem:[%s21507_s6 + $0x118] sm:$0xff] }
 0x568   :  { %v19918_v25 = vpop.eup %14070  ;;  %14090 = vrcp.f32 %v11061_v27  ;;  %v11067_v50 = vadd.f32 1e-20, %v11017_v58  ;;  %v10975_v29 = vmul.f32 %v10875_v0, %v10875_v0  ;;  %v11068_v60 = vadd.f32 1e-20, %v11018_v28  ;;  %v10828_v28 = vld [vmem:[%s21507_s6 + $0x120] sm:$0xff] }
 0x569   :  { %v19926_v7 = vpop.eup %14072  ;;  %14092 = vrcp.f32 %v11062_v36  ;;  %v10825_v36 = vld [vmem:[%s21507_s6 + $0x108] sm:$0xff]  ;;  %v11021_v15 = vadd.f32 %v10971_v61, %v10921_v46  ;;  %v11069_v39 = vadd.f32 1e-20, %v11019_v53  ;;  %v11024_v58 = vadd.f32 %v10974_v37, %v10924_v31  ;;  %v10880_v31 = vld [vmem:[%s21508_s7 + $0x130] sm:$0xff] }
 0x56a   :  { %v19934_v57 = vpop.eup %14074  ;;  %14094 = vrcp.f32 %v11063_v43  ;;  %v10973_v43 = vmul.f32 %v10873_v49, %v10873_v49  ;;  %v10925_v11 = vmul.f32 %v10825_v36, %v10825_v36  ;;  %v10976_v49 = vmul.f32 %v10876_v59, %v10876_v59 }
 0x56b   :  { %24564 = vst [vmem:[#allocation213_spill] sm:$0xff] %v19934_v57  ;;  %v19966_v27 = vpop.eup %14076  ;;  %14096 = vrcp.f32 %v11064_v33  ;;  %v11020_v33 = vadd.f32 %v10970_v62, %v10920_v48  ;;  %v11022_v48 = vadd.f32 %v10972_v9, %v10922_v54  ;;  %v10926_v62 = vmul.f32 %v10826_v30, %v10826_v30  ;;  %v10878_v54 = vld [vmem:[%s21508_s7 + $0x120] sm:$0xff] }
 0x56c   :  { %24565 = vst [vmem:[#allocation208_spill] sm:$0xff] %v19966_v27  ;;  %v19974_v45 = vpop.eup %14078  ;;  %14098 = vrcp.f32 %v11065_v47  ;;  %v10977_v27 = vmul.f32 %v10877_v56, %v10877_v56  ;;  %v11071_v61 = vadd.f32 1e-20, %v11021_v15  ;;  %v11025_v36 = vadd.f32 %v10975_v29, %v10925_v11  ;;  %v10831_v15 = vld [vmem:[%s21507_s6 + $0x138] sm:$0xff] }
 0x56d   :  { %24566 = vst [vmem:[#allocation222_spill] sm:$0xff] %v19974_v45  ;;  %v19982_v63 = vpop.eup %14080  ;;  %v10927_v45 = vmul.f32 %v10827_v13, %v10827_v13  ;;  %14100 = vrcp.f32 %v11066_v52  ;;  %v11072_v0 = vadd.f32 1e-20, %v11022_v48  ;;  %v11026_v53 = vadd.f32 %v10976_v49, %v10926_v62 }
 0x56e   :  { %24567 = vst [vmem:[#allocation217_spill] sm:$0xff] %v19982_v63  ;;  %v19990_v47 = vpop.eup %14082  ;;  %v11023_v63 = vadd.f32 %v10973_v43, %v10923_v23  ;;  %14102 = vrcp.f32 %v11067_v50  ;;  %v10829_v23 = vld [vmem:[%s21507_s6 + $0x128] sm:$0xff]  ;;  %v11074_v13 = vadd.f32 1e-20, %v11024_v58  ;;  %v10928_v56 = vmul.f32 %v10828_v28, %v10828_v28 }
 0x56f   :  { %24568 = vst [vmem:[#allocation232_spill] sm:$0xff] %v19990_v47  ;;  %v19992_v44 = vpop.eup %14084  ;;  %v11070_v47 = vadd.f32 1e-20, %v11020_v33  ;;  %14104 = vrcp.f32 %v11068_v60  ;;  %v10879_v43 = vld [vmem:[%s21508_s7 + $0x128] sm:$0xff]  ;;  %v11027_v52 = vadd.f32 %v10977_v27, %v10927_v45  ;;  %v10830_v33 = vld [vmem:[%s21507_s6 + $0x130] sm:$0xff]  ;;  %v10978_v50 = vmul.f32 %v10878_v54, %v10878_v54  ;;  %v10881_v27 = vld [vmem:[%s21508_s7 + $0x138] sm:$0xff] }
 0x570   :  { %v19994_v6 = vpop.eup %14086  ;;  %14106 = vrcp.f32 %v11069_v39  ;;  %v11073_v59 = vadd.f32 1e-20, %v11023_v63  ;;  %v11075_v63 = vadd.f32 1e-20, %v11025_v36  ;;  %v10929_v11 = vmul.f32 %v10829_v23, %v10829_v23  ;;  %v10882_v60 = vld [vmem:[%s21508_s7 + $0x140] sm:$0xff]  ;;  %v10833_v39 = vld [vmem:[%s21507_s6 + $0x148] sm:$0xff] }
 0x571   :  { %v19996_v57 = vpop.eup %14088  ;;  %14108 = vrcp.f32 %v11070_v47  ;;  %v10979_v29 = vmul.f32 %v10879_v43, %v10879_v43  ;;  %v10832_v47 = vld [vmem:[%s21507_s6 + $0x140] sm:$0xff]  ;;  %v11076_v48 = vadd.f32 1e-20, %v11026_v53  ;;  %v10930_v62 = vmul.f32 %v10830_v33, %v10830_v33  ;;  %v10883_v58 = vld [vmem:[%s21508_s7 + $0x148] sm:$0xff]  ;;  %v10834_v54 = vld [vmem:[%s21507_s6 + $0x150] sm:$0xff] }
 0x572   :  { %v19998_v46 = vpop.eup %14090  ;;  %14110 = vrcp.f32 %v11071_v61  ;;  %v10980_v49 = vmul.f32 %v10880_v31, %v10880_v31  ;;  %v11077_v61 = vadd.f32 1e-20, %v11027_v52  ;;  %v10931_v36 = vmul.f32 %v10831_v15, %v10831_v15  ;;  %v10835_v33 = vld [vmem:[%s21507_s6 + $0x158] sm:$0xff] }
 0x573   :  { %24569 = vst [vmem:[#allocation227_spill] sm:$0xff] %v19998_v46  ;;  %v20006_v9 = vpop.eup %14092  ;;  %14112 = vrcp.f32 %v11072_v0  ;;  %v10981_v28 = vmul.f32 %v10881_v27, %v10881_v27  ;;  %v10884_v0 = vld [vmem:[%s21508_s7 + $0x150] sm:$0xff]  ;;  %v11028_v53 = vadd.f32 %v10978_v50, %v10928_v56  ;;  %v10932_v23 = vmul.f32 %v10832_v47, %v10832_v47  ;;  %v10836_v27 = vld [vmem:[%s21507_s6 + $0x160] sm:$0xff] }
 0x574   :  { %24570 = vst [vmem:[#allocation242_spill] sm:$0xff] %v20006_v9  ;;  %v20014_v30 = vpop.eup %14094  ;;  %14114 = vrcp.f32 %v11073_v59  ;;  %v10982_v43 = vmul.f32 %v10882_v60, %v10882_v60  ;;  %v10885_v59 = vld [vmem:[%s21508_s7 + $0x158] sm:$0xff]  ;;  %v11029_v52 = vadd.f32 %v10979_v29, %v10929_v11  ;;  %v10933_v31 = vmul.f32 %v10833_v39, %v10833_v39  ;;  %v10887_v11 = vld [vmem:[%s21508_s7 + $0x168] sm:$0xff] }
 0x575   :  { %24571 = vst [vmem:[#allocation238_spill] sm:$0xff] %v20014_v30  ;;  %v20022_v37 = vpop.eup %14096  ;;  %14116 = vrcp.f32 %v11074_v13  ;;  %v10983_v15 = vmul.f32 %v10883_v58, %v10883_v58  ;;  %v10886_v13 = vld [vmem:[%s21508_s7 + $0x160] sm:$0xff]  ;;  %v11030_v50 = vadd.f32 %v10980_v49, %v10930_v62  ;;  %v10934_v47 = vmul.f32 %v10834_v54, %v10834_v54 }
 0x576   :  { %24572 = vst [vmem:[#allocation245_spill] sm:$0xff] %v20022_v37  ;;  %v20030_v45 = vpop.eup %14098  ;;  %14118 = vrcp.f32 %v11075_v63  ;;  %v10984_v60 = vmul.f32 %v10884_v0, %v10884_v0  ;;  %v10837_v63 = vld [vmem:[%s21507_s6 + $0x168] sm:$0xff]  ;;  %v11031_v39 = vadd.f32 %v10981_v28, %v10931_v36  ;;  %v10935_v58 = vmul.f32 %v10835_v33, %v10835_v33  ;;  %v10839_v33 = vld [vmem:[%s21507_s6 + $0x178] sm:$0xff] }
 0x577   :  { %24573 = vst [vmem:[#allocation239_spill] sm:$0xff] %v20030_v45  ;;  %v20062_v56 = vpop.eup %14100  ;;  %14120 = vrcp.f32 %v11076_v48  ;;  %v10985_v45 = vmul.f32 %v10885_v59, %v10885_v59  ;;  %v11078_v48 = vadd.f32 1e-20, %v11028_v53  ;;  %v11032_v62 = vadd.f32 %v10982_v43, %v10932_v23  ;;  %v10889_v59 = vld [vmem:[%s21508_s7 + $0x178] sm:$0xff] }
 0x578   :  { %24574 = vst [vmem:[#allocation255_spill] sm:$0xff] %v20062_v56  ;;  %v20070_v29 = vpop.eup %14102  ;;  %14122 = vrcp.f32 %v11077_v61  ;;  %v10936_v49 = vmul.f32 %v10836_v27, %v10836_v27  ;;  %v10986_v54 = vmul.f32 %v10886_v13, %v10886_v13  ;;  %v11079_v56 = vadd.f32 1e-20, %v11029_v52  ;;  %v10888_v61 = vld [vmem:[%s21508_s7 + $0x170] sm:$0xff] }
 0x579   :  { %24575 = vst [vmem:[#allocation249_spill] sm:$0xff] %v20070_v29  ;;  %v20072_v37 = vpop.eup %14104  ;;  %v11033_v30 = vadd.f32 %v10983_v15, %v10933_v31  ;;  %v10937_v9 = vmul.f32 %v10837_v63, %v10837_v63  ;;  %v10987_v46 = vmul.f32 %v10887_v11, %v10887_v11  ;;  %v10838_v29 = vld [vmem:[%s21507_s6 + $0x170] sm:$0xff]  ;;  %v11080_v28 = vadd.f32 1e-20, %v11030_v50 }
 0x57a   :  { %v20074_v0 = vpop.eup %14106  ;;  %v11034_v53 = vadd.f32 %v10984_v60, %v10934_v47  ;;  %v10938_v23 = vmul.f32 %v10838_v29, %v10838_v29  ;;  %v10988_v43 = vmul.f32 %v10888_v61, %v10888_v61  ;;  %v11081_v31 = vadd.f32 1e-20, %v11031_v39 }
 0x57b   :  { %24576 = vst [vmem:[#allocation9_spill] sm:$0xff] %v20074_v0  ;;  %v20082_v36 = vpop.eup %14108  ;;  %v11035_v15 = vadd.f32 %v10985_v45, %v10935_v58  ;;  %v10939_v27 = vmul.f32 %v10839_v33, %v10839_v33  ;;  %v10989_v13 = vmul.f32 %v10889_v59, %v10889_v59  ;;  %14124 = vrcp.f32 %v11078_v48 }
 0x57c   :  { %24577 = vst [vmem:[#allocation268_spill] sm:$0xff] %v20082_v36  ;;  %v20090_v52 = vpop.eup %14110  ;;  %v11082_v50 = vadd.f32 1e-20, %v11032_v62  ;;  %v11036_v47 = vadd.f32 %v10986_v54, %v10936_v49  ;;  %14126 = vrcp.f32 %v11079_v56  ;;  %v11083_v11 = vadd.f32 1e-20, %v11033_v30  ;;  %v10840_v56 = vld [vmem:[%s21507_s6 + $0x180] sm:$0xff] }
 0x57d   :  { %24578 = vst [vmem:[#allocation259_spill] sm:$0xff] %v20090_v52  ;;  %v20092_v63 = vpop.eup %14112  ;;  %v11037_v29 = vadd.f32 %v10987_v46, %v10937_v9  ;;  %14128 = vrcp.f32 %v11080_v28  ;;  %v11084_v36 = vadd.f32 1e-20, %v11034_v53  ;;  %v11038_v0 = vadd.f32 %v10988_v43, %v10938_v23  ;;  %v10890_v46 = vld [vmem:[%s21508_s7 + $0x180] sm:$0xff]  ;;  %v10841_v54 = vld [vmem:[%s21507_s6 + $0x188] sm:$0xff] }
 0x57e   :  { %v20094_v60 = vpop.eup %14114  ;;  %14130 = vrcp.f32 %v11081_v31  ;;  %v11085_v45 = vadd.f32 1e-20, %v11035_v15  ;;  %v11039_v39 = vadd.f32 %v10989_v13, %v10939_v27  ;;  %v11086_v48 = vadd.f32 1e-20, %v11036_v47  ;;  %v10891_v28 = vld [vmem:[%s21508_s7 + $0x188] sm:$0xff] }
 0x57f   :  { %v20096_v61 = vpop.eup %14116  ;;  %14132 = vrcp.f32 %v11082_v50  ;;  %v11087_v30 = vadd.f32 1e-20, %v11037_v29  ;;  %v10940_v62 = vmul.f32 %v10840_v56, %v10840_v56  ;;  %v10990_v49 = vmul.f32 %v10890_v46, %v10890_v46  ;;  %v24579_v50 = vld [vmem:[#allocation24_spill] sm:$0xff] }
 0x580   :  { %v20098_v52 = vpop.eup %14118  ;;  %14134 = vrcp.f32 %v11083_v11  ;;  %v11088_v53 = vadd.f32 1e-20, %v11038_v0  ;;  %v10941_v23 = vmul.f32 %v10841_v54, %v10841_v54  ;;  %v10991_v43 = vmul.f32 %v10891_v28, %v10891_v28 }
 0x581   :  { %v20100_v58 = vpop.eup %14120  ;;  %14136 = vrcp.f32 %v11084_v36  ;;  %v11089_v33 = vadd.f32 1e-20, %v11039_v39  ;;  %v11040_v59 = vadd.f32 %v10990_v49, %v10940_v62 }
 0x582   :  { %v20108_v9 = vpop.eup %14122  ;;  %14138 = vrcp.f32 %v11085_v45  ;;  %v11041_v31 = vadd.f32 %v10991_v43, %v10941_v23  ;;  %v24580_v45 = vld [vmem:[#allocation28_spill] sm:$0xff] }
 0x583   :  { %14140 = vrcp.f32 %v11086_v48  ;;  %v11090_v27 = vadd.f32 1e-20, %v11040_v59 }
 0x584   :  { %14142 = vrcp.f32 %v11087_v30  ;;  %v11091_v56 = vadd.f32 1e-20, %v11041_v31 }
 0x585   :  { %v20116_v13 = vpop.eup %14124  ;;  %14144 = vrcp.f32 %v11088_v53 }
 0x586   :  { %v20119_v36 = vpop.eup %14126  ;;  %14146 = vrcp.f32 %v11089_v33 }
 0x587   :  { %v20123_v48 = vpop.eup %14128  ;;  %14148 = vrcp.f32 %v11090_v27 }
 0x588   :  { %24581 = vst [vmem:[#allocation275_spill] sm:$0xff] %v20123_v48  ;;  %v20128_v54 = vpop.eup %14130  ;;  %14150 = vrcp.f32 %v11091_v56 }
 0x589   :  { %24582 = vst [vmem:[#allocation272_spill] sm:$0xff] %v20128_v54  ;;  %v20134_v59 = vpop.eup %14132 }
 0x58a   :  { %24583 = vst [vmem:[#allocation278_spill] sm:$0xff] %v20134_v59  ;;  %v20137_v27 = vpop.eup %14134 }
 0x58b   :  { %24585 = vst [vmem:[#allocation277_spill] sm:$0xff] %v20137_v27 }
 0x5c3   :  { %v5365_v15 = vpop.f32.mrb[50].mxu1 }
 0x5c4   :  { %v5562_v47 = vsub.f32 %v24579_v50, %v5365_v15  ;;  %v5367_v29 = vpop.f32.mrb[51].mxu1  ;;  %v24584_v50 = vld [vmem:[#allocation32_spill] sm:$0xff] }
 0x5c5   :  { %v10595_v11 = vpop.f32.mrb[0].mxu0  ;;  %v5563_v39 = vsub.f32 %v24580_v45, %v5367_v29 }
 0x5c6   :  { %v11192_v0 = vmul.f32 %v19680_v19, %v10595_v11  ;;  %v10597_v46 = vpop.f32.mrb[1].mxu0  ;;  %v11142_v30 = vmul.f32 %v19675_v26, %v5562_v47  ;;  %v11592_v62 = vmul.f32 %v19680_v19, %v5562_v47  ;;  %v11542_v49 = vmul.f32 %v19675_v26, %v10595_v11  ;;  %v11092_v11 = vld [vmem:[%s21509_s0] sm:$0xff] }
 0x5c7   :  { %v11143_v28 = vmul.f32 %v19685_v17, %v5563_v39  ;;  %v11593_v53 = vmul.f32 %v19690_v35, %v5563_v39  ;;  %v11193_v23 = vmul.f32 %v19690_v35, %v10597_v46  ;;  %v11543_v43 = vmul.f32 %v19685_v17, %v10597_v46  ;;  %v5373_v33 = vpop.f32.mrb[52].mxu1  ;;  %v11492_v17 = vld [vmem:[%s21510_s1] sm:$0xff]  ;;  %v20147_v46 = vpop.eup %14136 }
 0x5c8   :  { %v11242_v31 = vadd.f32 %v11192_v0, %v11142_v30  ;;  %v11642_v15 = vsub.f32 %v11542_v49, %v11592_v62  ;;  %v5564_v19 = vsub.f32 %v24584_v50, %v5373_v33  ;;  %v5375_v26 = vpop.f32.mrb[53].mxu1  ;;  %24586 = vst [vmem:[#allocation300_spill] sm:$0xff] %v20147_v46  ;;  %v11093_v62 = vld [vmem:[%s21509_s0 + $0x8] sm:$0xff] }
 0x5c9   :  { %v10603_v47 = vpop.f32.mrb[2].mxu0  ;;  %v11243_v35 = vadd.f32 %v11193_v23, %v11143_v28  ;;  %v11643_v29 = vsub.f32 %v11543_v43, %v11593_v53  ;;  %v11493_v49 = vld [vmem:[%s21510_s1 + $0x8] sm:$0xff]  ;;  %v20159_v23 = vpop.eup %14138 }
 0x5ca   :  { %v11194_v0 = vmul.f32 %v19700_v40, %v10603_v47  ;;  %v11544_v45 = vmul.f32 %v19695_v34, %v10603_v47  ;;  %v10605_v39 = vpop.f32.mrb[3].mxu0  ;;  %v11293_v56 = vmul.f32 %v19870_v42, %v11242_v31  ;;  %v11692_v30 = vmul.f32 %v19870_v42, %v11642_v15  ;;  %24587 = vst [vmem:[#allocation287_spill] sm:$0xff] %v20159_v23  ;;  %v24588_v31 = vld [vmem:[#allocation35_spill] sm:$0xff]  ;;  %v20165_v47 = vpop.eup %14140 }
 0x5cb   :  { %v11144_v28 = vmul.f32 %v19695_v34, %v5564_v19  ;;  %v11594_v53 = vmul.f32 %v19700_v40, %v5564_v19  ;;  %v11295_v43 = vmul.f32 %v19878_v21, %v11243_v35  ;;  %v11693_v33 = vmul.f32 %v19878_v21, %v11643_v29  ;;  %v5381_v50 = vpop.f32.mrb[54].mxu1  ;;  %v20167_v40 = vpop.eup %14142  ;;  %v11094_v21 = vld [vmem:[%s21509_s0 + $0x10] sm:$0xff] }
 0x5cc   :  { %v5565_v42 = vsub.f32 %v24588_v31, %v5375_v26  ;;  %v11195_v15 = vmul.f32 %v19714_v2, %v10605_v39  ;;  %v11392_v46 = vsub.f32 %v11092_v11, %v11293_v56  ;;  %v11742_v27 = vsub.f32 %v11492_v17, %v11692_v30  ;;  %v5383_v48 = vpop.f32.mrb[55].mxu1  ;;  %v11494_v26 = vld [vmem:[%s21510_s1 + $0x10] sm:$0xff]  ;;  %v20177_v29 = vpop.eup %14144 }
 0x5cd   :  { %v11244_v59 = vadd.f32 %v11194_v0, %v11144_v28  ;;  %v11644_v54 = vsub.f32 %v11544_v45, %v11594_v53  ;;  %v10611_v34 = vpop.f32.mrb[4].mxu0  ;;  %v11393_v19 = vsub.f32 %v11093_v62, %v11295_v43  ;;  %v11743_v23 = vsub.f32 %v11493_v49, %v11693_v33  ;;  %v24589_v30 = vld [vmem:[#allocation36_spill] sm:$0xff]  ;;  %v11095_v53 = vld [vmem:[%s21509_s0 + $0x18] sm:$0xff] }
 0x5ce   :  { %v11145_v35 = vmul.f32 %v19709_v41, %v5565_v42  ;;  %v11595_v11 = vmul.f32 %v19714_v2, %v5565_v42  ;;  %v10613_v17 = vpop.f32.mrb[5].mxu0  ;;  %11442 = vst [vmem:[%s21511_s8] sm:$0xff] %v11392_v46  ;;  %11792 = vst [vmem:[%s21512_s9] sm:$0xff] %v11742_v27  ;;  %v11545_v56 = vmul.f32 %v19709_v41, %v10605_v39  ;;  %v20189_v2 = vpop.eup %14146  ;;  %v24590_v41 = vld [vmem:[#allocation37_spill] sm:$0xff] }
 0x5cf   :  { %v11297_v0 = vmul.f32 %v19886_v16, %v11244_v59  ;;  %v11694_v45 = vmul.f32 %v19886_v16, %v11644_v54  ;;  %v5566_v62 = vsub.f32 %v24589_v30, %v5381_v50  ;;  %11443 = vst.msk [vmem:[%s21511_s8 + $0x8] sm:$0xff] %vm231_vm0, %v11393_v19  ;;  %11793 = vst.msk [vmem:[%s21512_s9 + $0x8] sm:$0xff] %vm231_vm0, %v11743_v23  ;;  %v5389_v39 = vpop.f32.mrb[56].mxu1  ;;  %v20202_v46 = vpop.eup %14148 }
 0x5d0   :  { %v11245_v27 = vadd.f32 %v11195_v15, %v11145_v35  ;;  %v11196_v59 = vmul.f32 %v19728_v3, %v10611_v34  ;;  %v11546_v16 = vmul.f32 %v19723_v4, %v10611_v34  ;;  %v5567_v54 = vsub.f32 %v24590_v41, %v5383_v48  ;;  %v5391_v31 = vpop.f32.mrb[57].mxu1  ;;  %v11495_v48 = vld [vmem:[%s21510_s1 + $0x18] sm:$0xff] }
 0x5d1   :  { %v11394_v49 = vsub.f32 %v11094_v21, %v11297_v0  ;;  %v11744_v28 = vsub.f32 %v11494_v26, %v11694_v45  ;;  %v11645_v43 = vsub.f32 %v11545_v56, %v11595_v11  ;;  %v11146_v33 = vmul.f32 %v19723_v4, %v5566_v62  ;;  %v10619_v23 = vpop.f32.mrb[6].mxu0  ;;  %v20215_v21 = vpop.eup %14150  ;;  %v11096_v0 = vld [vmem:[%s21509_s0 + $0x20] sm:$0xff] }
 0x5d2   :  { %v11299_v42 = vmul.f32 %v19894_v55, %v11245_v27  ;;  %v11596_v15 = vmul.f32 %v19728_v3, %v5566_v62  ;;  %v11147_v50 = vmul.f32 %v19737_v22, %v5567_v54  ;;  %v11597_v34 = vmul.f32 %v19742_v10, %v5567_v54  ;;  %v10621_v19 = vpop.f32.mrb[7].mxu0  ;;  %v24591_v56 = vld [vmem:[#allocation38_spill] sm:$0xff] }
 0x5d3   :  { %11444 = vst [vmem:[%s21511_s8 + $0x10] sm:$0xff] %v11394_v49  ;;  %11794 = vst [vmem:[%s21512_s9 + $0x10] sm:$0xff] %v11744_v28  ;;  %v11695_v4 = vmul.f32 %v19894_v55, %v11645_v43  ;;  %v11246_v26 = vadd.f32 %v11196_v59, %v11146_v33  ;;  %v11197_v3 = vmul.f32 %v19742_v10, %v10613_v17  ;;  %v5397_v27 = vpop.f32.mrb[58].mxu1  ;;  %v11496_v10 = vld [vmem:[%s21510_s1 + $0x20] sm:$0xff]  ;;  %v11497_v49 = vld [vmem:[%s21510_s1 + $0x28] sm:$0xff] }
 0x5d4   :  { %v11547_v35 = vmul.f32 %v19737_v22, %v10613_v17  ;;  %v11395_v11 = vsub.f32 %v11095_v53, %v11299_v42  ;;  %v11646_v45 = vsub.f32 %v11546_v16, %v11596_v15  ;;  %v5568_v30 = vsub.f32 %v24591_v56, %v5389_v39  ;;  %v5399_v59 = vpop.f32.mrb[59].mxu1  ;;  %v11097_v39 = vld [vmem:[%s21509_s0 + $0x28] sm:$0xff]  ;;  %v24592_v15 = vld [vmem:[#allocation40_spill] sm:$0xff] }
 0x5d5   :  { %v11198_v62 = vmul.f32 %v19756_v14, %v10619_v23  ;;  %v11745_v41 = vsub.f32 %v11495_v48, %v11695_v4  ;;  %v11301_v54 = vmul.f32 %v19896_v51, %v11246_v26  ;;  %v11247_v55 = vadd.f32 %v11197_v3, %v11147_v50  ;;  %v10627_v17 = vpop.f32.mrb[8].mxu0 }
 0x5d6   :  { %v11647_v22 = vsub.f32 %v11547_v35, %v11597_v34  ;;  %11445 = vst.msk [vmem:[%s21511_s8 + $0x18] sm:$0xff] %vm231_vm0, %v11395_v11  ;;  %v11696_v16 = vmul.f32 %v19896_v51, %v11646_v45  ;;  %v11148_v28 = vmul.f32 %v19751_v18, %v5568_v30  ;;  %v11598_v53 = vmul.f32 %v19756_v14, %v5568_v30  ;;  %v10629_v33 = vpop.f32.mrb[9].mxu0  ;;  %v11098_v35 = vld [vmem:[%s21509_s0 + $0x30] sm:$0xff] }
 0x5d7   :  { %v11548_v43 = vmul.f32 %v19751_v18, %v10619_v23  ;;  %11795 = vst.msk [vmem:[%s21512_s9 + $0x18] sm:$0xff] %vm231_vm0, %v11745_v41  ;;  %v11396_v51 = vsub.f32 %v11096_v0, %v11301_v54  ;;  %v11303_v42 = vmul.f32 %v19898_v1, %v11247_v55  ;;  %v5569_v50 = vsub.f32 %v24592_v15, %v5391_v31  ;;  %v5405_v3 = vpop.f32.mrb[60].mxu1  ;;  %v24593_v41 = vld [vmem:[#allocation41_spill] sm:$0xff] }
 0x5d8   :  { %v11697_v48 = vmul.f32 %v19898_v1, %v11647_v22  ;;  %v11746_v34 = vsub.f32 %v11496_v10, %v11696_v16  ;;  %v11248_v4 = vadd.f32 %v11198_v62, %v11148_v28  ;;  %v11199_v14 = vmul.f32 %v19770_v38, %v10621_v19  ;;  %v11498_v1 = vld [vmem:[%s21510_s1 + $0x30] sm:$0xff]  ;;  %v20268_v45 = vpop.f32.mrb[61].mxu1  ;;  %v11099_v16 = vld [vmem:[%s21509_s0 + $0x38] sm:$0xff] }
 0x5d9   :  { %v11648_v26 = vsub.f32 %v11548_v43, %v11598_v53  ;;  %11446 = vst [vmem:[%s21511_s8 + $0x20] sm:$0xff] %v11396_v51  ;;  %v11397_v18 = vsub.f32 %v11097_v39, %v11303_v42  ;;  %v11149_v31 = vmul.f32 %v19765_v20, %v5569_v50  ;;  %v11599_v11 = vmul.f32 %v19770_v38, %v5569_v50  ;;  %v10635_v0 = vpop.f32.mrb[10].mxu0  ;;  %v14184_v43 = vld [vmem:[%s21507_s6 + $0x48] sm:$0xff] }
 0x5da   :  { %v11747_v23 = vsub.f32 %v11497_v49, %v11697_v48  ;;  %11796 = vst [vmem:[%s21512_s9 + $0x20] sm:$0xff] %v11746_v34  ;;  %v11305_v56 = vmul.f32 %v19900_v5, %v11248_v4  ;;  %v11549_v62 = vmul.f32 %v19765_v20, %v10621_v19  ;;  %v5570_v54 = vsub.f32 %v24593_v41, %v5397_v27  ;;  %v20277_v10 = vpop.f32.mrb[11].mxu0  ;;  %v24594_v20 = vld [vmem:[#allocation43_spill] sm:$0xff]  ;;  %v14182_v49 = vld [vmem:[%s21507_s6 + $0x40] sm:$0xff] }
 0x5db   :  { %v11698_v30 = vmul.f32 %v19900_v5, %v11648_v26  ;;  %11447 = vst.msk [vmem:[%s21511_s8 + $0x28] sm:$0xff] %vm231_vm0, %v11397_v18  ;;  %v11249_v38 = vadd.f32 %v11199_v14, %v11149_v31  ;;  %v11200_v55 = vmul.f32 %v19784_v32, %v10627_v17  ;;  %v11550_v5 = vmul.f32 %v19779_v24, %v10627_v17  ;;  %v20296_v53 = vpop.f32.mrb[62].mxu1  ;;  %v11499_v24 = vld [vmem:[%s21510_s1 + $0x38] sm:$0xff]  ;;  %v14183_v17 = vld [vmem:[%s21508_s7 + $0x40] sm:$0xff]  ;;  %v14185_v42 = vld [vmem:[%s21508_s7 + $0x48] sm:$0xff] }
 0x5dc   :  { %11797 = vst.msk [vmem:[%s21512_s9 + $0x28] sm:$0xff] %vm231_vm0, %v11747_v23  ;;  %v5571_v19 = vsub.f32 %v24594_v20, %v5399_v59  ;;  %v11398_v27 = vsub.f32 %v11098_v35, %v11305_v56  ;;  %v11649_v39 = vsub.f32 %v11549_v62, %v11599_v11  ;;  %v11150_v28 = vmul.f32 %v14182_v49, %v5570_v54  ;;  %v20313_v50 = vpop.f32.mrb[63].mxu1  ;;  %v11100_v35 = vld [vmem:[%s21509_s0 + $0x40] sm:$0xff]  ;;  %v14186_v56 = vld [vmem:[%s21508_s7 + $0x50] sm:$0xff] }
 0x5dd   :  { %v11748_v22 = vsub.f32 %v11498_v1, %v11698_v30  ;;  %v11307_v32 = vmul.f32 %v19902_v12, %v11249_v38  ;;  %v11600_v59 = vmul.f32 %v14183_v17, %v5570_v54  ;;  %v20311_v15 = vpop.f32.mrb[12].mxu0  ;;  %v11201_v26 = vmul.f32 %v14185_v42, %v10629_v33  ;;  %v24595_v31 = vld [vmem:[#allocation42_spill] sm:$0xff]  ;;  %v14187_v20 = vld [vmem:[%s21507_s6 + $0x50] sm:$0xff] }
 0x5de   :  { %v11151_v51 = vmul.f32 %v14184_v43, %v5571_v19  ;;  %v11601_v48 = vmul.f32 %v14185_v42, %v5571_v19  ;;  %11448 = vst [vmem:[%s21511_s8 + $0x30] sm:$0xff] %v11398_v27  ;;  %v11699_v34 = vmul.f32 %v19902_v12, %v11649_v39  ;;  %v11250_v4 = vadd.f32 %v11200_v55, %v11150_v28  ;;  %v20322_v18 = vpop.f32.mrb[13].mxu0  ;;  %v11101_v55 = vld [vmem:[%s21509_s0 + $0x48] sm:$0xff] }
 0x5df   :  { %11798 = vst [vmem:[%s21512_s9 + $0x30] sm:$0xff] %v11748_v22  ;;  %v11551_v14 = vmul.f32 %v14184_v43, %v10629_v33  ;;  %v11399_v23 = vsub.f32 %v11099_v16, %v11307_v32  ;;  %v11650_v1 = vsub.f32 %v11550_v5, %v11600_v59  ;;  %v5572_v11 = vsub.f32 %v24595_v31, %v5405_v3  ;;  %v11500_v33 = vld [vmem:[%s21510_s1 + $0x40] sm:$0xff]  ;;  %v20335_v38 = vpop.f32.mrb[64].mxu1  ;;  %v11501_v5 = vld [vmem:[%s21510_s1 + $0x48] sm:$0xff]  ;;  %v24596_v32 = vld [vmem:[#allocation56_spill] sm:$0xff] }
 0x5e0   :  { %v11202_v30 = vmul.f32 %v14186_v56, %v10635_v0  ;;  %v11749_v62 = vsub.f32 %v11499_v24, %v11699_v34  ;;  %v11309_v12 = vmul.f32 %v19910_v8, %v11250_v4  ;;  %v11251_v41 = vadd.f32 %v11201_v26, %v11151_v51  ;;  %v20353_v39 = vpop.f32.mrb[65].mxu1  ;;  %v14188_v51 = vld [vmem:[%s21508_s7 + $0x58] sm:$0xff]  ;;  %v11502_v34 = vld [vmem:[%s21510_s1 + $0x50] sm:$0xff] }
 0x5e1   :  { %v11651_v54 = vsub.f32 %v11551_v14, %v11601_v48  ;;  %11449 = vst.msk [vmem:[%s21511_s8 + $0x38] sm:$0xff] %vm231_vm0, %v11399_v23  ;;  %v11700_v3 = vmul.f32 %v19910_v8, %v11650_v1  ;;  %v11152_v19 = vmul.f32 %v14187_v20, %v5572_v11  ;;  %v11602_v27 = vmul.f32 %v14186_v56, %v5572_v11  ;;  %v20351_v16 = vpop.f32.mrb[14].mxu0  ;;  %v14189_v4 = vld [vmem:[%s21507_s6 + $0x58] sm:$0xff] }
 0x5e2   :  { %v11552_v22 = vmul.f32 %v14187_v20, %v10635_v0  ;;  %11799 = vst.msk [vmem:[%s21512_s9 + $0x38] sm:$0xff] %vm231_vm0, %v11749_v62  ;;  %v11400_v8 = vsub.f32 %v11100_v35, %v11309_v12  ;;  %v11311_v49 = vmul.f32 %v19918_v25, %v11251_v41  ;;  %v5573_v24 = vsub.f32 %v24596_v32, %v20268_v45  ;;  %v20363_v17 = vpop.f32.mrb[15].mxu0  ;;  %v11102_v45 = vld [vmem:[%s21509_s0 + $0x50] sm:$0xff]  ;;  %v24597_v11 = vld [vmem:[#allocation61_spill] sm:$0xff]  ;;  %v14191_v12 = vld [vmem:[%s21507_s6 + $0x60] sm:$0xff] }
 0x5e3   :  { %v11701_v28 = vmul.f32 %v19918_v25, %v11651_v54  ;;  %v11750_v0 = vsub.f32 %v11500_v33, %v11700_v3  ;;  %v11252_v59 = vadd.f32 %v11202_v30, %v11152_v19  ;;  %v11203_v42 = vmul.f32 %v14188_v51, %v20277_v10  ;;  %v20381_v23 = vpop.f32.mrb[66].mxu1  ;;  %v24598_v41 = vld [vmem:[#allocation59_spill] sm:$0xff]  ;;  %v11103_v20 = vld [vmem:[%s21509_s0 + $0x58] sm:$0xff] }
 0x5e4   :  { %v11652_v43 = vsub.f32 %v11552_v22, %v11602_v27  ;;  %11450 = vst [vmem:[%s21511_s8 + $0x40] sm:$0xff] %v11400_v8  ;;  %v11401_v48 = vsub.f32 %v11101_v55, %v11311_v49  ;;  %v11153_v26 = vmul.f32 %v14189_v4, %v5573_v24  ;;  %v11603_v14 = vmul.f32 %v14188_v51, %v5573_v24  ;;  %v20393_v62 = vpop.f32.mrb[67].mxu1  ;;  %v24599_v22 = vld [vmem:[#allocation213_spill] sm:$0xff]  ;;  %v14193_v32 = vld [vmem:[%s21508_s7 + $0x68] sm:$0xff] }
 0x5e5   :  { %v11751_v25 = vsub.f32 %v11501_v5, %v11701_v28  ;;  %11800 = vst [vmem:[%s21512_s9 + $0x40] sm:$0xff] %v11750_v0  ;;  %v11313_v35 = vmul.f32 %v19926_v7, %v11252_v59  ;;  %v11553_v31 = vmul.f32 %v14189_v4, %v20277_v10  ;;  %v5574_v56 = vsub.f32 %v24597_v11, %v20296_v53  ;;  %v20391_v30 = vpop.f32.mrb[16].mxu0  ;;  %v14190_v10 = vld [vmem:[%s21508_s7 + $0x60] sm:$0xff]  ;;  %v11503_v49 = vld [vmem:[%s21510_s1 + $0x58] sm:$0xff]  ;;  %v24601_v11 = vld [vmem:[#allocation208_spill] sm:$0xff] }
 0x5e6   :  { %v11702_v1 = vmul.f32 %v19926_v7, %v11652_v43  ;;  %11451 = vst.msk [vmem:[%s21511_s8 + $0x48] sm:$0xff] %vm231_vm0, %v11401_v48  ;;  %v11253_v7 = vadd.f32 %v11203_v42, %v11153_v26  ;;  %v11204_v53 = vmul.f32 %v14190_v10, %v20311_v15  ;;  %v11554_v33 = vmul.f32 %v14191_v12, %v20311_v15  ;;  %v20413_v3 = vpop.f32.mrb[17].mxu0  ;;  %v24600_v26 = vld [vmem:[#allocation62_spill] sm:$0xff] }
 0x5e7   :  { %11801 = vst.msk [vmem:[%s21512_s9 + $0x48] sm:$0xff] %vm231_vm0, %v11751_v25  ;;  %v5575_v54 = vsub.f32 %v24598_v41, %v20313_v50  ;;  %v11402_v55 = vsub.f32 %v11102_v45, %v11313_v35  ;;  %v11653_v19 = vsub.f32 %v11553_v31, %v11603_v14  ;;  %v11154_v27 = vmul.f32 %v14191_v12, %v5574_v56  ;;  %v14192_v50 = vld [vmem:[%s21507_s6 + $0x68] sm:$0xff]  ;;  %v20428_v0 = vpop.f32.mrb[68].mxu1  ;;  %v14194_v35 = vld [vmem:[%s21508_s7 + $0x70] sm:$0xff] }
 0x5e8   :  { %v11752_v5 = vsub.f32 %v11502_v34, %v11702_v1  ;;  %v11315_v8 = vmul.f32 %v24599_v22, %v11253_v7  ;;  %v11604_v15 = vmul.f32 %v14190_v10, %v5574_v56  ;;  %v11205_v51 = vmul.f32 %v14193_v32, %v20322_v18  ;;  %v20441_v25 = vpop.f32.mrb[69].mxu1  ;;  %v11104_v34 = vld [vmem:[%s21509_s0 + $0x60] sm:$0xff]  ;;  %v11105_v12 = vld [vmem:[%s21509_s0 + $0x68] sm:$0xff]  ;;  %v14195_v41 = vld [vmem:[%s21507_s6 + $0x70] sm:$0xff] }
 0x5e9   :  { %v11155_v28 = vmul.f32 %v14192_v50, %v5575_v54  ;;  %v11605_v24 = vmul.f32 %v14193_v32, %v5575_v54  ;;  %11452 = vst [vmem:[%s21511_s8 + $0x50] sm:$0xff] %v11402_v55  ;;  %v11703_v59 = vmul.f32 %v24599_v22, %v11653_v19  ;;  %v11254_v43 = vadd.f32 %v11204_v53, %v11154_v27  ;;  %v20439_v48 = vpop.f32.mrb[18].mxu0  ;;  %v11504_v7 = vld [vmem:[%s21510_s1 + $0x60] sm:$0xff] }
 0x5ea   :  { %11802 = vst [vmem:[%s21512_s9 + $0x50] sm:$0xff] %v11752_v5  ;;  %v11555_v42 = vmul.f32 %v14192_v50, %v20322_v18  ;;  %v11403_v45 = vsub.f32 %v11103_v20, %v11315_v8  ;;  %v11654_v4 = vsub.f32 %v11554_v33, %v11604_v15  ;;  %v5576_v14 = vsub.f32 %v24600_v26, %v20335_v38  ;;  %v20452_v18 = vpop.f32.mrb[19].mxu0  ;;  %v11505_v33 = vld [vmem:[%s21510_s1 + $0x68] sm:$0xff]  ;;  %v24602_v27 = vld [vmem:[#allocation222_spill] sm:$0xff] }
 0x5eb   :  { %v11206_v1 = vmul.f32 %v14194_v35, %v20351_v16  ;;  %v11753_v31 = vsub.f32 %v11503_v49, %v11703_v59  ;;  %v11317_v56 = vmul.f32 %v24601_v11, %v11254_v43  ;;  %v11255_v10 = vadd.f32 %v11205_v51, %v11155_v28  ;;  %v20473_v20 = vpop.f32.mrb[70].mxu1  ;;  %v24603_v49 = vld [vmem:[#allocation60_spill] sm:$0xff]  ;;  %v14196_v59 = vld [vmem:[%s21508_s7 + $0x78] sm:$0xff] }
 0x5ec   :  { %v11655_v53 = vsub.f32 %v11555_v42, %v11605_v24  ;;  %11453 = vst.msk [vmem:[%s21511_s8 + $0x58] sm:$0xff] %vm231_vm0, %v11403_v45  ;;  %v11704_v38 = vmul.f32 %v24601_v11, %v11654_v4  ;;  %v11156_v54 = vmul.f32 %v14195_v41, %v5576_v14  ;;  %v11606_v55 = vmul.f32 %v14194_v35, %v5576_v14  ;;  %v20485_v28 = vpop.f32.mrb[71].mxu1  ;;  %v11106_v45 = vld [vmem:[%s21509_s0 + $0x70] sm:$0xff]  ;;  %v14197_v4 = vld [vmem:[%s21507_s6 + $0x78] sm:$0xff] }
 0x5ed   :  { %v11556_v5 = vmul.f32 %v14195_v41, %v20351_v16  ;;  %11803 = vst.msk [vmem:[%s21512_s9 + $0x58] sm:$0xff] %vm231_vm0, %v11753_v31  ;;  %v11404_v19 = vsub.f32 %v11104_v34, %v11317_v56  ;;  %v11319_v22 = vmul.f32 %v24602_v27, %v11255_v10  ;;  %v5577_v15 = vsub.f32 %v24603_v49, %v20353_v39  ;;  %v20483_v50 = vpop.f32.mrb[20].mxu0  ;;  %v11506_v34 = vld [vmem:[%s21510_s1 + $0x70] sm:$0xff]  ;;  %v24604_v35 = vld [vmem:[#allocation217_spill] sm:$0xff]  ;;  %v24605_v56 = vld [vmem:[#allocation87_spill] sm:$0xff] }
 0x5ee   :  { %v11705_v8 = vmul.f32 %v24602_v27, %v11655_v53  ;;  %v11754_v16 = vsub.f32 %v11504_v7, %v11704_v38  ;;  %v11256_v32 = vadd.f32 %v11206_v1, %v11156_v54  ;;  %v11207_v43 = vmul.f32 %v14196_v59, %v20363_v17  ;;  %v20491_v51 = vpop.f32.mrb[21].mxu0  ;;  %v11107_v27 = vld [vmem:[%s21509_s0 + $0x78] sm:$0xff] }
 0x5ef   :  { %v11656_v24 = vsub.f32 %v11556_v5, %v11606_v55  ;;  %11454 = vst [vmem:[%s21511_s8 + $0x60] sm:$0xff] %v11404_v19  ;;  %v11405_v39 = vsub.f32 %v11105_v12, %v11319_v22  ;;  %v11157_v26 = vmul.f32 %v14197_v4, %v5577_v15  ;;  %v11607_v14 = vmul.f32 %v14196_v59, %v5577_v15  ;;  %v20513_v10 = vpop.f32.mrb[72].mxu1  ;;  %v24607_v15 = vld [vmem:[#allocation232_spill] sm:$0xff]  ;;  %v14201_v59 = vld [vmem:[%s21508_s7 + $0x88] sm:$0xff] }
 0x5f0   :  { %v11755_v42 = vsub.f32 %v11505_v33, %v11705_v8  ;;  %11804 = vst [vmem:[%s21512_s9 + $0x60] sm:$0xff] %v11754_v16  ;;  %v11321_v1 = vmul.f32 %v24604_v35, %v11256_v32  ;;  %v11557_v11 = vmul.f32 %v14197_v4, %v20363_v17  ;;  %v5578_v7 = vsub.f32 %v24605_v56, %v20381_v23  ;;  %v14198_v17 = vld [vmem:[%s21508_s7 + $0x80] sm:$0xff]  ;;  %v20535_v55 = vpop.f32.mrb[73].mxu1  ;;  %v14200_v32 = vld [vmem:[%s21507_s6 + $0x88] sm:$0xff] }
 0x5f1   :  { %v11706_v31 = vmul.f32 %v24604_v35, %v11656_v24  ;;  %11455 = vst.msk [vmem:[%s21511_s8 + $0x68] sm:$0xff] %vm231_vm0, %v11405_v39  ;;  %v11257_v53 = vadd.f32 %v11207_v43, %v11157_v26  ;;  %v11208_v38 = vmul.f32 %v14198_v17, %v20391_v30  ;;  %v14199_v23 = vld [vmem:[%s21507_s6 + $0x80] sm:$0xff]  ;;  %v20533_v54 = vpop.f32.mrb[22].mxu0 }
 0x5f2   :  { %11805 = vst.msk [vmem:[%s21512_s9 + $0x68] sm:$0xff] %vm231_vm0, %v11755_v42  ;;  %v11558_v12 = vmul.f32 %v14199_v23, %v20391_v30  ;;  %v24606_v33 = vld [vmem:[#allocation82_spill] sm:$0xff]  ;;  %v11406_v5 = vsub.f32 %v11106_v45, %v11321_v1  ;;  %v11657_v22 = vsub.f32 %v11557_v11, %v11607_v14  ;;  %v11158_v8 = vmul.f32 %v14199_v23, %v5578_v7  ;;  %v20540_v49 = vpop.f32.mrb[23].mxu0  ;;  %v11507_v30 = vld [vmem:[%s21510_s1 + $0x78] sm:$0xff]  ;;  %v14202_v11 = vld [vmem:[%s21508_s7 + $0x90] sm:$0xff] }
 0x5f3   :  { %v5579_v41 = vsub.f32 %v24606_v33, %v20393_v62  ;;  %v11756_v19 = vsub.f32 %v11506_v34, %v11706_v31  ;;  %v11323_v16 = vmul.f32 %v24607_v15, %v11257_v53  ;;  %v11608_v62 = vmul.f32 %v14198_v17, %v5578_v7  ;;  %v20561_v4 = vpop.f32.mrb[74].mxu1  ;;  %v11108_v14 = vld [vmem:[%s21509_s0 + $0x80] sm:$0xff] }
 0x5f4   :  { %11456 = vst [vmem:[%s21511_s8 + $0x70] sm:$0xff] %v11406_v5  ;;  %v11707_v39 = vmul.f32 %v24607_v15, %v11657_v22  ;;  %v11258_v42 = vadd.f32 %v11208_v38, %v11158_v8  ;;  %v11209_v45 = vmul.f32 %v14201_v59, %v20413_v3  ;;  %v11559_v34 = vmul.f32 %v14200_v32, %v20413_v3  ;;  %v24608_v1 = vld [vmem:[#allocation86_spill] sm:$0xff]  ;;  %v20574_v3 = vpop.f32.mrb[75].mxu1  ;;  %v11509_v5 = vld [vmem:[%s21510_s1 + $0x88] sm:$0xff] }
 0x5f5   :  { %v11159_v24 = vmul.f32 %v14200_v32, %v5579_v41  ;;  %v11609_v43 = vmul.f32 %v14201_v59, %v5579_v41  ;;  %11806 = vst [vmem:[%s21512_s9 + $0x70] sm:$0xff] %v11756_v19  ;;  %v11407_v26 = vsub.f32 %v11107_v27, %v11323_v16  ;;  %v11658_v35 = vsub.f32 %v11558_v12, %v11608_v62  ;;  %v20572_v7 = vpop.f32.mrb[24].mxu0  ;;  %v11508_v38 = vld [vmem:[%s21510_s1 + $0x80] sm:$0xff]  ;;  %v11109_v41 = vld [vmem:[%s21509_s0 + $0x88] sm:$0xff]  ;;  %v14203_v19 = vld [vmem:[%s21507_s6 + $0x90] sm:$0xff] }
 0x5f6   :  { %v5580_v31 = vsub.f32 %v24608_v1, %v20428_v0  ;;  %v11210_v56 = vmul.f32 %v14202_v11, %v20439_v48  ;;  %v11757_v53 = vsub.f32 %v11507_v30, %v11707_v39  ;;  %v11325_v17 = vmul.f32 %v19992_v44, %v11258_v42  ;;  %v20580_v0 = vpop.f32.mrb[25].mxu0  ;;  %v24609_v30 = vld [vmem:[#allocation85_spill] sm:$0xff] }
 0x5f7   :  { %v11259_v23 = vadd.f32 %v11209_v45, %v11159_v24  ;;  %v11659_v12 = vsub.f32 %v11559_v34, %v11609_v43  ;;  %11457 = vst.msk [vmem:[%s21511_s8 + $0x78] sm:$0xff] %vm231_vm0, %v11407_v26  ;;  %v11708_v33 = vmul.f32 %v19992_v44, %v11658_v35  ;;  %v11560_v8 = vmul.f32 %v14203_v19, %v20439_v48  ;;  %v20605_v32 = vpop.f32.mrb[76].mxu1  ;;  %v14204_v48 = vld [vmem:[%s21508_s7 + $0x98] sm:$0xff]  ;;  %v11110_v34 = vld [vmem:[%s21509_s0 + $0x90] sm:$0xff] }
 0x5f8   :  { %v11160_v27 = vmul.f32 %v14203_v19, %v5580_v31  ;;  %v11610_v22 = vmul.f32 %v14202_v11, %v5580_v31  ;;  %11807 = vst.msk [vmem:[%s21512_s9 + $0x78] sm:$0xff] %vm231_vm0, %v11757_v53  ;;  %v11408_v44 = vsub.f32 %v11108_v14, %v11325_v17  ;;  %v5581_v62 = vsub.f32 %v24609_v30, %v20441_v25  ;;  %v20613_v45 = vpop.f32.mrb[77].mxu1  ;;  %v11510_v26 = vld [vmem:[%s21510_s1 + $0x90] sm:$0xff]  ;;  %v14205_v14 = vld [vmem:[%s21507_s6 + $0x98] sm:$0xff]  ;;  %v24610_v17 = vld [vmem:[#allocation91_spill] sm:$0xff] }
 0x5f9   :  { %v11327_v15 = vmul.f32 %v19994_v6, %v11259_v23  ;;  %v11709_v16 = vmul.f32 %v19994_v6, %v11659_v12  ;;  %v11758_v24 = vsub.f32 %v11508_v38, %v11708_v33  ;;  %v11211_v39 = vmul.f32 %v14204_v48, %v20452_v18  ;;  %v20611_v42 = vpop.f32.mrb[26].mxu0  ;;  %v24611_v33 = vld [vmem:[#allocation89_spill] sm:$0xff]  ;;  %v24612_v30 = vld [vmem:[#allocation227_spill] sm:$0xff] }
 0x5fa   :  { %v11260_v59 = vadd.f32 %v11210_v56, %v11160_v27  ;;  %v11660_v43 = vsub.f32 %v11560_v8, %v11610_v22  ;;  %11458 = vst [vmem:[%s21511_s8 + $0x80] sm:$0xff] %v11408_v44  ;;  %v11161_v35 = vmul.f32 %v14205_v14, %v5581_v62  ;;  %v11611_v1 = vmul.f32 %v14204_v48, %v5581_v62  ;;  %v20627_v31 = vpop.f32.mrb[27].mxu0  ;;  %v11111_v22 = vld [vmem:[%s21509_s0 + $0x98] sm:$0xff] }
 0x5fb   :  { %v11409_v6 = vsub.f32 %v11109_v41, %v11327_v15  ;;  %v11759_v25 = vsub.f32 %v11509_v5, %v11709_v16  ;;  %11808 = vst [vmem:[%s21512_s9 + $0x80] sm:$0xff] %v11758_v24  ;;  %v11561_v53 = vmul.f32 %v14205_v14, %v20452_v18  ;;  %v5582_v38 = vsub.f32 %v24610_v17, %v20473_v20  ;;  %v14207_v20 = vld [vmem:[%s21507_s6 + $0xa0] sm:$0xff]  ;;  %v20655_v5 = vpop.f32.mrb[78].mxu1  ;;  %v14208_v24 = vld [vmem:[%s21507_s6 + $0xa8] sm:$0xff] }
 0x5fc   :  { %v11329_v11 = vmul.f32 %v19996_v57, %v11260_v59  ;;  %v11710_v56 = vmul.f32 %v19996_v57, %v11660_v43  ;;  %v11261_v23 = vadd.f32 %v11211_v39, %v11161_v35  ;;  %v14206_v57 = vld [vmem:[%s21508_s7 + $0xa0] sm:$0xff]  ;;  %v11562_v12 = vmul.f32 %v14207_v20, %v20483_v50  ;;  %v20662_v16 = vpop.f32.mrb[79].mxu1  ;;  %v14209_v43 = vld [vmem:[%s21508_s7 + $0xa8] sm:$0xff] }
 0x5fd   :  { %11459 = vst.msk [vmem:[%s21511_s8 + $0x88] sm:$0xff] %vm231_vm0, %v11409_v6  ;;  %11809 = vst.msk [vmem:[%s21512_s9 + $0x88] sm:$0xff] %vm231_vm0, %v11759_v25  ;;  %v11212_v18 = vmul.f32 %v14206_v57, %v20483_v50  ;;  %v5583_v41 = vsub.f32 %v24611_v33, %v20485_v28  ;;  %v11661_v8 = vsub.f32 %v11561_v53, %v11611_v1  ;;  %v20660_v15 = vpop.f32.mrb[28].mxu0  ;;  %v11511_v50 = vld [vmem:[%s21510_s1 + $0x98] sm:$0xff]  ;;  %v11112_v35 = vld [vmem:[%s21509_s0 + $0xa0] sm:$0xff] }
 0x5fe   :  { %v11410_v19 = vsub.f32 %v11110_v34, %v11329_v11  ;;  %v11760_v27 = vsub.f32 %v11510_v26, %v11710_v56  ;;  %v11162_v44 = vmul.f32 %v14207_v20, %v5582_v38  ;;  %v11331_v62 = vmul.f32 %v24612_v30, %v11261_v23  ;;  %v20674_v39 = vpop.f32.mrb[29].mxu0  ;;  %v24613_v11 = vld [vmem:[#allocation105_spill] sm:$0xff]  ;;  %v14210_v53 = vld [vmem:[%s21508_s7 + $0xb0] sm:$0xff] }
 0x5ff   :  { %v11612_v28 = vmul.f32 %v14206_v57, %v5582_v38  ;;  %v11163_v59 = vmul.f32 %v14208_v24, %v5583_v41  ;;  %v11613_v48 = vmul.f32 %v14209_v43, %v5583_v41  ;;  %v11711_v6 = vmul.f32 %v24612_v30, %v11661_v8  ;;  %v20694_v38 = vpop.f32.mrb[80].mxu1  ;;  %v24614_v57 = vld [vmem:[#allocation242_spill] sm:$0xff] }
 0x600   :  { %11460 = vst [vmem:[%s21511_s8 + $0x90] sm:$0xff] %v11410_v19  ;;  %11810 = vst [vmem:[%s21512_s9 + $0x90] sm:$0xff] %v11760_v27  ;;  %v11262_v25 = vadd.f32 %v11212_v18, %v11162_v44  ;;  %v11213_v34 = vmul.f32 %v14209_v43, %v20491_v51  ;;  %v11563_v26 = vmul.f32 %v14208_v24, %v20491_v51  ;;  %v11512_v18 = vld [vmem:[%s21510_s1 + $0xa0] sm:$0xff]  ;;  %v11113_v19 = vld [vmem:[%s21509_s0 + $0xa8] sm:$0xff] }
 0x601   :  { %v11411_v14 = vsub.f32 %v11111_v22, %v11331_v62  ;;  %v11662_v1 = vsub.f32 %v11562_v12, %v11612_v28  ;;  %v5584_v56 = vsub.f32 %v24613_v11, %v20513_v10  ;;  %v11214_v17 = vmul.f32 %v14210_v53, %v20533_v54  ;;  %v20700_v33 = vpop.f32.mrb[30].mxu0  ;;  %v20702_v10 = vpop.f32.mrb[81].mxu1  ;;  %v11513_v27 = vld [vmem:[%s21510_s1 + $0xa8] sm:$0xff]  ;;  %v14211_v22 = vld [vmem:[%s21507_s6 + $0xb0] sm:$0xff]  ;;  %v24615_v28 = vld [vmem:[#allocation238_spill] sm:$0xff] }
 0x602   :  { %v11761_v23 = vsub.f32 %v11511_v50, %v11711_v6  ;;  %v11333_v51 = vmul.f32 %v24614_v57, %v11262_v25  ;;  %v11263_v20 = vadd.f32 %v11213_v34, %v11163_v59  ;;  %v11663_v12 = vsub.f32 %v11563_v26, %v11613_v48  ;;  %v20719_v62 = vpop.f32.mrb[31].mxu0  ;;  %v24616_v43 = vld [vmem:[#allocation92_spill] sm:$0xff] }
 0x603   :  { %11461 = vst.msk [vmem:[%s21511_s8 + $0x98] sm:$0xff] %vm231_vm0, %v11411_v14  ;;  %v11712_v41 = vmul.f32 %v24614_v57, %v11662_v1  ;;  %v11164_v8 = vmul.f32 %v14211_v22, %v5584_v56  ;;  %v11614_v44 = vmul.f32 %v14210_v53, %v5584_v56  ;;  %v11564_v30 = vmul.f32 %v14211_v22, %v20533_v54  ;;  %v14212_v54 = vld [vmem:[%s21508_s7 + $0xb8] sm:$0xff]  ;;  %v20733_v14 = vpop.f32.mrb[82].mxu1  ;;  %v11514_v11 = vld [vmem:[%s21510_s1 + $0xb0] sm:$0xff] }
 0x604   :  { %11811 = vst.msk [vmem:[%s21512_s9 + $0x98] sm:$0xff] %vm231_vm0, %v11761_v23  ;;  %v11412_v50 = vsub.f32 %v11112_v35, %v11333_v51  ;;  %v11335_v24 = vmul.f32 %v24615_v28, %v11263_v20  ;;  %v11713_v59 = vmul.f32 %v24615_v28, %v11663_v12  ;;  %v5585_v48 = vsub.f32 %v24616_v43, %v20535_v55  ;;  %v11114_v55 = vld [vmem:[%s21509_s0 + $0xb0] sm:$0xff]  ;;  %v14213_v56 = vld [vmem:[%s21507_s6 + $0xb8] sm:$0xff]  ;;  %v20749_v57 = vpop.f32.mrb[83].mxu1 }
 0x605   :  { %v11762_v6 = vsub.f32 %v11512_v18, %v11712_v41  ;;  %v11264_v25 = vadd.f32 %v11214_v17, %v11164_v8  ;;  %v11664_v34 = vsub.f32 %v11564_v30, %v11614_v44  ;;  %v11215_v26 = vmul.f32 %v14212_v54, %v20540_v49  ;;  %v20747_v23 = vpop.f32.mrb[32].mxu0  ;;  %v24617_v51 = vld [vmem:[#allocation245_spill] sm:$0xff]  ;;  %v24618_v41 = vld [vmem:[#allocation111_spill] sm:$0xff]  ;;  %v24619_v30 = vld [vmem:[#allocation110_spill] sm:$0xff] }
 0x606   :  { %11462 = vst [vmem:[%s21511_s8 + $0xa0] sm:$0xff] %v11412_v50  ;;  %v11413_v35 = vsub.f32 %v11113_v19, %v11335_v24  ;;  %v11763_v1 = vsub.f32 %v11513_v27, %v11713_v59  ;;  %v11165_v53 = vmul.f32 %v14213_v56, %v5585_v48  ;;  %v11615_v17 = vmul.f32 %v14212_v54, %v5585_v48  ;;  %v20759_v27 = vpop.f32.mrb[33].mxu0  ;;  %v11115_v59 = vld [vmem:[%s21509_s0 + $0xb8] sm:$0xff] }
 0x607   :  { %11812 = vst [vmem:[%s21512_s9 + $0xa0] sm:$0xff] %v11762_v6  ;;  %v11337_v18 = vmul.f32 %v24617_v51, %v11264_v25  ;;  %v11714_v20 = vmul.f32 %v24617_v51, %v11664_v34  ;;  %v11565_v12 = vmul.f32 %v14213_v56, %v20540_v49  ;;  %v5586_v19 = vsub.f32 %v24618_v41, %v20561_v4  ;;  %v14214_v49 = vld [vmem:[%s21508_s7 + $0xc0] sm:$0xff]  ;;  %v20782_v6 = vpop.f32.mrb[84].mxu1  ;;  %v24620_v25 = vld [vmem:[#allocation239_spill] sm:$0xff]  ;;  %v11515_v54 = vld [vmem:[%s21510_s1 + $0xb8] sm:$0xff] }
 0x608   :  { %11463 = vst.msk [vmem:[%s21511_s8 + $0xa8] sm:$0xff] %vm231_vm0, %v11413_v35  ;;  %11813 = vst.msk [vmem:[%s21512_s9 + $0xa8] sm:$0xff] %vm231_vm0, %v11763_v1  ;;  %v11265_v22 = vadd.f32 %v11215_v26, %v11165_v53  ;;  %v11216_v8 = vmul.f32 %v14214_v49, %v20572_v7  ;;  %v14215_v4 = vld [vmem:[%s21507_s6 + $0xc0] sm:$0xff]  ;;  %v5587_v50 = vsub.f32 %v24619_v30, %v20574_v3  ;;  %v14216_v3 = vld [vmem:[%s21507_s6 + $0xc8] sm:$0xff] }
 0x609   :  { %v11566_v44 = vmul.f32 %v14215_v4, %v20572_v7  ;;  %v11414_v28 = vsub.f32 %v11114_v55, %v11337_v18  ;;  %v11764_v24 = vsub.f32 %v11514_v11, %v11714_v20  ;;  %v11665_v43 = vsub.f32 %v11565_v12, %v11615_v17  ;;  %v14217_v35 = vld [vmem:[%s21508_s7 + $0xc8] sm:$0xff]  ;;  %v20794_v55 = vpop.f32.mrb[34].mxu0  ;;  %v20796_v11 = vpop.f32.mrb[85].mxu1  ;;  %v11116_v12 = vld [vmem:[%s21509_s0 + $0xc0] sm:$0xff] }
 0x60a   :  { %v11166_v48 = vmul.f32 %v14215_v4, %v5586_v19  ;;  %v11339_v34 = vmul.f32 %v24620_v25, %v11265_v22  ;;  %v11616_v7 = vmul.f32 %v14214_v49, %v5586_v19  ;;  %v11167_v26 = vmul.f32 %v14216_v3, %v5587_v50  ;;  %v20807_v18 = vpop.f32.mrb[35].mxu0  ;;  %v24621_v19 = vld [vmem:[#allocation115_spill] sm:$0xff]  ;;  %v14218_v49 = vld [vmem:[%s21508_s7 + $0xd0] sm:$0xff] }
 0x60b   :  { %v11617_v1 = vmul.f32 %v14217_v35, %v5587_v50  ;;  %11464 = vst [vmem:[%s21511_s8 + $0xb0] sm:$0xff] %v11414_v28  ;;  %11814 = vst [vmem:[%s21512_s9 + $0xb0] sm:$0xff] %v11764_v24  ;;  %v11715_v56 = vmul.f32 %v24620_v25, %v11665_v43  ;;  %v11217_v17 = vmul.f32 %v14217_v35, %v20580_v0  ;;  %v24622_v30 = vld [vmem:[#allocation255_spill] sm:$0xff]  ;;  %v11516_v50 = vld [vmem:[%s21510_s1 + $0xc0] sm:$0xff] }
 0x60c   :  { %v11266_v53 = vadd.f32 %v11216_v8, %v11166_v48  ;;  %v11567_v51 = vmul.f32 %v14216_v3, %v20580_v0  ;;  %v11415_v20 = vsub.f32 %v11115_v59, %v11339_v34  ;;  %v11666_v41 = vsub.f32 %v11566_v44, %v11616_v7  ;;  %v20822_v59 = vpop.f32.mrb[86].mxu1  ;;  %v11117_v44 = vld [vmem:[%s21509_s0 + $0xc8] sm:$0xff]  ;;  %v14219_v48 = vld [vmem:[%s21507_s6 + $0xd0] sm:$0xff]  ;;  %v24623_v35 = vld [vmem:[#allocation249_spill] sm:$0xff] }
 0x60d   :  { %v5588_v22 = vsub.f32 %v24621_v19, %v20605_v32  ;;  %v11218_v8 = vmul.f32 %v14218_v49, %v20611_v42  ;;  %v11765_v4 = vsub.f32 %v11515_v54, %v11715_v56  ;;  %v11267_v28 = vadd.f32 %v11217_v17, %v11167_v26  ;;  %v11517_v43 = vld [vmem:[%s21510_s1 + $0xc8] sm:$0xff]  ;;  %v20839_v7 = vpop.f32.mrb[36].mxu0  ;;  %v20841_v3 = vpop.f32.mrb[87].mxu1  ;;  %v14220_v19 = vld [vmem:[%s21508_s7 + $0xd8] sm:$0xff] }
 0x60e   :  { %v11341_v0 = vmul.f32 %v24622_v30, %v11266_v53  ;;  %v11667_v24 = vsub.f32 %v11567_v51, %v11617_v1  ;;  %11465 = vst.msk [vmem:[%s21511_s8 + $0xb8] sm:$0xff] %vm231_vm0, %v11415_v20  ;;  %v11716_v32 = vmul.f32 %v24622_v30, %v11666_v41  ;;  %v11568_v54 = vmul.f32 %v14219_v48, %v20611_v42  ;;  %v24624_v53 = vld [vmem:[#allocation114_spill] sm:$0xff]  ;;  %v20851_v51 = vpop.f32.mrb[37].mxu0 }
 0x60f   :  { %v11168_v25 = vmul.f32 %v14219_v48, %v5588_v22  ;;  %v11618_v34 = vmul.f32 %v14218_v49, %v5588_v22  ;;  %11815 = vst.msk [vmem:[%s21512_s9 + $0xb8] sm:$0xff] %vm231_vm0, %v11765_v4  ;;  %v11343_v1 = vmul.f32 %v24623_v35, %v11267_v28  ;;  %v5589_v17 = vsub.f32 %v24624_v53, %v20613_v45  ;;  %v11118_v45 = vld [vmem:[%s21509_s0 + $0xd0] sm:$0xff]  ;;  %v14221_v4 = vld [vmem:[%s21507_s6 + $0xd8] sm:$0xff] }
 0x610   :  { %v11416_v26 = vsub.f32 %v11116_v12, %v11341_v0  ;;  %v11717_v56 = vmul.f32 %v24623_v35, %v11667_v24  ;;  %v11766_v42 = vsub.f32 %v11516_v50, %v11716_v32  ;;  %v11219_v22 = vmul.f32 %v14220_v19, %v20627_v31  ;;  %v20869_v50 = vpop.f32.mrb[88].mxu1 }
 0x611   :  { %v11268_v20 = vadd.f32 %v11218_v8, %v11168_v25  ;;  %v11668_v41 = vsub.f32 %v11568_v54, %v11618_v34  ;;  %v11417_v12 = vsub.f32 %v11117_v44, %v11343_v1  ;;  %v11518_v8 = vld [vmem:[%s21510_s1 + $0xd0] sm:$0xff]  ;;  %v11169_v30 = vmul.f32 %v14221_v4, %v5589_v17  ;;  %v24625_v44 = vld [vmem:[#allocation126_spill] sm:$0xff]  ;;  %v20879_v48 = vpop.f32.mrb[38].mxu0  ;;  %v20881_v25 = vpop.f32.mrb[89].mxu1 }
 0x612   :  { %11466 = vst [vmem:[%s21511_s8 + $0xc0] sm:$0xff] %v11416_v26  ;;  %v11767_v49 = vsub.f32 %v11517_v43, %v11717_v56  ;;  %v11619_v0 = vmul.f32 %v14220_v19, %v5589_v17  ;;  %11816 = vst [vmem:[%s21512_s9 + $0xc0] sm:$0xff] %v11766_v42  ;;  %v11569_v32 = vmul.f32 %v14221_v4, %v20627_v31  ;;  %v14222_v31 = vld [vmem:[%s21508_s7 + $0xe0] sm:$0xff]  ;;  %v24626_v26 = vld [vmem:[#allocation123_spill] sm:$0xff]  ;;  %v20901_v1 = vpop.f32.mrb[39].mxu0 }
 0x613   :  { %v11345_v28 = vmul.f32 %v20072_v37, %v11268_v20  ;;  %v11718_v24 = vmul.f32 %v20072_v37, %v11668_v41  ;;  %v5590_v43 = vsub.f32 %v24625_v44, %v20655_v5  ;;  %11467 = vst.msk [vmem:[%s21511_s8 + $0xc8] sm:$0xff] %vm231_vm0, %v11417_v12  ;;  %v11269_v37 = vadd.f32 %v11219_v22, %v11169_v30  ;;  %v14223_v34 = vld [vmem:[%s21507_s6 + $0xe0] sm:$0xff]  ;;  %v11119_v17 = vld [vmem:[%s21509_s0 + $0xd8] sm:$0xff] }
 0x614   :  { %11817 = vst.msk [vmem:[%s21512_s9 + $0xc8] sm:$0xff] %vm231_vm0, %v11767_v49  ;;  %v11220_v5 = vmul.f32 %v14222_v31, %v20660_v15  ;;  %v11570_v54 = vmul.f32 %v14223_v34, %v20660_v15  ;;  %v5591_v35 = vsub.f32 %v24626_v26, %v20662_v16  ;;  %v11669_v42 = vsub.f32 %v11569_v32, %v11619_v0  ;;  %v24627_v41 = vld [vmem:[#allocation9_spill] sm:$0xff]  ;;  %v14224_v16 = vld [vmem:[%s21507_s6 + $0xe8] sm:$0xff] }
 0x615   :  { %v11418_v56 = vsub.f32 %v11118_v45, %v11345_v28  ;;  %v11768_v53 = vsub.f32 %v11518_v8, %v11718_v24  ;;  %v11170_v20 = vmul.f32 %v14223_v34, %v5590_v43  ;;  %v11347_v19 = vmul.f32 %v24627_v41, %v11269_v37  ;;  %v11519_v22 = vld [vmem:[%s21510_s1 + $0xd8] sm:$0xff]  ;;  %v14225_v49 = vld [vmem:[%s21508_s7 + $0xe8] sm:$0xff]  ;;  %v20916_v8 = vpop.f32.mrb[90].mxu1  ;;  %v20927_v24 = vpop.f32.mrb[40].mxu0 }
 0x616   :  { %v11620_v15 = vmul.f32 %v14222_v31, %v5590_v43  ;;  %v11171_v12 = vmul.f32 %v14224_v16, %v5591_v35  ;;  %v11621_v45 = vmul.f32 %v14225_v49, %v5591_v35  ;;  %v11719_v4 = vmul.f32 %v24627_v41, %v11669_v42  ;;  %v20929_v32 = vpop.f32.mrb[91].mxu1  ;;  %v11120_v43 = vld [vmem:[%s21509_s0 + $0xe0] sm:$0xff]  ;;  %v24628_v31 = vld [vmem:[#allocation128_spill] sm:$0xff]  ;;  %v11521_v41 = vld [vmem:[%s21510_s1 + $0xe8] sm:$0xff] }
 0x617   :  { %11468 = vst [vmem:[%s21511_s8 + $0xd0] sm:$0xff] %v11418_v56  ;;  %11818 = vst [vmem:[%s21512_s9 + $0xd0] sm:$0xff] %v11768_v53  ;;  %v11270_v30 = vadd.f32 %v11220_v5, %v11170_v20  ;;  %v11221_v0 = vmul.f32 %v14225_v49, %v20674_v39  ;;  %v11571_v28 = vmul.f32 %v14224_v16, %v20674_v39  ;;  %v14226_v5 = vld [vmem:[%s21508_s7 + $0xf0] sm:$0xff]  ;;  %v20940_v39 = vpop.f32.mrb[41].mxu0  ;;  %v11121_v20 = vld [vmem:[%s21509_s0 + $0xe8] sm:$0xff] }
 0x618   :  { %v11419_v44 = vsub.f32 %v11119_v17, %v11347_v19  ;;  %v11670_v37 = vsub.f32 %v11570_v54, %v11620_v15  ;;  %v5592_v34 = vsub.f32 %v24628_v31, %v20694_v38  ;;  %v11222_v26 = vmul.f32 %v14226_v5, %v20700_v33  ;;  %v24629_v56 = vld [vmem:[#allocation268_spill] sm:$0xff]  ;;  %v11520_v17 = vld [vmem:[%s21510_s1 + $0xe0] sm:$0xff] }
 0x619   :  { %v11769_v35 = vsub.f32 %v11519_v22, %v11719_v4  ;;  %v11349_v53 = vmul.f32 %v24629_v56, %v11270_v30  ;;  %v11271_v42 = vadd.f32 %v11221_v0, %v11171_v12  ;;  %v11671_v54 = vsub.f32 %v11571_v28, %v11621_v45  ;;  %v14227_v19 = vld [vmem:[%s21507_s6 + $0xf0] sm:$0xff]  ;;  %v20961_v12 = vpop.f32.mrb[92].mxu1  ;;  %v24630_v45 = vld [vmem:[#allocation259_spill] sm:$0xff]  ;;  %v24631_v0 = vld [vmem:[#allocation125_spill] sm:$0xff] }
 0x61a   :  { %11469 = vst.msk [vmem:[%s21511_s8 + $0xd8] sm:$0xff] %vm231_vm0, %v11419_v44  ;;  %v11720_v38 = vmul.f32 %v24629_v56, %v11670_v37  ;;  %v11172_v22 = vmul.f32 %v14227_v19, %v5592_v34  ;;  %v11622_v15 = vmul.f32 %v14226_v5, %v5592_v34  ;;  %v11572_v16 = vmul.f32 %v14227_v19, %v20700_v33  ;;  %v20971_v44 = vpop.f32.mrb[42].mxu0  ;;  %v20973_v37 = vpop.f32.mrb[93].mxu1  ;;  %v14228_v5 = vld [vmem:[%s21508_s7 + $0xf8] sm:$0xff]  ;;  %v24632_v19 = vld [vmem:[#allocation150_spill] sm:$0xff] }
 0x61b   :  { %11819 = vst.msk [vmem:[%s21512_s9 + $0xd8] sm:$0xff] %vm231_vm0, %v11769_v35  ;;  %v11420_v49 = vsub.f32 %v11120_v43, %v11349_v53  ;;  %v11351_v4 = vmul.f32 %v24630_v45, %v11271_v42  ;;  %v11721_v30 = vmul.f32 %v24630_v45, %v11671_v54  ;;  %v5593_v28 = vsub.f32 %v24631_v0, %v20702_v10  ;;  %v20979_v35 = vpop.f32.mrb[43].mxu0  ;;  %v11122_v53 = vld [vmem:[%s21509_s0 + $0xf0] sm:$0xff]  ;;  %v24633_v45 = vld [vmem:[#allocation147_spill] sm:$0xff] }
 0x61c   :  { %v11770_v33 = vsub.f32 %v11520_v17, %v11720_v38  ;;  %v11272_v31 = vadd.f32 %v11222_v26, %v11172_v22  ;;  %v11672_v34 = vsub.f32 %v11572_v16, %v11622_v15  ;;  %v11223_v43 = vmul.f32 %v14228_v5, %v20719_v62  ;;  %v11522_v26 = vld [vmem:[%s21510_s1 + $0xf0] sm:$0xff]  ;;  %v14229_v17 = vld [vmem:[%s21507_s6 + $0xf8] sm:$0xff]  ;;  %v21001_v15 = vpop.f32.mrb[94].mxu1 }
 0x61d   :  { %11470 = vst [vmem:[%s21511_s8 + $0xe0] sm:$0xff] %v11420_v49  ;;  %v11421_v10 = vsub.f32 %v11121_v20, %v11351_v4  ;;  %v11771_v56 = vsub.f32 %v11521_v41, %v11721_v30  ;;  %v11173_v42 = vmul.f32 %v14229_v17, %v5593_v28  ;;  %v11623_v54 = vmul.f32 %v14228_v5, %v5593_v28  ;;  %v21021_v30 = vpop.f32.mrb[44].mxu0  ;;  %v21023_v0 = vpop.f32.mrb[95].mxu1 }
 0x61e   :  { %11820 = vst [vmem:[%s21512_s9 + $0xe0] sm:$0xff] %v11770_v33  ;;  %v11353_v38 = vmul.f32 %v20092_v63, %v11272_v31  ;;  %v11722_v20 = vmul.f32 %v20092_v63, %v11672_v34  ;;  %v11573_v41 = vmul.f32 %v14229_v17, %v20719_v62  ;;  %v5594_v22 = vsub.f32 %v24632_v19, %v20733_v14  ;;  %v14230_v63 = vld [vmem:[%s21508_s7 + $0x100] sm:$0xff]  ;;  %v11123_v31 = vld [vmem:[%s21509_s0 + $0xf8] sm:$0xff] }
 0x61f   :  { %11471 = vst.msk [vmem:[%s21511_s8 + $0xe8] sm:$0xff] %vm231_vm0, %v11421_v10  ;;  %11821 = vst.msk [vmem:[%s21512_s9 + $0xe8] sm:$0xff] %vm231_vm0, %v11771_v56  ;;  %v11273_v16 = vadd.f32 %v11223_v43, %v11173_v42  ;;  %v11224_v62 = vmul.f32 %v14230_v63, %v20747_v23  ;;  %v14231_v14 = vld [vmem:[%s21507_s6 + $0x100] sm:$0xff]  ;;  %v5595_v4 = vsub.f32 %v24633_v45, %v20749_v57  ;;  %v21028_v43 = vpop.f32.mrb[45].mxu0  ;;  %v14232_v56 = vld [vmem:[%s21507_s6 + $0x108] sm:$0xff] }
 0x620   :  { %v11574_v49 = vmul.f32 %v14231_v14, %v20747_v23  ;;  %v11422_v28 = vsub.f32 %v11122_v53, %v11353_v38  ;;  %v11772_v33 = vsub.f32 %v11522_v26, %v11722_v20  ;;  %v11673_v34 = vsub.f32 %v11573_v41, %v11623_v54  ;;  %v11523_v23 = vld [vmem:[%s21510_s1 + $0xf8] sm:$0xff]  ;;  %v14233_v26 = vld [vmem:[%s21508_s7 + $0x108] sm:$0xff]  ;;  %v21049_v41 = vpop.f32.mrb[96].mxu1 }
 0x621   :  { %v11174_v5 = vmul.f32 %v14231_v14, %v5594_v22  ;;  %v11355_v10 = vmul.f32 %v20094_v60, %v11273_v16  ;;  %v11624_v57 = vmul.f32 %v14230_v63, %v5594_v22  ;;  %v11175_v53 = vmul.f32 %v14232_v56, %v5595_v4  ;;  %v11124_v22 = vld [vmem:[%s21509_s0 + $0x100] sm:$0xff]  ;;  %v24634_v63 = vld [vmem:[#allocation152_spill] sm:$0xff]  ;;  %v21060_v45 = vpop.f32.mrb[46].mxu0 }
 0x622   :  { %v11625_v17 = vmul.f32 %v14233_v26, %v5595_v4  ;;  %11472 = vst [vmem:[%s21511_s8 + $0xf0] sm:$0xff] %v11422_v28  ;;  %11822 = vst [vmem:[%s21512_s9 + $0xf0] sm:$0xff] %v11772_v33  ;;  %v11723_v42 = vmul.f32 %v20094_v60, %v11673_v34  ;;  %v11225_v38 = vmul.f32 %v14233_v26, %v20759_v27  ;;  %v14234_v60 = vld [vmem:[%s21508_s7 + $0x110] sm:$0xff] }
 0x623   :  { %v11274_v54 = vadd.f32 %v11224_v62, %v11174_v5  ;;  %v11575_v20 = vmul.f32 %v14232_v56, %v20759_v27  ;;  %v11423_v19 = vsub.f32 %v11123_v31, %v11355_v10  ;;  %v11674_v16 = vsub.f32 %v11574_v49, %v11624_v57  ;;  %v21062_v27 = vpop.f32.mrb[97].mxu1  ;;  %v11524_v49 = vld [vmem:[%s21510_s1 + $0x100] sm:$0xff]  ;;  %v11125_v5 = vld [vmem:[%s21509_s0 + $0x108] sm:$0xff] }
 0x624   :  { %v5596_v14 = vsub.f32 %v24634_v63, %v20782_v6  ;;  %v11226_v62 = vmul.f32 %v14234_v60, %v20794_v55  ;;  %v11773_v4 = vsub.f32 %v11523_v23, %v11723_v42  ;;  %v11275_v33 = vadd.f32 %v11225_v38, %v11175_v53  ;;  %v21068_v6 = vpop.f32.mrb[47].mxu0  ;;  %v11525_v10 = vld [vmem:[%s21510_s1 + $0x108] sm:$0xff]  ;;  %v14235_v23 = vld [vmem:[%s21507_s6 + $0x110] sm:$0xff]  ;;  %v21093_v38 = vpop.f32.mrb[98].mxu1 }
 0x625   :  { %v11357_v28 = vmul.f32 %v20096_v61, %v11274_v54  ;;  %v11675_v31 = vsub.f32 %v11575_v20, %v11625_v17  ;;  %11473 = vst.msk [vmem:[%s21511_s8 + $0xf8] sm:$0xff] %vm231_vm0, %v11423_v19  ;;  %v11724_v34 = vmul.f32 %v20096_v61, %v11674_v16  ;;  %v11576_v53 = vmul.f32 %v14235_v23, %v20794_v55  ;;  %v24635_v42 = vld [vmem:[#allocation151_spill] sm:$0xff]  ;;  %v14236_v55 = vld [vmem:[%s21508_s7 + $0x118] sm:$0xff] }
 0x626   :  { %v11176_v57 = vmul.f32 %v14235_v23, %v5596_v14  ;;  %v11626_v56 = vmul.f32 %v14234_v60, %v5596_v14  ;;  %11823 = vst.msk [vmem:[%s21512_s9 + $0xf8] sm:$0xff] %vm231_vm0, %v11773_v4  ;;  %v11359_v26 = vmul.f32 %v20098_v52, %v11275_v33  ;;  %v5597_v54 = vsub.f32 %v24635_v42, %v20796_v11  ;;  %v21099_v14 = vpop.f32.mrb[48].mxu0  ;;  %v11126_v60 = vld [vmem:[%s21509_s0 + $0x110] sm:$0xff]  ;;  %v14237_v4 = vld [vmem:[%s21507_s6 + $0x118] sm:$0xff] }
 0x627   :  { %v11424_v61 = vsub.f32 %v11124_v22, %v11357_v28  ;;  %v11725_v17 = vmul.f32 %v20098_v52, %v11675_v31  ;;  %v11774_v20 = vsub.f32 %v11524_v49, %v11724_v34  ;;  %v11227_v63 = vmul.f32 %v14236_v55, %v20807_v18  ;;  %v21101_v22 = vpop.f32.mrb[99].mxu1  ;;  %v21115_v33 = vpop.f32.mrb[49].mxu0  ;;  %v11127_v42 = vld [vmem:[%s21509_s0 + $0x118] sm:$0xff] }
 0x628   :  { %v11276_v19 = vadd.f32 %v11226_v62, %v11176_v57  ;;  %v11676_v16 = vsub.f32 %v11576_v53, %v11626_v56  ;;  %v11425_v52 = vsub.f32 %v11125_v5, %v11359_v26  ;;  %v11526_v62 = vld [vmem:[%s21510_s1 + $0x110] sm:$0xff]  ;;  %v11177_v28 = vmul.f32 %v14237_v4, %v5597_v54  ;;  %v24637_v53 = vld [vmem:[#allocation153_spill] sm:$0xff] }
 0x629   :  { %11474 = vst [vmem:[%s21511_s8 + $0x100] sm:$0xff] %v11424_v61  ;;  %v11775_v11 = vsub.f32 %v11525_v10, %v11725_v17  ;;  %v11627_v49 = vmul.f32 %v14236_v55, %v5597_v54  ;;  %11824 = vst [vmem:[%s21512_s9 + $0x100] sm:$0xff] %v11774_v20  ;;  %v11577_v5 = vmul.f32 %v14237_v4, %v20807_v18  ;;  %v24636_v10 = vld [vmem:[#allocation155_spill] sm:$0xff] }
 0x62a   :  { %v11361_v31 = vmul.f32 %v20100_v58, %v11276_v19  ;;  %v11726_v34 = vmul.f32 %v20100_v58, %v11676_v16  ;;  %v5598_v23 = vsub.f32 %v24636_v10, %v20822_v59  ;;  %11475 = vst.msk [vmem:[%s21511_s8 + $0x108] sm:$0xff] %vm231_vm0, %v11425_v52  ;;  %v11277_v57 = vadd.f32 %v11227_v63, %v11177_v28  ;;  %v14238_v58 = vld [vmem:[%s21508_s7 + $0x120] sm:$0xff]  ;;  %v11527_v16 = vld [vmem:[%s21510_s1 + $0x118] sm:$0xff]  ;;  %v14241_v63 = vld [vmem:[%s21508_s7 + $0x128] sm:$0xff] }
 0x62b   :  { %11825 = vst.msk [vmem:[%s21512_s9 + $0x108] sm:$0xff] %vm231_vm0, %v11775_v11  ;;  %v11228_v18 = vmul.f32 %v14238_v58, %v20839_v7  ;;  %v14239_v59 = vld [vmem:[%s21507_s6 + $0x120] sm:$0xff]  ;;  %v5599_v61 = vsub.f32 %v24637_v53, %v20841_v3  ;;  %v11677_v54 = vsub.f32 %v11577_v5, %v11627_v49  ;;  %v14242_v10 = vld [vmem:[%s21508_s7 + $0x130] sm:$0xff] }
 0x62c   :  { %v11578_v56 = vmul.f32 %v14239_v59, %v20839_v7  ;;  %v11426_v26 = vsub.f32 %v11126_v60, %v11361_v31  ;;  %v11776_v17 = vsub.f32 %v11526_v62, %v11726_v34  ;;  %v11178_v20 = vmul.f32 %v14239_v59, %v5598_v23  ;;  %v14240_v7 = vld [vmem:[%s21507_s6 + $0x128] sm:$0xff]  ;;  %v11128_v49 = vld [vmem:[%s21509_s0 + $0x120] sm:$0xff]  ;;  %v24638_v34 = vld [vmem:[#allocation169_spill] sm:$0xff] }
 0x62d   :  { %v11363_v19 = vmul.f32 %v20108_v9, %v11277_v57  ;;  %v11628_v55 = vmul.f32 %v14238_v58, %v5598_v23  ;;  %v11179_v3 = vmul.f32 %v14240_v7, %v5599_v61  ;;  %v11629_v52 = vmul.f32 %v14241_v63, %v5599_v61  ;;  %v11129_v59 = vld [vmem:[%s21509_s0 + $0x128] sm:$0xff]  ;;  %v14243_v53 = vld [vmem:[%s21507_s6 + $0x130] sm:$0xff] }
 0x62e   :  { %11476 = vst [vmem:[%s21511_s8 + $0x110] sm:$0xff] %v11426_v26  ;;  %11826 = vst [vmem:[%s21512_s9 + $0x110] sm:$0xff] %v11776_v17  ;;  %v11727_v11 = vmul.f32 %v20108_v9, %v11677_v54  ;;  %v11278_v60 = vadd.f32 %v11228_v18, %v11178_v20  ;;  %v11229_v62 = vmul.f32 %v14241_v63, %v20851_v51  ;;  %v24639_v20 = vld [vmem:[#allocation156_spill] sm:$0xff] }
 0x62f   :  { %v11579_v4 = vmul.f32 %v14240_v7, %v20851_v51  ;;  %v11427_v28 = vsub.f32 %v11127_v42, %v11363_v19  ;;  %v11678_v31 = vsub.f32 %v11578_v56, %v11628_v55  ;;  %v5600_v5 = vsub.f32 %v24638_v34, %v20869_v50  ;;  %v11528_v51 = vld [vmem:[%s21510_s1 + $0x120] sm:$0xff]  ;;  %v11529_v56 = vld [vmem:[%s21510_s1 + $0x128] sm:$0xff] }
 0x630   :  { %v11230_v9 = vmul.f32 %v14242_v10, %v20879_v48  ;;  %v11777_v23 = vsub.f32 %v11527_v16, %v11727_v11  ;;  %v11365_v57 = vmul.f32 %v20116_v13, %v11278_v60  ;;  %v11279_v58 = vadd.f32 %v11229_v62, %v11179_v3  ;;  %v14245_v11 = vld [vmem:[%s21507_s6 + $0x138] sm:$0xff]  ;;  %v24641_v34 = vld [vmem:[#allocation174_spill] sm:$0xff] }
 0x631   :  { %v11679_v18 = vsub.f32 %v11579_v4, %v11629_v52  ;;  %11477 = vst.msk [vmem:[%s21511_s8 + $0x118] sm:$0xff] %vm231_vm0, %v11427_v28  ;;  %v11728_v50 = vmul.f32 %v20116_v13, %v11678_v31  ;;  %v11180_v61 = vmul.f32 %v14243_v53, %v5600_v5  ;;  %v11630_v26 = vmul.f32 %v14242_v10, %v5600_v5  ;;  %v24640_v4 = vld [vmem:[#allocation275_spill] sm:$0xff] }
 0x632   :  { %v11580_v17 = vmul.f32 %v14243_v53, %v20879_v48  ;;  %11827 = vst.msk [vmem:[%s21512_s9 + $0x118] sm:$0xff] %vm231_vm0, %v11777_v23  ;;  %v11428_v13 = vsub.f32 %v11128_v49, %v11365_v57  ;;  %v11367_v42 = vmul.f32 %v20119_v36, %v11279_v58  ;;  %v5601_v19 = vsub.f32 %v24639_v20, %v20881_v25  ;;  %v14244_v48 = vld [vmem:[%s21508_s7 + $0x138] sm:$0xff]  ;;  %v11530_v25 = vld [vmem:[%s21510_s1 + $0x130] sm:$0xff] }
 0x633   :  { %v11729_v54 = vmul.f32 %v20119_v36, %v11679_v18  ;;  %v11778_v16 = vsub.f32 %v11528_v51, %v11728_v50  ;;  %v11280_v55 = vadd.f32 %v11230_v9, %v11180_v61  ;;  %v11231_v3 = vmul.f32 %v14244_v48, %v20901_v1  ;;  %v11130_v36 = vld [vmem:[%s21509_s0 + $0x130] sm:$0xff]  ;;  %v14246_v9 = vld [vmem:[%s21508_s7 + $0x140] sm:$0xff]  ;;  %v24642_v57 = vld [vmem:[#allocation173_spill] sm:$0xff] }
 0x634   :  { %v11680_v7 = vsub.f32 %v11580_v17, %v11630_v26  ;;  %11478 = vst [vmem:[%s21511_s8 + $0x120] sm:$0xff] %v11428_v13  ;;  %v11429_v63 = vsub.f32 %v11129_v59, %v11367_v42  ;;  %v11181_v60 = vmul.f32 %v14245_v11, %v5601_v19  ;;  %v11631_v62 = vmul.f32 %v14244_v48, %v5601_v19  ;;  %v11131_v50 = vld [vmem:[%s21509_s0 + $0x138] sm:$0xff]  ;;  %v24643_v53 = vld [vmem:[#allocation272_spill] sm:$0xff]  ;;  %v14249_v13 = vld [vmem:[%s21508_s7 + $0x148] sm:$0xff] }
 0x635   :  { %v11779_v52 = vsub.f32 %v11529_v56, %v11729_v54  ;;  %11828 = vst [vmem:[%s21512_s9 + $0x120] sm:$0xff] %v11778_v16  ;;  %v11369_v28 = vmul.f32 %v24640_v4, %v11280_v55  ;;  %v11581_v31 = vmul.f32 %v14245_v11, %v20901_v1  ;;  %v5602_v5 = vsub.f32 %v24641_v34, %v20916_v8  ;;  %v14247_v8 = vld [vmem:[%s21507_s6 + $0x140] sm:$0xff]  ;;  %v11531_v26 = vld [vmem:[%s21510_s1 + $0x138] sm:$0xff] }
 0x636   :  { %v11730_v49 = vmul.f32 %v24640_v4, %v11680_v7  ;;  %11479 = vst.msk [vmem:[%s21511_s8 + $0x128] sm:$0xff] %vm231_vm0, %v11429_v63  ;;  %v11281_v10 = vadd.f32 %v11231_v3, %v11181_v60  ;;  %v11232_v1 = vmul.f32 %v14246_v9, %v20927_v24  ;;  %v11582_v23 = vmul.f32 %v14247_v8, %v20927_v24  ;;  %v14248_v24 = vld [vmem:[%s21507_s6 + $0x148] sm:$0xff]  ;;  %v11132_v7 = vld [vmem:[%s21509_s0 + $0x140] sm:$0xff]  ;;  %v24644_v3 = vld [vmem:[#allocation177_spill] sm:$0xff] }
 0x637   :  { %11829 = vst.msk [vmem:[%s21512_s9 + $0x128] sm:$0xff] %vm231_vm0, %v11779_v52  ;;  %v5603_v51 = vsub.f32 %v24642_v57, %v20929_v32  ;;  %v11430_v58 = vsub.f32 %v11130_v36, %v11369_v28  ;;  %v11681_v59 = vsub.f32 %v11581_v31, %v11631_v62  ;;  %v11182_v56 = vmul.f32 %v14247_v8, %v5602_v5  ;;  %v14250_v52 = vld [vmem:[%s21508_s7 + $0x150] sm:$0xff]  ;;  %v24645_v11 = vld [vmem:[#allocation278_spill] sm:$0xff]  ;;  %v11133_v28 = vld [vmem:[%s21509_s0 + $0x148] sm:$0xff] }
 0x638   :  { %v11780_v18 = vsub.f32 %v11530_v25, %v11730_v49  ;;  %v11371_v61 = vmul.f32 %v24643_v53, %v11281_v10  ;;  %v11632_v17 = vmul.f32 %v14246_v9, %v5602_v5  ;;  %v11233_v19 = vmul.f32 %v14249_v13, %v20940_v39  ;;  %v11533_v49 = vld [vmem:[%s21510_s1 + $0x148] sm:$0xff]  ;;  %v14251_v31 = vld [vmem:[%s21507_s6 + $0x150] sm:$0xff] }
 0x639   :  { %v11183_v32 = vmul.f32 %v14248_v24, %v5603_v51  ;;  %v11633_v42 = vmul.f32 %v14249_v13, %v5603_v51  ;;  %11480 = vst [vmem:[%s21511_s8 + $0x130] sm:$0xff] %v11430_v58  ;;  %v11731_v54 = vmul.f32 %v24643_v53, %v11681_v59  ;;  %v11282_v20 = vadd.f32 %v11232_v1, %v11182_v56  ;;  %v24646_v1 = vld [vmem:[#allocation277_spill] sm:$0xff]  ;;  %v24647_v57 = vld [vmem:[#allocation176_spill] sm:$0xff] }
 0x63a   :  { %11830 = vst [vmem:[%s21512_s9 + $0x130] sm:$0xff] %v11780_v18  ;;  %v11583_v16 = vmul.f32 %v14248_v24, %v20940_v39  ;;  %v11431_v55 = vsub.f32 %v11131_v50, %v11371_v61  ;;  %v11682_v48 = vsub.f32 %v11582_v23, %v11632_v17  ;;  %v5604_v63 = vsub.f32 %v24644_v3, %v20961_v12  ;;  %v11532_v39 = vld [vmem:[%s21510_s1 + $0x140] sm:$0xff]  ;;  %v11134_v61 = vld [vmem:[%s21509_s0 + $0x150] sm:$0xff] }
 0x63b   :  { %v11234_v36 = vmul.f32 %v14250_v52, %v20971_v44  ;;  %v11781_v25 = vsub.f32 %v11531_v26, %v11731_v54  ;;  %v11373_v60 = vmul.f32 %v24645_v11, %v11282_v20  ;;  %v11283_v62 = vadd.f32 %v11233_v19, %v11183_v32  ;;  %v14253_v26 = vld [vmem:[%s21507_s6 + $0x158] sm:$0xff]  ;;  %v24648_v32 = vld [vmem:[#allocation300_spill] sm:$0xff]  ;;  %v24649_v20 = vld [vmem:[#allocation191_spill] sm:$0xff] }
 0x63c   :  { %v11683_v4 = vsub.f32 %v11583_v16, %v11633_v42  ;;  %11481 = vst.msk [vmem:[%s21511_s8 + $0x138] sm:$0xff] %vm231_vm0, %v11431_v55  ;;  %v11732_v12 = vmul.f32 %v24645_v11, %v11682_v48  ;;  %v11184_v34 = vmul.f32 %v14251_v31, %v5604_v63  ;;  %v11634_v5 = vmul.f32 %v14250_v52, %v5604_v63  ;;  %v14254_v55 = vld [vmem:[%s21508_s7 + $0x160] sm:$0xff]  ;;  %v24650_v48 = vld [vmem:[#allocation185_spill] sm:$0xff] }
 0x63d   :  { %v11584_v10 = vmul.f32 %v14251_v31, %v20971_v44  ;;  %11831 = vst.msk [vmem:[%s21512_s9 + $0x138] sm:$0xff] %vm231_vm0, %v11781_v25  ;;  %v11432_v9 = vsub.f32 %v11132_v7, %v11373_v60  ;;  %v11375_v8 = vmul.f32 %v24646_v1, %v11283_v62  ;;  %v5605_v51 = vsub.f32 %v24647_v57, %v20973_v37  ;;  %v14252_v44 = vld [vmem:[%s21508_s7 + $0x158] sm:$0xff]  ;;  %v11534_v37 = vld [vmem:[%s21510_s1 + $0x150] sm:$0xff]  ;;  %v24651_v60 = vld [vmem:[#allocation287_spill] sm:$0xff] }
 0x63e   :  { %v11733_v23 = vmul.f32 %v24646_v1, %v11683_v4  ;;  %v11782_v58 = vsub.f32 %v11532_v39, %v11732_v12  ;;  %v11284_v18 = vadd.f32 %v11234_v36, %v11184_v34  ;;  %v11235_v59 = vmul.f32 %v14252_v44, %v20979_v35  ;;  %v11135_v36 = vld [vmem:[%s21509_s0 + $0x158] sm:$0xff]  ;;  %v14257_v12 = vld [vmem:[%s21508_s7 + $0x168] sm:$0xff]  ;;  %v14258_v57 = vld [vmem:[%s21508_s7 + $0x170] sm:$0xff] }
 0x63f   :  { %v11684_v50 = vsub.f32 %v11584_v10, %v11634_v5  ;;  %11482 = vst [vmem:[%s21511_s8 + $0x140] sm:$0xff] %v11432_v9  ;;  %v11433_v56 = vsub.f32 %v11133_v28, %v11375_v8  ;;  %v11185_v17 = vmul.f32 %v14253_v26, %v5605_v51  ;;  %v11635_v24 = vmul.f32 %v14252_v44, %v5605_v51  ;;  %v11535_v62 = vld [vmem:[%s21510_s1 + $0x158] sm:$0xff]  ;;  %v11136_v9 = vld [vmem:[%s21509_s0 + $0x160] sm:$0xff]  ;;  %v24652_v8 = vld [vmem:[#allocation195_spill] sm:$0xff] }
 0x640   :  { %v11783_v53 = vsub.f32 %v11533_v49, %v11733_v23  ;;  %11832 = vst [vmem:[%s21512_s9 + $0x140] sm:$0xff] %v11782_v58  ;;  %v11377_v13 = vmul.f32 %v24648_v32, %v11284_v18  ;;  %v11585_v54 = vmul.f32 %v14253_v26, %v20979_v35  ;;  %v5606_v19 = vsub.f32 %v24649_v20, %v21001_v15  ;;  %v14255_v15 = vld [vmem:[%s21507_s6 + $0x160] sm:$0xff] }
 0x641   :  { %v11734_v42 = vmul.f32 %v24648_v32, %v11684_v50  ;;  %11483 = vst.msk [vmem:[%s21511_s8 + $0x148] sm:$0xff] %vm231_vm0, %v11433_v56  ;;  %v11285_v16 = vadd.f32 %v11235_v59, %v11185_v17  ;;  %v11236_v35 = vmul.f32 %v14254_v55, %v21021_v30  ;;  %v11586_v7 = vmul.f32 %v14255_v15, %v21021_v30  ;;  %v14256_v30 = vld [vmem:[%s21507_s6 + $0x168] sm:$0xff]  ;;  %v24653_v32 = vld [vmem:[#allocation192_spill] sm:$0xff] }
 0x642   :  { %11833 = vst.msk [vmem:[%s21512_s9 + $0x148] sm:$0xff] %vm231_vm0, %v11783_v53  ;;  %v5607_v3 = vsub.f32 %v24650_v48, %v21023_v0  ;;  %v11434_v63 = vsub.f32 %v11134_v61, %v11377_v13  ;;  %v11685_v25 = vsub.f32 %v11585_v54, %v11635_v24  ;;  %v11186_v11 = vmul.f32 %v14255_v15, %v5606_v19  ;;  %v11137_v59 = vld [vmem:[%s21509_s0 + $0x168] sm:$0xff]  ;;  %v14259_v53 = vld [vmem:[%s21507_s6 + $0x170] sm:$0xff] }
 0x643   :  { %v11784_v52 = vsub.f32 %v11534_v37, %v11734_v42  ;;  %v11379_v39 = vmul.f32 %v24651_v60, %v11285_v16  ;;  %v11636_v4 = vmul.f32 %v14254_v55, %v5606_v19  ;;  %v11237_v34 = vmul.f32 %v14257_v12, %v21028_v43  ;;  %v11537_v56 = vld [vmem:[%s21510_s1 + $0x168] sm:$0xff] }
 0x644   :  { %v11187_v0 = vmul.f32 %v14256_v30, %v5607_v3  ;;  %v11637_v28 = vmul.f32 %v14257_v12, %v5607_v3  ;;  %11484 = vst [vmem:[%s21511_s8 + $0x150] sm:$0xff] %v11434_v63  ;;  %v11735_v49 = vmul.f32 %v24651_v60, %v11685_v25  ;;  %v11286_v31 = vadd.f32 %v11236_v35, %v11186_v11  ;;  %v14261_v35 = vld [vmem:[%s21507_s6 + $0x178] sm:$0xff]  ;;  %v24655_v60 = vld [vmem:[#allocation206_spill] sm:$0xff] }
 0x645   :  { %11834 = vst [vmem:[%s21512_s9 + $0x150] sm:$0xff] %v11784_v52  ;;  %v11587_v5 = vmul.f32 %v14256_v30, %v21028_v43  ;;  %v11435_v10 = vsub.f32 %v11135_v36, %v11379_v39  ;;  %v11686_v1 = vsub.f32 %v11586_v7, %v11636_v4  ;;  %v5608_v23 = vsub.f32 %v24652_v8, %v21049_v41  ;;  %v11536_v43 = vld [vmem:[%s21510_s1 + $0x160] sm:$0xff]  ;;  %v11139_v30 = vld [vmem:[%s21509_s0 + $0x178] sm:$0xff] }
 0x646   :  { %v11238_v51 = vmul.f32 %v14258_v57, %v21060_v45  ;;  %v11785_v58 = vsub.f32 %v11535_v62, %v11735_v49  ;;  %v11381_v18 = vmul.f32 %v20165_v47, %v11286_v31  ;;  %v11287_v50 = vadd.f32 %v11237_v34, %v11187_v0  ;;  %v24654_v52 = vld [vmem:[#allocation210_spill] sm:$0xff]  ;;  %v11539_v49 = vld [vmem:[%s21510_s1 + $0x178] sm:$0xff]  ;;  %v14265_v34 = vld [vmem:[%s21508_s7 + $0x188] sm:$0xff] }
 0x647   :  { %v11687_v44 = vsub.f32 %v11587_v5, %v11637_v28  ;;  %11485 = vst.msk [vmem:[%s21511_s8 + $0x158] sm:$0xff] %vm231_vm0, %v11435_v10  ;;  %v11736_v41 = vmul.f32 %v20165_v47, %v11686_v1  ;;  %v11188_v61 = vmul.f32 %v14259_v53, %v5608_v23  ;;  %v11638_v37 = vmul.f32 %v14258_v57, %v5608_v23  ;;  %v11140_v57 = vld [vmem:[%s21509_s0 + $0x180] sm:$0xff] }
 0x648   :  { %v11588_v26 = vmul.f32 %v14259_v53, %v21060_v45  ;;  %11835 = vst.msk [vmem:[%s21512_s9 + $0x158] sm:$0xff] %vm231_vm0, %v11785_v58  ;;  %v11436_v47 = vsub.f32 %v11136_v9, %v11381_v18  ;;  %v11383_v17 = vmul.f32 %v20167_v40, %v11287_v50  ;;  %v5609_v13 = vsub.f32 %v24653_v32, %v21062_v27  ;;  %v14260_v45 = vld [vmem:[%s21508_s7 + $0x178] sm:$0xff]  ;;  %v11538_v27 = vld [vmem:[%s21510_s1 + $0x170] sm:$0xff] }
 0x649   :  { %v11737_v24 = vmul.f32 %v20167_v40, %v11687_v44  ;;  %v11786_v42 = vsub.f32 %v11536_v43, %v11736_v41  ;;  %v11288_v54 = vadd.f32 %v11238_v51, %v11188_v61  ;;  %v11239_v19 = vmul.f32 %v14260_v45, %v21068_v6  ;;  %v11138_v40 = vld [vmem:[%s21509_s0 + $0x170] sm:$0xff]  ;;  %v11540_v43 = vld [vmem:[%s21510_s1 + $0x180] sm:$0xff]  ;;  %v11141_v44 = vld [vmem:[%s21509_s0 + $0x188] sm:$0xff] }
 0x64a   :  { %v11688_v20 = vsub.f32 %v11588_v26, %v11638_v37  ;;  %11486 = vst [vmem:[%s21511_s8 + $0x160] sm:$0xff] %v11436_v47  ;;  %v11437_v16 = vsub.f32 %v11137_v59, %v11383_v17  ;;  %v11189_v15 = vmul.f32 %v14261_v35, %v5609_v13  ;;  %v11639_v7 = vmul.f32 %v14260_v45, %v5609_v13  ;;  %v11541_v41 = vld [vmem:[%s21510_s1 + $0x188] sm:$0xff] }
 0x64b   :  { %v11787_v55 = vsub.f32 %v11537_v56, %v11737_v24  ;;  %11836 = vst [vmem:[%s21512_s9 + $0x160] sm:$0xff] %v11786_v42  ;;  %v11385_v48 = vmul.f32 %v20177_v29, %v11288_v54  ;;  %v11589_v63 = vmul.f32 %v14261_v35, %v21068_v6  ;;  %v5610_v36 = vsub.f32 %v24654_v52, %v21093_v38  ;;  %v14263_v38 = vld [vmem:[%s21507_s6 + $0x180] sm:$0xff] }
 0x64c   :  { %v11738_v3 = vmul.f32 %v20177_v29, %v11688_v20  ;;  %11487 = vst.msk [vmem:[%s21511_s8 + $0x168] sm:$0xff] %vm231_vm0, %v11437_v16  ;;  %v11289_v25 = vadd.f32 %v11239_v19, %v11189_v15  ;;  %v14262_v29 = vld [vmem:[%s21508_s7 + $0x180] sm:$0xff]  ;;  %v11590_v11 = vmul.f32 %v14263_v38, %v21099_v14  ;;  %v5611_v39 = vsub.f32 %v24655_v60, %v21101_v22 }
 0x64d   :  { %11837 = vst.msk [vmem:[%s21512_s9 + $0x168] sm:$0xff] %vm231_vm0, %v11787_v55  ;;  %v11240_v6 = vmul.f32 %v14262_v29, %v21099_v14  ;;  %v11438_v62 = vsub.f32 %v11138_v40, %v11385_v48  ;;  %v11689_v0 = vsub.f32 %v11589_v63, %v11639_v7  ;;  %v11190_v12 = vmul.f32 %v14263_v38, %v5610_v36  ;;  %v14264_v14 = vld [vmem:[%s21507_s6 + $0x188] sm:$0xff] }
 0x64e   :  { %v11788_v4 = vsub.f32 %v11538_v27, %v11738_v3  ;;  %v11387_v28 = vmul.f32 %v20189_v2, %v11289_v25  ;;  %v11640_v31 = vmul.f32 %v14262_v29, %v5610_v36  ;;  %v11191_v22 = vmul.f32 %v14264_v14, %v5611_v39 }
 0x64f   :  { %v11641_v5 = vmul.f32 %v14265_v34, %v5611_v39  ;;  %11488 = vst [vmem:[%s21511_s8 + $0x170] sm:$0xff] %v11438_v62  ;;  %v11739_v10 = vmul.f32 %v20189_v2, %v11689_v0  ;;  %v11290_v9 = vadd.f32 %v11240_v6, %v11190_v12  ;;  %v11241_v1 = vmul.f32 %v14265_v34, %v21115_v33 }
 0x650   :  { %11838 = vst [vmem:[%s21512_s9 + $0x170] sm:$0xff] %v11788_v4  ;;  %v11591_v8 = vmul.f32 %v14264_v14, %v21115_v33  ;;  %v11439_v23 = vsub.f32 %v11139_v30, %v11387_v28  ;;  %v11690_v51 = vsub.f32 %v11590_v11, %v11640_v31 }
 0x651   :  { %v11789_v58 = vsub.f32 %v11539_v49, %v11739_v10  ;;  %v11389_v18 = vmul.f32 %v20202_v46, %v11290_v9  ;;  %v11291_v50 = vadd.f32 %v11241_v1, %v11191_v22 }
 0x652   :  { %v11691_v2 = vsub.f32 %v11591_v8, %v11641_v5  ;;  %11489 = vst.msk [vmem:[%s21511_s8 + $0x178] sm:$0xff] %vm231_vm0, %v11439_v23  ;;  %v11740_v33 = vmul.f32 %v20202_v46, %v11690_v51 }
 0x653   :  { %11839 = vst.msk [vmem:[%s21512_s9 + $0x178] sm:$0xff] %vm231_vm0, %v11789_v58  ;;  %v11440_v59 = vsub.f32 %v11140_v57, %v11389_v18  ;;  %v11391_v56 = vmul.f32 %v20215_v21, %v11291_v50 }
 0x654   :  { %v11741_v53 = vmul.f32 %v20215_v21, %v11691_v2  ;;  %v11790_v61 = vsub.f32 %v11540_v43, %v11740_v33 }
 0x655   :  { %11490 = vst [vmem:[%s21511_s8 + $0x180] sm:$0xff] %v11440_v59  ;;  %v11441_v46 = vsub.f32 %v11141_v44, %v11391_v56 }
 0x656   :  { %v11791_v37 = vsub.f32 %v11541_v41, %v11741_v53  ;;  %11840 = vst [vmem:[%s21512_s9 + $0x180] sm:$0xff] %v11790_v61 }
 0x657   :  { %11491 = vst.msk [vmem:[%s21511_s8 + $0x188] sm:$0xff] %vm231_vm0, %v11441_v46 }
 0x658   :  { %11841 = vst.msk [vmem:[%s21512_s9 + $0x188] sm:$0xff] %vm231_vm0, %v11791_v37 }

</bundles_post_ra>
